<compile_context>
chip_gen: v7x
topology: tpu7x:2x2x1
jax: 0.10.0
libtpu: 0.0.40
codegen_flags: <defaults>
</compile_context>

<pallas_src>
import jax
import jax.numpy as jnp
from jax.experimental import pallas as pl
from jax.experimental.pallas import tpu as pltpu


# ----------------------------------------------------------------------------
# Kernel 1: fused b6·b7 conv as a matmul, contracting the 2048 channels of the
# NCHW feature map directly.  Grid = (batch, output-row-block).
#   x_ref : (1, 2048, H*W) f32 block (one image; cast to bf16 in-kernel)
#   w_ref : (rb, 2048) bf16, rows ordered (co, ky, kx)
#   o_ref : (1, rb, H*W) bf16
# ----------------------------------------------------------------------------
def _fused_conv_kernel(x_ref, w_ref, o_ref):
    x = x_ref[0].astype(jnp.bfloat16)                       # in-kernel VPU pack (free)
    o_ref[0] = jnp.dot(w_ref[...], x,
                       preferred_element_type=jnp.float32).astype(jnp.bfloat16)


def _fused_conv(x_f32, wft, rb=128):
    N, C, HW = x_f32.shape
    R = wft.shape[0]
    assert R % rb == 0
    flops = 2 * N * R * C * HW
    bytes_accessed = N * C * HW * 4 + R * C * 2 + N * R * HW * 2
    return pl.pallas_call(
        _fused_conv_kernel,
        out_shape=jax.ShapeDtypeStruct((N, R, HW), jnp.bfloat16),
        grid_spec=pltpu.PrefetchScalarGridSpec(
            num_scalar_prefetch=0,
            grid=(N, R // rb),
            in_specs=[
                pl.BlockSpec((1, C, HW), lambda n, r: (n, 0, 0)),  # per-image activations
                pl.BlockSpec((rb, C), lambda n, r: (r, 0)),        # fused-weight row block
            ],
            out_specs=pl.BlockSpec((1, rb, HW), lambda n, r: (n, r, 0)),
        ),
        compiler_params=pltpu.CompilerParams(
            dimension_semantics=("parallel", "parallel")),
        cost_estimate=pl.CostEstimate(flops=flops, transcendentals=0,
                                      bytes_accessed=bytes_accessed),
    )(x_f32, wft)


# ----------------------------------------------------------------------------
# Kernel 2: bilinear resize (align_corners=True) per channel-block, gridded over
# (batch, channel-block); output written directly in NCHW.
#   z_ref   : (1, cpb*P, P) bf16  (P = 4*H interior rows/cols of the b7 output,
#                                  rows ordered (channel, pre-resize row))
#   ah_ref  : (out, P) bf16
#   awt_ref : (P, out) bf16
#   o_ref   : (1, cpb, out, out) f32
# ----------------------------------------------------------------------------
def _resize_kernel(z_ref, ah_ref, awt_ref, o_ref):
    P = awt_ref.shape[0]
    cpb = o_ref.shape[1]
    # Batched width resize: one lane-dense (cpb*P, P) @ (P, out) MXU call.
    s = jnp.dot(z_ref[0], awt_ref[...],
                preferred_element_type=jnp.float32).astype(jnp.bfloat16)
    ah = ah_ref[...]
    for j in range(cpb):                                    # height resize per channel
        o_ref[0, j] = jnp.dot(ah, s[j * P:(j + 1) * P, :],
                              preferred_element_type=jnp.float32)


def _resize_nchw(zr2, ah, awt, n_ch, out_size, cpb):
    N = zr2.shape[0]
    P = awt.shape[0]
    assert zr2.shape[1] == n_ch * P and n_ch % cpb == 0
    flops = 2 * N * n_ch * P * out_size * (P + out_size)
    bytes_accessed = (zr2.size * 2 + ah.size * 2 + awt.size * 2
                      + N * n_ch * out_size * out_size * 4)
    return pl.pallas_call(
        _resize_kernel,
        out_shape=jax.ShapeDtypeStruct((N, n_ch, out_size, out_size), jnp.float32),
        grid_spec=pltpu.PrefetchScalarGridSpec(
            num_scalar_prefetch=0,
            grid=(N, n_ch // cpb),
            in_specs=[
                pl.BlockSpec((1, cpb * P, P), lambda n, c: (n, c, 0)),
                pl.BlockSpec((out_size, P), lambda n, c: (0, 0)),
                pl.BlockSpec((P, out_size), lambda n, c: (0, 0)),
            ],
            out_specs=pl.BlockSpec((1, cpb, out_size, out_size),
                                   lambda n, c: (n, c, 0, 0)),
        ),
        compiler_params=pltpu.CompilerParams(
            dimension_semantics=("parallel", "parallel")),
        cost_estimate=pl.CostEstimate(flops=flops, transcendentals=0,
                                      bytes_accessed=bytes_accessed),
    )(zr2, ah, awt)


# ----------------------------------------------------------------------------
# align_corners=True bilinear resize weights as a dense (out, in) matrix.
# ----------------------------------------------------------------------------
def _interp_matrix(in_size, out_size):
    o = jnp.arange(out_size, dtype=jnp.float32)
    scale = (in_size - 1) / (out_size - 1)
    src = o * scale
    i0 = jnp.clip(jnp.floor(src), 0, in_size - 1).astype(jnp.int32)
    i1 = jnp.clip(i0 + 1, 0, in_size - 1)
    frac = src - i0.astype(jnp.float32)
    a0 = jax.nn.one_hot(i0, in_size, dtype=jnp.float32) * (1.0 - frac)[:, None]
    a1 = jax.nn.one_hot(i1, in_size, dtype=jnp.float32) * frac[:, None]
    return a0 + a1


# ----------------------------------------------------------------------------
# One-time parameter preparation (hoisted out of the per-forward jit):
#   w6 : (2048, 16)     Conv2d(2048,16,1,1,pad=1,bias=False), (Cin, Cout)
#   w7 : (16, 16, 4, 4) ConvTranspose2d(16,16,4,4,bias=False), (Cin, Cout, kH, kW)
# Returns (wft, ah, awt):
#   wft : (256, 2048) bf16 fused weight, rows ordered (co, ky, kx)
#   ah  : (256, 4H)  bf16 height-interp interior columns
#   awt : (4W, 256)  bf16 width-interp interior columns, transposed
# ----------------------------------------------------------------------------
def prepare_head_params(w6, w7, H, W, out_size=256):
    C = w6.shape[0]
    M, CO, KH, KW = w7.shape
    assert w6.shape[1] == M
    # Fused b6·b7 weight (valid because both convs are bias-free).
    wf = jnp.einsum('cm,moab->oabc', w6.astype(jnp.float32), w7.astype(jnp.float32))
    wft = wf.reshape(CO * KH * KW, C).astype(jnp.bfloat16)
    # The padding=1 ring of b6 only produces zero rows/cols of the b7 output, so
    # drop the border by slicing the interior columns of the full interp matrices.
    ah = _interp_matrix(KH * (H + 2), out_size)[:, KH:KH + H * KH]
    awt = _interp_matrix(KW * (W + 2), out_size)[:, KW:KW + W * KW].T
    return wft, ah.astype(jnp.bfloat16), awt.astype(jnp.bfloat16)


# ----------------------------------------------------------------------------
# Forward pass of the PartDetectNet head (everything after b5).
#   features_nchw : (N, 2048, H, W) f32 -- b5 output
#   wft, ah, awt  : from prepare_head_params
# returns (N, 16, 256, 256) NCHW f32.
# ----------------------------------------------------------------------------
def part_detect_net_head(features_nchw, wft, ah, awt, *,
                         out_size=256, co=16, kh=4, kw=4):
    N, C, H, W = features_nchw.shape

    # Kernel 1: per-image (128, 2048) @ (2048, HW) on the MXU (bf16 in, f32 acc),
    # emitting bf16.  Grid (N, 2) -> always >= 2 parallel steps.
    x = features_nchw.reshape(N, C, H * W)                   # free contiguous reshape
    zt = _fused_conv(x, wft)                                 # (N, 256, HW) bf16

    # Tiny (~64 KB) relayout: rows (co,ky,kx), cols (y,x) -> (n, (co, 4y+ky), 4x+kx),
    # already flattened to the (channel, row)-major layout kernel 2's BlockSpec reads.
    zr2 = (zt.reshape(N, co, kh, kw, H, W)
             .transpose(0, 1, 4, 2, 5, 3)
             .reshape(N, co * H * kh, W * kw))

    # Kernel 2: (Z_all @ Aw^T) then per-channel Ah @ S_j, output directly in NCHW.
    cpb = co if N >= 2 else co // 2                          # keep grid >= 2 parallel steps
    return _resize_nchw(zr2, ah, awt, co, out_size, cpb)


# ----------------------------------------------------------------------------
# Pure-JAX f32 reference mirroring the PyTorch module (b6 -> b7 -> bilinear).
# ----------------------------------------------------------------------------
def _reference_head(features_nchw, w6, w7, out_size=256):
    N, C, H, W = features_nchw.shape
    CO, KH, KW = w7.shape[1], w7.shape[2], w7.shape[3]
    hp = jax.lax.Precision.HIGHEST
    x = jnp.transpose(features_nchw, (0, 2, 3, 1)).astype(jnp.float32)        # NHWC
    y = jnp.einsum('nhwc,cm->nhwm', x, w6.astype(jnp.float32), precision=hp)  # b6 1x1
    y = jnp.pad(y, ((0, 0), (1, 1), (1, 1), (0, 0)))                          # padding=1
    z = jnp.einsum('nijm,moab->niajbo', y, w7.astype(jnp.float32), precision=hp)
    z = z.reshape(N, KH * (H + 2), KW * (W + 2), CO)                          # b7 (stride=kernel)
    aw = _interp_matrix(KW * (W + 2), out_size)
    ah = _interp_matrix(KH * (H + 2), out_size)
    t = jnp.einsum('nyxc,ox->nyoc', z, aw, precision=hp)
    r = jnp.einsum('nyoc,py->npoc', t, ah, precision=hp)
    return jnp.transpose(r, (0, 3, 1, 2))                                     # NCHW


if __name__ == "__main__":
    key = jax.random.PRNGKey(0)
    k_feat, k_w6, k_w7 = jax.random.split(key, 3)

    # Module-consistent small shapes: b5 emits 2048 channels; spatial kept tiny (8x8).
    N, C, H, W = 2, 2048, 8, 8
    features = jax.random.normal(k_feat, (N, C, H, W), dtype=jnp.float32)

    w6 = jax.random.normal(k_w6, (C, 16), dtype=jnp.float32) * 0.02        # Conv2d(2048,16,1x1)
    w7 = jax.random.normal(k_w7, (16, 16, 4, 4), dtype=jnp.float32) * 0.05  # ConvT(16,16,4,4)

    # Static-weight fusion done ONCE, outside the per-forward jit.
    wft, ah, awt = prepare_head_params(w6, w7, H, W)
    head = jax.jit(part_detect_net_head)

    out = jax.block_until_ready(head(features, wft, ah, awt))
    assert out.shape == (2, 16, 256, 256) and out.dtype == jnp.float32

    ref = jax.block_until_ready(jax.jit(_reference_head)(features, w6, w7))
    err = float(jnp.max(jnp.abs(out - ref)) / (jnp.max(jnp.abs(ref)) + 1e-6))
    assert err < 5e-2, f"mismatch vs f32 reference: normalized max err {err}"

    print("KERNEL_OK")
</pallas_src>

<mosaic_0001>
module attributes {stable_mosaic.version = 11 : i64} {
  func.func @_fused_conv_kernel(%arg0: i32, %arg1: i32, %arg2: memref<1x2048x64xf32, #tpu.memory_space<vmem>>, %arg3: memref<128x2048xbf16, #tpu.memory_space<vmem>>, %arg4: memref<1x128x64xbf16, #tpu.memory_space<vmem>>) attributes {dimension_semantics = [#tpu.dimension_semantics<parallel>, #tpu.dimension_semantics<parallel>], iteration_bounds = array<i64: 2, 2>, scalar_prefetch = 0 : i64, scratch_operands = 0 : i64, tpu.core_type = #tpu.core_type<tc>, window_params = [{transform_indices = @transform_0, window_bounds = array<i64: 1, 2048, 64>}, {transform_indices = @transform_1, window_bounds = array<i64: 128, 2048>}, {transform_indices = @transform_2, window_bounds = array<i64: 1, 128, 64>}]} {
    %c0 = arith.constant 0 : index
    %c0_0 = arith.constant 0 : index
    %c0_1 = arith.constant 0 : index
    %0 = vector.load %arg2[%c0, %c0_0, %c0_1] : memref<1x2048x64xf32, #tpu.memory_space<vmem>>, vector<1x2048x64xf32>
    %1 = vector.shape_cast %0 : vector<1x2048x64xf32> to vector<2048x64xf32>
    %2 = arith.truncf %1 : vector<2048x64xf32> to vector<2048x64xbf16>
    %c0_2 = arith.constant 0 : index
    %c0_3 = arith.constant 0 : index
    %3 = vector.load %arg3[%c0_2, %c0_3] : memref<128x2048xbf16, #tpu.memory_space<vmem>>, vector<128x2048xbf16>
    %cst = arith.constant dense<0.000000e+00> : vector<128x64xf32>
    %4 = tpu.matmul %3, %2, %cst {dimension_numbers = #tpu.dot_dimension_numbers<[1], [0], [0], [1], [0, 0, 1, 1], [], []>} : vector<128x2048xbf16>, vector<2048x64xbf16>, vector<128x64xf32> -> vector<128x64xf32>
    %5 = arith.truncf %4 : vector<128x64xf32> to vector<128x64xbf16>
    %c0_4 = arith.constant 0 : index
    %c0_5 = arith.constant 0 : index
    %c0_6 = arith.constant 0 : index
    %6 = vector.load %arg4[%c0_4, %c0_5, %c0_6] : memref<1x128x64xbf16, #tpu.memory_space<vmem>>, vector<1x128x64xbf16>
    %7 = vector.shape_cast %6 : vector<1x128x64xbf16> to vector<128x64xbf16>
    %8 = vector.shape_cast %5 : vector<128x64xbf16> to vector<1x128x64xbf16>
    tpu.vector_store %arg4[%c0_4, %c0_5, %c0_6], %8 {strides = array<i32>} : memref<1x128x64xbf16, #tpu.memory_space<vmem>>, vector<1x128x64xbf16>,
    return
  }
  func.func @transform_0(%arg0: i32, %arg1: i32) -> (i32, i32, i32) {
    %c0_i32 = arith.constant 0 : i32
    %c0_i32_0 = arith.constant 0 : i32
    %c0_i32_1 = arith.constant 0 : i32
    return %arg0, %c0_i32, %c0_i32_0 : i32, i32, i32
  }
  func.func @transform_1(%arg0: i32, %arg1: i32) -> (i32, i32) {
    %c0_i32 = arith.constant 0 : i32
    %c0_i32_0 = arith.constant 0 : i32
    return %arg1, %c0_i32 : i32, i32
  }
  func.func @transform_2(%arg0: i32, %arg1: i32) -> (i32, i32, i32) {
    %c0_i32 = arith.constant 0 : i32
    %c0_i32_0 = arith.constant 0 : i32
    return %arg0, %arg1, %c0_i32 : i32, i32, i32
  }
}

module attributes {stable_mosaic.version = 11 : i64} {
  func.func @_resize_kernel(%arg0: i32, %arg1: i32, %arg2: memref<1x512x32xbf16, #tpu.memory_space<vmem>>, %arg3: memref<256x32xbf16, #tpu.memory_space<vmem>>, %arg4: memref<32x256xbf16, #tpu.memory_space<vmem>>, %arg5: memref<1x16x256x256xf32, #tpu.memory_space<vmem>>) attributes {dimension_semantics = [#tpu.dimension_semantics<parallel>, #tpu.dimension_semantics<parallel>], iteration_bounds = array<i64: 2, 1>, scalar_prefetch = 0 : i64, scratch_operands = 0 : i64, tpu.core_type = #tpu.core_type<tc>, window_params = [{transform_indices = @transform_0, window_bounds = array<i64: 1, 512, 32>}, {pipeline_mode = #tpu.pipeline_mode<synchronous>, transform_indices = @transform_1, window_bounds = array<i64: 256, 32>}, {pipeline_mode = #tpu.pipeline_mode<synchronous>, transform_indices = @transform_2, window_bounds = array<i64: 32, 256>}, {transform_indices = @transform_3, window_bounds = array<i64: 1, 16, 256, 256>}]} {
    %c0 = arith.constant 0 : index
    %c0_0 = arith.constant 0 : index
    %c0_1 = arith.constant 0 : index
    %0 = vector.load %arg2[%c0, %c0_0, %c0_1] : memref<1x512x32xbf16, #tpu.memory_space<vmem>>, vector<1x512x32xbf16>
    %1 = vector.shape_cast %0 : vector<1x512x32xbf16> to vector<512x32xbf16>
    %c0_2 = arith.constant 0 : index
    %c0_3 = arith.constant 0 : index
    %2 = vector.load %arg4[%c0_2, %c0_3] : memref<32x256xbf16, #tpu.memory_space<vmem>>, vector<32x256xbf16>
    %cst = arith.constant dense<0.000000e+00> : vector<512x256xf32>
    %3 = tpu.matmul %1, %2, %cst {dimension_numbers = #tpu.dot_dimension_numbers<[1], [0], [0], [1], [0, 0, 1, 1], [], []>} : vector<512x32xbf16>, vector<32x256xbf16>, vector<512x256xf32> -> vector<512x256xf32>
    %4 = arith.truncf %3 : vector<512x256xf32> to vector<512x256xbf16>
    %c0_4 = arith.constant 0 : index
    %c0_5 = arith.constant 0 : index
    %5 = vector.load %arg3[%c0_4, %c0_5] : memref<256x32xbf16, #tpu.memory_space<vmem>>, vector<256x32xbf16>
    %6 = vector.extract_strided_slice %4 {offsets = [0, 0], sizes = [32, 256], strides = [1, 1]} : vector<512x256xbf16> to vector<32x256xbf16>
    %cst_6 = arith.constant dense<0.000000e+00> : vector<256x256xf32>
    %7 = tpu.matmul %5, %6, %cst_6 {dimension_numbers = #tpu.dot_dimension_numbers<[1], [0], [0], [1], [0, 0, 1, 1], [], []>} : vector<256x32xbf16>, vector<32x256xbf16>, vector<256x256xf32> -> vector<256x256xf32>
    %c0_7 = arith.constant 0 : index
    %c0_8 = arith.constant 0 : index
    %c0_9 = arith.constant 0 : index
    %c0_10 = arith.constant 0 : index
    %8 = vector.load %arg5[%c0_7, %c0_8, %c0_9, %c0_10] : memref<1x16x256x256xf32, #tpu.memory_space<vmem>>, vector<1x1x256x256xf32>
    %9 = vector.shape_cast %8 : vector<1x1x256x256xf32> to vector<256x256xf32>
    %10 = vector.shape_cast %7 : vector<256x256xf32> to vector<1x1x256x256xf32>
    tpu.vector_store %arg5[%c0_7, %c0_8, %c0_9, %c0_10], %10 {strides = array<i32>} : memref<1x16x256x256xf32, #tpu.memory_space<vmem>>, vector<1x1x256x256xf32>,
    %11 = vector.extract_strided_slice %4 {offsets = [32, 0], sizes = [32, 256], strides = [1, 1]} : vector<512x256xbf16> to vector<32x256xbf16>
    %cst_11 = arith.constant dense<0.000000e+00> : vector<256x256xf32>
    %12 = tpu.matmul %5, %11, %cst_11 {dimension_numbers = #tpu.dot_dimension_numbers<[1], [0], [0], [1], [0, 0, 1, 1], [], []>} : vector<256x32xbf16>, vector<32x256xbf16>, vector<256x256xf32> -> vector<256x256xf32>
    %c0_12 = arith.constant 0 : index
    %c1 = arith.constant 1 : index
    %c0_13 = arith.constant 0 : index
    %c0_14 = arith.constant 0 : index
    %13 = vector.load %arg5[%c0_12, %c1, %c0_13, %c0_14] : memref<1x16x256x256xf32, #tpu.memory_space<vmem>>, vector<1x1x256x256xf32>
    %14 = vector.shape_cast %13 : vector<1x1x256x256xf32> to vector<256x256xf32>
    %15 = vector.shape_cast %12 : vector<256x256xf32> to vector<1x1x256x256xf32>
    tpu.vector_store %arg5[%c0_12, %c1, %c0_13, %c0_14], %15 {strides = array<i32>} : memref<1x16x256x256xf32, #tpu.memory_space<vmem>>, vector<1x1x256x256xf32>,
    %16 = vector.extract_strided_slice %4 {offsets = [64, 0], sizes = [32, 256], strides = [1, 1]} : vector<512x256xbf16> to vector<32x256xbf16>
    %cst_15 = arith.constant dense<0.000000e+00> : vector<256x256xf32>
    %17 = tpu.matmul %5, %16, %cst_15 {dimension_numbers = #tpu.dot_dimension_numbers<[1], [0], [0], [1], [0, 0, 1, 1], [], []>} : vector<256x32xbf16>, vector<32x256xbf16>, vector<256x256xf32> -> vector<256x256xf32>
    %c0_16 = arith.constant 0 : index
    %c2 = arith.constant 2 : index
    %c0_17 = arith.constant 0 : index
    %c0_18 = arith.constant 0 : index
    %18 = vector.load %arg5[%c0_16, %c2, %c0_17, %c0_18] : memref<1x16x256x256xf32, #tpu.memory_space<vmem>>, vector<1x1x256x256xf32>
    %19 = vector.shape_cast %18 : vector<1x1x256x256xf32> to vector<256x256xf32>
    %20 = vector.shape_cast %17 : vector<256x256xf32> to vector<1x1x256x256xf32>
    tpu.vector_store %arg5[%c0_16, %c2, %c0_17, %c0_18], %20 {strides = array<i32>} : memref<1x16x256x256xf32, #tpu.memory_space<vmem>>, vector<1x1x256x256xf32>,
    %21 = vector.extract_strided_slice %4 {offsets = [96, 0], sizes = [32, 256], strides = [1, 1]} : vector<512x256xbf16> to vector<32x256xbf16>
    %cst_19 = arith.constant dense<0.000000e+00> : vector<256x256xf32>
    %22 = tpu.matmul %5, %21, %cst_19 {dimension_numbers = #tpu.dot_dimension_numbers<[1], [0], [0], [1], [0, 0, 1, 1], [], []>} : vector<256x32xbf16>, vector<32x256xbf16>, vector<256x256xf32> -> vector<256x256xf32>
    %c0_20 = arith.constant 0 : index
    %c3 = arith.constant 3 : index
    %c0_21 = arith.constant 0 : index
    %c0_22 = arith.constant 0 : index
    %23 = vector.load %arg5[%c0_20, %c3, %c0_21, %c0_22] : memref<1x16x256x256xf32, #tpu.memory_space<vmem>>, vector<1x1x256x256xf32>
    %24 = vector.shape_cast %23 : vector<1x1x256x256xf32> to vector<256x256xf32>
    %25 = vector.shape_cast %22 : vector<256x256xf32> to vector<1x1x256x256xf32>
    tpu.vector_store %arg5[%c0_20, %c3, %c0_21, %c0_22], %25 {strides = array<i32>} : memref<1x16x256x256xf32, #tpu.memory_space<vmem>>, vector<1x1x256x256xf32>,
    %26 = vector.extract_strided_slice %4 {offsets = [128, 0], sizes = [32, 256], strides = [1, 1]} : vector<512x256xbf16> to vector<32x256xbf16>
    %cst_23 = arith.constant dense<0.000000e+00> : vector<256x256xf32>
    %27 = tpu.matmul %5, %26, %cst_23 {dimension_numbers = #tpu.dot_dimension_numbers<[1], [0], [0], [1], [0, 0, 1, 1], [], []>} : vector<256x32xbf16>, vector<32x256xbf16>, vector<256x256xf32> -> vector<256x256xf32>
    %c0_24 = arith.constant 0 : index
    %c4 = arith.constant 4 : index
    %c0_25 = arith.constant 0 : index
    %c0_26 = arith.constant 0 : index
    %28 = vector.load %arg5[%c0_24, %c4, %c0_25, %c0_26] : memref<1x16x256x256xf32, #tpu.memory_space<vmem>>, vector<1x1x256x256xf32>
    %29 = vector.shape_cast %28 : vector<1x1x256x256xf32> to vector<256x256xf32>
    %30 = vector.shape_cast %27 : vector<256x256xf32> to vector<1x1x256x256xf32>
    tpu.vector_store %arg5[%c0_24, %c4, %c0_25, %c0_26], %30 {strides = array<i32>} : memref<1x16x256x256xf32, #tpu.memory_space<vmem>>, vector<1x1x256x256xf32>,
    %31 = vector.extract_strided_slice %4 {offsets = [160, 0], sizes = [32, 256], strides = [1, 1]} : vector<512x256xbf16> to vector<32x256xbf16>
    %cst_27 = arith.constant dense<0.000000e+00> : vector<256x256xf32>
    %32 = tpu.matmul %5, %31, %cst_27 {dimension_numbers = #tpu.dot_dimension_numbers<[1], [0], [0], [1], [0, 0, 1, 1], [], []>} : vector<256x32xbf16>, vector<32x256xbf16>, vector<256x256xf32> -> vector<256x256xf32>
    %c0_28 = arith.constant 0 : index
    %c5 = arith.constant 5 : index
    %c0_29 = arith.constant 0 : index
    %c0_30 = arith.constant 0 : index
    %33 = vector.load %arg5[%c0_28, %c5, %c0_29, %c0_30] : memref<1x16x256x256xf32, #tpu.memory_space<vmem>>, vector<1x1x256x256xf32>
    %34 = vector.shape_cast %33 : vector<1x1x256x256xf32> to vector<256x256xf32>
    %35 = vector.shape_cast %32 : vector<256x256xf32> to vector<1x1x256x256xf32>
    tpu.vector_store %arg5[%c0_28, %c5, %c0_29, %c0_30], %35 {strides = array<i32>} : memref<1x16x256x256xf32, #tpu.memory_space<vmem>>, vector<1x1x256x256xf32>,
    %36 = vector.extract_strided_slice %4 {offsets = [192, 0], sizes = [32, 256], strides = [1, 1]} : vector<512x256xbf16> to vector<32x256xbf16>
    %cst_31 = arith.constant dense<0.000000e+00> : vector<256x256xf32>
    %37 = tpu.matmul %5, %36, %cst_31 {dimension_numbers = #tpu.dot_dimension_numbers<[1], [0], [0], [1], [0, 0, 1, 1], [], []>} : vector<256x32xbf16>, vector<32x256xbf16>, vector<256x256xf32> -> vector<256x256xf32>
    %c0_32 = arith.constant 0 : index
    %c6 = arith.constant 6 : index
    %c0_33 = arith.constant 0 : index
    %c0_34 = arith.constant 0 : index
    %38 = vector.load %arg5[%c0_32, %c6, %c0_33, %c0_34] : memref<1x16x256x256xf32, #tpu.memory_space<vmem>>, vector<1x1x256x256xf32>
    %39 = vector.shape_cast %38 : vector<1x1x256x256xf32> to vector<256x256xf32>
    %40 = vector.shape_cast %37 : vector<256x256xf32> to vector<1x1x256x256xf32>
    tpu.vector_store %arg5[%c0_32, %c6, %c0_33, %c0_34], %40 {strides = array<i32>} : memref<1x16x256x256xf32, #tpu.memory_space<vmem>>, vector<1x1x256x256xf32>,
    %41 = vector.extract_strided_slice %4 {offsets = [224, 0], sizes = [32, 256], strides = [1, 1]} : vector<512x256xbf16> to vector<32x256xbf16>
    %cst_35 = arith.constant dense<0.000000e+00> : vector<256x256xf32>
    %42 = tpu.matmul %5, %41, %cst_35 {dimension_numbers = #tpu.dot_dimension_numbers<[1], [0], [0], [1], [0, 0, 1, 1], [], []>} : vector<256x32xbf16>, vector<32x256xbf16>, vector<256x256xf32> -> vector<256x256xf32>
    %c0_36 = arith.constant 0 : index
    %c7 = arith.constant 7 : index
    %c0_37 = arith.constant 0 : index
    %c0_38 = arith.constant 0 : index
    %43 = vector.load %arg5[%c0_36, %c7, %c0_37, %c0_38] : memref<1x16x256x256xf32, #tpu.memory_space<vmem>>, vector<1x1x256x256xf32>
    %44 = vector.shape_cast %43 : vector<1x1x256x256xf32> to vector<256x256xf32>
    %45 = vector.shape_cast %42 : vector<256x256xf32> to vector<1x1x256x256xf32>
    tpu.vector_store %arg5[%c0_36, %c7, %c0_37, %c0_38], %45 {strides = array<i32>} : memref<1x16x256x256xf32, #tpu.memory_space<vmem>>, vector<1x1x256x256xf32>,
    %46 = vector.extract_strided_slice %4 {offsets = [256, 0], sizes = [32, 256], strides = [1, 1]} : vector<512x256xbf16> to vector<32x256xbf16>
    %cst_39 = arith.constant dense<0.000000e+00> : vector<256x256xf32>
    %47 = tpu.matmul %5, %46, %cst_39 {dimension_numbers = #tpu.dot_dimension_numbers<[1], [0], [0], [1], [0, 0, 1, 1], [], []>} : vector<256x32xbf16>, vector<32x256xbf16>, vector<256x256xf32> -> vector<256x256xf32>
    %c0_40 = arith.constant 0 : index
    %c8 = arith.constant 8 : index
    %c0_41 = arith.constant 0 : index
    %c0_42 = arith.constant 0 : index
    %48 = vector.load %arg5[%c0_40, %c8, %c0_41, %c0_42] : memref<1x16x256x256xf32, #tpu.memory_space<vmem>>, vector<1x1x256x256xf32>
    %49 = vector.shape_cast %48 : vector<1x1x256x256xf32> to vector<256x256xf32>
    %50 = vector.shape_cast %47 : vector<256x256xf32> to vector<1x1x256x256xf32>
    tpu.vector_store %arg5[%c0_40, %c8, %c0_41, %c0_42], %50 {strides = array<i32>} : memref<1x16x256x256xf32, #tpu.memory_space<vmem>>, vector<1x1x256x256xf32>,
    %51 = vector.extract_strided_slice %4 {offsets = [288, 0], sizes = [32, 256], strides = [1, 1]} : vector<512x256xbf16> to vector<32x256xbf16>
    %cst_43 = arith.constant dense<0.000000e+00> : vector<256x256xf32>
    %52 = tpu.matmul %5, %51, %cst_43 {dimension_numbers = #tpu.dot_dimension_numbers<[1], [0], [0], [1], [0, 0, 1, 1], [], []>} : vector<256x32xbf16>, vector<32x256xbf16>, vector<256x256xf32> -> vector<256x256xf32>
    %c0_44 = arith.constant 0 : index
    %c9 = arith.constant 9 : index
    %c0_45 = arith.constant 0 : index
    %c0_46 = arith.constant 0 : index
    %53 = vector.load %arg5[%c0_44, %c9, %c0_45, %c0_46] : memref<1x16x256x256xf32, #tpu.memory_space<vmem>>, vector<1x1x256x256xf32>
    %54 = vector.shape_cast %53 : vector<1x1x256x256xf32> to vector<256x256xf32>
    %55 = vector.shape_cast %52 : vector<256x256xf32> to vector<1x1x256x256xf32>
    tpu.vector_store %arg5[%c0_44, %c9, %c0_45, %c0_46], %55 {strides = array<i32>} : memref<1x16x256x256xf32, #tpu.memory_space<vmem>>, vector<1x1x256x256xf32>,
    %56 = vector.extract_strided_slice %4 {offsets = [320, 0], sizes = [32, 256], strides = [1, 1]} : vector<512x256xbf16> to vector<32x256xbf16>
    %cst_47 = arith.constant dense<0.000000e+00> : vector<256x256xf32>
    %57 = tpu.matmul %5, %56, %cst_47 {dimension_numbers = #tpu.dot_dimension_numbers<[1], [0], [0], [1], [0, 0, 1, 1], [], []>} : vector<256x32xbf16>, vector<32x256xbf16>, vector<256x256xf32> -> vector<256x256xf32>
    %c0_48 = arith.constant 0 : index
    %c10 = arith.constant 10 : index
    %c0_49 = arith.constant 0 : index
    %c0_50 = arith.constant 0 : index
    %58 = vector.load %arg5[%c0_48, %c10, %c0_49, %c0_50] : memref<1x16x256x256xf32, #tpu.memory_space<vmem>>, vector<1x1x256x256xf32>
    %59 = vector.shape_cast %58 : vector<1x1x256x256xf32> to vector<256x256xf32>
    %60 = vector.shape_cast %57 : vector<256x256xf32> to vector<1x1x256x256xf32>
    tpu.vector_store %arg5[%c0_48, %c10, %c0_49, %c0_50], %60 {strides = array<i32>} : memref<1x16x256x256xf32, #tpu.memory_space<vmem>>, vector<1x1x256x256xf32>,
    %61 = vector.extract_strided_slice %4 {offsets = [352, 0], sizes = [32, 256], strides = [1, 1]} : vector<512x256xbf16> to vector<32x256xbf16>
    %cst_51 = arith.constant dense<0.000000e+00> : vector<256x256xf32>
    %62 = tpu.matmul %5, %61, %cst_51 {dimension_numbers = #tpu.dot_dimension_numbers<[1], [0], [0], [1], [0, 0, 1, 1], [], []>} : vector<256x32xbf16>, vector<32x256xbf16>, vector<256x256xf32> -> vector<256x256xf32>
    %c0_52 = arith.constant 0 : index
    %c11 = arith.constant 11 : index
    %c0_53 = arith.constant 0 : index
    %c0_54 = arith.constant 0 : index
    %63 = vector.load %arg5[%c0_52, %c11, %c0_53, %c0_54] : memref<1x16x256x256xf32, #tpu.memory_space<vmem>>, vector<1x1x256x256xf32>
    %64 = vector.shape_cast %63 : vector<1x1x256x256xf32> to vector<256x256xf32>
    %65 = vector.shape_cast %62 : vector<256x256xf32> to vector<1x1x256x256xf32>
    tpu.vector_store %arg5[%c0_52, %c11, %c0_53, %c0_54], %65 {strides = array<i32>} : memref<1x16x256x256xf32, #tpu.memory_space<vmem>>, vector<1x1x256x256xf32>,
    %66 = vector.extract_strided_slice %4 {offsets = [384, 0], sizes = [32, 256], strides = [1, 1]} : vector<512x256xbf16> to vector<32x256xbf16>
    %cst_55 = arith.constant dense<0.000000e+00> : vector<256x256xf32>
    %67 = tpu.matmul %5, %66, %cst_55 {dimension_numbers = #tpu.dot_dimension_numbers<[1], [0], [0], [1], [0, 0, 1, 1], [], []>} : vector<256x32xbf16>, vector<32x256xbf16>, vector<256x256xf32> -> vector<256x256xf32>
    %c0_56 = arith.constant 0 : index
    %c12 = arith.constant 12 : index
    %c0_57 = arith.constant 0 : index
    %c0_58 = arith.constant 0 : index
    %68 = vector.load %arg5[%c0_56, %c12, %c0_57, %c0_58] : memref<1x16x256x256xf32, #tpu.memory_space<vmem>>, vector<1x1x256x256xf32>
    %69 = vector.shape_cast %68 : vector<1x1x256x256xf32> to vector<256x256xf32>
    %70 = vector.shape_cast %67 : vector<256x256xf32> to vector<1x1x256x256xf32>
    tpu.vector_store %arg5[%c0_56, %c12, %c0_57, %c0_58], %70 {strides = array<i32>} : memref<1x16x256x256xf32, #tpu.memory_space<vmem>>, vector<1x1x256x256xf32>,
    %71 = vector.extract_strided_slice %4 {offsets = [416, 0], sizes = [32, 256], strides = [1, 1]} : vector<512x256xbf16> to vector<32x256xbf16>
    %cst_59 = arith.constant dense<0.000000e+00> : vector<256x256xf32>
    %72 = tpu.matmul %5, %71, %cst_59 {dimension_numbers = #tpu.dot_dimension_numbers<[1], [0], [0], [1], [0, 0, 1, 1], [], []>} : vector<256x32xbf16>, vector<32x256xbf16>, vector<256x256xf32> -> vector<256x256xf32>
    %c0_60 = arith.constant 0 : index
    %c13 = arith.constant 13 : index
    %c0_61 = arith.constant 0 : index
    %c0_62 = arith.constant 0 : index
    %73 = vector.load %arg5[%c0_60, %c13, %c0_61, %c0_62] : memref<1x16x256x256xf32, #tpu.memory_space<vmem>>, vector<1x1x256x256xf32>
    %74 = vector.shape_cast %73 : vector<1x1x256x256xf32> to vector<256x256xf32>
    %75 = vector.shape_cast %72 : vector<256x256xf32> to vector<1x1x256x256xf32>
    tpu.vector_store %arg5[%c0_60, %c13, %c0_61, %c0_62], %75 {strides = array<i32>} : memref<1x16x256x256xf32, #tpu.memory_space<vmem>>, vector<1x1x256x256xf32>,
    %76 = vector.extract_strided_slice %4 {offsets = [448, 0], sizes = [32, 256], strides = [1, 1]} : vector<512x256xbf16> to vector<32x256xbf16>
    %cst_63 = arith.constant dense<0.000000e+00> : vector<256x256xf32>
    %77 = tpu.matmul %5, %76, %cst_63 {dimension_numbers = #tpu.dot_dimension_numbers<[1], [0], [0], [1], [0, 0, 1, 1], [], []>} : vector<256x32xbf16>, vector<32x256xbf16>, vector<256x256xf32> -> vector<256x256xf32>
    %c0_64 = arith.constant 0 : index
    %c14 = arith.constant 14 : index
    %c0_65 = arith.constant 0 : index
    %c0_66 = arith.constant 0 : index
    %78 = vector.load %arg5[%c0_64, %c14, %c0_65, %c0_66] : memref<1x16x256x256xf32, #tpu.memory_space<vmem>>, vector<1x1x256x256xf32>
    %79 = vector.shape_cast %78 : vector<1x1x256x256xf32> to vector<256x256xf32>
    %80 = vector.shape_cast %77 : vector<256x256xf32> to vector<1x1x256x256xf32>
    tpu.vector_store %arg5[%c0_64, %c14, %c0_65, %c0_66], %80 {strides = array<i32>} : memref<1x16x256x256xf32, #tpu.memory_space<vmem>>, vector<1x1x256x256xf32>,
    %81 = vector.extract_strided_slice %4 {offsets = [480, 0], sizes = [32, 256], strides = [1, 1]} : vector<512x256xbf16> to vector<32x256xbf16>
    %cst_67 = arith.constant dense<0.000000e+00> : vector<256x256xf32>
    %82 = tpu.matmul %5, %81, %cst_67 {dimension_numbers = #tpu.dot_dimension_numbers<[1], [0], [0], [1], [0, 0, 1, 1], [], []>} : vector<256x32xbf16>, vector<32x256xbf16>, vector<256x256xf32> -> vector<256x256xf32>
    %c0_68 = arith.constant 0 : index
    %c15 = arith.constant 15 : index
    %c0_69 = arith.constant 0 : index
    %c0_70 = arith.constant 0 : index
    %83 = vector.load %arg5[%c0_68, %c15, %c0_69, %c0_70] : memref<1x16x256x256xf32, #tpu.memory_space<vmem>>, vector<1x1x256x256xf32>
    %84 = vector.shape_cast %83 : vector<1x1x256x256xf32> to vector<256x256xf32>
    %85 = vector.shape_cast %82 : vector<256x256xf32> to vector<1x1x256x256xf32>
    tpu.vector_store %arg5[%c0_68, %c15, %c0_69, %c0_70], %85 {strides = array<i32>} : memref<1x16x256x256xf32, #tpu.memory_space<vmem>>, vector<1x1x256x256xf32>,
    return
  }
  func.func @transform_0(%arg0: i32, %arg1: i32) -> (i32, i32, i32) {
    %c0_i32 = arith.constant 0 : i32
    %c0_i32_0 = arith.constant 0 : i32
    return %arg0, %arg1, %c0_i32 : i32, i32, i32
  }
  func.func @transform_1(%arg0: i32, %arg1: i32) -> (i32, i32) {
    %c0_i32 = arith.constant 0 : i32
    %c0_i32_0 = arith.constant 0 : i32
    %c0_i32_1 = arith.constant 0 : i32
    return %c0_i32, %c0_i32_0 : i32, i32
  }
  func.func @transform_2(%arg0: i32, %arg1: i32) -> (i32, i32) {
    %c0_i32 = arith.constant 0 : i32
    %c0_i32_0 = arith.constant 0 : i32
    %c0_i32_1 = arith.constant 0 : i32
    return %c0_i32, %c0_i32_0 : i32, i32
  }
  func.func @transform_3(%arg0: i32, %arg1: i32) -> (i32, i32, i32, i32) {
    %c0_i32 = arith.constant 0 : i32
    %c0_i32_0 = arith.constant 0 : i32
    %c0_i32_1 = arith.constant 0 : i32
    return %arg0, %arg1, %c0_i32, %c0_i32_0 : i32, i32, i32, i32
  }
}

</mosaic_0001>

<bundles_post_ra>
// kernel: part_detect_net_head.2
= control target key start
LH: loop header
LB: loop body
LE: loop exit
PB: predicated region body
PF: predicated region fallthrough
CT: control target
= control target key end

     0   :  { %s3082_s9 = smov 0   ;;  %s3084_s10 = smov 0   ;;  %s3883_s0 = inlined_call_operand.vmem [shape: f32[2,2048,64], index: 0, kind: input, shape index: {}]   ;;  %s3884_s1 = inlined_call_operand.vmem [shape: bf16[256,2048], index: 1, kind: input, shape index: {}]   ;;  %s3885_s2 = inlined_call_operand.vmem [shape: bf16[2,256,64], index: 2, kind: output, shape index: {}]  }
   0x1   :  { %s3086_s11 = smov 0   ;;  %s3088_s12 = smov 0  }
   0x2   :  { %s3090_s13 = smov 0  }
   0x3 LB: > { %s21_s14 = sadd.s32 1, %s3057_s11  ;;  %s24_s15 = sadd.s32 1, %s3061_s12  ;;  %s3065_s13 = sphi %s3090_s13, %s12_s13   ;;  %s3061_s12 = sphi %s3088_s12, %s3890_s12   ;;  %s3057_s11 = sphi %s3086_s11, %s3889_s11   ;;  %s3053_s10 = sphi %s3084_s10, %s3888_s10   ;;  %s3049_s9 = sphi %s3082_s9, %s3887_s9  }
   0x4   : > { %p22_p0 = scmp.ge.s32.totalorder %s21_s14, 2  ;;  %p2302_p1 = scmp.ge.s32.totalorder %s3065_s13, 1 }
   0x5   : > { %p138_p2 = scmp.lt.s32.totalorder %s3065_s13, 5 }
   0x6   : > { %s3892_s14 = smov (%p22_p0, %s21_s14), 0  ;;  %s3894_s15 = smov (!%p22_p0, %s24_s15), %s3061_s12 }
   0x7   : > { %p139_p3 = pnand %p2302_p1, %p138_p2  ;;  %p26_p4 = scmp.ge.s32.totalorder %s3894_s15, 2 }
   0x8   : > { %p170_p5 = scmp.lt.s32.totalorder (!%p139_p3), %s3053_s10, 1  ;;  %s2305_s20 = sshll.u32 (!%p139_p3), %s3049_s9, 4  ;;  %vm2185_vm0 = vcmask (!%p139_p3), 519168  }
   0x9   : > { %s3896_s15 = smov (%p26_p4, %s3894_s15), 0  ;;  %142 = sbr.rel (%p139_p3) target bundleno = 527 (0x20f), region = 28 }
   0xa   : > { %p3149_p6 = scmp.lt.s32.totalorder (!%p139_p3), %s2305_s20, 31 }
  0x10   : > { %s3898_s10 = smov (!%p170_p5, %s3053_s10), 1  ;;  %s3900_s20 = smov (!%p3149_p6, %s2305_s20), 31 }
  0x11   : > { %s2457_s16 = sshll.u32 %s3898_s10, 11  ;;  %s2458_s22 = sshll.u32 %s3900_s20, 6 }
  0x12   : > { %s3120_s19 = scalar_lea.vmem %s3883_s0, %s2457_s16  ;;  %s3189_s25 = scalar_lea.vmem %s3884_s1, %s2458_s22 }
  0x13   : > { %v209_v0 = vld [vmem:[%s3120_s19 + $0x80] sm:$0xff]  ;;  %v210_v1 = vld [vmem:[%s3120_s19 + $0x88] sm:$0xff]  ;;  %v211_v11 = vld [vmem:[%s3120_s19 + $0x90] sm:$0xff]  ;;  %s2309_s26 = sshll.u32 %s3898_s10, 5 }
  0x14   : > { %v241_v2 = vld [vmem:[%s3120_s19 + $0x180] sm:$0xff]  ;;  %v457_v3 = vpack.c.bf16 %v210_v1, %v209_v0  ;;  %v242_v4 = vld [vmem:[%s3120_s19 + $0x188] sm:$0xff]  ;;  %v212_v13 = vld [vmem:[%s3120_s19 + $0x98] sm:$0xff]  ;;  %s188_s27 = sadd.s32 %s2309_s26, %s3900_s20 }
  0x15   : > { %v193_v5 = vld [vmem:[%s3120_s19] sm:$0xff]  ;;  %v194_v6 = vld [vmem:[%s3120_s19 + $0x8] sm:$0xff]  ;;  %v473_v7 = vpack.c.bf16 %v242_v4, %v241_v2  ;;  %v243_v14 = vld [vmem:[%s3120_s19 + $0x190] sm:$0xff]  ;;  %v458_v16 = vpack.c.bf16 %v212_v13, %v211_v11  ;;  %s2310_s28 = sshll.u32 %s188_s27, 2 }
  0x16   : > { %v449_v8 = vpack.c.bf16 %v194_v6, %v193_v5  ;;  %v225_v9 = vld [vmem:[%s3120_s19 + $0x100] sm:$0xff]  ;;  %v226_v10 = vld [vmem:[%s3120_s19 + $0x108] sm:$0xff]  ;;  %2475 = vmatprep.subr.bf16.mxu0 %v457_v3  ;;  %v244_v15 = vld [vmem:[%s3120_s19 + $0x198] sm:$0xff]  ;;  %s3820_s3 = scalar_lea.vmem %s3885_s2, %s2310_s28 }
  0x17   : > { %v465_v12 = vpack.c.bf16 %v226_v10, %v225_v9  ;;  %2539 = vmatprep.subr.bf16.mxu1 %v473_v7  ;;  %v474_v17 = vpack.c.bf16 %v244_v15, %v243_v14  ;;  %v195_v18 = vld [vmem:[%s3120_s19 + $0x10] sm:$0xff]  ;;  %v196_v19 = vld [vmem:[%s3120_s19 + $0x18] sm:$0xff]  ;;  %v213_v23 = vld [vmem:[%s3120_s19 + $0xa0] sm:$0xff] }
  0x18   : > { %2476 = vmatpush3.bf16.msra.mxu0 %v449_v8  ;;  %v227_v20 = vld [vmem:[%s3120_s19 + $0x110] sm:$0xff]  ;;  %v450_v21 = vpack.c.bf16 %v196_v19, %v195_v18  ;;  %v228_v22 = vld [vmem:[%s3120_s19 + $0x118] sm:$0xff]  ;;  %v214_v24 = vld [vmem:[%s3120_s19 + $0xa8] sm:$0xff] }
  0x19   : > { %2540 = vmatpush3.bf16.msra.mxu1 %v465_v12  ;;  %2477 = vmatprep.subr.bf16.mxu0 %v458_v16  ;;  %v466_v25 = vpack.c.bf16 %v228_v22, %v227_v20  ;;  %v459_v26 = vpack.c.bf16 %v214_v24, %v213_v23  ;;  %v245_v27 = vld [vmem:[%s3120_s19 + $0x1a0] sm:$0xff]  ;;  %v246_v28 = vld [vmem:[%s3120_s19 + $0x1a8] sm:$0xff]  ;;  %v215_v35 = vld [vmem:[%s3120_s19 + $0xb0] sm:$0xff] }
  0x1a   : > { %2541 = vmatprep.subr.bf16.mxu1 %v474_v17  ;;  %v197_v29 = vld [vmem:[%s3120_s19 + $0x20] sm:$0xff]  ;;  %v475_v30 = vpack.c.bf16 %v246_v28, %v245_v27  ;;  %v198_v31 = vld [vmem:[%s3120_s19 + $0x28] sm:$0xff]  ;;  %v216_v36 = vld [vmem:[%s3120_s19 + $0xb8] sm:$0xff] }
  0x1b   : > { %v229_v32 = vld [vmem:[%s3120_s19 + $0x120] sm:$0xff]  ;;  %v230_v33 = vld [vmem:[%s3120_s19 + $0x128] sm:$0xff]  ;;  %v451_v34 = vpack.c.bf16 %v198_v31, %v197_v29  ;;  %v247_v37 = vld [vmem:[%s3120_s19 + $0x1b0] sm:$0xff]  ;;  %v460_v39 = vpack.c.bf16 %v216_v36, %v215_v35 }
  0x1c   : > { %2478 = vmatpush3.bf16.msra.mxu0 %v450_v21  ;;  %v467_v38 = vpack.c.bf16 %v230_v33, %v229_v32  ;;  %v248_v40 = vld [vmem:[%s3120_s19 + $0x1b8] sm:$0xff]  ;;  %v199_v41 = vld [vmem:[%s3120_s19 + $0x30] sm:$0xff]  ;;  %v217_v46 = vld [vmem:[%s3120_s19 + $0xc0] sm:$0xff] }
  0x1d   : > { %2542 = vmatpush3.bf16.msra.mxu1 %v466_v25  ;;  %2479 = vmatprep.subr.bf16.mxu0 %v459_v26  ;;  %v200_v42 = vld [vmem:[%s3120_s19 + $0x38] sm:$0xff]  ;;  %v476_v43 = vpack.c.bf16 %v248_v40, %v247_v37  ;;  %v231_v44 = vld [vmem:[%s3120_s19 + $0x130] sm:$0xff]  ;;  %v218_v47 = vld [vmem:[%s3120_s19 + $0xc8] sm:$0xff] }
  0x1e   : > { %2543 = vmatprep.subr.bf16.mxu1 %v475_v30  ;;  %v232_v45 = vld [vmem:[%s3120_s19 + $0x138] sm:$0xff]  ;;  %v249_v48 = vld [vmem:[%s3120_s19 + $0x1c0] sm:$0xff]  ;;  %v250_v49 = vld [vmem:[%s3120_s19 + $0x1c8] sm:$0xff]  ;;  %v452_v50 = vpack.c.bf16 %v200_v42, %v199_v41  ;;  %v461_v52 = vpack.c.bf16 %v218_v47, %v217_v46 }
  0x1f   : > { %v468_v51 = vpack.c.bf16 %v232_v45, %v231_v44  ;;  %v201_v53 = vld [vmem:[%s3120_s19 + $0x40] sm:$0xff]  ;;  %v202_v54 = vld [vmem:[%s3120_s19 + $0x48] sm:$0xff]  ;;  %v477_v56 = vpack.c.bf16 %v250_v49, %v249_v48  ;;  %v219_v58 = vld [vmem:[%s3120_s19 + $0xd0] sm:$0xff] }
  0x20   : > { %2480 = vmatpush3.bf16.msra.mxu0 %v451_v34  ;;  %v233_v55 = vld [vmem:[%s3120_s19 + $0x140] sm:$0xff]  ;;  %v234_v57 = vld [vmem:[%s3120_s19 + $0x148] sm:$0xff]  ;;  %v220_v59 = vld [vmem:[%s3120_s19 + $0xd8] sm:$0xff]  ;;  %v453_v62 = vpack.c.bf16 %v202_v54, %v201_v53 }
  0x21   : > { %2544 = vmatpush3.bf16.msra.mxu1 %v467_v38  ;;  %2481 = vmatprep.subr.bf16.mxu0 %v460_v39  ;;  %v251_v60 = vld [vmem:[%s3120_s19 + $0x1d0] sm:$0xff]  ;;  %v252_v61 = vld [vmem:[%s3120_s19 + $0x1d8] sm:$0xff]  ;;  %v469_v63 = vpack.c.bf16 %v234_v57, %v233_v55  ;;  %v462_v0 = vpack.c.bf16 %v220_v59, %v219_v58  ;;  %v221_v6 = vld [vmem:[%s3120_s19 + $0xe0] sm:$0xff] }
  0x22   : > { %2545 = vmatprep.subr.bf16.mxu1 %v476_v43  ;;  %v203_v1 = vld [vmem:[%s3120_s19 + $0x50] sm:$0xff]  ;;  %v204_v2 = vld [vmem:[%s3120_s19 + $0x58] sm:$0xff]  ;;  %v478_v4 = vpack.c.bf16 %v252_v61, %v251_v60  ;;  %v222_v7 = vld [vmem:[%s3120_s19 + $0xe8] sm:$0xff] }
  0x23   : > { %v235_v3 = vld [vmem:[%s3120_s19 + $0x150] sm:$0xff]  ;;  %v236_v5 = vld [vmem:[%s3120_s19 + $0x158] sm:$0xff]  ;;  %v253_v8 = vld [vmem:[%s3120_s19 + $0x1e0] sm:$0xff]  ;;  %v454_v11 = vpack.c.bf16 %v204_v2, %v203_v1  ;;  %v463_v16 = vpack.c.bf16 %v222_v7, %v221_v6 }
  0x24   : > { %2482 = vmatpush3.bf16.msra.mxu0 %v452_v50  ;;  %v254_v9 = vld [vmem:[%s3120_s19 + $0x1e8] sm:$0xff]  ;;  %v205_v10 = vld [vmem:[%s3120_s19 + $0x60] sm:$0xff]  ;;  %v470_v15 = vpack.c.bf16 %v236_v5, %v235_v3  ;;  %v223_v17 = vld [vmem:[%s3120_s19 + $0xf0] sm:$0xff] }
  0x25   : > { %2546 = vmatpush3.bf16.msra.mxu1 %v468_v51  ;;  %2483 = vmatprep.subr.bf16.mxu0 %v461_v52  ;;  %v206_v12 = vld [vmem:[%s3120_s19 + $0x68] sm:$0xff]  ;;  %v237_v13 = vld [vmem:[%s3120_s19 + $0x160] sm:$0xff]  ;;  %v479_v20 = vpack.c.bf16 %v254_v9, %v253_v8  ;;  %v224_v21 = vld [vmem:[%s3120_s19 + $0xf8] sm:$0xff] }
  0x26   : > { %2547 = vmatprep.subr.bf16.mxu1 %v477_v56  ;;  %v238_v14 = vld [vmem:[%s3120_s19 + $0x168] sm:$0xff]  ;;  %v3199_v18 = vld [vmem:[%s3189_s25] sm:$0xff]  ;;  %v255_v25 = vld [vmem:[%s3120_s19 + $0x1f0] sm:$0xff]  ;;  %v455_v28 = vpack.c.bf16 %v206_v12, %v205_v10  ;;  %v464_v30 = vpack.c.bf16 %v224_v21, %v223_v17 }
  0x27   : > { %v3202_v19 = vld [vmem:[%s3189_s25 + $0x40] sm:$0xff]  ;;  %v3208_v23 = vld [vmem:[%s3189_s25 + $0x8] sm:$0xff]  ;;  %v256_v26 = vld [vmem:[%s3120_s19 + $0x1f8] sm:$0xff]  ;;  %v471_v29 = vpack.c.bf16 %v238_v14, %v237_v13 }
  0x28   : > { %2484 = vmatpush3.bf16.msra.mxu0 %v453_v62  ;;  %v2312_v22 = vcombine.high %v3199_v18, %v3202_v19  ;;  %v3211_v24 = vld [vmem:[%s3189_s25 + $0x48] sm:$0xff]  ;;  %v207_v31 = vld [vmem:[%s3120_s19 + $0x70] sm:$0xff]  ;;  %v208_v32 = vld [vmem:[%s3120_s19 + $0x78] sm:$0xff]  ;;  %v480_v34 = vpack.c.bf16 %v256_v26, %v255_v25  ;;  %v2311_v51 = vcombine.low %v3199_v18, %v3202_v19 }
  0x29   : > { %2548 = vmatpush3.bf16.msra.mxu1 %v469_v63  ;;  %2485 = vmatprep.subr.bf16.mxu0 %v462_v0  ;;  %v2314_v27 = vcombine.high %v3208_v23, %v3211_v24  ;;  %v239_v33 = vld [vmem:[%s3120_s19 + $0x170] sm:$0xff]  ;;  %v240_v35 = vld [vmem:[%s3120_s19 + $0x178] sm:$0xff]  ;;  %v273_v36 = vld [vmem:[%s3120_s19 + $0x280] sm:$0xff]  ;;  %v456_v40 = vpack.c.bf16 %v208_v32, %v207_v31  ;;  %v2313_v55 = vcombine.low %v3208_v23, %v3211_v24 }
  0x2a   : > { %2549 = vmatprep.subr.bf16.mxu1 %v478_v4  ;;  %1377 = vmatprep.mubr.bf16.mxu0 %v2312_v22  ;;  %v274_v37 = vld [vmem:[%s3120_s19 + $0x288] sm:$0xff]  ;;  %v305_v38 = vld [vmem:[%s3120_s19 + $0x380] sm:$0xff]  ;;  %v472_v42 = vpack.c.bf16 %v240_v35, %v239_v33  ;;  %v275_v53 = vld [vmem:[%s3120_s19 + $0x290] sm:$0xff] }
  0x2b   : > { %1474 = vmatprep.mubr.bf16.mxu1 %v2314_v27  ;;  %v306_v39 = vld [vmem:[%s3120_s19 + $0x388] sm:$0xff]  ;;  %v257_v41 = vld [vmem:[%s3120_s19 + $0x200] sm:$0xff]  ;;  %v489_v43 = vpack.c.bf16 %v274_v37, %v273_v36  ;;  %v276_v54 = vld [vmem:[%s3120_s19 + $0x298] sm:$0xff] }
  0x2c   : > { %2486 = vmatpush3.bf16.msra.mxu0 %v454_v11  ;;  %v258_v44 = vld [vmem:[%s3120_s19 + $0x208] sm:$0xff]  ;;  %v289_v45 = vld [vmem:[%s3120_s19 + $0x300] sm:$0xff]  ;;  %v505_v47 = vpack.c.bf16 %v306_v39, %v305_v38  ;;  %v307_v57 = vld [vmem:[%s3120_s19 + $0x390] sm:$0xff]  ;;  %v490_v1 = vpack.c.bf16 %v276_v54, %v275_v53 }
  0x2d   : > { %2550 = vmatpush3.bf16.msra.mxu1 %v470_v15  ;;  %2487 = vmatprep.subr.bf16.mxu0 %v463_v16  ;;  %v290_v46 = vld [vmem:[%s3120_s19 + $0x308] sm:$0xff]  ;;  %v3230_v48 = vld [vmem:[%s3189_s25 + $0x80] sm:$0xff]  ;;  %v481_v56 = vpack.c.bf16 %v258_v44, %v257_v41  ;;  %v308_v58 = vld [vmem:[%s3120_s19 + $0x398] sm:$0xff] }
  0x2e   : > { %2551 = vmatprep.subr.bf16.mxu1 %v479_v20  ;;  %v3233_v49 = vld [vmem:[%s3189_s25 + $0xc0] sm:$0xff]  ;;  %v3236_v50 = vld [vmem:[%s3189_s25 + $0x88] sm:$0xff]  ;;  %v497_v59 = vpack.c.bf16 %v290_v46, %v289_v45  ;;  %v259_v61 = vld [vmem:[%s3120_s19 + $0x210] sm:$0xff]  ;;  %v506_v5 = vpack.c.bf16 %v308_v58, %v307_v57 }
  0x2f   : > { %v3241_v52 = vld [vmem:[%s3189_s25 + $0xc8] sm:$0xff]  ;;  %v2328_v60 = vcombine.high %v3230_v48, %v3233_v49  ;;  %v260_v62 = vld [vmem:[%s3120_s19 + $0x218] sm:$0xff]  ;;  %v291_v63 = vld [vmem:[%s3120_s19 + $0x310] sm:$0xff]  ;;  %v2327_v19 = vcombine.low %v3230_v48, %v3233_v49 }
  0x30   : > { %2488 = vmatpush3.bf16.msra.mxu0 %v455_v28  ;;  %v2330_v0 = vcombine.high %v3236_v50, %v3241_v52  ;;  %v292_v2 = vld [vmem:[%s3120_s19 + $0x318] sm:$0xff]  ;;  %v277_v3 = vld [vmem:[%s3120_s19 + $0x2a0] sm:$0xff]  ;;  %v278_v4 = vld [vmem:[%s3120_s19 + $0x2a8] sm:$0xff]  ;;  %v482_v8 = vpack.c.bf16 %v260_v62, %v259_v61  ;;  %v2329_v23 = vcombine.low %v3236_v50, %v3241_v52 }
  0x31   : > { %2552 = vmatpush3.bf16.msra.mxu1 %v471_v29  ;;  %2489 = vmatprep.subr.bf16.mxu0 %v464_v30  ;;  %v309_v6 = vld [vmem:[%s3120_s19 + $0x3a0] sm:$0xff]  ;;  %v310_v7 = vld [vmem:[%s3120_s19 + $0x3a8] sm:$0xff]  ;;  %v498_v10 = vpack.c.bf16 %v292_v2, %v291_v63  ;;  %v491_v14 = vpack.c.bf16 %v278_v4, %v277_v3  ;;  %v279_v21 = vld [vmem:[%s3120_s19 + $0x2b0] sm:$0xff] }
  0x32   : > { %2553 = vmatprep.subr.bf16.mxu1 %v480_v34  ;;  %v3262_v9 = vld [vmem:[%s3189_s25 + $0x100] sm:$0xff]  ;;  %v3268_v12 = vld [vmem:[%s3189_s25 + $0x108] sm:$0xff]  ;;  %v507_v17 = vpack.c.bf16 %v310_v7, %v309_v6  ;;  %v280_v22 = vld [vmem:[%s3120_s19 + $0x2b8] sm:$0xff] }
  0x33   : > { %v3265_v11 = vld [vmem:[%s3189_s25 + $0x140] sm:$0xff]  ;;  %v3271_v13 = vld [vmem:[%s3189_s25 + $0x148] sm:$0xff]  ;;  %v311_v25 = vld [vmem:[%s3120_s19 + $0x3b0] sm:$0xff]  ;;  %v492_v30 = vpack.c.bf16 %v280_v22, %v279_v21 }
  0x34   : > { %2490 = vmatpush3.bf16.msra.mxu0 %v456_v40  ;;  %v261_v15 = vld [vmem:[%s3120_s19 + $0x220] sm:$0xff]  ;;  %v262_v16 = vld [vmem:[%s3120_s19 + $0x228] sm:$0xff]  ;;  %v2344_v24 = vcombine.high %v3262_v9, %v3265_v11  ;;  %v312_v26 = vld [vmem:[%s3120_s19 + $0x3b8] sm:$0xff]  ;;  %v2346_v27 = vcombine.high %v3268_v12, %v3271_v13  ;;  %v2343_v50 = vcombine.low %v3262_v9, %v3265_v11 }
  0x35   : > { %2554 = vmatpush3.bf16.msra.mxu1 %v472_v42  ;;  %2603 = vmatprep.subr.bf16.mxu0 %v489_v43  ;;  %v293_v18 = vld [vmem:[%s3120_s19 + $0x320] sm:$0xff]  ;;  %v294_v20 = vld [vmem:[%s3120_s19 + $0x328] sm:$0xff]  ;;  %v483_v28 = vpack.c.bf16 %v262_v16, %v261_v15  ;;  %v263_v31 = vld [vmem:[%s3120_s19 + $0x230] sm:$0xff]  ;;  %v508_v34 = vpack.c.bf16 %v312_v26, %v311_v25 }
  0x36   : > { %2667 = vmatprep.subr.bf16.mxu1 %v505_v47  ;;  %v499_v29 = vpack.c.bf16 %v294_v20, %v293_v18  ;;  %v264_v32 = vld [vmem:[%s3120_s19 + $0x238] sm:$0xff]  ;;  %v295_v33 = vld [vmem:[%s3120_s19 + $0x330] sm:$0xff]  ;;  %v281_v36 = vld [vmem:[%s3120_s19 + $0x2c0] sm:$0xff] }
  0x37   : > { %1378 = vmatmul.mubr.bf16.vlgmr.msra.gmra.mrb[0].mxu0 %v2311_v51  ;;  %v296_v35 = vld [vmem:[%s3120_s19 + $0x338] sm:$0xff]  ;;  %v282_v37 = vld [vmem:[%s3120_s19 + $0x2c8] sm:$0xff]  ;;  %v3296_v38 = vld [vmem:[%s3189_s25 + $0x180] sm:$0xff]  ;;  %v484_v44 = vpack.c.bf16 %v264_v32, %v263_v31 }
  0x38   : > { %1475 = vmatmul.mubr.bf16.vlgmr.msra.gmra.mrb[0].mxu1 %v2313_v55  ;;  %2604 = vmatpush3.bf16.msra.mxu0 %v481_v56  ;;  %v313_v39 = vld [vmem:[%s3120_s19 + $0x3c0] sm:$0xff]  ;;  %v314_v40 = vld [vmem:[%s3120_s19 + $0x3c8] sm:$0xff]  ;;  %v500_v45 = vpack.c.bf16 %v296_v35, %v295_v33  ;;  %v493_v46 = vpack.c.bf16 %v282_v37, %v281_v36  ;;  %v283_v53 = vld [vmem:[%s3120_s19 + $0x2d0] sm:$0xff]  ;;  %v2345_v55 = vcombine.low %v3268_v12, %v3271_v13 }
  0x39   : > { %2668 = vmatpush3.bf16.msra.mxu1 %v497_v59  ;;  %1385 = vmatprep.mubr.bf16.mxu0 %v2328_v60  ;;  %v3301_v41 = vld [vmem:[%s3189_s25 + $0x1c0] sm:$0xff]  ;;  %v3304_v42 = vld [vmem:[%s3189_s25 + $0x188] sm:$0xff]  ;;  %v509_v51 = vpack.c.bf16 %v314_v40, %v313_v39  ;;  %v284_v54 = vld [vmem:[%s3120_s19 + $0x2d8] sm:$0xff] }
  0x3a   : > { %1482 = vmatprep.mubr.bf16.mxu1 %v2330_v0  ;;  %2605 = vmatprep.subr.bf16.mxu0 %v490_v1  ;;  %v3307_v43 = vld [vmem:[%s3189_s25 + $0x1c8] sm:$0xff]  ;;  %v265_v47 = vld [vmem:[%s3120_s19 + $0x240] sm:$0xff]  ;;  %v2360_v56 = vcombine.high %v3296_v38, %v3301_v41  ;;  %v315_v57 = vld [vmem:[%s3120_s19 + $0x3d0] sm:$0xff]  ;;  %v494_v62 = vpack.c.bf16 %v284_v54, %v283_v53  ;;  %v2359_v18 = vcombine.low %v3296_v38, %v3301_v41 }
  0x3b   : > { %2669 = vmatprep.subr.bf16.mxu1 %v506_v5  ;;  %v266_v48 = vld [vmem:[%s3120_s19 + $0x248] sm:$0xff]  ;;  %v297_v49 = vld [vmem:[%s3120_s19 + $0x340] sm:$0xff]  ;;  %v316_v58 = vld [vmem:[%s3120_s19 + $0x3d8] sm:$0xff]  ;;  %v2362_v59 = vcombine.high %v3304_v42, %v3307_v43 }
  0x3c   : > { %2606 = vmatpush3.bf16.msra.mxu0 %v482_v8  ;;  %v298_v52 = vld [vmem:[%s3120_s19 + $0x348] sm:$0xff]  ;;  %v485_v60 = vpack.c.bf16 %v266_v48, %v265_v47  ;;  %v267_v63 = vld [vmem:[%s3120_s19 + $0x250] sm:$0xff]  ;;  %v268_v0 = vld [vmem:[%s3120_s19 + $0x258] sm:$0xff]  ;;  %v510_v2 = vpack.c.bf16 %v316_v58, %v315_v57 }
  0x3d   : > { %2670 = vmatpush3.bf16.msra.mxu1 %v498_v10  ;;  %2607 = vmatprep.subr.bf16.mxu0 %v491_v14  ;;  %v501_v61 = vpack.c.bf16 %v298_v52, %v297_v49  ;;  %v299_v1 = vld [vmem:[%s3120_s19 + $0x350] sm:$0xff]  ;;  %v300_v3 = vld [vmem:[%s3120_s19 + $0x358] sm:$0xff]  ;;  %v285_v4 = vld [vmem:[%s3120_s19 + $0x2e0] sm:$0xff]  ;;  %v486_v12 = vpack.c.bf16 %v268_v0, %v267_v63 }
  0x3e   : > { %2671 = vmatprep.subr.bf16.mxu1 %v507_v17  ;;  %v286_v5 = vld [vmem:[%s3120_s19 + $0x2e8] sm:$0xff]  ;;  %v3332_v6 = vld [vmem:[%s3189_s25 + $0x200] sm:$0xff]  ;;  %v502_v13 = vpack.c.bf16 %v300_v3, %v299_v1  ;;  %v287_v21 = vld [vmem:[%s3120_s19 + $0x2f0] sm:$0xff] }
  0x3f   : > { %1386 = vmatmul.mubr.bf16.gmra.mrb[4].mxu0 %v2327_v19  ;;  %v317_v7 = vld [vmem:[%s3120_s19 + $0x3e0] sm:$0xff]  ;;  %v318_v8 = vld [vmem:[%s3120_s19 + $0x3e8] sm:$0xff]  ;;  %v495_v14 = vpack.c.bf16 %v286_v5, %v285_v4  ;;  %v288_v22 = vld [vmem:[%s3120_s19 + $0x2f8] sm:$0xff] }
  0x40   : > { %1483 = vmatmul.mubr.bf16.gmra.mrb[4].mxu1 %v2329_v23  ;;  %1393 = vmatprep.mubr.bf16.mxu0 %v2344_v24  ;;  %v649_v9 = vld [vmem:[%s3189_s25 + $0x240] sm:$0xff]  ;;  %v3338_v10 = vld [vmem:[%s3189_s25 + $0x208] sm:$0xff]  ;;  %v511_v19 = vpack.c.bf16 %v318_v8, %v317_v7  ;;  %v2361_v23 = vcombine.low %v3304_v42, %v3307_v43  ;;  %v319_v25 = vld [vmem:[%s3120_s19 + $0x3f0] sm:$0xff] }
  0x41   : > { %1490 = vmatprep.mubr.bf16.mxu1 %v2346_v27  ;;  %2608 = vmatpush3.bf16.msra.mxu0 %v483_v28  ;;  %v650_v11 = vld [vmem:[%s3189_s25 + $0x248] sm:$0xff]  ;;  %v269_v15 = vld [vmem:[%s3120_s19 + $0x260] sm:$0xff]  ;;  %v2376_v24 = vcombine.high %v3332_v6, %v649_v9  ;;  %v320_v26 = vld [vmem:[%s3120_s19 + $0x3f8] sm:$0xff]  ;;  %v2375_v47 = vcombine.low %v3332_v6, %v649_v9 }
  0x42   : > { %2672 = vmatpush3.bf16.msra.mxu1 %v499_v29  ;;  %2609 = vmatprep.subr.bf16.mxu0 %v492_v30  ;;  %v270_v16 = vld [vmem:[%s3120_s19 + $0x268] sm:$0xff]  ;;  %v301_v17 = vld [vmem:[%s3120_s19 + $0x360] sm:$0xff]  ;;  %v2378_v27 = vcombine.high %v3338_v10, %v650_v11  ;;  %v496_v30 = vpack.c.bf16 %v288_v22, %v287_v21  ;;  %v271_v31 = vld [vmem:[%s3120_s19 + $0x270] sm:$0xff]  ;;  %v2377_v49 = vcombine.low %v3338_v10, %v650_v11 }
  0x43   : > { %2673 = vmatprep.subr.bf16.mxu1 %v508_v34  ;;  %v302_v20 = vld [vmem:[%s3120_s19 + $0x368] sm:$0xff]  ;;  %v487_v28 = vpack.c.bf16 %v270_v16, %v269_v15  ;;  %v272_v32 = vld [vmem:[%s3120_s19 + $0x278] sm:$0xff]  ;;  %v303_v33 = vld [vmem:[%s3120_s19 + $0x370] sm:$0xff]  ;;  %v512_v34 = vpack.c.bf16 %v320_v26, %v319_v25 }
  0x44   : > { %v503_v29 = vpack.c.bf16 %v302_v20, %v301_v17  ;;  %v304_v35 = vld [vmem:[%s3120_s19 + $0x378] sm:$0xff]  ;;  %v337_v36 = vld [vmem:[%s3120_s19 + $0x480] sm:$0xff]  ;;  %v338_v37 = vld [vmem:[%s3120_s19 + $0x488] sm:$0xff]  ;;  %v488_v42 = vpack.c.bf16 %v272_v32, %v271_v31 }
  0x45   : > { %2610 = vmatpush3.bf16.msra.mxu0 %v484_v44  ;;  %v369_v38 = vld [vmem:[%s3120_s19 + $0x580] sm:$0xff]  ;;  %v370_v39 = vld [vmem:[%s3120_s19 + $0x588] sm:$0xff]  ;;  %v579_v4 = vld [vmem:[%s3189_s25 + $0x10] sm:$0xff] }
  0x46   : > { %2674 = vmatpush3.bf16.msra.mxu1 %v500_v45  ;;  %2611 = vmatprep.subr.bf16.mxu0 %v493_v46  ;;  %v657_v40 = vld [vmem:[%s3189_s25 + $0x280] sm:$0xff]  ;;  %v658_v43 = vld [vmem:[%s3189_s25 + $0x288] sm:$0xff]  ;;  %v504_v45 = vpack.c.bf16 %v304_v35, %v303_v33  ;;  %v521_v46 = vpack.c.bf16 %v338_v37, %v337_v36  ;;  %v537_v48 = vpack.c.bf16 %v370_v39, %v369_v38  ;;  %v587_v5 = vld [vmem:[%s3189_s25 + $0x50] sm:$0xff] }
  0x47   : > { %1394 = vmatmul.mubr.bf16.gmra.mrb[8].mxu0 %v2343_v50  ;;  %2675 = vmatprep.subr.bf16.mxu1 %v509_v51  ;;  %v665_v41 = vld [vmem:[%s3189_s25 + $0x2c0] sm:$0xff]  ;;  %v666_v44 = vld [vmem:[%s3189_s25 + $0x2c8] sm:$0xff]  ;;  %v580_v6 = vld [vmem:[%s3189_s25 + $0x18] sm:$0xff]  ;;  %v2316_v10 = vcombine.high %v579_v4, %v587_v5 }
  0x48   : > { %1491 = vmatmul.mubr.bf16.gmra.mrb[8].mxu1 %v2345_v55  ;;  %1401 = vmatprep.mubr.bf16.mxu0 %v2360_v56  ;;  %v2392_v50 = vcombine.high %v657_v40, %v665_v41  ;;  %v2394_v51 = vcombine.high %v658_v43, %v666_v44  ;;  %v673_v52 = vld [vmem:[%s3189_s25 + $0x300] sm:$0xff]  ;;  %v674_v54 = vld [vmem:[%s3189_s25 + $0x308] sm:$0xff]  ;;  %v2391_v56 = vcombine.low %v657_v40, %v665_v41  ;;  %v588_v7 = vld [vmem:[%s3189_s25 + $0x58] sm:$0xff] }
  0x49   : > { %1498 = vmatprep.mubr.bf16.mxu1 %v2362_v59  ;;  %2612 = vmatpush3.bf16.msra.mxu0 %v485_v60  ;;  %v681_v53 = vld [vmem:[%s3189_s25 + $0x340] sm:$0xff]  ;;  %v682_v55 = vld [vmem:[%s3189_s25 + $0x348] sm:$0xff]  ;;  %v2393_v57 = vcombine.low %v658_v43, %v666_v44  ;;  %v2318_v11 = vcombine.high %v580_v6, %v588_v7  ;;  %v595_v16 = vld [vmem:[%s3189_s25 + $0x90] sm:$0xff] }
  0x4a   : > { %2676 = vmatpush3.bf16.msra.mxu1 %v501_v61  ;;  %2613 = vmatprep.subr.bf16.mxu0 %v494_v62  ;;  %v2408_v58 = vcombine.high %v673_v52, %v681_v53  ;;  %v2410_v59 = vcombine.high %v674_v54, %v682_v55  ;;  %v689_v60 = vld [vmem:[%s3189_s25 + $0x380] sm:$0xff]  ;;  %v690_v62 = vld [vmem:[%s3189_s25 + $0x388] sm:$0xff]  ;;  %v2407_v0 = vcombine.low %v673_v52, %v681_v53  ;;  %v603_v17 = vld [vmem:[%s3189_s25 + $0xd0] sm:$0xff] }
  0x4b   : > { %2677 = vmatprep.subr.bf16.mxu1 %v510_v2  ;;  %v697_v61 = vld [vmem:[%s3189_s25 + $0x3c0] sm:$0xff]  ;;  %v698_v63 = vld [vmem:[%s3189_s25 + $0x3c8] sm:$0xff]  ;;  %v2409_v1 = vcombine.low %v674_v54, %v682_v55  ;;  %v3391_v20 = vld [vmem:[%s3189_s25 + $0xd8] sm:$0xff] }
  0x4c   : > { %v2424_v2 = vcombine.high %v689_v60, %v697_v61  ;;  %v2426_v3 = vcombine.high %v690_v62, %v698_v63  ;;  %v2423_v8 = vcombine.low %v689_v60, %v697_v61  ;;  %v2425_v9 = vcombine.low %v690_v62, %v698_v63  ;;  %v354_v15 = vld [vmem:[%s3120_s19 + $0x508] sm:$0xff]  ;;  %v339_v21 = vld [vmem:[%s3120_s19 + $0x490] sm:$0xff]  ;;  %v340_v22 = vld [vmem:[%s3120_s19 + $0x498] sm:$0xff] }
  0x4d   : > { %2614 = vmatpush3.bf16.msra.mxu0 %v486_v12  ;;  %v321_v12 = vld [vmem:[%s3120_s19 + $0x400] sm:$0xff]  ;;  %v371_v25 = vld [vmem:[%s3120_s19 + $0x590] sm:$0xff]  ;;  %v372_v26 = vld [vmem:[%s3120_s19 + $0x598] sm:$0xff]  ;;  %v522_v33 = vpack.c.bf16 %v340_v22, %v339_v21 }
  0x4e   : > { %2678 = vmatpush3.bf16.msra.mxu1 %v502_v13  ;;  %2615 = vmatprep.subr.bf16.mxu0 %v495_v14  ;;  %v322_v13 = vld [vmem:[%s3120_s19 + $0x408] sm:$0xff]  ;;  %v353_v14 = vld [vmem:[%s3120_s19 + $0x500] sm:$0xff]  ;;  %v355_v31 = vld [vmem:[%s3120_s19 + $0x510] sm:$0xff]  ;;  %v538_v37 = vpack.c.bf16 %v372_v26, %v371_v25 }
  0x4f   : > { %1402 = vmatmul.mubr.bf16.gmra.mrb[12].mxu0 %v2359_v18  ;;  %2679 = vmatprep.subr.bf16.mxu1 %v511_v19  ;;  %v3388_v18 = vld [vmem:[%s3189_s25 + $0x98] sm:$0xff]  ;;  %v2315_v19 = vcombine.low %v579_v4, %v587_v5  ;;  %v341_v35 = vld [vmem:[%s3120_s19 + $0x4a0] sm:$0xff]  ;;  %v342_v36 = vld [vmem:[%s3120_s19 + $0x4a8] sm:$0xff] }
  0x50   : > { %1499 = vmatmul.mubr.bf16.gmra.mrb[12].mxu1 %v2361_v23  ;;  %1409 = vmatprep.mubr.bf16.mxu0 %v2376_v24  ;;  %v2317_v23 = vcombine.low %v580_v6, %v588_v7  ;;  %v513_v24 = vpack.c.bf16 %v322_v13, %v321_v12  ;;  %v2334_v32 = vcombine.high %v3388_v18, %v3391_v20  ;;  %v373_v38 = vld [vmem:[%s3120_s19 + $0x5a0] sm:$0xff]  ;;  %v374_v39 = vld [vmem:[%s3120_s19 + $0x5a8] sm:$0xff]  ;;  %v3408_v41 = vld [vmem:[%s3189_s25 + $0x110] sm:$0xff] }
  0x51   : > { %1506 = vmatprep.mubr.bf16.mxu1 %v2378_v27  ;;  %2616 = vmatpush3.bf16.msra.mxu0 %v487_v28  ;;  %v529_v27 = vpack.c.bf16 %v354_v15, %v353_v14  ;;  %v2332_v28 = vcombine.high %v595_v16, %v603_v17  ;;  %v3411_v43 = vld [vmem:[%s3189_s25 + $0x150] sm:$0xff]  ;;  %v3414_v44 = vld [vmem:[%s3189_s25 + $0x118] sm:$0xff]  ;;  %v358_v52 = vld [vmem:[%s3120_s19 + $0x528] sm:$0xff]  ;;  %v2333_v55 = vcombine.low %v3388_v18, %v3391_v20 }
  0x52   : > { %2680 = vmatpush3.bf16.msra.mxu1 %v503_v29  ;;  %2617 = vmatprep.subr.bf16.mxu0 %v496_v30  ;;  %v323_v29 = vld [vmem:[%s3120_s19 + $0x410] sm:$0xff]  ;;  %v324_v30 = vld [vmem:[%s3120_s19 + $0x418] sm:$0xff]  ;;  %v345_v4 = vld [vmem:[%s3120_s19 + $0x4c0] sm:$0xff]  ;;  %v2347_v18 = vcombine.low %v3408_v41, %v3411_v43 }
  0x53   : > { %2681 = vmatprep.subr.bf16.mxu1 %v512_v34  ;;  %v356_v34 = vld [vmem:[%s3120_s19 + $0x518] sm:$0xff]  ;;  %v514_v40 = vpack.c.bf16 %v324_v30, %v323_v29  ;;  %v343_v53 = vld [vmem:[%s3120_s19 + $0x4b0] sm:$0xff]  ;;  %v346_v5 = vld [vmem:[%s3120_s19 + $0x4c8] sm:$0xff] }
  0x54   : > { %v344_v54 = vld [vmem:[%s3120_s19 + $0x4b8] sm:$0xff]  ;;  %v327_v63 = vld [vmem:[%s3120_s19 + $0x430] sm:$0xff]  ;;  %v377_v7 = vld [vmem:[%s3120_s19 + $0x5c0] sm:$0xff]  ;;  %v525_v14 = vpack.c.bf16 %v346_v5, %v345_v4 }
  0x55   : > { %2618 = vmatpush3.bf16.msra.mxu0 %v488_v42  ;;  %v530_v42 = vpack.c.bf16 %v356_v34, %v355_v31  ;;  %v524_v62 = vpack.c.bf16 %v344_v54, %v343_v53  ;;  %v3440_v6 = vld [vmem:[%s3189_s25 + $0x190] sm:$0xff]  ;;  %v329_v15 = vld [vmem:[%s3120_s19 + $0x440] sm:$0xff]  ;;  %v362_v20 = vld [vmem:[%s3120_s19 + $0x548] sm:$0xff] }
  0x56   : > { %2682 = vmatpush3.bf16.msra.mxu1 %v504_v45  ;;  %2731 = vmatprep.subr.bf16.mxu0 %v521_v46  ;;  %v3417_v45 = vld [vmem:[%s3189_s25 + $0x158] sm:$0xff]  ;;  %v523_v46 = vpack.c.bf16 %v342_v36, %v341_v35  ;;  %v347_v21 = vld [vmem:[%s3120_s19 + $0x4d0] sm:$0xff]  ;;  %v349_v36 = vld [vmem:[%s3120_s19 + $0x4e0] sm:$0xff] }
  0x57   : > { %1410 = vmatmul.mubr.bf16.gmra.mrb[16].mxu0 %v2375_v47  ;;  %2795 = vmatprep.subr.bf16.mxu1 %v537_v48  ;;  %v325_v47 = vld [vmem:[%s3120_s19 + $0x420] sm:$0xff]  ;;  %v326_v48 = vld [vmem:[%s3120_s19 + $0x428] sm:$0xff]  ;;  %v348_v22 = vld [vmem:[%s3120_s19 + $0x4d8] sm:$0xff] }
  0x58   : > { %1507 = vmatmul.mubr.bf16.gmra.mrb[16].mxu1 %v2377_v49  ;;  %1417 = vmatprep.mubr.bf16.mxu0 %v2392_v50  ;;  %v539_v49 = vpack.c.bf16 %v374_v39, %v373_v38  ;;  %v357_v50 = vld [vmem:[%s3120_s19 + $0x520] sm:$0xff]  ;;  %v515_v60 = vpack.c.bf16 %v326_v48, %v325_v47  ;;  %v379_v25 = vld [vmem:[%s3120_s19 + $0x5d0] sm:$0xff]  ;;  %v380_v26 = vld [vmem:[%s3120_s19 + $0x5d8] sm:$0xff]  ;;  %v526_v30 = vpack.c.bf16 %v348_v22, %v347_v21 }
  0x59   : > { %1514 = vmatprep.mubr.bf16.mxu1 %v2394_v51  ;;  %v2331_v51 = vcombine.low %v595_v16, %v603_v17  ;;  %v531_v61 = vpack.c.bf16 %v358_v52, %v357_v50  ;;  %v330_v16 = vld [vmem:[%s3120_s19 + $0x448] sm:$0xff]  ;;  %v361_v17 = vld [vmem:[%s3120_s19 + $0x540] sm:$0xff]  ;;  %v331_v31 = vld [vmem:[%s3120_s19 + $0x450] sm:$0xff]  ;;  %v542_v34 = vpack.c.bf16 %v380_v26, %v379_v25 }
  0x5a   : > { %v533_v29 = vpack.c.bf16 %v362_v20, %v361_v17  ;;  %v364_v35 = vld [vmem:[%s3120_s19 + $0x558] sm:$0xff]  ;;  %v3476_v38 = vld [vmem:[%s3189_s25 + $0x210] sm:$0xff]  ;;  %v381_v39 = vld [vmem:[%s3120_s19 + $0x5e0] sm:$0xff] }
  0x5b   : > { %v333_v47 = vld [vmem:[%s3120_s19 + $0x460] sm:$0xff]  ;;  %v334_v48 = vld [vmem:[%s3120_s19 + $0x468] sm:$0xff]  ;;  %v351_v53 = vld [vmem:[%s3120_s19 + $0x4f0] sm:$0xff] }
  0x5c   : > { %v366_v52 = vld [vmem:[%s3120_s19 + $0x568] sm:$0xff]  ;;  %v352_v54 = vld [vmem:[%s3120_s19 + $0x4f8] sm:$0xff]  ;;  %v401_v4 = vld [vmem:[%s3120_s19 + $0x680] sm:$0xff] }
  0x5d   : > { %v402_v5 = vld [vmem:[%s3120_s19 + $0x688] sm:$0xff]  ;;  %v675_v20 = vld [vmem:[%s3189_s25 + $0x310] sm:$0xff]  ;;  %v676_v22 = vld [vmem:[%s3189_s25 + $0x318] sm:$0xff] }
  0x5e   : > { %v683_v21 = vld [vmem:[%s3189_s25 + $0x350] sm:$0xff] }
  0x5f   : > { %1418 = vmatmul.mubr.bf16.gmra.mrb[20].mxu0 %v2391_v56  ;;  %v2348_v56 = vcombine.high %v3408_v41, %v3411_v43  ;;  %v651_v41 = vld [vmem:[%s3189_s25 + $0x250] sm:$0xff]  ;;  %v652_v43 = vld [vmem:[%s3189_s25 + $0x258] sm:$0xff]  ;;  %v2412_v26 = vcombine.high %v675_v20, %v683_v21 }
  0x60   : > { %1515 = vmatmul.mubr.bf16.gmra.mrb[20].mxu1 %v2393_v57  ;;  %1425 = vmatprep.mubr.bf16.mxu0 %v2408_v58  ;;  %v375_v57 = vld [vmem:[%s3120_s19 + $0x5b0] sm:$0xff]  ;;  %v376_v58 = vld [vmem:[%s3120_s19 + $0x5b8] sm:$0xff] }
  0x61   : > { %1522 = vmatprep.mubr.bf16.mxu1 %v2410_v59  ;;  %v2350_v59 = vcombine.high %v3414_v44, %v3417_v45 }
  0x67   : > { %1426 = vmatmul.mubr.bf16.gmra.mrb[24].mxu0 %v2407_v0  ;;  %v328_v0 = vld [vmem:[%s3120_s19 + $0x438] sm:$0xff] }
  0x68   : > { %1523 = vmatmul.mubr.bf16.gmra.mrb[24].mxu1 %v2409_v1  ;;  %1433 = vmatprep.mubr.bf16.mxu0 %v2424_v2  ;;  %v359_v1 = vld [vmem:[%s3120_s19 + $0x530] sm:$0xff]  ;;  %v540_v2 = vpack.c.bf16 %v376_v58, %v375_v57  ;;  %v516_v12 = vpack.c.bf16 %v328_v0, %v327_v63  ;;  %v384_v58 = vld [vmem:[%s3120_s19 + $0x5f8] sm:$0xff] }
  0x69   : > { %1530 = vmatprep.mubr.bf16.mxu1 %v2426_v3  ;;  %v360_v3 = vld [vmem:[%s3120_s19 + $0x538] sm:$0xff]  ;;  %v383_v57 = vld [vmem:[%s3120_s19 + $0x5f0] sm:$0xff] }
  0x6a   : > { %v532_v13 = vpack.c.bf16 %v360_v3, %v359_v1  ;;  %v335_v63 = vld [vmem:[%s3120_s19 + $0x470] sm:$0xff]  ;;  %v336_v0 = vld [vmem:[%s3120_s19 + $0x478] sm:$0xff] }
  0x6b   : > { %v367_v1 = vld [vmem:[%s3120_s19 + $0x570] sm:$0xff]  ;;  %v368_v3 = vld [vmem:[%s3120_s19 + $0x578] sm:$0xff] }
  0x6f   : > { %1434 = vmatmul.mubr.bf16.gmra.mrb[28].mxu0 %v2423_v8  ;;  %v378_v8 = vld [vmem:[%s3120_s19 + $0x5c8] sm:$0xff] }
  0x70   : > { %1531 = vmatmul.mubr.bf16.gmra.mrb[28].mxu1 %v2425_v9  ;;  %1571 = vmatprep.mubr.bf16.mxu0 %v2316_v10  ;;  %v3445_v9 = vld [vmem:[%s3189_s25 + $0x1d0] sm:$0xff]  ;;  %v3448_v10 = vld [vmem:[%s3189_s25 + $0x198] sm:$0xff] }
  0x71   : > { %1668 = vmatprep.mubr.bf16.mxu1 %v2318_v11  ;;  %v3451_v11 = vld [vmem:[%s3189_s25 + $0x1d8] sm:$0xff]  ;;  %v2363_v50 = vcombine.low %v3440_v6, %v3445_v9 }
  0x77   : > { %1572 = vmatmul.mubr.bf16.vlgmr.msra.gmra.mrb[32].mxu0 %v2315_v19  ;;  %v541_v19 = vpack.c.bf16 %v378_v8, %v377_v7  ;;  %v434_v7 = vld [vmem:[%s3120_s19 + $0x788] sm:$0xff]  ;;  %v659_v8 = vld [vmem:[%s3189_s25 + $0x290] sm:$0xff] }
  0x78   : > { %1669 = vmatmul.mubr.bf16.vlgmr.msra.gmra.mrb[32].mxu1 %v2317_v23  ;;  %2732 = vmatpush3.bf16.msra.mxu0 %v513_v24  ;;  %v2349_v23 = vcombine.low %v3414_v44, %v3417_v45  ;;  %v2364_v24 = vcombine.high %v3440_v6, %v3445_v9  ;;  %v433_v6 = vld [vmem:[%s3120_s19 + $0x780] sm:$0xff]  ;;  %v667_v9 = vld [vmem:[%s3189_s25 + $0x2d0] sm:$0xff] }
  0x79   : > { %2796 = vmatpush3.bf16.msra.mxu1 %v529_v27  ;;  %1579 = vmatprep.mubr.bf16.mxu0 %v2332_v28  ;;  %v2366_v27 = vcombine.high %v3448_v10, %v3451_v11  ;;  %v517_v28 = vpack.c.bf16 %v330_v16, %v329_v15  ;;  %v2379_v15 = vcombine.low %v3476_v38, %v651_v41 }
  0x7a   : > { %1676 = vmatprep.mubr.bf16.mxu1 %v2334_v32  ;;  %2733 = vmatprep.subr.bf16.mxu0 %v522_v33  ;;  %v332_v32 = vld [vmem:[%s3120_s19 + $0x458] sm:$0xff]  ;;  %v363_v33 = vld [vmem:[%s3120_s19 + $0x550] sm:$0xff]  ;;  %v569_v16 = vpack.c.bf16 %v434_v7, %v433_v6  ;;  %v437_v6 = vld [vmem:[%s3120_s19 + $0x7a0] sm:$0xff] }
  0x7b   : > { %2797 = vmatprep.subr.bf16.mxu1 %v538_v37  ;;  %v350_v37 = vld [vmem:[%s3120_s19 + $0x4e8] sm:$0xff]  ;;  %v518_v44 = vpack.c.bf16 %v332_v32, %v331_v31  ;;  %v534_v45 = vpack.c.bf16 %v364_v35, %v363_v33  ;;  %v700_v31 = vld [vmem:[%s3189_s25 + $0x3d8] sm:$0xff]  ;;  %v2411_v32 = vcombine.low %v675_v20, %v683_v21  ;;  %v407_v21 = vld [vmem:[%s3120_s19 + $0x6b0] sm:$0xff] }
  0x7c   : > { %2734 = vmatpush3.bf16.msra.mxu0 %v514_v40  ;;  %v382_v40 = vld [vmem:[%s3120_s19 + $0x5e8] sm:$0xff] }
  0x7d   : > { %2798 = vmatpush3.bf16.msra.mxu1 %v530_v42  ;;  %2735 = vmatprep.subr.bf16.mxu0 %v523_v46  ;;  %v3482_v42 = vld [vmem:[%s3189_s25 + $0x218] sm:$0xff]  ;;  %v527_v46 = vpack.c.bf16 %v350_v37, %v349_v36  ;;  %v581_v36 = vld [vmem:[%s3189_s25 + $0x20] sm:$0xff]  ;;  %v438_v7 = vld [vmem:[%s3120_s19 + $0x7a8] sm:$0xff] }
  0x7e   : > { %2799 = vmatprep.subr.bf16.mxu1 %v539_v49  ;;  %v365_v49 = vld [vmem:[%s3120_s19 + $0x560] sm:$0xff]  ;;  %v2381_v17 = vcombine.low %v3482_v42, %v652_v43  ;;  %v422_v20 = vld [vmem:[%s3120_s19 + $0x728] sm:$0xff] }
  0x7f   : > { %1580 = vmatmul.mubr.bf16.gmra.mrb[36].mxu0 %v2331_v51  ;;  %v543_v51 = vpack.c.bf16 %v382_v40, %v381_v39  ;;  %v589_v37 = vld [vmem:[%s3189_s25 + $0x60] sm:$0xff]  ;;  %v590_v39 = vld [vmem:[%s3189_s25 + $0x68] sm:$0xff] }
  0x80   : > { %1677 = vmatmul.mubr.bf16.gmra.mrb[36].mxu1 %v2333_v55  ;;  %1587 = vmatprep.mubr.bf16.mxu0 %v2348_v56  ;;  %v2365_v55 = vcombine.low %v3448_v10, %v3451_v11  ;;  %v2380_v56 = vcombine.high %v3476_v38, %v651_v41  ;;  %v520_v10 = vpack.c.bf16 %v336_v0, %v335_v63  ;;  %v660_v11 = vld [vmem:[%s3189_s25 + $0x298] sm:$0xff]  ;;  %v582_v38 = vld [vmem:[%s3189_s25 + $0x28] sm:$0xff]  ;;  %v419_v63 = vld [vmem:[%s3120_s19 + $0x710] sm:$0xff] }
  0x81   : > { %1684 = vmatprep.mubr.bf16.mxu1 %v2350_v59  ;;  %2736 = vmatpush3.bf16.msra.mxu0 %v515_v60  ;;  %v2382_v59 = vcombine.high %v3482_v42, %v652_v43  ;;  %v519_v60 = vpack.c.bf16 %v334_v48, %v333_v47  ;;  %v2320_v42 = vcombine.high %v581_v36, %v589_v37  ;;  %v418_v47 = vld [vmem:[%s3120_s19 + $0x708] sm:$0xff]  ;;  %v597_v48 = vld [vmem:[%s3189_s25 + $0xa0] sm:$0xff] }
  0x82   : > { %2800 = vmatpush3.bf16.msra.mxu1 %v531_v61  ;;  %2737 = vmatprep.subr.bf16.mxu0 %v524_v62  ;;  %v535_v61 = vpack.c.bf16 %v366_v52, %v365_v49  ;;  %v528_v62 = vpack.c.bf16 %v352_v54, %v351_v53  ;;  %v2322_v43 = vcombine.high %v582_v38, %v590_v39  ;;  %v605_v49 = vld [vmem:[%s3189_s25 + $0xe0] sm:$0xff]  ;;  %v3535_v52 = vld [vmem:[%s3189_s25 + $0xe8] sm:$0xff]  ;;  %v403_v53 = vld [vmem:[%s3120_s19 + $0x690] sm:$0xff] }
  0x83   : > { %2801 = vmatprep.subr.bf16.mxu1 %v540_v2  ;;  %v544_v2 = vpack.c.bf16 %v384_v58, %v383_v57  ;;  %v404_v54 = vld [vmem:[%s3120_s19 + $0x698] sm:$0xff]  ;;  %v435_v57 = vld [vmem:[%s3120_s19 + $0x790] sm:$0xff] }
  0x84   : > { %v436_v58 = vld [vmem:[%s3120_s19 + $0x798] sm:$0xff] }
  0x85   : > { %2738 = vmatpush3.bf16.msra.mxu0 %v516_v12  ;;  %v668_v12 = vld [vmem:[%s3189_s25 + $0x2d8] sm:$0xff] }
  0x86   : > { %2802 = vmatpush3.bf16.msra.mxu1 %v532_v13  ;;  %2739 = vmatprep.subr.bf16.mxu0 %v525_v14  ;;  %v536_v13 = vpack.c.bf16 %v368_v3, %v367_v1  ;;  %v553_v14 = vpack.c.bf16 %v402_v5, %v401_v4  ;;  %v2397_v25 = vcombine.low %v660_v11, %v668_v12  ;;  %v405_v3 = vld [vmem:[%s3120_s19 + $0x6a0] sm:$0xff]  ;;  %v406_v4 = vld [vmem:[%s3120_s19 + $0x6a8] sm:$0xff] }
  0x87   : > { %1588 = vmatmul.mubr.bf16.gmra.mrb[40].mxu0 %v2347_v18  ;;  %2803 = vmatprep.subr.bf16.mxu1 %v541_v19  ;;  %v2396_v18 = vcombine.high %v659_v8, %v667_v9  ;;  %v2398_v19 = vcombine.high %v660_v11, %v668_v12  ;;  %v554_v1 = vpack.c.bf16 %v404_v54, %v403_v53  ;;  %v3555_v11 = vld [vmem:[%s3189_s25 + $0x160] sm:$0xff]  ;;  %v3558_v12 = vld [vmem:[%s3189_s25 + $0x128] sm:$0xff]  ;;  %v411_v53 = vld [vmem:[%s3120_s19 + $0x6d0] sm:$0xff] }
  0x88   : > { %1685 = vmatmul.mubr.bf16.gmra.mrb[40].mxu1 %v2349_v23  ;;  %1595 = vmatprep.mubr.bf16.mxu0 %v2364_v24  ;;  %v684_v23 = vld [vmem:[%s3189_s25 + $0x358] sm:$0xff]  ;;  %v2395_v24 = vcombine.low %v659_v8, %v667_v9  ;;  %v570_v5 = vpack.c.bf16 %v436_v58, %v435_v57  ;;  %v3552_v9 = vld [vmem:[%s3189_s25 + $0x120] sm:$0xff]  ;;  %v443_v57 = vld [vmem:[%s3120_s19 + $0x7d0] sm:$0xff] }
  0x89   : > { %1692 = vmatprep.mubr.bf16.mxu1 %v2366_v27  ;;  %2740 = vmatpush3.bf16.msra.mxu0 %v517_v28  ;;  %v2414_v27 = vcombine.high %v676_v22, %v684_v23  ;;  %v691_v28 = vld [vmem:[%s3189_s25 + $0x390] sm:$0xff]  ;;  %v2413_v33 = vcombine.low %v676_v22, %v684_v23  ;;  %v408_v22 = vld [vmem:[%s3120_s19 + $0x6b8] sm:$0xff] }
  0x8a   : > { %2804 = vmatpush3.bf16.msra.mxu1 %v533_v29  ;;  %2741 = vmatprep.subr.bf16.mxu0 %v526_v30  ;;  %v699_v29 = vld [vmem:[%s3189_s25 + $0x3d0] sm:$0xff]  ;;  %v692_v30 = vld [vmem:[%s3189_s25 + $0x398] sm:$0xff] }
  0x8b   : > { %2805 = vmatprep.subr.bf16.mxu1 %v542_v34  ;;  %v2428_v34 = vcombine.high %v691_v28, %v699_v29  ;;  %v2430_v35 = vcombine.high %v692_v30, %v700_v31  ;;  %v2427_v40 = vcombine.low %v691_v28, %v699_v29  ;;  %v2429_v41 = vcombine.low %v692_v30, %v700_v31  ;;  %v391_v31 = vld [vmem:[%s3120_s19 + $0x630] sm:$0xff]  ;;  %v412_v54 = vld [vmem:[%s3120_s19 + $0x6d8] sm:$0xff] }
  0x8c   : > { %v556_v30 = vpack.c.bf16 %v408_v22, %v407_v21  ;;  %v444_v58 = vld [vmem:[%s3120_s19 + $0x7d8] sm:$0xff]  ;;  %v415_v21 = vld [vmem:[%s3120_s19 + $0x6f0] sm:$0xff] }
  0x8d   : > { %2742 = vmatpush3.bf16.msra.mxu0 %v518_v44  ;;  %v385_v44 = vld [vmem:[%s3120_s19 + $0x600] sm:$0xff]  ;;  %v416_v22 = vld [vmem:[%s3120_s19 + $0x6f8] sm:$0xff] }
  0x8e   : > { %2806 = vmatpush3.bf16.msra.mxu1 %v534_v45  ;;  %2743 = vmatprep.subr.bf16.mxu0 %v527_v46  ;;  %v386_v45 = vld [vmem:[%s3120_s19 + $0x608] sm:$0xff]  ;;  %v417_v46 = vld [vmem:[%s3120_s19 + $0x700] sm:$0xff] }
  0x8f   : > { %1596 = vmatmul.mubr.bf16.gmra.mrb[44].mxu0 %v2363_v50  ;;  %2807 = vmatprep.subr.bf16.mxu1 %v543_v51  ;;  %v3532_v50 = vld [vmem:[%s3189_s25 + $0xa8] sm:$0xff]  ;;  %v2319_v51 = vcombine.low %v581_v36, %v589_v37  ;;  %v409_v36 = vld [vmem:[%s3120_s19 + $0x6c0] sm:$0xff] }
  0x90   : > { %1693 = vmatmul.mubr.bf16.gmra.mrb[44].mxu1 %v2365_v55  ;;  %1603 = vmatprep.mubr.bf16.mxu0 %v2380_v56  ;;  %v2321_v55 = vcombine.low %v582_v38, %v590_v39  ;;  %v545_v56 = vpack.c.bf16 %v386_v45, %v385_v44  ;;  %v2338_v0 = vcombine.high %v3532_v50, %v3535_v52  ;;  %v410_v37 = vld [vmem:[%s3120_s19 + $0x6c8] sm:$0xff]  ;;  %v3584_v38 = vld [vmem:[%s3189_s25 + $0x1a0] sm:$0xff] }
  0x91   : > { %1700 = vmatprep.mubr.bf16.mxu1 %v2382_v59  ;;  %2744 = vmatpush3.bf16.msra.mxu0 %v519_v60  ;;  %v561_v59 = vpack.c.bf16 %v418_v47, %v417_v46  ;;  %v2336_v60 = vcombine.high %v597_v48, %v605_v49  ;;  %v2337_v23 = vcombine.low %v3532_v50, %v3535_v52  ;;  %v441_v39 = vld [vmem:[%s3120_s19 + $0x7c0] sm:$0xff]  ;;  %v426_v52 = vld [vmem:[%s3120_s19 + $0x748] sm:$0xff] }
  0x92   : > { %2808 = vmatpush3.bf16.msra.mxu1 %v535_v61  ;;  %2745 = vmatprep.subr.bf16.mxu0 %v528_v62  ;;  %v387_v61 = vld [vmem:[%s3120_s19 + $0x610] sm:$0xff]  ;;  %v388_v62 = vld [vmem:[%s3120_s19 + $0x618] sm:$0xff]  ;;  %v557_v46 = vpack.c.bf16 %v410_v37, %v409_v36  ;;  %v393_v47 = vld [vmem:[%s3120_s19 + $0x640] sm:$0xff]  ;;  %v2351_v50 = vcombine.low %v3552_v9, %v3555_v11 }
  0x93   : > { %2809 = vmatprep.subr.bf16.mxu1 %v544_v2  ;;  %v420_v2 = vld [vmem:[%s3120_s19 + $0x718] sm:$0xff]  ;;  %v546_v8 = vpack.c.bf16 %v388_v62, %v387_v61  ;;  %v558_v62 = vpack.c.bf16 %v412_v54, %v411_v53  ;;  %v661_v36 = vld [vmem:[%s3189_s25 + $0x2a0] sm:$0xff] }
  0x94   : > { %v669_v37 = vld [vmem:[%s3189_s25 + $0x2e0] sm:$0xff] }
  0x95   : > { %2746 = vmatpush3.bf16.msra.mxu0 %v520_v10  ;;  %v562_v10 = vpack.c.bf16 %v420_v2, %v419_v63  ;;  %v395_v63 = vld [vmem:[%s3120_s19 + $0x650] sm:$0xff]  ;;  %v574_v2 = vpack.c.bf16 %v444_v58, %v443_v57  ;;  %v693_v54 = vld [vmem:[%s3189_s25 + $0x3a0] sm:$0xff]  ;;  %v702_v57 = vld [vmem:[%s3189_s25 + $0x3e8] sm:$0xff] }
  0x96   : > { %2810 = vmatpush3.bf16.msra.mxu1 %v536_v13  ;;  %2859 = vmatprep.subr.bf16.mxu0 %v553_v14  ;;  %v3561_v13 = vld [vmem:[%s3189_s25 + $0x168] sm:$0xff]  ;;  %v555_v14 = vpack.c.bf16 %v406_v4, %v405_v3  ;;  %v428_v3 = vld [vmem:[%s3120_s19 + $0x758] sm:$0xff]  ;;  %v413_v4 = vld [vmem:[%s3120_s19 + $0x6e0] sm:$0xff] }
  0x97   : > { %1604 = vmatmul.mubr.bf16.gmra.mrb[48].mxu0 %v2379_v15  ;;  %2923 = vmatprep.subr.bf16.mxu1 %v569_v16  ;;  %v389_v15 = vld [vmem:[%s3120_s19 + $0x620] sm:$0xff]  ;;  %v390_v16 = vld [vmem:[%s3120_s19 + $0x628] sm:$0xff] }
  0x98   : > { %1701 = vmatmul.mubr.bf16.gmra.mrb[48].mxu1 %v2381_v17  ;;  %1611 = vmatprep.mubr.bf16.mxu0 %v2396_v18  ;;  %v571_v17 = vpack.c.bf16 %v438_v7, %v437_v6  ;;  %v421_v18 = vld [vmem:[%s3120_s19 + $0x720] sm:$0xff]  ;;  %v547_v28 = vpack.c.bf16 %v390_v16, %v389_v15  ;;  %v398_v16 = vld [vmem:[%s3120_s19 + $0x668] sm:$0xff] }
  0x99   : > { %1708 = vmatprep.mubr.bf16.mxu1 %v2398_v19  ;;  %v2335_v19 = vcombine.low %v597_v48, %v605_v49  ;;  %v563_v29 = vpack.c.bf16 %v422_v20, %v421_v18  ;;  %v394_v48 = vld [vmem:[%s3120_s19 + $0x648] sm:$0xff]  ;;  %v425_v49 = vld [vmem:[%s3120_s19 + $0x740] sm:$0xff] }
  0x9a   : > { %v565_v61 = vpack.c.bf16 %v426_v52, %v425_v49  ;;  %v645_v6 = vld [vmem:[%s3189_s25 + $0x220] sm:$0xff]  ;;  %v430_v20 = vld [vmem:[%s3120_s19 + $0x768] sm:$0xff] }
  0x9b   : > { %v445_v7 = vld [vmem:[%s3120_s19 + $0x7e0] sm:$0xff]  ;;  %v686_v49 = vld [vmem:[%s3189_s25 + $0x368] sm:$0xff] }
  0x9c   : > { %v397_v15 = vld [vmem:[%s3120_s19 + $0x660] sm:$0xff] }
  0x9f   : > { %1612 = vmatmul.mubr.bf16.gmra.mrb[52].mxu0 %v2395_v24  ;;  %v2352_v24 = vcombine.high %v3552_v9, %v3555_v11  ;;  %v653_v9 = vld [vmem:[%s3189_s25 + $0x260] sm:$0xff]  ;;  %v654_v11 = vld [vmem:[%s3189_s25 + $0x268] sm:$0xff] }
  0xa0   : > { %1709 = vmatmul.mubr.bf16.gmra.mrb[52].mxu1 %v2397_v25  ;;  %1619 = vmatprep.mubr.bf16.mxu0 %v2412_v26  ;;  %v439_v25 = vld [vmem:[%s3120_s19 + $0x7b0] sm:$0xff]  ;;  %v440_v26 = vld [vmem:[%s3120_s19 + $0x7b8] sm:$0xff] }
  0xa1   : > { %1716 = vmatprep.mubr.bf16.mxu1 %v2414_v27  ;;  %v2354_v27 = vcombine.high %v3558_v12, %v3561_v13 }
  0xa7   : > { %1620 = vmatmul.mubr.bf16.gmra.mrb[56].mxu0 %v2411_v32  ;;  %v392_v32 = vld [vmem:[%s3120_s19 + $0x638] sm:$0xff] }
  0xa8   : > { %1717 = vmatmul.mubr.bf16.gmra.mrb[56].mxu1 %v2413_v33  ;;  %1627 = vmatprep.mubr.bf16.mxu0 %v2428_v34  ;;  %v423_v33 = vld [vmem:[%s3120_s19 + $0x730] sm:$0xff]  ;;  %v572_v34 = vpack.c.bf16 %v440_v26, %v439_v25  ;;  %v548_v44 = vpack.c.bf16 %v392_v32, %v391_v31  ;;  %v448_v26 = vld [vmem:[%s3120_s19 + $0x7f8] sm:$0xff] }
  0xa9   : > { %1724 = vmatprep.mubr.bf16.mxu1 %v2430_v35  ;;  %v424_v35 = vld [vmem:[%s3120_s19 + $0x738] sm:$0xff]  ;;  %v447_v25 = vld [vmem:[%s3120_s19 + $0x7f0] sm:$0xff] }
  0xaa   : > { %v564_v45 = vpack.c.bf16 %v424_v35, %v423_v33  ;;  %v399_v31 = vld [vmem:[%s3120_s19 + $0x670] sm:$0xff]  ;;  %v400_v32 = vld [vmem:[%s3120_s19 + $0x678] sm:$0xff]  ;;  %v576_v33 = vpack.c.bf16 %v448_v26, %v447_v25 }
  0xab   : > { %v432_v35 = vld [vmem:[%s3120_s19 + $0x778] sm:$0xff] }
  0xac   : > { %v640_v25 = vld [vmem:[%s3189_s25 + $0x1f8] sm:$0xff] }
  0xaf   : > { %1628 = vmatmul.mubr.bf16.gmra.mrb[60].mxu0 %v2427_v40  ;;  %v442_v40 = vld [vmem:[%s3120_s19 + $0x7c8] sm:$0xff] }
  0xb0   : > { %1725 = vmatmul.mubr.bf16.gmra.mrb[60].mxu1 %v2429_v41  ;;  %1765 = vmatprep.mubr.bf16.mxu0 %v2320_v42  ;;  %v3589_v41 = vld [vmem:[%s3189_s25 + $0x1e0] sm:$0xff]  ;;  %v3592_v42 = vld [vmem:[%s3189_s25 + $0x1a8] sm:$0xff] }
  0xb1   : > { %1862 = vmatprep.mubr.bf16.mxu1 %v2322_v43  ;;  %v3595_v43 = vld [vmem:[%s3189_s25 + $0x1e8] sm:$0xff]  ;;  %v2367_v18 = vcombine.low %v3584_v38, %v3589_v41 }
  0xb7   : > { %1766 = vmatmul.mubr.bf16.vlgmr.msra.gmra.mrb[64].mxu0 %v2319_v51  ;;  %v573_v51 = vpack.c.bf16 %v442_v40, %v441_v39  ;;  %v662_v39 = vld [vmem:[%s3189_s25 + $0x2a8] sm:$0xff] }
  0xb8   : > { %1863 = vmatmul.mubr.bf16.vlgmr.msra.gmra.mrb[64].mxu1 %v2321_v55  ;;  %2860 = vmatpush3.bf16.msra.mxu0 %v545_v56  ;;  %v2353_v55 = vcombine.low %v3558_v12, %v3561_v13  ;;  %v2368_v56 = vcombine.high %v3584_v38, %v3589_v41  ;;  %v552_v38 = vpack.c.bf16 %v400_v32, %v399_v31  ;;  %v670_v40 = vld [vmem:[%s3189_s25 + $0x2e8] sm:$0xff]  ;;  %v655_v31 = vld [vmem:[%s3189_s25 + $0x270] sm:$0xff] }
  0xb9   : > { %2924 = vmatpush3.bf16.msra.mxu1 %v561_v59  ;;  %1773 = vmatprep.mubr.bf16.mxu0 %v2336_v60  ;;  %v2370_v59 = vcombine.high %v3592_v42, %v3595_v43  ;;  %v549_v60 = vpack.c.bf16 %v394_v48, %v393_v47  ;;  %v685_v47 = vld [vmem:[%s3189_s25 + $0x360] sm:$0xff]  ;;  %v678_v48 = vld [vmem:[%s3189_s25 + $0x328] sm:$0xff] }
  0xba   : > { %1870 = vmatprep.mubr.bf16.mxu1 %v2338_v0  ;;  %2861 = vmatprep.subr.bf16.mxu0 %v554_v1  ;;  %v396_v0 = vld [vmem:[%s3120_s19 + $0x658] sm:$0xff]  ;;  %v427_v1 = vld [vmem:[%s3120_s19 + $0x750] sm:$0xff]  ;;  %v2418_v53 = vcombine.high %v678_v48, %v686_v49 }
  0xbb   : > { %2925 = vmatprep.subr.bf16.mxu1 %v570_v5  ;;  %v414_v5 = vld [vmem:[%s3120_s19 + $0x6e8] sm:$0xff]  ;;  %v550_v12 = vpack.c.bf16 %v396_v0, %v395_v63  ;;  %v566_v13 = vpack.c.bf16 %v428_v3, %v427_v1  ;;  %v591_v63 = vld [vmem:[%s3189_s25 + $0x70] sm:$0xff]  ;;  %v584_v0 = vld [vmem:[%s3189_s25 + $0x38] sm:$0xff] }
  0xbc   : > { %2862 = vmatpush3.bf16.msra.mxu0 %v546_v8  ;;  %v446_v8 = vld [vmem:[%s3120_s19 + $0x7e8] sm:$0xff]  ;;  %v592_v1 = vld [vmem:[%s3189_s25 + $0x78] sm:$0xff] }
  0xbd   : > { %2926 = vmatpush3.bf16.msra.mxu1 %v562_v10  ;;  %2863 = vmatprep.subr.bf16.mxu0 %v555_v14  ;;  %v646_v10 = vld [vmem:[%s3189_s25 + $0x228] sm:$0xff]  ;;  %v559_v14 = vpack.c.bf16 %v414_v5, %v413_v4  ;;  %v2326_v5 = vcombine.high %v584_v0, %v592_v1 }
  0xbe   : > { %2927 = vmatprep.subr.bf16.mxu1 %v571_v17  ;;  %v429_v17 = vld [vmem:[%s3120_s19 + $0x760] sm:$0xff] }
  0xbf   : > { %1774 = vmatmul.mubr.bf16.gmra.mrb[68].mxu0 %v2335_v19  ;;  %v575_v19 = vpack.c.bf16 %v446_v8, %v445_v7  ;;  %v607_v7 = vld [vmem:[%s3189_s25 + $0xf0] sm:$0xff]  ;;  %v600_v8 = vld [vmem:[%s3189_s25 + $0xb8] sm:$0xff] }
  0xc0   : > { %1871 = vmatmul.mubr.bf16.gmra.mrb[68].mxu1 %v2337_v23  ;;  %1781 = vmatprep.mubr.bf16.mxu0 %v2352_v24  ;;  %v2369_v23 = vcombine.low %v3592_v42, %v3595_v43  ;;  %v2384_v24 = vcombine.high %v645_v6, %v653_v9  ;;  %v2383_v42 = vcombine.low %v645_v6, %v653_v9  ;;  %v599_v6 = vld [vmem:[%s3189_s25 + $0xb0] sm:$0xff]  ;;  %v608_v9 = vld [vmem:[%s3189_s25 + $0xf8] sm:$0xff] }
  0xc1   : > { %1878 = vmatprep.mubr.bf16.mxu1 %v2354_v27  ;;  %2864 = vmatpush3.bf16.msra.mxu0 %v547_v28  ;;  %v2386_v27 = vcombine.high %v646_v10, %v654_v11  ;;  %v551_v28 = vpack.c.bf16 %v398_v16, %v397_v15  ;;  %v2385_v43 = vcombine.low %v646_v10, %v654_v11  ;;  %v623_v15 = vld [vmem:[%s3189_s25 + $0x170] sm:$0xff]  ;;  %v616_v16 = vld [vmem:[%s3189_s25 + $0x138] sm:$0xff] }
  0xc2   : > { %2928 = vmatpush3.bf16.msra.mxu1 %v563_v29  ;;  %2865 = vmatprep.subr.bf16.mxu0 %v556_v30  ;;  %v567_v29 = vpack.c.bf16 %v430_v20, %v429_v17  ;;  %v560_v30 = vpack.c.bf16 %v416_v22, %v415_v21  ;;  %v2325_v11 = vcombine.low %v584_v0, %v592_v1  ;;  %v624_v17 = vld [vmem:[%s3189_s25 + $0x178] sm:$0xff]  ;;  %v631_v22 = vld [vmem:[%s3189_s25 + $0x1b0] sm:$0xff] }
  0xc3   : > { %2929 = vmatprep.subr.bf16.mxu1 %v572_v34  ;;  %v431_v34 = vld [vmem:[%s3120_s19 + $0x770] sm:$0xff]  ;;  %v2358_v21 = vcombine.high %v616_v16, %v624_v17 }
  0xc4   : > { %v568_v41 = vpack.c.bf16 %v432_v35, %v431_v34  ;;  %v656_v34 = vld [vmem:[%s3189_s25 + $0x278] sm:$0xff] }
  0xc5   : > { %2866 = vmatpush3.bf16.msra.mxu0 %v548_v44  ;;  %v2400_v44 = vcombine.high %v661_v36, %v669_v37 }
  0xc6   : > { %2930 = vmatpush3.bf16.msra.mxu1 %v564_v45  ;;  %2867 = vmatprep.subr.bf16.mxu0 %v557_v46  ;;  %v2402_v45 = vcombine.high %v662_v39, %v670_v40  ;;  %v677_v46 = vld [vmem:[%s3189_s25 + $0x320] sm:$0xff] }
  0xc7   : > { %1782 = vmatmul.mubr.bf16.gmra.mrb[72].mxu0 %v2351_v50  ;;  %2931 = vmatprep.subr.bf16.mxu1 %v573_v51  ;;  %v2399_v50 = vcombine.low %v661_v36, %v669_v37  ;;  %v2401_v51 = vcombine.low %v662_v39, %v670_v40  ;;  %v2416_v52 = vcombine.high %v677_v46, %v685_v47 }
  0xc8   : > { %1879 = vmatmul.mubr.bf16.gmra.mrb[72].mxu1 %v2353_v55  ;;  %1789 = vmatprep.mubr.bf16.mxu0 %v2368_v56  ;;  %v701_v55 = vld [vmem:[%s3189_s25 + $0x3e0] sm:$0xff]  ;;  %v694_v56 = vld [vmem:[%s3189_s25 + $0x3a8] sm:$0xff]  ;;  %v2415_v58 = vcombine.low %v677_v46, %v685_v47 }
  0xc9   : > { %1886 = vmatprep.mubr.bf16.mxu1 %v2370_v59  ;;  %2868 = vmatpush3.bf16.msra.mxu0 %v549_v60  ;;  %v2417_v59 = vcombine.low %v678_v48, %v686_v49  ;;  %v2432_v60 = vcombine.high %v693_v54, %v701_v55  ;;  %v2433_v3 = vcombine.low %v694_v56, %v702_v57 }
  0xca   : > { %2932 = vmatpush3.bf16.msra.mxu1 %v565_v61  ;;  %2869 = vmatprep.subr.bf16.mxu0 %v558_v62  ;;  %v2434_v61 = vcombine.high %v694_v56, %v702_v57  ;;  %v583_v62 = vld [vmem:[%s3189_s25 + $0x30] sm:$0xff]  ;;  %v672_v56 = vld [vmem:[%s3189_s25 + $0x2f8] sm:$0xff] }
  0xcb   : > { %2933 = vmatprep.subr.bf16.mxu1 %v574_v2  ;;  %v2431_v2 = vcombine.low %v693_v54, %v701_v55  ;;  %v2324_v4 = vcombine.high %v583_v62, %v591_v63  ;;  %v2323_v10 = vcombine.low %v583_v62, %v591_v63  ;;  %v664_v55 = vld [vmem:[%s3189_s25 + $0x2b8] sm:$0xff] }
  0xcd   : > { %2870 = vmatpush3.bf16.msra.mxu0 %v550_v12  ;;  %v2340_v12 = vcombine.high %v599_v6, %v607_v7 }
  0xce   : > { %2934 = vmatpush3.bf16.msra.mxu1 %v566_v13  ;;  %2871 = vmatprep.subr.bf16.mxu0 %v559_v14  ;;  %v2342_v13 = vcombine.high %v600_v8, %v608_v9  ;;  %v615_v14 = vld [vmem:[%s3189_s25 + $0x130] sm:$0xff] }
  0xcf   : > { %1790 = vmatmul.mubr.bf16.gmra.mrb[76].mxu0 %v2367_v18  ;;  %2935 = vmatprep.subr.bf16.mxu1 %v575_v19  ;;  %v2339_v18 = vcombine.low %v599_v6, %v607_v7  ;;  %v2341_v19 = vcombine.low %v600_v8, %v608_v9  ;;  %v2356_v20 = vcombine.high %v615_v14, %v623_v15 }
  0xd0   : > { %1887 = vmatmul.mubr.bf16.gmra.mrb[76].mxu1 %v2369_v23  ;;  %1797 = vmatprep.mubr.bf16.mxu0 %v2384_v24  ;;  %v639_v23 = vld [vmem:[%s3189_s25 + $0x1f0] sm:$0xff]  ;;  %v632_v24 = vld [vmem:[%s3189_s25 + $0x1b8] sm:$0xff]  ;;  %v2355_v26 = vcombine.low %v615_v14, %v623_v15 }
  0xd1   : > { %1894 = vmatprep.mubr.bf16.mxu1 %v2386_v27  ;;  %2872 = vmatpush3.bf16.msra.mxu0 %v551_v28  ;;  %v2357_v27 = vcombine.low %v616_v16, %v624_v17  ;;  %v2372_v28 = vcombine.high %v631_v22, %v639_v23  ;;  %v2371_v37 = vcombine.low %v631_v22, %v639_v23  ;;  %v688_v14 = vld [vmem:[%s3189_s25 + $0x378] sm:$0xff] }
  0xd2   : > { %2936 = vmatpush3.bf16.msra.mxu1 %v567_v29  ;;  %2873 = vmatprep.subr.bf16.mxu0 %v560_v30  ;;  %v2374_v29 = vcombine.high %v632_v24, %v640_v25  ;;  %v647_v30 = vld [vmem:[%s3189_s25 + $0x230] sm:$0xff] }
  0xd3   : > { %2937 = vmatprep.subr.bf16.mxu1 %v576_v33  ;;  %v648_v33 = vld [vmem:[%s3189_s25 + $0x238] sm:$0xff] }
  0xd4   : > { %v2390_v46 = vcombine.high %v648_v33, %v656_v34  ;;  %v2389_v63 = vcombine.low %v648_v33, %v656_v34  ;;  %v703_v33 = vld [vmem:[%s3189_s25 + $0x3f0] sm:$0xff] }
  0xd5   : > { %2874 = vmatpush3.bf16.msra.mxu0 %v552_v38 }
  0xd6   : > { %2938 = vmatpush3.bf16.msra.mxu1 %v568_v41  ;;  %v2373_v41 = vcombine.low %v632_v24, %v640_v25 }
  0xd7   : > { %1798 = vmatmul.mubr.bf16.gmra.mrb[80].mxu0 %v2383_v42  ;;  %v2388_v42 = vcombine.high %v647_v30, %v655_v31 }
  0xd8   : > { %1895 = vmatmul.mubr.bf16.gmra.mrb[80].mxu1 %v2385_v43  ;;  %1805 = vmatprep.mubr.bf16.mxu0 %v2400_v44 }
  0xd9   : > { %1902 = vmatprep.mubr.bf16.mxu1 %v2402_v45 }
  0xdf   : > { %1806 = vmatmul.mubr.bf16.gmra.mrb[84].mxu0 %v2399_v50 }
  0xe0   : > { %1903 = vmatmul.mubr.bf16.gmra.mrb[84].mxu1 %v2401_v51  ;;  %1813 = vmatprep.mubr.bf16.mxu0 %v2416_v52  ;;  %v663_v52 = vld [vmem:[%s3189_s25 + $0x2b0] sm:$0xff] }
  0xe1   : > { %1910 = vmatprep.mubr.bf16.mxu1 %v2418_v53  ;;  %v671_v53 = vld [vmem:[%s3189_s25 + $0x2f0] sm:$0xff] }
  0xe2   : > { %v2404_v0 = vcombine.high %v663_v52, %v671_v53  ;;  %v2403_v17 = vcombine.low %v663_v52, %v671_v53 }
  0xe7   : > { %1814 = vmatmul.mubr.bf16.gmra.mrb[88].mxu0 %v2415_v58 }
  0xe8   : > { %1911 = vmatmul.mubr.bf16.gmra.mrb[88].mxu1 %v2417_v59  ;;  %1821 = vmatprep.mubr.bf16.mxu0 %v2432_v60  ;;  %v2387_v59 = vcombine.low %v647_v30, %v655_v31 }
  0xe9   : > { %1918 = vmatprep.mubr.bf16.mxu1 %v2434_v61 }
  0xef   : > { %1822 = vmatmul.mubr.bf16.gmra.mrb[92].mxu0 %v2431_v2 }
  0xf0   : > { %1919 = vmatmul.mubr.bf16.gmra.mrb[92].mxu1 %v2433_v3  ;;  %1959 = vmatprep.mubr.bf16.mxu0 %v2324_v4  ;;  %v2406_v4 = vcombine.high %v664_v55, %v672_v56 }
  0xf1   : > { %2056 = vmatprep.mubr.bf16.mxu1 %v2326_v5 }
  0xf7   : > { %1960 = vmatmul.mubr.bf16.vlgmr.msra.gmra.mrb[96].mxu0 %v2323_v10  ;;  %v679_v10 = vld [vmem:[%s3189_s25 + $0x330] sm:$0xff] }
  0xf8   : > { %2057 = vmatmul.mubr.bf16.vlgmr.msra.gmra.mrb[96].mxu1 %v2325_v11  ;;  %1967 = vmatprep.mubr.bf16.mxu0 %v2340_v12  ;;  %v687_v11 = vld [vmem:[%s3189_s25 + $0x370] sm:$0xff] }
  0xf9   : > { %2064 = vmatprep.mubr.bf16.mxu1 %v2342_v13  ;;  %v680_v13 = vld [vmem:[%s3189_s25 + $0x338] sm:$0xff]  ;;  %v2420_v22 = vcombine.high %v679_v10, %v687_v11 }
  0xff   : > { %1968 = vmatmul.mubr.bf16.gmra.mrb[100].mxu0 %v2339_v18 }
 0x100   : > { %2065 = vmatmul.mubr.bf16.gmra.mrb[100].mxu1 %v2341_v19  ;;  %1975 = vmatprep.mubr.bf16.mxu0 %v2356_v20 }
 0x101   : > { %2072 = vmatprep.mubr.bf16.mxu1 %v2358_v21  ;;  %v2405_v21 = vcombine.low %v664_v55, %v672_v56 }
 0x107   : > { %1976 = vmatmul.mubr.bf16.gmra.mrb[104].mxu0 %v2355_v26  ;;  %v2422_v26 = vcombine.high %v680_v13, %v688_v14 }
 0x108   : > { %2073 = vmatmul.mubr.bf16.gmra.mrb[104].mxu1 %v2357_v27  ;;  %1983 = vmatprep.mubr.bf16.mxu0 %v2372_v28 }
 0x109   : > { %2080 = vmatprep.mubr.bf16.mxu1 %v2374_v29 }
 0x10a   : > { %v2491_v32 = vpop.f32.mrb[0].mxu0 }
 0x10b   : > { %v2555_v35 = vpop.f32.mrb[0].mxu1  ;;  %v2492_v36 = vpop.f32.mrb[1].mxu0 }
 0x10c   : > { %v2493_v38 = vadd.f32 %v2492_v36, %v2491_v32  ;;  %v2556_v39 = vpop.f32.mrb[1].mxu1  ;;  %v2494_v40 = vpop.f32.mrb[2].mxu0  ;;  %v695_v32 = vld [vmem:[%s3189_s25 + $0x3b0] sm:$0xff]  ;;  %v704_v36 = vld [vmem:[%s3189_s25 + $0x3f8] sm:$0xff] }
 0x10d   : > { %v2557_v43 = vadd.f32 %v2556_v39, %v2555_v35  ;;  %v2558_v44 = vpop.f32.mrb[2].mxu1  ;;  %v2495_v45 = vpop.f32.mrb[3].mxu0  ;;  %v696_v35 = vld [vmem:[%s3189_s25 + $0x3b8] sm:$0xff]  ;;  %v2419_v39 = vcombine.low %v679_v10, %v687_v11 }
 0x10e   : > { %v2496_v47 = vadd.f32 %v2495_v45, %v2494_v40  ;;  %v2559_v48 = vpop.f32.mrb[3].mxu1 }
 0x10f   : > { %v3673_v49 = vadd.f32 %v2557_v43, %v2493_v38  ;;  %v2560_v50 = vadd.f32 %v2559_v48, %v2558_v44  ;;  %1984 = vmatmul.mubr.bf16.gmra.mrb[108].mxu0 %v2371_v37  ;;  %v2421_v43 = vcombine.low %v680_v13, %v688_v14  ;;  %v2436_v44 = vcombine.high %v695_v32, %v703_v33 }
 0x110   : > { %2081 = vmatmul.mubr.bf16.gmra.mrb[108].mxu1 %v2373_v41  ;;  %1991 = vmatprep.mubr.bf16.mxu0 %v2388_v42  ;;  %v2438_v48 = vcombine.high %v696_v35, %v704_v36 }
 0x111   : > { %v3675_v51 = vadd.f32 %v2560_v50, %v2496_v47  ;;  %2088 = vmatprep.mubr.bf16.mxu1 %v2390_v46 }
 0x112   : > { %v2497_v54 = vpop.f32.mrb[4].mxu0 }
 0x113   : > { %v2561_v57 = vpop.f32.mrb[4].mxu1  ;;  %v2498_v58 = vpop.f32.mrb[5].mxu0 }
 0x114   : > { %v2499_v60 = vadd.f32 %v2498_v58, %v2497_v54  ;;  %v2562_v61 = vpop.f32.mrb[5].mxu1  ;;  %v2500_v62 = vpop.f32.mrb[6].mxu0 }
 0x115   : > { %v2563_v1 = vadd.f32 %v2562_v61, %v2561_v57  ;;  %v2564_v2 = vpop.f32.mrb[6].mxu1  ;;  %v2501_v3 = vpop.f32.mrb[7].mxu0 }
 0x116   : > { %v2502_v5 = vadd.f32 %v2501_v3, %v2500_v62  ;;  %v2565_v6 = vpop.f32.mrb[7].mxu1 }
 0x117   : > { %v3681_v7 = vadd.f32 %v2563_v1, %v2499_v60  ;;  %v2566_v8 = vadd.f32 %v2565_v6, %v2564_v2  ;;  %1992 = vmatmul.mubr.bf16.gmra.mrb[112].mxu0 %v2387_v59  ;;  %v2435_v59 = vcombine.low %v695_v32, %v703_v33 }
 0x118   : > { %2089 = vmatmul.mubr.bf16.gmra.mrb[112].mxu1 %v2389_v63  ;;  %1999 = vmatprep.mubr.bf16.mxu0 %v2404_v0  ;;  %v2437_v63 = vcombine.low %v696_v35, %v704_v36 }
 0x119   : > { %v3683_v9 = vadd.f32 %v2566_v8, %v2502_v5  ;;  %2096 = vmatprep.mubr.bf16.mxu1 %v2406_v4 }
 0x11a   : > { %v2503_v12 = vpop.f32.mrb[8].mxu0 }
 0x11b   : > { %v2567_v15 = vpop.f32.mrb[8].mxu1  ;;  %v2504_v16 = vpop.f32.mrb[9].mxu0 }
 0x11c   : > { %v2505_v18 = vadd.f32 %v2504_v16, %v2503_v12  ;;  %v2568_v19 = vpop.f32.mrb[9].mxu1  ;;  %v2506_v20 = vpop.f32.mrb[10].mxu0 }
 0x11d   : > { %v2569_v23 = vadd.f32 %v2568_v19, %v2567_v15  ;;  %v2570_v24 = vpop.f32.mrb[10].mxu1  ;;  %v2507_v25 = vpop.f32.mrb[11].mxu0 }
 0x11e   : > { %v2508_v27 = vadd.f32 %v2507_v25, %v2506_v20  ;;  %v2571_v28 = vpop.f32.mrb[11].mxu1 }
 0x11f   : > { %v3689_v29 = vadd.f32 %v2569_v23, %v2505_v18  ;;  %v2572_v30 = vadd.f32 %v2571_v28, %v2570_v24  ;;  %2000 = vmatmul.mubr.bf16.gmra.mrb[116].mxu0 %v2403_v17 }
 0x120   : > { %2097 = vmatmul.mubr.bf16.gmra.mrb[116].mxu1 %v2405_v21  ;;  %2007 = vmatprep.mubr.bf16.mxu0 %v2420_v22 }
 0x121   : > { %v3691_v31 = vadd.f32 %v2572_v30, %v2508_v27  ;;  %2104 = vmatprep.mubr.bf16.mxu1 %v2422_v26 }
 0x122   : > { %v2509_v34 = vpop.f32.mrb[12].mxu0 }
 0x123   : > { %v2573_v37 = vpop.f32.mrb[12].mxu1  ;;  %v2510_v38 = vpop.f32.mrb[13].mxu0 }
 0x124   : > { %v2511_v40 = vadd.f32 %v2510_v38, %v2509_v34  ;;  %v2574_v41 = vpop.f32.mrb[13].mxu1  ;;  %v2512_v42 = vpop.f32.mrb[14].mxu0 }
 0x125   : > { %v2575_v45 = vadd.f32 %v2574_v41, %v2573_v37  ;;  %v2576_v46 = vpop.f32.mrb[14].mxu1  ;;  %v2513_v47 = vpop.f32.mrb[15].mxu0 }
 0x126   : > { %v2514_v50 = vadd.f32 %v2513_v47, %v2512_v42  ;;  %v2577_v52 = vpop.f32.mrb[15].mxu1 }
 0x127   : > { %v3697_v53 = vadd.f32 %v2575_v45, %v2511_v40  ;;  %v2578_v54 = vadd.f32 %v2577_v52, %v2576_v46  ;;  %2008 = vmatmul.mubr.bf16.gmra.mrb[120].mxu0 %v2419_v39 }
 0x128   : > { %2105 = vmatmul.mubr.bf16.gmra.mrb[120].mxu1 %v2421_v43  ;;  %2015 = vmatprep.mubr.bf16.mxu0 %v2436_v44 }
 0x129   : > { %v3699_v55 = vadd.f32 %v2578_v54, %v2514_v50  ;;  %2112 = vmatprep.mubr.bf16.mxu1 %v2438_v48 }
 0x12a   : > { %v2515_v56 = vpop.f32.mrb[16].mxu0 }
 0x12b   : > { %v2579_v57 = vpop.f32.mrb[16].mxu1  ;;  %v2516_v58 = vpop.f32.mrb[17].mxu0 }
 0x12c   : > { %v2517_v60 = vadd.f32 %v2516_v58, %v2515_v56  ;;  %v2580_v61 = vpop.f32.mrb[17].mxu1  ;;  %v2518_v62 = vpop.f32.mrb[18].mxu0 }
 0x12d   : > { %v2581_v0 = vadd.f32 %v2580_v61, %v2579_v57  ;;  %v2582_v1 = vpop.f32.mrb[18].mxu1  ;;  %v2519_v2 = vpop.f32.mrb[19].mxu0 }
 0x12e   : > { %v2520_v3 = vadd.f32 %v2519_v2, %v2518_v62  ;;  %v2583_v4 = vpop.f32.mrb[19].mxu1 }
 0x12f   : > { %v3701_v5 = vadd.f32 %v2581_v0, %v2517_v60  ;;  %v2584_v6 = vadd.f32 %v2583_v4, %v2582_v1  ;;  %2016 = vmatmul.mubr.bf16.gmra.mrb[124].mxu0 %v2435_v59 }
 0x130   : > { %2113 = vmatmul.mubr.bf16.gmra.mrb[124].mxu1 %v2437_v63 }
 0x131   : > { %v3703_v8 = vadd.f32 %v2584_v6, %v2520_v3 }
 0x132   : > { %v2521_v10 = vpop.f32.mrb[20].mxu0 }
 0x133   : > { %v2585_v11 = vpop.f32.mrb[20].mxu1  ;;  %v2522_v12 = vpop.f32.mrb[21].mxu0 }
 0x134   : > { %v2523_v13 = vadd.f32 %v2522_v12, %v2521_v10  ;;  %v2586_v14 = vpop.f32.mrb[21].mxu1  ;;  %v2524_v15 = vpop.f32.mrb[22].mxu0 }
 0x135   : > { %v2587_v16 = vadd.f32 %v2586_v14, %v2585_v11  ;;  %v2588_v17 = vpop.f32.mrb[22].mxu1  ;;  %v2525_v18 = vpop.f32.mrb[23].mxu0 }
 0x136   : > { %v2526_v19 = vadd.f32 %v2525_v18, %v2524_v15  ;;  %v2589_v20 = vpop.f32.mrb[23].mxu1 }
 0x137   : > { %v3705_v21 = vadd.f32 %v2587_v16, %v2523_v13  ;;  %v2590_v22 = vadd.f32 %v2589_v20, %v2588_v17 }
 0x139   : > { %v3707_v23 = vadd.f32 %v2590_v22, %v2526_v19 }
 0x13a   : > { %v2527_v24 = vpop.f32.mrb[24].mxu0 }
 0x13b   : > { %v2591_v25 = vpop.f32.mrb[24].mxu1  ;;  %v2528_v26 = vpop.f32.mrb[25].mxu0 }
 0x13c   : > { %v2529_v27 = vadd.f32 %v2528_v26, %v2527_v24  ;;  %v2592_v28 = vpop.f32.mrb[25].mxu1  ;;  %v2530_v30 = vpop.f32.mrb[26].mxu0 }
 0x13d   : > { %v2593_v32 = vadd.f32 %v2592_v28, %v2591_v25  ;;  %v2594_v33 = vpop.f32.mrb[26].mxu1  ;;  %v2531_v34 = vpop.f32.mrb[27].mxu0 }
 0x13e   : > { %v2532_v35 = vadd.f32 %v2531_v34, %v2530_v30  ;;  %v2595_v36 = vpop.f32.mrb[27].mxu1 }
 0x13f   : > { %v3709_v37 = vadd.f32 %v2593_v32, %v2529_v27  ;;  %v2596_v38 = vadd.f32 %v2595_v36, %v2594_v33 }
 0x141   : > { %v3711_v39 = vadd.f32 %v2596_v38, %v2532_v35 }
 0x142   : > { %v2533_v40 = vpop.f32.mrb[28].mxu0 }
 0x143   : > { %v2597_v41 = vpop.f32.mrb[28].mxu1  ;;  %v2534_v42 = vpop.f32.mrb[29].mxu0 }
 0x144   : > { %v2535_v43 = vadd.f32 %v2534_v42, %v2533_v40  ;;  %v2598_v44 = vpop.f32.mrb[29].mxu1  ;;  %v2536_v45 = vpop.f32.mrb[30].mxu0 }
 0x145   : > { %v2599_v46 = vadd.f32 %v2598_v44, %v2597_v41  ;;  %v2600_v47 = vpop.f32.mrb[30].mxu1  ;;  %v2537_v48 = vpop.f32.mrb[31].mxu0 }
 0x146   : > { %v2538_v50 = vadd.f32 %v2537_v48, %v2536_v45  ;;  %v2601_v52 = vpop.f32.mrb[31].mxu1 }
 0x147   : > { %v3713_v54 = vadd.f32 %v2599_v46, %v2535_v43  ;;  %v2602_v56 = vadd.f32 %v2601_v52, %v2600_v47 }
 0x149   : > { %v3715_v57 = vadd.f32 %v2602_v56, %v2538_v50 }
 0x14a   : > { %v2619_v58 = vpop.f32.mrb[32].mxu0 }
 0x14b   : > { %v2683_v59 = vpop.f32.mrb[32].mxu1  ;;  %v2620_v60 = vpop.f32.mrb[33].mxu0 }
 0x14c   : > { %v2621_v61 = vadd.f32 %v2620_v60, %v2619_v58  ;;  %v2684_v62 = vpop.f32.mrb[33].mxu1  ;;  %v2622_v63 = vpop.f32.mrb[34].mxu0 }
 0x14d   : > { %v2685_v0 = vadd.f32 %v2684_v62, %v2683_v59  ;;  %v2686_v1 = vpop.f32.mrb[34].mxu1  ;;  %v2623_v2 = vpop.f32.mrb[35].mxu0 }
 0x14e   : > { %v1574_v3 = vadd.f32 %v2621_v61, %v3673_v49  ;;  %v2624_v4 = vadd.f32 %v2623_v2, %v2622_v63  ;;  %v2687_v6 = vpop.f32.mrb[35].mxu1 }
 0x14f   : > { %v2688_v10 = vadd.f32 %v2687_v6, %v2686_v1 }
 0x150   : > { %v3718_v11 = vadd.f32 %v2685_v0, %v1574_v3  ;;  %v1577_v12 = vadd.f32 %v2624_v4, %v3675_v51 }
 0x152   : > { %v3721_v13 = vadd.f32 %v2688_v10, %v1577_v12  ;;  %v2625_v14 = vpop.f32.mrb[36].mxu0 }
 0x153   : > { %v2689_v15 = vpop.f32.mrb[36].mxu1  ;;  %v2626_v16 = vpop.f32.mrb[37].mxu0 }
 0x154   : > { %v2627_v17 = vadd.f32 %v2626_v16, %v2625_v14  ;;  %v2690_v18 = vpop.f32.mrb[37].mxu1  ;;  %v2628_v19 = vpop.f32.mrb[38].mxu0 }
 0x155   : > { %v2691_v20 = vadd.f32 %v2690_v18, %v2689_v15  ;;  %v2692_v22 = vpop.f32.mrb[38].mxu1  ;;  %v2629_v24 = vpop.f32.mrb[39].mxu0 }
 0x156   : > { %v1582_v49 = vadd.f32 %v2627_v17, %v3681_v7  ;;  %v2630_v25 = vadd.f32 %v2629_v24, %v2628_v19  ;;  %v2693_v26 = vpop.f32.mrb[39].mxu1 }
 0x157   : > { %v2694_v27 = vadd.f32 %v2693_v26, %v2692_v22 }
 0x158   : > { %v3724_v28 = vadd.f32 %v2691_v20, %v1582_v49  ;;  %v1585_v51 = vadd.f32 %v2630_v25, %v3683_v9 }
 0x15a   : > { %v3727_v30 = vadd.f32 %v2694_v27, %v1585_v51  ;;  %v2631_v32 = vpop.f32.mrb[40].mxu0 }
 0x15b   : > { %v2695_v33 = vpop.f32.mrb[40].mxu1  ;;  %v2632_v34 = vpop.f32.mrb[41].mxu0 }
 0x15c   : > { %v2633_v35 = vadd.f32 %v2632_v34, %v2631_v32  ;;  %v2696_v36 = vpop.f32.mrb[41].mxu1  ;;  %v2634_v38 = vpop.f32.mrb[42].mxu0 }
 0x15d   : > { %v2697_v40 = vadd.f32 %v2696_v36, %v2695_v33  ;;  %v2698_v41 = vpop.f32.mrb[42].mxu1  ;;  %v2635_v42 = vpop.f32.mrb[43].mxu0 }
 0x15e   : > { %v1590_v7 = vadd.f32 %v2633_v35, %v3689_v29  ;;  %v2636_v43 = vadd.f32 %v2635_v42, %v2634_v38  ;;  %v2699_v44 = vpop.f32.mrb[43].mxu1 }
 0x15f   : > { %v2700_v45 = vadd.f32 %v2699_v44, %v2698_v41 }
 0x160   : > { %v3730_v46 = vadd.f32 %v2697_v40, %v1590_v7  ;;  %v1593_v9 = vadd.f32 %v2636_v43, %v3691_v31 }
 0x162   : > { %v3733_v47 = vadd.f32 %v2700_v45, %v1593_v9  ;;  %v2637_v48 = vpop.f32.mrb[44].mxu0 }
 0x163   : > { %v2701_v50 = vpop.f32.mrb[44].mxu1  ;;  %v2638_v52 = vpop.f32.mrb[45].mxu0 }
 0x164   : > { %v2639_v56 = vadd.f32 %v2638_v52, %v2637_v48  ;;  %v2702_v58 = vpop.f32.mrb[45].mxu1  ;;  %v2640_v59 = vpop.f32.mrb[46].mxu0 }
 0x165   : > { %v2703_v60 = vadd.f32 %v2702_v58, %v2701_v50  ;;  %v2704_v61 = vpop.f32.mrb[46].mxu1  ;;  %v2641_v62 = vpop.f32.mrb[47].mxu0 }
 0x166   : > { %v1598_v29 = vadd.f32 %v2639_v56, %v3697_v53  ;;  %v2642_v63 = vadd.f32 %v2641_v62, %v2640_v59  ;;  %v2705_v0 = vpop.f32.mrb[47].mxu1 }
 0x167   : > { %v2706_v1 = vadd.f32 %v2705_v0, %v2704_v61 }
 0x168   : > { %v3736_v2 = vadd.f32 %v2703_v60, %v1598_v29  ;;  %v1601_v31 = vadd.f32 %v2642_v63, %v3699_v55 }
 0x16a   : > { %v3739_v3 = vadd.f32 %v2706_v1, %v1601_v31  ;;  %v2643_v4 = vpop.f32.mrb[48].mxu0 }
 0x16b   : > { %v2707_v6 = vpop.f32.mrb[48].mxu1  ;;  %v2644_v10 = vpop.f32.mrb[49].mxu0 }
 0x16c   : > { %v2645_v12 = vadd.f32 %v2644_v10, %v2643_v4  ;;  %v2708_v14 = vpop.f32.mrb[49].mxu1  ;;  %v2646_v15 = vpop.f32.mrb[50].mxu0 }
 0x16d   : > { %v2709_v16 = vadd.f32 %v2708_v14, %v2707_v6  ;;  %v2710_v17 = vpop.f32.mrb[50].mxu1  ;;  %v2647_v18 = vpop.f32.mrb[51].mxu0 }
 0x16e   : > { %v1606_v53 = vadd.f32 %v2645_v12, %v3701_v5  ;;  %v2648_v19 = vadd.f32 %v2647_v18, %v2646_v15  ;;  %v2711_v20 = vpop.f32.mrb[51].mxu1 }
 0x16f   : > { %v2712_v22 = vadd.f32 %v2711_v20, %v2710_v17 }
 0x170   : > { %v3742_v24 = vadd.f32 %v2709_v16, %v1606_v53  ;;  %v1609_v55 = vadd.f32 %v2648_v19, %v3703_v8 }
 0x172   : > { %v3745_v49 = vadd.f32 %v2712_v22, %v1609_v55  ;;  %v2649_v25 = vpop.f32.mrb[52].mxu0 }
 0x173   : > { %v2713_v26 = vpop.f32.mrb[52].mxu1  ;;  %v2650_v27 = vpop.f32.mrb[53].mxu0 }
 0x174   : > { %v2651_v51 = vadd.f32 %v2650_v27, %v2649_v25  ;;  %v2714_v32 = vpop.f32.mrb[53].mxu1  ;;  %v2652_v33 = vpop.f32.mrb[54].mxu0 }
 0x175   : > { %v2715_v34 = vadd.f32 %v2714_v32, %v2713_v26  ;;  %v2716_v35 = vpop.f32.mrb[54].mxu1  ;;  %v2653_v36 = vpop.f32.mrb[55].mxu0 }
 0x176   : > { %v1614_v5 = vadd.f32 %v2651_v51, %v3705_v21  ;;  %v2654_v38 = vadd.f32 %v2653_v36, %v2652_v33  ;;  %v2717_v40 = vpop.f32.mrb[55].mxu1 }
 0x177   : > { %v2718_v41 = vadd.f32 %v2717_v40, %v2716_v35 }
 0x178   : > { %v3748_v42 = vadd.f32 %v2715_v34, %v1614_v5  ;;  %v1617_v8 = vadd.f32 %v2654_v38, %v3707_v23 }
 0x17a   : > { %v3751_v7 = vadd.f32 %v2718_v41, %v1617_v8  ;;  %v2655_v43 = vpop.f32.mrb[56].mxu0 }
 0x17b   : > { %v2719_v44 = vpop.f32.mrb[56].mxu1  ;;  %v2656_v45 = vpop.f32.mrb[57].mxu0 }
 0x17c   : > { %v2657_v9 = vadd.f32 %v2656_v45, %v2655_v43  ;;  %v2720_v48 = vpop.f32.mrb[57].mxu1  ;;  %v2658_v50 = vpop.f32.mrb[58].mxu0 }
 0x17d   : > { %v2721_v52 = vadd.f32 %v2720_v48, %v2719_v44  ;;  %v2722_v56 = vpop.f32.mrb[58].mxu1  ;;  %v2659_v58 = vpop.f32.mrb[59].mxu0 }
 0x17e   : > { %v1622_v21 = vadd.f32 %v2657_v9, %v3709_v37  ;;  %v2660_v59 = vadd.f32 %v2659_v58, %v2658_v50  ;;  %v2723_v60 = vpop.f32.mrb[59].mxu1 }
 0x17f   : > { %v2724_v61 = vadd.f32 %v2723_v60, %v2722_v56 }
 0x180   : > { %v3754_v62 = vadd.f32 %v2721_v52, %v1622_v21  ;;  %v1625_v23 = vadd.f32 %v2660_v59, %v3711_v39 }
 0x182   : > { %v3757_v29 = vadd.f32 %v2724_v61, %v1625_v23  ;;  %v2661_v63 = vpop.f32.mrb[60].mxu0 }
 0x183   : > { %v2725_v0 = vpop.f32.mrb[60].mxu1  ;;  %v2662_v1 = vpop.f32.mrb[61].mxu0 }
 0x184   : > { %v2663_v31 = vadd.f32 %v2662_v1, %v2661_v63  ;;  %v2726_v4 = vpop.f32.mrb[61].mxu1  ;;  %v2664_v6 = vpop.f32.mrb[62].mxu0 }
 0x185   : > { %v2727_v10 = vadd.f32 %v2726_v4, %v2725_v0  ;;  %v2728_v12 = vpop.f32.mrb[62].mxu1  ;;  %v2665_v14 = vpop.f32.mrb[63].mxu0 }
 0x186   : > { %v1630_v37 = vadd.f32 %v2663_v31, %v3713_v54  ;;  %v2666_v15 = vadd.f32 %v2665_v14, %v2664_v6  ;;  %v2729_v16 = vpop.f32.mrb[63].mxu1 }
 0x187   : > { %v2730_v17 = vadd.f32 %v2729_v16, %v2728_v12 }
 0x188   : > { %v3760_v18 = vadd.f32 %v2727_v10, %v1630_v37  ;;  %v1633_v39 = vadd.f32 %v2666_v15, %v3715_v57 }
 0x18a   : > { %v3763_v53 = vadd.f32 %v2730_v17, %v1633_v39  ;;  %v2747_v19 = vpop.f32.mrb[64].mxu0 }
 0x18b   : > { %v2811_v20 = vpop.f32.mrb[64].mxu1  ;;  %v2748_v22 = vpop.f32.mrb[65].mxu0 }
 0x18c   : > { %v2749_v55 = vadd.f32 %v2748_v22, %v2747_v19  ;;  %v2812_v25 = vpop.f32.mrb[65].mxu1  ;;  %v2750_v26 = vpop.f32.mrb[66].mxu0 }
 0x18d   : > { %v2813_v27 = vadd.f32 %v2812_v25, %v2811_v20  ;;  %v2814_v51 = vpop.f32.mrb[66].mxu1  ;;  %v2751_v32 = vpop.f32.mrb[67].mxu0 }
 0x18e   : > { %v1768_v54 = vadd.f32 %v2749_v55, %v3718_v11  ;;  %v2752_v33 = vadd.f32 %v2751_v32, %v2750_v26  ;;  %v2815_v34 = vpop.f32.mrb[67].mxu1 }
 0x18f   : > { %v2816_v35 = vadd.f32 %v2815_v34, %v2814_v51 }
 0x190   : > { %v3766_v36 = vadd.f32 %v2813_v27, %v1768_v54  ;;  %v1771_v57 = vadd.f32 %v2752_v33, %v3721_v13 }
 0x192   : > { %v3769_v5 = vadd.f32 %v2816_v35, %v1771_v57  ;;  %v2753_v38 = vpop.f32.mrb[68].mxu0 }
 0x193   : > { %v2817_v40 = vpop.f32.mrb[68].mxu1  ;;  %v2754_v41 = vpop.f32.mrb[69].mxu0 }
 0x194   : > { %v2755_v8 = vadd.f32 %v2754_v41, %v2753_v38  ;;  %v2818_v43 = vpop.f32.mrb[69].mxu1  ;;  %v2756_v44 = vpop.f32.mrb[70].mxu0 }
 0x195   : > { %v2819_v45 = vadd.f32 %v2818_v43, %v2817_v40  ;;  %v2820_v9 = vpop.f32.mrb[70].mxu1  ;;  %v2757_v48 = vpop.f32.mrb[71].mxu0 }
 0x196   : > { %v1776_v11 = vadd.f32 %v2755_v8, %v3724_v28  ;;  %v2758_v50 = vadd.f32 %v2757_v48, %v2756_v44  ;;  %v2821_v52 = vpop.f32.mrb[71].mxu1 }
 0x197   : > { %v2822_v56 = vadd.f32 %v2821_v52, %v2820_v9 }
 0x198   : > { %v3772_v58 = vadd.f32 %v2819_v45, %v1776_v11  ;;  %v1779_v13 = vadd.f32 %v2758_v50, %v3727_v30 }
 0x19a   : > { %v3775_v21 = vadd.f32 %v2822_v56, %v1779_v13  ;;  %v2759_v59 = vpop.f32.mrb[72].mxu0 }
 0x19b   : > { %v2823_v60 = vpop.f32.mrb[72].mxu1  ;;  %v2760_v61 = vpop.f32.mrb[73].mxu0 }
 0x19c   : > { %v2761_v23 = vadd.f32 %v2760_v61, %v2759_v59  ;;  %v2824_v63 = vpop.f32.mrb[73].mxu1  ;;  %v2762_v0 = vpop.f32.mrb[74].mxu0 }
 0x19d   : > { %v2825_v1 = vadd.f32 %v2824_v63, %v2823_v60  ;;  %v2826_v31 = vpop.f32.mrb[74].mxu1  ;;  %v2763_v4 = vpop.f32.mrb[75].mxu0 }
 0x19e   : > { %v1784_v28 = vadd.f32 %v2761_v23, %v3730_v46  ;;  %v2764_v6 = vadd.f32 %v2763_v4, %v2762_v0  ;;  %v2827_v10 = vpop.f32.mrb[75].mxu1 }
 0x19f   : > { %v2828_v12 = vadd.f32 %v2827_v10, %v2826_v31 }
 0x1a0   : > { %v3778_v14 = vadd.f32 %v2825_v1, %v1784_v28  ;;  %v1787_v30 = vadd.f32 %v2764_v6, %v3733_v47 }
 0x1a2   : > { %v3781_v37 = vadd.f32 %v2828_v12, %v1787_v30  ;;  %v2765_v15 = vpop.f32.mrb[76].mxu0 }
 0x1a3   : > { %v2829_v16 = vpop.f32.mrb[76].mxu1  ;;  %v2766_v17 = vpop.f32.mrb[77].mxu0 }
 0x1a4   : > { %v2767_v39 = vadd.f32 %v2766_v17, %v2765_v15  ;;  %v2830_v19 = vpop.f32.mrb[77].mxu1  ;;  %v2768_v20 = vpop.f32.mrb[78].mxu0 }
 0x1a5   : > { %v2831_v22 = vadd.f32 %v2830_v19, %v2829_v16  ;;  %v2832_v55 = vpop.f32.mrb[78].mxu1  ;;  %v2769_v25 = vpop.f32.mrb[79].mxu0 }
 0x1a6   : > { %v1792_v46 = vadd.f32 %v2767_v39, %v3736_v2  ;;  %v2770_v26 = vadd.f32 %v2769_v25, %v2768_v20  ;;  %v2833_v27 = vpop.f32.mrb[79].mxu1 }
 0x1a7   : > { %v2834_v51 = vadd.f32 %v2833_v27, %v2832_v55 }
 0x1a8   : > { %v3784_v32 = vadd.f32 %v2831_v22, %v1792_v46  ;;  %v1795_v47 = vadd.f32 %v2770_v26, %v3739_v3 }
 0x1aa   : > { %v3787_v54 = vadd.f32 %v2834_v51, %v1795_v47  ;;  %v2771_v33 = vpop.f32.mrb[80].mxu0 }
 0x1ab   : > { %v2835_v34 = vpop.f32.mrb[80].mxu1  ;;  %v2772_v35 = vpop.f32.mrb[81].mxu0 }
 0x1ac   : > { %v2773_v57 = vadd.f32 %v2772_v35, %v2771_v33  ;;  %v2836_v38 = vpop.f32.mrb[81].mxu1  ;;  %v2774_v40 = vpop.f32.mrb[82].mxu0 }
 0x1ad   : > { %v2837_v41 = vadd.f32 %v2836_v38, %v2835_v34  ;;  %v2838_v8 = vpop.f32.mrb[82].mxu1  ;;  %v2775_v43 = vpop.f32.mrb[83].mxu0 }
 0x1ae   : > { %v1800_v2 = vadd.f32 %v2773_v57, %v3742_v24  ;;  %v2776_v44 = vadd.f32 %v2775_v43, %v2774_v40  ;;  %v2839_v45 = vpop.f32.mrb[83].mxu1 }
 0x1af   : > { %v2840_v9 = vadd.f32 %v2839_v45, %v2838_v8 }
 0x1b0   : > { %v3790_v48 = vadd.f32 %v2837_v41, %v1800_v2  ;;  %v1803_v3 = vadd.f32 %v2776_v44, %v3745_v49 }
 0x1b2   : > { %v3793_v11 = vadd.f32 %v2840_v9, %v1803_v3  ;;  %v2777_v50 = vpop.f32.mrb[84].mxu0 }
 0x1b3   : > { %v2841_v52 = vpop.f32.mrb[84].mxu1  ;;  %v2778_v56 = vpop.f32.mrb[85].mxu0 }
 0x1b4   : > { %v2779_v13 = vadd.f32 %v2778_v56, %v2777_v50  ;;  %v2842_v59 = vpop.f32.mrb[85].mxu1  ;;  %v2780_v60 = vpop.f32.mrb[86].mxu0 }
 0x1b5   : > { %v2843_v61 = vadd.f32 %v2842_v59, %v2841_v52  ;;  %v2844_v23 = vpop.f32.mrb[86].mxu1  ;;  %v2781_v63 = vpop.f32.mrb[87].mxu0 }
 0x1b6   : > { %v1808_v24 = vadd.f32 %v2779_v13, %v3748_v42  ;;  %v2782_v0 = vadd.f32 %v2781_v63, %v2780_v60  ;;  %v2845_v1 = vpop.f32.mrb[87].mxu1 }
 0x1b7   : > { %v2846_v31 = vadd.f32 %v2845_v1, %v2844_v23 }
 0x1b8   : > { %v3796_v4 = vadd.f32 %v2843_v61, %v1808_v24  ;;  %v1811_v49 = vadd.f32 %v2782_v0, %v3751_v7 }
 0x1ba   : > { %v3799_v28 = vadd.f32 %v2846_v31, %v1811_v49  ;;  %v2783_v6 = vpop.f32.mrb[88].mxu0 }
 0x1bb   : > { %v2847_v10 = vpop.f32.mrb[88].mxu1  ;;  %v2784_v12 = vpop.f32.mrb[89].mxu0 }
 0x1bc   : > { %v2785_v30 = vadd.f32 %v2784_v12, %v2783_v6  ;;  %v2848_v15 = vpop.f32.mrb[89].mxu1  ;;  %v2786_v16 = vpop.f32.mrb[90].mxu0 }
 0x1bd   : > { %v2849_v17 = vadd.f32 %v2848_v15, %v2847_v10  ;;  %v2850_v39 = vpop.f32.mrb[90].mxu1  ;;  %v2787_v19 = vpop.f32.mrb[91].mxu0 }
 0x1be   : > { %v1816_v42 = vadd.f32 %v2785_v30, %v3754_v62  ;;  %v2788_v20 = vadd.f32 %v2787_v19, %v2786_v16  ;;  %v2851_v22 = vpop.f32.mrb[91].mxu1 }
 0x1bf   : > { %v2852_v55 = vadd.f32 %v2851_v22, %v2850_v39 }
 0x1c0   : > { %v3802_v25 = vadd.f32 %v2849_v17, %v1816_v42  ;;  %v1819_v7 = vadd.f32 %v2788_v20, %v3757_v29 }
 0x1c2   : > { %v3805_v46 = vadd.f32 %v2852_v55, %v1819_v7  ;;  %v2789_v26 = vpop.f32.mrb[92].mxu0 }
 0x1c3   : > { %v2853_v27 = vpop.f32.mrb[92].mxu1  ;;  %v2790_v51 = vpop.f32.mrb[93].mxu0 }
 0x1c4   : > { %v2791_v47 = vadd.f32 %v2790_v51, %v2789_v26  ;;  %v2854_v33 = vpop.f32.mrb[93].mxu1  ;;  %v2792_v34 = vpop.f32.mrb[94].mxu0 }
 0x1c5   : > { %v2855_v35 = vadd.f32 %v2854_v33, %v2853_v27  ;;  %v2856_v57 = vpop.f32.mrb[94].mxu1  ;;  %v2793_v62 = vpop.f32.mrb[95].mxu0 }
 0x1c6   : > { %v1824_v38 = vadd.f32 %v2791_v47, %v3760_v18  ;;  %v2794_v40 = vadd.f32 %v2793_v62, %v2792_v34  ;;  %v2857_v41 = vpop.f32.mrb[95].mxu1 }
 0x1c7   : > { %v2858_v8 = vadd.f32 %v2857_v41, %v2856_v57 }
 0x1c8   : > { %v3808_v43 = vadd.f32 %v2855_v35, %v1824_v38  ;;  %v1827_v29 = vadd.f32 %v2794_v40, %v3763_v53 }
 0x1ca   : > { %v3812_v2 = vadd.f32 %v2858_v8, %v1827_v29  ;;  %v2875_v44 = vpop.f32.mrb[96].mxu0 }
 0x1cb   : > { %v2939_v45 = vpop.f32.mrb[96].mxu1  ;;  %v2876_v9 = vpop.f32.mrb[97].mxu0 }
 0x1cc   : > { %v2877_v3 = vadd.f32 %v2876_v9, %v2875_v44  ;;  %v2940_v50 = vpop.f32.mrb[97].mxu1  ;;  %v2878_v52 = vpop.f32.mrb[98].mxu0 }
 0x1cd   : > { %v2941_v56 = vadd.f32 %v2940_v50, %v2939_v45  ;;  %v2942_v13 = vpop.f32.mrb[98].mxu1  ;;  %v2879_v18 = vpop.f32.mrb[99].mxu0 }
 0x1ce   : > { %v1962_v59 = vadd.f32 %v2877_v3, %v3766_v36  ;;  %v2880_v60 = vadd.f32 %v2879_v18, %v2878_v52  ;;  %v2943_v61 = vpop.f32.mrb[99].mxu1 }
 0x1cf   : > { %v2944_v23 = vadd.f32 %v2943_v61, %v2942_v13 }
 0x1d0   : > { %v2059_v53 = vadd.f32 %v2941_v56, %v1962_v59  ;;  %v1965_v63 = vadd.f32 %v2880_v60, %v3769_v5 }
 0x1d2   : > { %v2459_v24 = vpack.c.bf16 %v2059_v53, %v2059_v53  ;;  %v2062_v0 = vadd.f32 %v2944_v23, %v1965_v63  ;;  %v2881_v1 = vpop.f32.mrb[100].mxu0 }
 0x1d3   : > { %v2945_v31 = vpop.f32.mrb[100].mxu1  ;;  %v2882_v36 = vpop.f32.mrb[101].mxu0 }
 0x1d4   : > { %2186 = vst.msk [vmem:[%s3820_s3] sm:$0xf] %vm2185_vm0, %v2459_v24  ;;  %v2460_v49 = vpack.c.bf16 %v2062_v0, %v2062_v0  ;;  %v2883_v6 = vadd.f32 %v2882_v36, %v2881_v1  ;;  %v2946_v10 = vpop.f32.mrb[101].mxu1  ;;  %v2884_v12 = vpop.f32.mrb[102].mxu0 }
 0x1d5   : > { %v2947_v5 = vadd.f32 %v2946_v10, %v2945_v31  ;;  %v2948_v30 = vpop.f32.mrb[102].mxu1  ;;  %v2885_v15 = vpop.f32.mrb[103].mxu0 }
 0x1d6   : > { %2187 = vst.msk [vmem:[%s3820_s3 + $0x4] sm:$0xf] %vm2185_vm0, %v2460_v49  ;;  %v1970_v16 = vadd.f32 %v2883_v6, %v3772_v58  ;;  %v2886_v17 = vadd.f32 %v2885_v15, %v2884_v12  ;;  %v2949_v39 = vpop.f32.mrb[103].mxu1 }
 0x1d7   : > { %v2950_v19 = vadd.f32 %v2949_v39, %v2948_v30 }
 0x1d8   : > { %v2067_v42 = vadd.f32 %v2947_v5, %v1970_v16  ;;  %v1973_v20 = vadd.f32 %v2886_v17, %v3775_v21 }
 0x1da   : > { %v2461_v22 = vpack.c.bf16 %v2067_v42, %v2067_v42  ;;  %v2070_v55 = vadd.f32 %v2950_v19, %v1973_v20  ;;  %v2887_v7 = vpop.f32.mrb[104].mxu0 }
 0x1db   : > { %v2951_v26 = vpop.f32.mrb[104].mxu1  ;;  %v2888_v27 = vpop.f32.mrb[105].mxu0 }
 0x1dc   : > { %2188 = vst.msk [vmem:[%s3820_s3 + $0x8] sm:$0xf] %vm2185_vm0, %v2461_v22  ;;  %v2462_v51 = vpack.c.bf16 %v2070_v55, %v2070_v55  ;;  %v2889_v47 = vadd.f32 %v2888_v27, %v2887_v7  ;;  %v2952_v33 = vpop.f32.mrb[105].mxu1  ;;  %v2890_v34 = vpop.f32.mrb[106].mxu0 }
 0x1dd   : > { %v2953_v58 = vadd.f32 %v2952_v33, %v2951_v26  ;;  %v2954_v35 = vpop.f32.mrb[106].mxu1  ;;  %v2891_v57 = vpop.f32.mrb[107].mxu0 }
 0x1de   : > { %2189 = vst.msk [vmem:[%s3820_s3 + $0xc] sm:$0xf] %vm2185_vm0, %v2462_v51  ;;  %v1978_v62 = vadd.f32 %v2889_v47, %v3778_v14  ;;  %v2892_v21 = vadd.f32 %v2891_v57, %v2890_v34  ;;  %v2955_v38 = vpop.f32.mrb[107].mxu1 }
 0x1df   : > { %v2956_v40 = vadd.f32 %v2955_v38, %v2954_v35 }
 0x1e0   : > { %v2075_v41 = vadd.f32 %v2953_v58, %v1978_v62  ;;  %v1981_v8 = vadd.f32 %v2892_v21, %v3781_v37 }
 0x1e2   : > { %v2463_v29 = vpack.c.bf16 %v2075_v41, %v2075_v41  ;;  %v2078_v44 = vadd.f32 %v2956_v40, %v1981_v8  ;;  %v2893_v45 = vpop.f32.mrb[108].mxu0 }
 0x1e3   : > { %v2957_v9 = vpop.f32.mrb[108].mxu1  ;;  %v2894_v3 = vpop.f32.mrb[109].mxu0 }
 0x1e4   : > { %2190 = vst.msk [vmem:[%s3820_s3 + $0x10] sm:$0xf] %vm2185_vm0, %v2463_v29  ;;  %v2464_v50 = vpack.c.bf16 %v2078_v44, %v2078_v44  ;;  %v2895_v52 = vadd.f32 %v2894_v3, %v2893_v45  ;;  %v2958_v56 = vpop.f32.mrb[109].mxu1  ;;  %v2896_v13 = vpop.f32.mrb[110].mxu0 }
 0x1e5   : > { %v2959_v14 = vadd.f32 %v2958_v56, %v2957_v9  ;;  %v2960_v18 = vpop.f32.mrb[110].mxu1  ;;  %v2897_v59 = vpop.f32.mrb[111].mxu0 }
 0x1e6   : > { %2191 = vst.msk [vmem:[%s3820_s3 + $0x14] sm:$0xf] %vm2185_vm0, %v2464_v50  ;;  %v1986_v60 = vadd.f32 %v2895_v52, %v3784_v32  ;;  %v2898_v37 = vadd.f32 %v2897_v59, %v2896_v13  ;;  %v2961_v61 = vpop.f32.mrb[111].mxu1 }
 0x1e7   : > { %v2962_v23 = vadd.f32 %v2961_v61, %v2960_v18 }
 0x1e8   : > { %v2083_v53 = vadd.f32 %v2959_v14, %v1986_v60  ;;  %v1989_v63 = vadd.f32 %v2898_v37, %v3787_v54 }
 0x1ea   : > { %v2465_v24 = vpack.c.bf16 %v2083_v53, %v2083_v53  ;;  %v2086_v0 = vadd.f32 %v2962_v23, %v1989_v63  ;;  %v2899_v1 = vpop.f32.mrb[112].mxu0 }
 0x1eb   : > { %v2963_v31 = vpop.f32.mrb[112].mxu1  ;;  %v2900_v36 = vpop.f32.mrb[113].mxu0 }
 0x1ec   : > { %2192 = vst.msk [vmem:[%s3820_s3 + $0x18] sm:$0xf] %vm2185_vm0, %v2465_v24  ;;  %v2466_v49 = vpack.c.bf16 %v2086_v0, %v2086_v0  ;;  %v2901_v6 = vadd.f32 %v2900_v36, %v2899_v1  ;;  %v2964_v10 = vpop.f32.mrb[113].mxu1  ;;  %v2902_v12 = vpop.f32.mrb[114].mxu0 }
 0x1ed   : > { %v2965_v32 = vadd.f32 %v2964_v10, %v2963_v31  ;;  %v2966_v5 = vpop.f32.mrb[114].mxu1  ;;  %v2903_v30 = vpop.f32.mrb[115].mxu0 }
 0x1ee   : > { %2193 = vst.msk [vmem:[%s3820_s3 + $0x1c] sm:$0xf] %vm2185_vm0, %v2466_v49  ;;  %v1994_v15 = vadd.f32 %v2901_v6, %v3790_v48  ;;  %v2904_v54 = vadd.f32 %v2903_v30, %v2902_v12  ;;  %v2967_v16 = vpop.f32.mrb[115].mxu1 }
 0x1ef   : > { %v2968_v17 = vadd.f32 %v2967_v16, %v2966_v5 }
 0x1f0   : > { %v2091_v39 = vadd.f32 %v2965_v32, %v1994_v15  ;;  %v1997_v19 = vadd.f32 %v2904_v54, %v3793_v11 }
 0x1f2   : > { %v2467_v42 = vpack.c.bf16 %v2091_v39, %v2091_v39  ;;  %v2094_v20 = vadd.f32 %v2968_v17, %v1997_v19  ;;  %v2905_v22 = vpop.f32.mrb[116].mxu0 }
 0x1f3   : > { %v2969_v55 = vpop.f32.mrb[116].mxu1  ;;  %v2906_v7 = vpop.f32.mrb[117].mxu0 }
 0x1f4   : > { %2194 = vst.msk [vmem:[%s3820_s3 + $0x20] sm:$0xf] %vm2185_vm0, %v2467_v42  ;;  %v2468_v26 = vpack.c.bf16 %v2094_v20, %v2094_v20  ;;  %v2907_v27 = vadd.f32 %v2906_v7, %v2905_v22  ;;  %v2970_v51 = vpop.f32.mrb[117].mxu1  ;;  %v2908_v47 = vpop.f32.mrb[118].mxu0 }
 0x1f5   : > { %v2971_v48 = vadd.f32 %v2970_v51, %v2969_v55  ;;  %v2972_v33 = vpop.f32.mrb[118].mxu1  ;;  %v2909_v34 = vpop.f32.mrb[119].mxu0 }
 0x1f6   : > { %2195 = vst.msk [vmem:[%s3820_s3 + $0x24] sm:$0xf] %vm2185_vm0, %v2468_v26  ;;  %v2002_v58 = vadd.f32 %v2907_v27, %v3796_v4  ;;  %v2910_v11 = vadd.f32 %v2909_v34, %v2908_v47  ;;  %v2973_v35 = vpop.f32.mrb[119].mxu1 }
 0x1f7   : > { %v2974_v57 = vadd.f32 %v2973_v35, %v2972_v33 }
 0x1f8   : > { %v2099_v62 = vadd.f32 %v2971_v48, %v2002_v58  ;;  %v2005_v21 = vadd.f32 %v2910_v11, %v3799_v28 }
 0x1fa   : > { %v2469_v38 = vpack.c.bf16 %v2099_v62, %v2099_v62  ;;  %v2102_v40 = vadd.f32 %v2974_v57, %v2005_v21  ;;  %v2911_v41 = vpop.f32.mrb[120].mxu0 }
 0x1fb   : > { %v2975_v8 = vpop.f32.mrb[120].mxu1  ;;  %v2912_v29 = vpop.f32.mrb[121].mxu0 }
 0x1fc   : > { %2196 = vst.msk [vmem:[%s3820_s3 + $0x28] sm:$0xf] %vm2185_vm0, %v2469_v38  ;;  %v2470_v44 = vpack.c.bf16 %v2102_v40, %v2102_v40  ;;  %v2913_v45 = vadd.f32 %v2912_v29, %v2911_v41  ;;  %v2976_v9 = vpop.f32.mrb[121].mxu1  ;;  %v2914_v3 = vpop.f32.mrb[122].mxu0 }
 0x1fd   : > { %v2977_v4 = vadd.f32 %v2976_v9, %v2975_v8  ;;  %v2978_v50 = vpop.f32.mrb[122].mxu1  ;;  %v2915_v52 = vpop.f32.mrb[123].mxu0 }
 0x1fe   : > { %2197 = vst.msk [vmem:[%s3820_s3 + $0x2c] sm:$0xf] %vm2185_vm0, %v2470_v44  ;;  %v2010_v56 = vadd.f32 %v2913_v45, %v3802_v25  ;;  %v2916_v28 = vadd.f32 %v2915_v52, %v2914_v3  ;;  %v2979_v13 = vpop.f32.mrb[123].mxu1 }
 0x1ff   : > { %v2980_v14 = vadd.f32 %v2979_v13, %v2978_v50 }
 0x200   : > { %v2107_v18 = vadd.f32 %v2977_v4, %v2010_v56  ;;  %v2013_v59 = vadd.f32 %v2916_v28, %v3805_v46 }
 0x202   : > { %v2471_v60 = vpack.c.bf16 %v2107_v18, %v2107_v18  ;;  %v2110_v37 = vadd.f32 %v2980_v14, %v2013_v59  ;;  %v2917_v61 = vpop.f32.mrb[124].mxu0 }
 0x203   : > { %v2981_v23 = vpop.f32.mrb[124].mxu1  ;;  %v2918_v53 = vpop.f32.mrb[125].mxu0 }
 0x204   : > { %2198 = vst.msk [vmem:[%s3820_s3 + $0x30] sm:$0xf] %vm2185_vm0, %v2471_v60  ;;  %v2472_v63 = vpack.c.bf16 %v2110_v37, %v2110_v37  ;;  %v2919_v24 = vadd.f32 %v2918_v53, %v2917_v61  ;;  %v2982_v0 = vpop.f32.mrb[125].mxu1  ;;  %v2920_v25 = vpop.f32.mrb[126].mxu0 }
 0x205   : > { %v2983_v1 = vadd.f32 %v2982_v0, %v2981_v23  ;;  %v2984_v31 = vpop.f32.mrb[126].mxu1  ;;  %v2921_v36 = vpop.f32.mrb[127].mxu0 }
 0x206   : > { %2199 = vst.msk [vmem:[%s3820_s3 + $0x34] sm:$0xf] %vm2185_vm0, %v2472_v63  ;;  %v2018_v46 = vadd.f32 %v2919_v24, %v3808_v43  ;;  %v2922_v49 = vadd.f32 %v2921_v36, %v2920_v25  ;;  %v2985_v6 = vpop.f32.mrb[127].mxu1 }
 0x207   : > { %v2986_v10 = vadd.f32 %v2985_v6, %v2984_v31 }
 0x208   : > { %v2115_v12 = vadd.f32 %v2983_v1, %v2018_v46  ;;  %v2021_v32 = vadd.f32 %v2922_v49, %v3812_v2 }
 0x20a   : > { %v2473_v5 = vpack.c.bf16 %v2115_v12, %v2115_v12  ;;  %v2118_v30 = vadd.f32 %v2986_v10, %v2021_v32 }
 0x20c   : > { %2200 = vst.msk [vmem:[%s3820_s3 + $0x38] sm:$0xf] %vm2185_vm0, %v2473_v5  ;;  %v2474_v15 = vpack.c.bf16 %v2118_v30, %v2118_v30 }
 0x20e   : > { %2201 = vst.msk [vmem:[%s3820_s3 + $0x3c] sm:$0xf] %vm2185_vm0, %v2474_v15 }
 0x20f PF: > { %s12_s13 = sadd.s32 1, %s3065_s13   ;;  %s3887_s9 = smov %s3057_s11 }
 0x210   : > { %p9_p7 = scmp.ge.s32.totalorder %s12_s13, 6   ;;  %s3888_s10 = smov %s3061_s12 }
 0x211   : > { %s3889_s11 = smov %s3892_s14  ;;  %s3890_s12 = smov %s3896_s15 }
 0x212   :  { %11 = sbr.rel (!%p9_p7) target bundleno = 3 (0x3), region = 61 }

// kernel: part_detect_net_head.3
= control target key start
LH: loop header
LB: loop body
LE: loop exit
PB: predicated region body
PF: predicated region fallthrough
CT: control target
= control target key end

     0   :  { %8 = vsyncpa [#allocation3], 0  ;;  %s9650_s0 = inlined_call_operand.vmem [shape: bf16[2,512,32], index: 0, kind: input, shape index: {}]   ;;  %s9651_s1 = inlined_call_operand.vmem [shape: bf16[256,32], index: 1, kind: input, shape index: {}]   ;;  %s9652_s2 = inlined_call_operand.vmem [shape: bf16[32,256], index: 2, kind: input, shape index: {}]   ;;  %s9653_s3 = inlined_call_operand.hbm [shape: f32[2,16,256,256], index: 3, kind: output, shape index: {}]  }
   0x1   :  { %10 = vsyncpa [#allocation3 + $0x1], 0  ;;  %s6929_s12 = smov 0   ;;  %s6931_s13 = smov 0  }
   0x2   :  { %s6933_s14 = smov 0   ;;  %s6935_s15 = smov 0  }
   0x3   :  { %s6937_s16 = smov 0   ;;  %s6939_s17 = smov 0  }
   0x4 LB: > { %s5346_s18 = sadd.s32 4294967295, %s6903_s17   ;;  %s5347_s19 = sadd.s32 4294967294, %s6903_s17   ;;  %s6903_s17 = sphi %s6939_s17, %s16_s17   ;;  %s6899_s16 = sphi %s6937_s16, %s9739_s16   ;;  %s6895_s15 = sphi %s6935_s15, %s9738_s15   ;;  %s6891_s14 = sphi %s6933_s14, %s9737_s14   ;;  %s6887_s13 = sphi %s6931_s13, %s9736_s13   ;;  %s6883_s12 = sphi %s6929_s12, %s9735_s12  }
   0x5   : > { %s28_s20 = sadd.s32 1, %s6899_s16  ;;  %s107_s21 = sadd.s32 1, %s6891_s14 }
   0x6   : > { %p30_p0 = scmp.ge.s32.totalorder %s28_s20, 2  ;;  %p117_p1 = scmp.ne.s32.totalorder %s6891_s14, %s6887_s13 }
   0x7   : > { %p118_p2 = scmp.eq.s32.totalorder %s5346_s18, 1  ;;  %p123_p3 = scmp.ne.s32.totalorder %s6887_s13, %s6883_s12 }
   0x8   : > { %s9741_s20 = smov (%p30_p0, %s28_s20), 0  ;;  %p124_p5 = scmp.eq.s32.totalorder %s5347_s19, 1 }
   0x9   : > { %p6969_p4 = por %p118_p2, %p117_p1  ;;  %s102_s23 = ssub.s32 %s6899_s16, %s9741_s20 }
   0xa   : > { %p5350_p6 = scmp.ge.s32.totalorder %s6903_s17, 1  ;;  %p105_p7 = scmp.eq.s32.totalorder %s102_s23, 0 }
   0xb   : > { %p6976_p8 = por %p124_p5, %p123_p3  ;;  %p161_p9 = scmp.lt.s32.totalorder %s6903_s17, 3 }
   0xc   : > { %s6982_s25 = scalar_select %p105_p7, %s6891_s14, %s107_s21  }
   0xd   : > { %p162_p10 = pnand %p5350_p6, %p161_p9 }
   0xf   : > { %165 = sbr.rel (%p162_p10) target bundleno = 1635 (0x663), region = 32 }
  0x16   : > { %v6719_v0 = vld [vmem:[%s9652_s2 + $0x4] ss:$8 sps:$4 sm:$0xff]   ;;  %p190_p11 = scmp.lt.s32.totalorder %s6895_s15, 1  ;;  %v6721_v1 = vld [vmem:[%s9652_s2] ss:$8 sps:$4 sm:$0xff]   ;;  %v9655_v2 = vmov 0  }
  0x17   : > { %578 = vmatprep.mubr.bf16.mxu0 %v9655_v2  ;;  %1155 = vmatprep.mubr.bf16.mxu1 %v9655_v2  ;;  %v6722_v3 = vld [vmem:[%s9652_s2 + $0x14] ss:$8 sps:$4 sm:$0xff]   ;;  %v6724_v4 = vld [vmem:[%s9652_s2 + $0x10] ss:$8 sps:$4 sm:$0xff]   ;;  %vm449_vm0 = vcmask 261120   ;;  %v7094_v46 = vld [vmem:[%s9651_s1] sm:$0xff]  }
  0x18   : > { %546 = vmatprep.subr.bf16.mxu0 %v6719_v0  ;;  %s191_s7 = scalar_select %p190_p11, %s6895_s15, 1  ;;  %v7105_v54 = vld [vmem:[%s9651_s1 + $0x8] sm:$0xff]   ;;  %v7116_v62 = vld [vmem:[%s9651_s1 + $0x10] sm:$0xff]  }
  0x19   : > { %547 = vmatpush1.bf16.msra.mxu0 %v6721_v1  ;;  %s186_s10 = sand.u32 1, %s6887_s13   ;;  %s6906_s28 = smov [#allocation2]  }
  0x1a   : > { %548 = vmatprep.subr.bf16.mxu0 %v6722_v3  ;;  %s6659_s8 = sshll.u32 %s191_s7, 8  ;;  %s6829_s29 = sshll.u32 %s6906_s28, 4  ;;  %s6830_s29 = int_to_ptr.vmem [resolvable:$false] %s6829_s29 }
  0x1b   : > { %s7003_s11 = scalar_lea.vmem %s9650_s0, %s6659_s8  ;;  %s6831_s30 = scalar_lea.vmem %s6830_s29, 262144 }
  0x1c   : > { %v6725_v5 = vld [vmem:[%s7003_s11] sm:$0xff]   ;;  %v6726_v6 = vld [vmem:[%s7003_s11 + $0x8] sm:$0xff]   ;;  %v6727_v7 = vld [vmem:[%s7003_s11 + $0x10] sm:$0xff]  }
  0x1d   : > { %549 = vmatpush1.bf16.msra.mxu0 %v6724_v4  ;;  %v6728_v8 = vld [vmem:[%s7003_s11 + $0x18] sm:$0xff]   ;;  %v6729_v9 = vld [vmem:[%s7003_s11 + $0x20] sm:$0xff]   ;;  %v6730_v10 = vld [vmem:[%s7003_s11 + $0x28] sm:$0xff]  }
  0x1e   : > { %v6731_v11 = vld [vmem:[%s7003_s11 + $0x30] sm:$0xff]   ;;  %v6732_v12 = vld [vmem:[%s7003_s11 + $0x38] sm:$0xff]   ;;  %v6733_v13 = vld [vmem:[%s7003_s11 + $0x40] sm:$0xff]  }
  0x1f   : > { %v6734_v14 = vld [vmem:[%s7003_s11 + $0x48] sm:$0xff]   ;;  %v6735_v15 = vld [vmem:[%s7003_s11 + $0x50] sm:$0xff]   ;;  %v6736_v16 = vld [vmem:[%s7003_s11 + $0x58] sm:$0xff]  }
  0x20   : > { %5390 = vmatmul.mubr.msk.bf16.vlgmr.msra.gmra.mrb[0].mxu0 %vm449_vm0, %v6725_v5  ;;  %v6737_v17 = vld [vmem:[%s7003_s11 + $0x60] sm:$0xff]   ;;  %v6738_v18 = vld [vmem:[%s7003_s11 + $0x68] sm:$0xff]   ;;  %v6739_v19 = vld [vmem:[%s7003_s11 + $0x70] sm:$0xff]  }
  0x21   : > { %588 = vmatprep.mubr.bf16.mxu0 %v9655_v2  ;;  %v6740_v20 = vld [vmem:[%s7003_s11 + $0x78] sm:$0xff]   ;;  %v6741_v21 = vld [vmem:[%s7003_s11 + $0x80] sm:$0xff]   ;;  %v6742_v22 = vld [vmem:[%s7003_s11 + $0x88] sm:$0xff]  }
  0x22   : > { %v6743_v23 = vld [vmem:[%s7003_s11 + $0x90] sm:$0xff]   ;;  %v6744_v24 = vld [vmem:[%s7003_s11 + $0x98] sm:$0xff]   ;;  %v6745_v25 = vld [vmem:[%s7003_s11 + $0xa0] sm:$0xff]  }
  0x23   : > { %v6746_v26 = vld [vmem:[%s7003_s11 + $0xa8] sm:$0xff]   ;;  %v6747_v27 = vld [vmem:[%s7003_s11 + $0xb0] sm:$0xff]   ;;  %v6748_v28 = vld [vmem:[%s7003_s11 + $0xb8] sm:$0xff]  }
  0x24   : > { %v6749_v29 = vld [vmem:[%s7003_s11 + $0xc0] sm:$0xff]   ;;  %v6750_v30 = vld [vmem:[%s7003_s11 + $0xc8] sm:$0xff]   ;;  %v6751_v31 = vld [vmem:[%s7003_s11 + $0xd0] sm:$0xff]  }
  0x25   : > { %v6752_v34 = vld [vmem:[%s7003_s11 + $0xd8] sm:$0xff]   ;;  %v6753_v41 = vld [vmem:[%s7003_s11 + $0xe0] sm:$0xff]   ;;  %v6755_v49 = vld [vmem:[%s7003_s11 + $0xe8] sm:$0xff]  }
  0x26   : > { %v6757_v57 = vld [vmem:[%s7003_s11 + $0xf0] sm:$0xff]   ;;  %v6759_v1 = vld [vmem:[%s7003_s11 + $0xf8] sm:$0xff]   ;;  %s5351_s11 = sshll.u32 %s186_s10, 13 }
  0x27   : > { %s7407_s18 = scalar_lea.vmem [#allocation2], %s5351_s11  ;;  %s6660_s11 = sshll.u32 %s6895_s15, 17 }
  0x28   : > { %5391 = vmatmul.mubr.msk.bf16.gmra.mrb[4].mxu0 %vm449_vm0, %v6726_v6  ;;  %s5267_s19 = sshll.u32 %s7407_s18, 4  ;;  %s9595_s26 = scalar_lea.hbm %s9653_s3, %s6660_s11  ;;  %s9597_s19 = int_to_ptr.vmem [resolvable:$true] %s5267_s19 }
  0x29   : > { %598 = vmatprep.mubr.bf16.mxu0 %v9655_v2  ;;  %s9604_s15 = scalar_lea.sflag [#allocation3], %s186_s10  ;;  %s6825_s27 = scalar_lea.vmem %s9597_s19, 131072 }
  0x2a   : > { %p6826_p12 = scmp.ne.s32.totalorder %s9597_s19, %s6825_s27  ;;  %p6832_p1 = scmp.lt.s32.totalorder %s9597_s19, %s6830_s29 }
  0x2b   : > { %p6833_p2 = scmp.lt.s32.totalorder %s6831_s30, %s6825_s27 }
  0x2c   : > { %p6827_p13 = pnand %p6826_p12, %p6969_p4 }
  0x2d   : > { %p6834_p3 = por %p6833_p2, %p6832_p1 }
  0x2e   : > { %p6828_p0 = pneg %p6827_p13 }
  0x30   : > { %5392 = vmatmul.mubr.msk.bf16.gmra.mrb[8].mxu0 %vm449_vm0, %v6727_v7  ;;  %v7127_v7 = vld [vmem:[%s9651_s1 + $0x18] sm:$0xff]   ;;  %p6835_p5 = pnand %p6834_p3, %p6828_p0 }
  0x31   : > { %608 = vmatprep.mubr.bf16.mxu0 %v9655_v2 }
  0x38   : > { %5393 = vmatmul.mubr.msk.bf16.gmra.mrb[12].mxu0 %vm449_vm0, %v6728_v8 }
  0x39   : > { %618 = vmatprep.mubr.bf16.mxu0 %v9655_v2 }
  0x40   : > { %5394 = vmatmul.mubr.msk.bf16.gmra.mrb[16].mxu0 %vm449_vm0, %v6729_v9 }
  0x41   : > { %628 = vmatprep.mubr.bf16.mxu0 %v9655_v2 }
  0x48   : > { %5395 = vmatmul.mubr.msk.bf16.gmra.mrb[20].mxu0 %vm449_vm0, %v6730_v10 }
  0x49   : > { %638 = vmatprep.mubr.bf16.mxu0 %v9655_v2 }
  0x50   : > { %5396 = vmatmul.mubr.msk.bf16.gmra.mrb[24].mxu0 %vm449_vm0, %v6731_v11 }
  0x51   : > { %648 = vmatprep.mubr.bf16.mxu0 %v9655_v2 }
  0x58   : > { %5397 = vmatmul.mubr.msk.bf16.gmra.mrb[28].mxu0 %vm449_vm0, %v6732_v12 }
  0x59   : > { %658 = vmatprep.mubr.bf16.mxu0 %v9655_v2 }
  0x60   : > { %5398 = vmatmul.mubr.msk.bf16.gmra.mrb[32].mxu0 %vm449_vm0, %v6733_v13 }
  0x61   : > { %668 = vmatprep.mubr.bf16.mxu0 %v9655_v2 }
  0x68   : > { %5399 = vmatmul.mubr.msk.bf16.gmra.mrb[36].mxu0 %vm449_vm0, %v6734_v14  ;;  %v7136_v14 = vld [vmem:[%s9651_s1 + $0x20] sm:$0xff]  }
  0x69   : > { %678 = vmatprep.mubr.bf16.mxu0 %v9655_v2 }
  0x70   : > { %5400 = vmatmul.mubr.msk.bf16.gmra.mrb[40].mxu0 %vm449_vm0, %v6735_v15 }
  0x71   : > { %688 = vmatprep.mubr.bf16.mxu0 %v9655_v2 }
  0x78   : > { %5401 = vmatmul.mubr.msk.bf16.gmra.mrb[44].mxu0 %vm449_vm0, %v6736_v16 }
  0x79   : > { %698 = vmatprep.mubr.bf16.mxu0 %v9655_v2 }
  0x80   : > { %5402 = vmatmul.mubr.msk.bf16.gmra.mrb[48].mxu0 %vm449_vm0, %v6737_v17 }
  0x81   : > { %708 = vmatprep.mubr.bf16.mxu0 %v9655_v2 }
  0x88   : > { %5403 = vmatmul.mubr.msk.bf16.gmra.mrb[52].mxu0 %vm449_vm0, %v6738_v18 }
  0x89   : > { %718 = vmatprep.mubr.bf16.mxu0 %v9655_v2 }
  0x90   : > { %5404 = vmatmul.mubr.msk.bf16.gmra.mrb[56].mxu0 %vm449_vm0, %v6739_v19 }
  0x91   : > { %728 = vmatprep.mubr.bf16.mxu0 %v9655_v2 }
  0x98   : > { %5405 = vmatmul.mubr.msk.bf16.gmra.mrb[60].mxu0 %vm449_vm0, %v6740_v20 }
  0x99   : > { %738 = vmatprep.mubr.bf16.mxu0 %v9655_v2 }
  0xa0   : > { %5406 = vmatmul.mubr.msk.bf16.gmra.mrb[64].mxu0 %vm449_vm0, %v6741_v21  ;;  %v7153_v21 = vld [vmem:[%s9651_s1 + $0x28] sm:$0xff]  }
  0xa1   : > { %748 = vmatprep.mubr.bf16.mxu0 %v9655_v2 }
  0xa8   : > { %5407 = vmatmul.mubr.msk.bf16.gmra.mrb[68].mxu0 %vm449_vm0, %v6742_v22 }
  0xa9   : > { %758 = vmatprep.mubr.bf16.mxu0 %v9655_v2 }
  0xb0   : > { %5408 = vmatmul.mubr.msk.bf16.gmra.mrb[72].mxu0 %vm449_vm0, %v6743_v23 }
  0xb1   : > { %768 = vmatprep.mubr.bf16.mxu0 %v9655_v2 }
  0xb8   : > { %5409 = vmatmul.mubr.msk.bf16.gmra.mrb[76].mxu0 %vm449_vm0, %v6744_v24 }
  0xb9   : > { %778 = vmatprep.mubr.bf16.mxu0 %v9655_v2 }
  0xc0   : > { %5410 = vmatmul.mubr.msk.bf16.gmra.mrb[80].mxu0 %vm449_vm0, %v6745_v25 }
  0xc1   : > { %788 = vmatprep.mubr.bf16.mxu0 %v9655_v2 }
  0xc8   : > { %5411 = vmatmul.mubr.msk.bf16.gmra.mrb[84].mxu0 %vm449_vm0, %v6746_v26 }
  0xc9   : > { %798 = vmatprep.mubr.bf16.mxu0 %v9655_v2 }
  0xd0   : > { %5412 = vmatmul.mubr.msk.bf16.gmra.mrb[88].mxu0 %vm449_vm0, %v6747_v27 }
  0xd1   : > { %808 = vmatprep.mubr.bf16.mxu0 %v9655_v2 }
  0xd8   : > { %5413 = vmatmul.mubr.msk.bf16.gmra.mrb[92].mxu0 %vm449_vm0, %v6748_v28  ;;  %v7176_v28 = vld [vmem:[%s9651_s1 + $0x30] sm:$0xff]  }
  0xd9   : > { %818 = vmatprep.mubr.bf16.mxu0 %v9655_v2 }
  0xe0   : > { %5414 = vmatmul.mubr.msk.bf16.gmra.mrb[96].mxu0 %vm449_vm0, %v6749_v29 }
  0xe1   : > { %828 = vmatprep.mubr.bf16.mxu0 %v9655_v2 }
  0xe8   : > { %5415 = vmatmul.mubr.msk.bf16.gmra.mrb[100].mxu0 %vm449_vm0, %v6750_v30 }
  0xe9   : > { %838 = vmatprep.mubr.bf16.mxu0 %v9655_v2 }
  0xf0   : > { %5416 = vmatmul.mubr.msk.bf16.gmra.mrb[104].mxu0 %vm449_vm0, %v6751_v31 }
  0xf1   : > { %848 = vmatprep.mubr.bf16.mxu0 %v9655_v2 }
  0xf3   : > { %v580_v32 = vpop.f32.mrb[0].mxu0 }
  0xf4   : > { %v582_v33 = vpop.f32.mrb[1].mxu0 }
  0xf5   : > { %v584_v35 = vpop.f32.mrb[2].mxu0 }
  0xf6   : > { %v586_v36 = vpop.f32.mrb[3].mxu0  ;;  %v899_v37 = vpack.c.bf16 %v584_v35, %v580_v32  ;;  %v7187_v35 = vld [vmem:[%s9651_s1 + $0x38] sm:$0xff]  }
  0xf7   : > { %v900_v38 = vpack.c.bf16 %v586_v36, %v582_v33 }
  0xf8   : > { %5417 = vmatmul.mubr.msk.bf16.gmra.mrb[108].mxu0 %vm449_vm0, %v6752_v34 }
  0xf9   : > { %1123 = vmatprep.subr.bf16.mxu1 %v900_v38  ;;  %858 = vmatprep.mubr.bf16.mxu0 %v9655_v2 }
  0xfa   : > { %1124 = vmatpush1.bf16.msra.mxu1 %v899_v37 }
  0xfb   : > { %v590_v39 = vpop.f32.mrb[4].mxu0 }
  0xfc   : > { %v592_v40 = vpop.f32.mrb[5].mxu0 }
  0xfd   : > { %v594_v42 = vpop.f32.mrb[6].mxu0 }
  0xfe   : > { %v901_v43 = vpack.c.bf16 %v594_v42, %v590_v39  ;;  %v596_v44 = vpop.f32.mrb[7].mxu0  ;;  %v7198_v42 = vld [vmem:[%s9651_s1 + $0x40] sm:$0xff]  }
  0xff   : > { %v902_v45 = vpack.c.bf16 %v596_v44, %v592_v40  ;;  %v7220_v44 = vld [vmem:[%s9651_s1 + $0x50] sm:$0xff]  }
 0x100   : > { %5418 = vmatmul.mubr.msk.bf16.gmra.mrb[112].mxu0 %vm449_vm0, %v6753_v41 }
 0x101   : > { %1125 = vmatprep.subr.bf16.mxu1 %v902_v45  ;;  %868 = vmatprep.mubr.bf16.mxu0 %v9655_v2  ;;  %v7231_v45 = vld [vmem:[%s9651_s1 + $0x58] sm:$0xff]  }
 0x102   : > { %1126 = vmatpush1.bf16.msra.mxu1 %v901_v43  ;;  %v7209_v43 = vld [vmem:[%s9651_s1 + $0x48] sm:$0xff]  }
 0x103   : > { %v600_v47 = vpop.f32.mrb[8].mxu0 }
 0x104   : > { %v602_v48 = vpop.f32.mrb[9].mxu0 }
 0x105   : > { %v604_v50 = vpop.f32.mrb[10].mxu0  ;;  %5438 = vmatmul.mubr.msk.bf16.vlgmr.msra.gmra.mrb[0].mxu1 %vm449_vm0, %v7094_v46 }
 0x106   : > { %v903_v51 = vpack.c.bf16 %v604_v50, %v600_v47  ;;  %v606_v52 = vpop.f32.mrb[11].mxu0  ;;  %1165 = vmatprep.mubr.bf16.mxu1 %v9655_v2  ;;  %v7242_v47 = vld [vmem:[%s9651_s1 + $0x60] sm:$0xff]   ;;  %v7275_v50 = vld [vmem:[%s9651_s1 + $0x78] sm:$0xff]  }
 0x107   : > { %v904_v53 = vpack.c.bf16 %v606_v52, %v602_v48  ;;  %v7253_v48 = vld [vmem:[%s9651_s1 + $0x68] sm:$0xff]  }
 0x108   : > { %5419 = vmatmul.mubr.msk.bf16.gmra.mrb[116].mxu0 %vm449_vm0, %v6755_v49  ;;  %v7264_v49 = vld [vmem:[%s9651_s1 + $0x70] sm:$0xff]  }
 0x109   : > { %1380 = vmatprep.subr.bf16.mxu1 %v904_v53  ;;  %878 = vmatprep.mubr.bf16.mxu0 %v9655_v2 }
 0x10a   : > { %1381 = vmatpush1.bf16.msra.mxu1 %v903_v51 }
 0x10b   : > { %v610_v55 = vpop.f32.mrb[12].mxu0 }
 0x10c   : > { %v612_v56 = vpop.f32.mrb[13].mxu0 }
 0x10d   : > { %v614_v58 = vpop.f32.mrb[14].mxu0  ;;  %5439 = vmatmul.mubr.msk.bf16.gmra.mrb[4].mxu1 %vm449_vm0, %v7105_v54 }
 0x10e   : > { %v905_v59 = vpack.c.bf16 %v614_v58, %v610_v55  ;;  %v616_v60 = vpop.f32.mrb[15].mxu0  ;;  %1175 = vmatprep.mubr.bf16.mxu1 %v9655_v2 }
 0x10f   : > { %v906_v61 = vpack.c.bf16 %v616_v60, %v612_v56 }
 0x110   : > { %5420 = vmatmul.mubr.msk.bf16.gmra.mrb[120].mxu0 %vm449_vm0, %v6757_v57 }
 0x111   : > { %1382 = vmatprep.subr.bf16.mxu1 %v906_v61  ;;  %888 = vmatprep.mubr.bf16.mxu0 %v9655_v2 }
 0x112   : > { %1383 = vmatpush1.bf16.msra.mxu1 %v905_v59 }
 0x113   : > { %v620_v63 = vpop.f32.mrb[16].mxu0 }
 0x114   : > { %v622_v0 = vpop.f32.mrb[17].mxu0 }
 0x115   : > { %v624_v3 = vpop.f32.mrb[18].mxu0  ;;  %5440 = vmatmul.mubr.msk.bf16.gmra.mrb[8].mxu1 %vm449_vm0, %v7116_v62 }
 0x116   : > { %v907_v4 = vpack.c.bf16 %v624_v3, %v620_v63  ;;  %v626_v5 = vpop.f32.mrb[19].mxu0  ;;  %1185 = vmatprep.mubr.bf16.mxu1 %v9655_v2 }
 0x117   : > { %v908_v6 = vpack.c.bf16 %v626_v5, %v622_v0 }
 0x118   : > { %5421 = vmatmul.mubr.msk.bf16.gmra.mrb[124].mxu0 %vm449_vm0, %v6759_v1 }
 0x119   : > { %1638 = vmatprep.subr.bf16.mxu0 %v908_v6  ;;  %1670 = vmatprep.mubr.bf16.mxu0 %v9655_v2 }
 0x11a   : > { %1639 = vmatpush1.bf16.msra.mxu0 %v907_v4 }
 0x11b   : > { %v630_v8 = vpop.f32.mrb[20].mxu0 }
 0x11c   : > { %v632_v9 = vpop.f32.mrb[21].mxu0 }
 0x11d   : > { %v634_v10 = vpop.f32.mrb[22].mxu0  ;;  %5441 = vmatmul.mubr.msk.bf16.gmra.mrb[12].mxu1 %vm449_vm0, %v7127_v7 }
 0x11e   : > { %v909_v11 = vpack.c.bf16 %v634_v10, %v630_v8  ;;  %v636_v12 = vpop.f32.mrb[23].mxu0  ;;  %1195 = vmatprep.mubr.bf16.mxu1 %v9655_v2 }
 0x11f   : > { %v910_v13 = vpack.c.bf16 %v636_v12, %v632_v9 }
 0x121   : > { %1640 = vmatprep.subr.bf16.mxu0 %v910_v13 }
 0x122   : > { %1641 = vmatpush1.bf16.msra.mxu0 %v909_v11 }
 0x123   : > { %v7138_v15 = vpop.f32.mrb[24].mxu0 }
 0x124   : > { %v642_v16 = vpop.f32.mrb[25].mxu0 }
 0x125   : > { %5442 = vmatmul.mubr.msk.bf16.gmra.mrb[16].mxu1 %vm449_vm0, %v7136_v14  ;;  %5534 = vmatmul.mubr.msk.bf16.vlgmr.msra.gmra.mrb[128].mxu0 %vm449_vm0, %v7094_v46  ;;  %v7144_v17 = vpop.f32.mrb[26].mxu0 }
 0x126   : > { %1205 = vmatprep.mubr.bf16.mxu1 %v9655_v2  ;;  %1680 = vmatprep.mubr.bf16.mxu0 %v9655_v2  ;;  %v911_v18 = vpack.c.bf16 %v7144_v17, %v7138_v15  ;;  %v646_v19 = vpop.f32.mrb[27].mxu0 }
 0x127   : > { %v912_v20 = vpack.c.bf16 %v646_v19, %v642_v16 }
 0x129   : > { %1896 = vmatprep.subr.bf16.mxu1 %v912_v20 }
 0x12b   : > { %v7155_v22 = vpop.f32.mrb[28].mxu0 }
 0x12c   : > { %v7157_v23 = vpop.f32.mrb[29].mxu0 }
 0x12d   : > { %5443 = vmatmul.mubr.msk.bf16.gmra.mrb[20].mxu1 %vm449_vm0, %v7153_v21  ;;  %5535 = vmatmul.mubr.msk.bf16.gmra.mrb[132].mxu0 %vm449_vm0, %v7105_v54  ;;  %v7163_v24 = vpop.f32.mrb[30].mxu0 }
 0x12e   : > { %1215 = vmatprep.mubr.bf16.mxu1 %v9655_v2  ;;  %1690 = vmatprep.mubr.bf16.mxu0 %v9655_v2  ;;  %v913_v25 = vpack.c.bf16 %v7163_v24, %v7155_v22  ;;  %v7169_v26 = vpop.f32.mrb[31].mxu0 }
 0x12f   : > { %v914_v27 = vpack.c.bf16 %v7169_v26, %v7157_v23 }
 0x133   : > { %v660_v29 = vpop.f32.mrb[32].mxu0 }
 0x134   : > { %v662_v30 = vpop.f32.mrb[33].mxu0 }
 0x135   : > { %5444 = vmatmul.mubr.msk.bf16.gmra.mrb[24].mxu1 %vm449_vm0, %v7176_v28  ;;  %5536 = vmatmul.mubr.msk.bf16.gmra.mrb[136].mxu0 %vm449_vm0, %v7116_v62  ;;  %v664_v31 = vpop.f32.mrb[34].mxu0 }
 0x136   : > { %1225 = vmatprep.mubr.bf16.mxu1 %v9655_v2  ;;  %1700 = vmatprep.mubr.bf16.mxu0 %v9655_v2  ;;  %v915_v32 = vpack.c.bf16 %v664_v31, %v660_v29  ;;  %v666_v33 = vpop.f32.mrb[35].mxu0 }
 0x137   : > { %v916_v34 = vpack.c.bf16 %v666_v33, %v662_v30 }
 0x139   : > { %2154 = vmatprep.subr.bf16.mxu0 %v916_v34 }
 0x13a   : > { %2155 = vmatpush1.bf16.msra.mxu0 %v915_v32 }
 0x13b   : > { %v670_v36 = vpop.f32.mrb[36].mxu0 }
 0x13c   : > { %v672_v37 = vpop.f32.mrb[37].mxu0 }
 0x13d   : > { %5445 = vmatmul.mubr.msk.bf16.gmra.mrb[28].mxu1 %vm449_vm0, %v7187_v35  ;;  %5537 = vmatmul.mubr.msk.bf16.gmra.mrb[140].mxu0 %vm449_vm0, %v7127_v7  ;;  %v674_v38 = vpop.f32.mrb[38].mxu0 }
 0x13e   : > { %1235 = vmatprep.mubr.bf16.mxu1 %v9655_v2  ;;  %1710 = vmatprep.mubr.bf16.mxu0 %v9655_v2  ;;  %v917_v39 = vpack.c.bf16 %v674_v38, %v670_v36  ;;  %v676_v40 = vpop.f32.mrb[39].mxu0 }
 0x13f   : > { %v918_v41 = vpack.c.bf16 %v676_v40, %v672_v37 }
 0x141   : > { %2156 = vmatprep.subr.bf16.mxu0 %v918_v41 }
 0x142   : > { %2157 = vmatpush1.bf16.msra.mxu0 %v917_v39 }
 0x143   : > { %v7302_v51 = vpop.f32.mrb[40].mxu0 }
 0x144   : > { %v682_v52 = vpop.f32.mrb[41].mxu0 }
 0x145   : > { %5446 = vmatmul.mubr.msk.bf16.gmra.mrb[32].mxu1 %vm449_vm0, %v7198_v42  ;;  %5538 = vmatmul.mubr.msk.bf16.gmra.mrb[144].mxu0 %vm449_vm0, %v7136_v14  ;;  %v7306_v53 = vpop.f32.mrb[42].mxu0 }
 0x146   : > { %1245 = vmatprep.mubr.bf16.mxu1 %v9655_v2  ;;  %1720 = vmatprep.mubr.bf16.mxu0 %v9655_v2  ;;  %v919_v55 = vpack.c.bf16 %v7306_v53, %v7302_v51  ;;  %v686_v56 = vpop.f32.mrb[43].mxu0 }
 0x147   : > { %v920_v57 = vpack.c.bf16 %v686_v56, %v682_v52 }
 0x14b   : > { %v7310_v58 = vpop.f32.mrb[44].mxu0 }
 0x14c   : > { %v7312_v59 = vpop.f32.mrb[45].mxu0 }
 0x14d   : > { %5447 = vmatmul.mubr.msk.bf16.gmra.mrb[36].mxu1 %vm449_vm0, %v7209_v43  ;;  %5539 = vmatmul.mubr.msk.bf16.gmra.mrb[148].mxu0 %vm449_vm0, %v7153_v21  ;;  %v7314_v60 = vpop.f32.mrb[46].mxu0 }
 0x14e   : > { %1255 = vmatprep.mubr.bf16.mxu1 %v9655_v2  ;;  %1730 = vmatprep.mubr.bf16.mxu0 %v9655_v2  ;;  %v921_v61 = vpack.c.bf16 %v7314_v60, %v7310_v58  ;;  %v7322_v63 = vpop.f32.mrb[47].mxu0 }
 0x14f   : > { %v922_v0 = vpack.c.bf16 %v7322_v63, %v7312_v59 }
 0x153   : > { %v700_v1 = vpop.f32.mrb[48].mxu0 }
 0x154   : > { %v702_v3 = vpop.f32.mrb[49].mxu0 }
 0x155   : > { %5448 = vmatmul.mubr.msk.bf16.gmra.mrb[40].mxu1 %vm449_vm0, %v7220_v44  ;;  %5540 = vmatmul.mubr.msk.bf16.gmra.mrb[152].mxu0 %vm449_vm0, %v7176_v28  ;;  %v704_v4 = vpop.f32.mrb[50].mxu0 }
 0x156   : > { %1265 = vmatprep.mubr.bf16.mxu1 %v9655_v2  ;;  %1740 = vmatprep.mubr.bf16.mxu0 %v9655_v2  ;;  %v923_v5 = vpack.c.bf16 %v704_v4, %v700_v1  ;;  %v706_v6 = vpop.f32.mrb[51].mxu0 }
 0x157   : > { %v924_v8 = vpack.c.bf16 %v706_v6, %v702_v3 }
 0x159   : > { %2670 = vmatprep.subr.bf16.mxu0 %v924_v8 }
 0x15b   : > { %v710_v9 = vpop.f32.mrb[52].mxu0 }
 0x15c   : > { %v712_v10 = vpop.f32.mrb[53].mxu0 }
 0x15d   : > { %5449 = vmatmul.mubr.msk.bf16.gmra.mrb[44].mxu1 %vm449_vm0, %v7231_v45  ;;  %5541 = vmatmul.mubr.msk.bf16.gmra.mrb[156].mxu0 %vm449_vm0, %v7187_v35  ;;  %v714_v11 = vpop.f32.mrb[54].mxu0 }
 0x15e   : > { %1275 = vmatprep.mubr.bf16.mxu1 %v9655_v2  ;;  %1750 = vmatprep.mubr.bf16.mxu0 %v9655_v2  ;;  %v925_v12 = vpack.c.bf16 %v714_v11, %v710_v9  ;;  %v716_v13 = vpop.f32.mrb[55].mxu0 }
 0x15f   : > { %v926_v15 = vpack.c.bf16 %v716_v13, %v712_v10 }
 0x163   : > { %v7362_v16 = vpop.f32.mrb[56].mxu0 }
 0x164   : > { %v7366_v17 = vpop.f32.mrb[57].mxu0 }
 0x165   : > { %5450 = vmatmul.mubr.msk.bf16.gmra.mrb[48].mxu1 %vm449_vm0, %v7242_v47  ;;  %5542 = vmatmul.mubr.msk.bf16.gmra.mrb[160].mxu0 %vm449_vm0, %v7198_v42 }
 0x166   : > { %1285 = vmatprep.mubr.bf16.mxu1 %v9655_v2  ;;  %1760 = vmatprep.mubr.bf16.mxu0 %v9655_v2 }
 0x16d   : > { %5451 = vmatmul.mubr.msk.bf16.gmra.mrb[52].mxu1 %vm449_vm0, %v7253_v48  ;;  %5543 = vmatmul.mubr.msk.bf16.gmra.mrb[164].mxu0 %vm449_vm0, %v7209_v43 }
 0x16e   : > { %1295 = vmatprep.mubr.bf16.mxu1 %v9655_v2  ;;  %1770 = vmatprep.mubr.bf16.mxu0 %v9655_v2 }
 0x175   : > { %5452 = vmatmul.mubr.msk.bf16.gmra.mrb[56].mxu1 %vm449_vm0, %v7264_v49  ;;  %5544 = vmatmul.mubr.msk.bf16.gmra.mrb[168].mxu0 %vm449_vm0, %v7220_v44 }
 0x176   : > { %1305 = vmatprep.mubr.bf16.mxu1 %v9655_v2  ;;  %1780 = vmatprep.mubr.bf16.mxu0 %v9655_v2 }
 0x17d   : > { %5453 = vmatmul.mubr.msk.bf16.gmra.mrb[60].mxu1 %vm449_vm0, %v7275_v50  ;;  %5545 = vmatmul.mubr.msk.bf16.gmra.mrb[172].mxu0 %vm449_vm0, %v7231_v45 }
 0x17e   : > { %1412 = vmatprep.mubr.bf16.mxu1 %v9655_v2  ;;  %1790 = vmatprep.mubr.bf16.mxu0 %v9655_v2 }
 0x185   : > { %5454 = vmatmul.mubr.msk.bf16.vlgmr.msra.gmra.mrb[64].mxu1 %vm449_vm0, %v7094_v46  ;;  %5546 = vmatmul.mubr.msk.bf16.gmra.mrb[176].mxu0 %vm449_vm0, %v7242_v47 }
 0x186   : > { %1422 = vmatprep.mubr.bf16.mxu1 %v9655_v2  ;;  %1800 = vmatprep.mubr.bf16.mxu0 %v9655_v2 }
 0x187   : > { %1897 = vmatpush1.bf16.msra.mxu1 %v911_v18  ;;  %v7368_v18 = vpop.f32.mrb[58].mxu0 }
 0x188   : > { %1898 = vmatprep.subr.bf16.mxu1 %v914_v27  ;;  %v7370_v19 = vpop.f32.mrb[59].mxu0 }
 0x189   : > { %v928_v22 = vpack.c.bf16 %v7370_v19, %v7366_v17  ;;  %v7380_v23 = vpop.f32.mrb[60].mxu0 }
 0x18a   : > { %v7384_v24 = vpop.f32.mrb[61].mxu0 }
 0x18b   : > { %1899 = vmatpush1.bf16.msra.mxu1 %v913_v25  ;;  %v7386_v25 = vpop.f32.mrb[62].mxu0 }
 0x18c   : > { %2412 = vmatprep.subr.bf16.mxu1 %v920_v57  ;;  %v7389_v26 = vpop.f32.mrb[63].mxu0 }
 0x18d   : > { %5455 = vmatmul.mubr.msk.bf16.gmra.mrb[68].mxu1 %vm449_vm0, %v7105_v54  ;;  %5547 = vmatmul.mubr.msk.bf16.gmra.mrb[180].mxu0 %vm449_vm0, %v7253_v48  ;;  %v7397_v30 = vpop.f32.mrb[64].mxu0 }
 0x18e   : > { %1432 = vmatprep.mubr.bf16.mxu1 %v9655_v2  ;;  %1810 = vmatprep.mubr.bf16.mxu0 %v9655_v2  ;;  %v742_v31 = vpop.f32.mrb[65].mxu0 }
 0x18f   : > { %v7405_v32 = vpop.f32.mrb[66].mxu0 }
 0x190   : > { %v746_v33 = vpop.f32.mrb[67].mxu0 }
 0x191   : > { %v932_v36 = vpack.c.bf16 %v746_v33, %v742_v31  ;;  %v7415_v41 = vpop.f32.mrb[68].mxu0 }
 0x192   : > { %v7421_v52 = vpop.f32.mrb[69].mxu0 }
 0x193   : > { %v7425_v56 = vpop.f32.mrb[70].mxu0 }
 0x194   : > { %v7427_v57 = vpop.f32.mrb[71].mxu0 }
 0x195   : > { %5456 = vmatmul.mubr.msk.bf16.gmra.mrb[72].mxu1 %vm449_vm0, %v7116_v62  ;;  %5548 = vmatmul.mubr.msk.bf16.gmra.mrb[184].mxu0 %vm449_vm0, %v7264_v49  ;;  %v7441_v9 = vpop.f32.mrb[72].mxu0 }
 0x196   : > { %1442 = vmatprep.mubr.bf16.mxu1 %v9655_v2  ;;  %1820 = vmatprep.mubr.bf16.mxu0 %v9655_v2  ;;  %v7445_v10 = vpop.f32.mrb[73].mxu0 }
 0x197   : > { %v7447_v11 = vpop.f32.mrb[74].mxu0 }
 0x198   : > { %v7449_v13 = vpop.f32.mrb[75].mxu0 }
 0x19d   : > { %5457 = vmatmul.mubr.msk.bf16.gmra.mrb[76].mxu1 %vm449_vm0, %v7127_v7  ;;  %5549 = vmatmul.mubr.msk.bf16.gmra.mrb[188].mxu0 %vm449_vm0, %v7275_v50 }
 0x19e   : > { %1452 = vmatprep.mubr.bf16.mxu1 %v9655_v2  ;;  %2186 = vmatprep.mubr.bf16.mxu0 %v9655_v2 }
 0x1a5   : > { %5458 = vmatmul.mubr.msk.bf16.gmra.mrb[80].mxu1 %vm449_vm0, %v7136_v14  ;;  %5694 = vmatmul.mubr.msk.bf16.vlgmr.msra.gmra.mrb[192].mxu0 %vm449_vm0, %v7094_v46 }
 0x1a6   : > { %1462 = vmatprep.mubr.bf16.mxu1 %v9655_v2  ;;  %2196 = vmatprep.mubr.bf16.mxu0 %v9655_v2 }
 0x1a7   : > { %2671 = vmatpush1.bf16.msra.mxu0 %v923_v5 }
 0x1a8   : > { %2672 = vmatprep.subr.bf16.mxu0 %v926_v15 }
 0x1ab   : > { %2673 = vmatpush1.bf16.msra.mxu0 %v925_v12 }
 0x1ac   : > { %3186 = vmatprep.subr.bf16.mxu0 %v932_v36 }
 0x1ad   : > { %5459 = vmatmul.mubr.msk.bf16.gmra.mrb[84].mxu1 %vm449_vm0, %v7153_v21  ;;  %5695 = vmatmul.mubr.msk.bf16.gmra.mrb[196].mxu0 %vm449_vm0, %v7105_v54 }
 0x1ae   : > { %1472 = vmatprep.mubr.bf16.mxu1 %v9655_v2  ;;  %2206 = vmatprep.mubr.bf16.mxu0 %v9655_v2 }
 0x1b5   : > { %5460 = vmatmul.mubr.msk.bf16.gmra.mrb[88].mxu1 %vm449_vm0, %v7176_v28  ;;  %5696 = vmatmul.mubr.msk.bf16.gmra.mrb[200].mxu0 %vm449_vm0, %v7116_v62 }
 0x1b6   : > { %1482 = vmatprep.mubr.bf16.mxu1 %v9655_v2  ;;  %2216 = vmatprep.mubr.bf16.mxu0 %v9655_v2 }
 0x1bd   : > { %5461 = vmatmul.mubr.msk.bf16.gmra.mrb[92].mxu1 %vm449_vm0, %v7187_v35  ;;  %5697 = vmatmul.mubr.msk.bf16.gmra.mrb[204].mxu0 %vm449_vm0, %v7127_v7 }
 0x1be   : > { %1492 = vmatprep.mubr.bf16.mxu1 %v9655_v2  ;;  %2226 = vmatprep.mubr.bf16.mxu0 %v9655_v2 }
 0x1c5   : > { %5462 = vmatmul.mubr.msk.bf16.gmra.mrb[96].mxu1 %vm449_vm0, %v7198_v42  ;;  %5698 = vmatmul.mubr.msk.bf16.gmra.mrb[208].mxu0 %vm449_vm0, %v7136_v14 }
 0x1c6   : > { %1502 = vmatprep.mubr.bf16.mxu1 %v9655_v2  ;;  %2236 = vmatprep.mubr.bf16.mxu0 %v9655_v2 }
 0x1cd   : > { %5463 = vmatmul.mubr.msk.bf16.gmra.mrb[100].mxu1 %vm449_vm0, %v7209_v43  ;;  %5699 = vmatmul.mubr.msk.bf16.gmra.mrb[212].mxu0 %vm449_vm0, %v7153_v21 }
 0x1ce   : > { %1512 = vmatprep.mubr.bf16.mxu1 %v9655_v2  ;;  %2246 = vmatprep.mubr.bf16.mxu0 %v9655_v2 }
 0x1d5   : > { %5464 = vmatmul.mubr.msk.bf16.gmra.mrb[104].mxu1 %vm449_vm0, %v7220_v44  ;;  %5700 = vmatmul.mubr.msk.bf16.gmra.mrb[216].mxu0 %vm449_vm0, %v7176_v28 }
 0x1d6   : > { %1522 = vmatprep.mubr.bf16.mxu1 %v9655_v2  ;;  %2256 = vmatprep.mubr.bf16.mxu0 %v9655_v2 }
 0x1d8   : > { %v1157_v34 = vpop.f32.mrb[0].mxu1 }
 0x1d9   : > { %1316 = vst [vmem:[%s7407_s18] sm:$0xff] %v1157_v34  ;;  %v1159_v37 = vpop.f32.mrb[1].mxu1 }
 0x1da   : > { %1317 = vst [vmem:[%s7407_s18 + $0x8] sm:$0xff] %v1159_v37  ;;  %v1161_v39 = vpop.f32.mrb[2].mxu1  ;;  %v7463_v37 = vpop.f32.mrb[76].mxu0 }
 0x1db   : > { %1318 = vst [vmem:[%s7407_s18 + $0x10] sm:$0xff] %v1161_v39  ;;  %v1163_v40 = vpop.f32.mrb[3].mxu1  ;;  %v7467_v39 = vpop.f32.mrb[77].mxu0 }
 0x1dc   : > { %1319 = vst [vmem:[%s7407_s18 + $0x18] sm:$0xff] %v1163_v40  ;;  %v7469_v40 = vpop.f32.mrb[78].mxu0 }
 0x1dd   : > { %5465 = vmatmul.mubr.msk.bf16.gmra.mrb[108].mxu1 %vm449_vm0, %v7231_v45  ;;  %5701 = vmatmul.mubr.msk.bf16.gmra.mrb[220].mxu0 %vm449_vm0, %v7187_v35 }
 0x1de   : > { %1532 = vmatprep.mubr.bf16.mxu1 %v9655_v2  ;;  %2266 = vmatprep.mubr.bf16.mxu0 %v9655_v2 }
 0x1e0   : > { %v1167_v1 = vpop.f32.mrb[4].mxu1 }
 0x1e1   : > { %1320 = vst [vmem:[%s7407_s18 + $0x20] sm:$0xff] %v1167_v1  ;;  %v1169_v4 = vpop.f32.mrb[5].mxu1 }
 0x1e2   : > { %1321 = vst [vmem:[%s7407_s18 + $0x28] sm:$0xff] %v1169_v4  ;;  %v1171_v6 = vpop.f32.mrb[6].mxu1  ;;  %v7471_v4 = vpop.f32.mrb[79].mxu0 }
 0x1e3   : > { %1322 = vst [vmem:[%s7407_s18 + $0x30] sm:$0xff] %v1171_v6  ;;  %v1173_v8 = vpop.f32.mrb[7].mxu1 }
 0x1e4   : > { %1323 = vst [vmem:[%s7407_s18 + $0x38] sm:$0xff] %v1173_v8 }
 0x1e5   : > { %5466 = vmatmul.mubr.msk.bf16.gmra.mrb[112].mxu1 %vm449_vm0, %v7242_v47  ;;  %5702 = vmatmul.mubr.msk.bf16.gmra.mrb[224].mxu0 %vm449_vm0, %v7198_v42 }
 0x1e6   : > { %1542 = vmatprep.mubr.bf16.mxu1 %v9655_v2  ;;  %2276 = vmatprep.mubr.bf16.mxu0 %v9655_v2 }
 0x1e8   : > { %v1177_v12 = vpop.f32.mrb[8].mxu1 }
 0x1e9   : > { %1324 = vst [vmem:[%s7407_s18 + $0x40] sm:$0xff] %v1177_v12  ;;  %v1179_v15 = vpop.f32.mrb[9].mxu1 }
 0x1ea   : > { %1325 = vst [vmem:[%s7407_s18 + $0x48] sm:$0xff] %v1179_v15  ;;  %v1181_v34 = vpop.f32.mrb[10].mxu1 }
 0x1eb   : > { %1326 = vst [vmem:[%s7407_s18 + $0x50] sm:$0xff] %v1181_v34  ;;  %v1183_v36 = vpop.f32.mrb[11].mxu1 }
 0x1ec   : > { %1327 = vst [vmem:[%s7407_s18 + $0x58] sm:$0xff] %v1183_v36  ;;  %v7487_v36 = vpop.f32.mrb[80].mxu0 }
 0x1ed   : > { %5467 = vmatmul.mubr.msk.bf16.gmra.mrb[116].mxu1 %vm449_vm0, %v7253_v48  ;;  %5703 = vmatmul.mubr.msk.bf16.gmra.mrb[228].mxu0 %vm449_vm0, %v7209_v43 }
 0x1ee   : > { %1552 = vmatprep.mubr.bf16.mxu1 %v9655_v2  ;;  %2286 = vmatprep.mubr.bf16.mxu0 %v9655_v2 }
 0x1f0   : > { %v1187_v1 = vpop.f32.mrb[12].mxu1 }
 0x1f1   : > { %1328 = vst [vmem:[%s7407_s18 + $0x60] sm:$0xff] %v1187_v1  ;;  %v1189_v6 = vpop.f32.mrb[13].mxu1  ;;  %v7489_v1 = vpop.f32.mrb[81].mxu0 }
 0x1f2   : > { %1329 = vst [vmem:[%s7407_s18 + $0x68] sm:$0xff] %v1189_v6  ;;  %v1191_v15 = vpop.f32.mrb[14].mxu1 }
 0x1f3   : > { %1330 = vst [vmem:[%s7407_s18 + $0x70] sm:$0xff] %v1191_v15  ;;  %v1193_v34 = vpop.f32.mrb[15].mxu1  ;;  %v7491_v15 = vpop.f32.mrb[82].mxu0 }
 0x1f4   : > { %1331 = vst [vmem:[%s7407_s18 + $0x78] sm:$0xff] %v1193_v34  ;;  %v7494_v8 = vpop.f32.mrb[83].mxu0 }
 0x1f5   : > { %5468 = vmatmul.mubr.msk.bf16.gmra.mrb[120].mxu1 %vm449_vm0, %v7264_v49  ;;  %5704 = vmatmul.mubr.msk.bf16.gmra.mrb[232].mxu0 %vm449_vm0, %v7220_v44 }
 0x1f6   : > { %1562 = vmatprep.mubr.bf16.mxu1 %v9655_v2  ;;  %2296 = vmatprep.mubr.bf16.mxu0 %v9655_v2 }
 0x1f8   : > { %v1197_v6 = vpop.f32.mrb[16].mxu1 }
 0x1f9   : > { %1332 = vst [vmem:[%s7407_s18 + $0x80] sm:$0xff] %v1197_v6  ;;  %v1199_v34 = vpop.f32.mrb[17].mxu1  ;;  %v7509_v6 = vpop.f32.mrb[84].mxu0 }
 0x1fa   : > { %1333 = vst [vmem:[%s7407_s18 + $0x88] sm:$0xff] %v1199_v34  ;;  %v1201_v12 = vpop.f32.mrb[18].mxu1  ;;  %v7511_v34 = vpop.f32.mrb[85].mxu0 }
 0x1fb   : > { %1334 = vst [vmem:[%s7407_s18 + $0x90] sm:$0xff] %v1201_v12  ;;  %v1203_v27 = vpop.f32.mrb[19].mxu1  ;;  %v7513_v12 = vpop.f32.mrb[86].mxu0 }
 0x1fc   : > { %1335 = vst [vmem:[%s7407_s18 + $0x98] sm:$0xff] %v1203_v27  ;;  %v7516_v29 = vpop.f32.mrb[87].mxu0 }
 0x1fd   : > { %5469 = vmatmul.mubr.msk.bf16.gmra.mrb[124].mxu1 %vm449_vm0, %v7275_v50  ;;  %5705 = vmatmul.mubr.msk.bf16.gmra.mrb[236].mxu0 %vm449_vm0, %v7231_v45 }
 0x1fe   : > { %1928 = vmatprep.mubr.bf16.mxu1 %v9655_v2  ;;  %2306 = vmatprep.mubr.bf16.mxu0 %v9655_v2 }
 0x200   : > { %v1207_v31 = vpop.f32.mrb[20].mxu1 }
 0x201   : > { %1336 = vst [vmem:[%s7407_s18 + $0xa0] sm:$0xff] %v1207_v31  ;;  %v1209_v27 = vpop.f32.mrb[21].mxu1  ;;  %v7531_v31 = vpop.f32.mrb[88].mxu0 }
 0x202   : > { %1337 = vst [vmem:[%s7407_s18 + $0xa8] sm:$0xff] %v1209_v27  ;;  %v1211_v20 = vpop.f32.mrb[22].mxu1  ;;  %9672 = vst [vmem:[#allocation5_spill] sm:$0xff] %v7531_v31 }
 0x203   : > { %1338 = vst [vmem:[%s7407_s18 + $0xb0] sm:$0xff] %v1211_v20  ;;  %v1213_v3 = vpop.f32.mrb[23].mxu1  ;;  %v7536_v20 = vpop.f32.mrb[89].mxu0 }
 0x204   : > { %1339 = vst [vmem:[%s7407_s18 + $0xb8] sm:$0xff] %v1213_v3  ;;  %v7541_v27 = vpop.f32.mrb[90].mxu0 }
 0x205   : > { %5614 = vmatmul.mubr.msk.bf16.vlgmr.msra.gmra.mrb[128].mxu1 %vm449_vm0, %v7094_v46  ;;  %5706 = vmatmul.mubr.msk.bf16.gmra.mrb[240].mxu0 %vm449_vm0, %v7242_v47  ;;  %v7544_v5 = vpop.f32.mrb[91].mxu0 }
 0x206   : > { %1938 = vmatprep.mubr.bf16.mxu1 %v9655_v2  ;;  %2316 = vmatprep.mubr.bf16.mxu0 %v9655_v2  ;;  %v7565_v59 = vpop.f32.mrb[92].mxu0 }
 0x207   : > { %2413 = vmatpush1.bf16.msra.mxu1 %v919_v55  ;;  %9673 = vst [vmem:[#allocation6_spill] sm:$0xff] %v7565_v59  ;;  %v7567_v58 = vpop.f32.mrb[93].mxu0  ;;  %v9679_v59 = vpack.c.bf16 %v7405_v32, %v7397_v30 }
 0x208   : > { %v1217_v3 = vpop.f32.mrb[24].mxu1  ;;  %2414 = vmatprep.subr.bf16.mxu1 %v922_v0  ;;  %9674 = vst [vmem:[#allocation7_spill] sm:$0xff] %v7567_v58 }
 0x209   : > { %1340 = vst [vmem:[%s7407_s18 + $0xc0] sm:$0xff] %v1217_v3  ;;  %v1219_v33 = vpop.f32.mrb[25].mxu1 }
 0x20a   : > { %1341 = vst [vmem:[%s7407_s18 + $0xc8] sm:$0xff] %v1219_v33  ;;  %v1221_v38 = vpop.f32.mrb[26].mxu1 }
 0x20b   : > { %1342 = vst [vmem:[%s7407_s18 + $0xd0] sm:$0xff] %v1221_v38  ;;  %v1223_v55 = vpop.f32.mrb[27].mxu1  ;;  %2415 = vmatpush1.bf16.msra.mxu1 %v921_v61  ;;  %v7569_v61 = vpop.f32.mrb[94].mxu0 }
 0x20c   : > { %1343 = vst [vmem:[%s7407_s18 + $0xd8] sm:$0xff] %v1223_v55  ;;  %2928 = vmatprep.subr.bf16.mxu1 %v928_v22  ;;  %9675 = vst [vmem:[#allocation8_spill] sm:$0xff] %v7569_v61  ;;  %v7572_v0 = vpop.f32.mrb[95].mxu0 }
 0x20d   : > { %5615 = vmatmul.mubr.msk.bf16.gmra.mrb[132].mxu1 %vm449_vm0, %v7105_v54  ;;  %5707 = vmatmul.mubr.msk.bf16.gmra.mrb[244].mxu0 %vm449_vm0, %v7253_v48  ;;  %9676 = vst [vmem:[#allocation9_spill] sm:$0xff] %v7572_v0  ;;  %v7587_v33 = vpop.f32.mrb[96].mxu0 }
 0x20e   : > { %1948 = vmatprep.mubr.bf16.mxu1 %v9655_v2  ;;  %2326 = vmatprep.mubr.bf16.mxu0 %v9655_v2  ;;  %v7589_v3 = vpop.f32.mrb[97].mxu0 }
 0x210   : > { %v1227_v60 = vpop.f32.mrb[28].mxu1 }
 0x211   : > { %1344 = vst [vmem:[%s7407_s18 + $0xe0] sm:$0xff] %v1227_v60  ;;  %v1229_v63 = vpop.f32.mrb[29].mxu1  ;;  %v7591_v60 = vpop.f32.mrb[98].mxu0 }
 0x212   : > { %1345 = vst [vmem:[%s7407_s18 + $0xe8] sm:$0xff] %v1229_v63  ;;  %v1231_v17 = vpop.f32.mrb[30].mxu1 }
 0x213   : > { %1346 = vst [vmem:[%s7407_s18 + $0xf0] sm:$0xff] %v1231_v17  ;;  %v1233_v38 = vpop.f32.mrb[31].mxu1  ;;  %v7594_v17 = vpop.f32.mrb[99].mxu0 }
 0x214   : > { %1347 = vst [vmem:[%s7407_s18 + $0xf8] sm:$0xff] %v1233_v38 }
 0x215   : > { %5616 = vmatmul.mubr.msk.bf16.gmra.mrb[136].mxu1 %vm449_vm0, %v7116_v62  ;;  %5708 = vmatmul.mubr.msk.bf16.gmra.mrb[248].mxu0 %vm449_vm0, %v7264_v49 }
 0x216   : > { %1958 = vmatprep.mubr.bf16.mxu1 %v9655_v2  ;;  %2336 = vmatprep.mubr.bf16.mxu0 %v9655_v2 }
 0x218   : > { %v1237_v55 = vpop.f32.mrb[32].mxu1 }
 0x219   : > { %1348 = vst [vmem:[%s7407_s18 + $0x100] sm:$0xff] %v1237_v55  ;;  %v1239_v63 = vpop.f32.mrb[33].mxu1  ;;  %v7609_v55 = vpop.f32.mrb[100].mxu0 }
 0x21a   : > { %1349 = vst [vmem:[%s7407_s18 + $0x108] sm:$0xff] %v1239_v63  ;;  %v1241_v38 = vpop.f32.mrb[34].mxu1  ;;  %v7611_v63 = vpop.f32.mrb[101].mxu0 }
 0x21b   : > { %1350 = vst [vmem:[%s7407_s18 + $0x110] sm:$0xff] %v1241_v38  ;;  %v1243_v51 = vpop.f32.mrb[35].mxu1  ;;  %v7613_v38 = vpop.f32.mrb[102].mxu0 }
 0x21c   : > { %1351 = vst [vmem:[%s7407_s18 + $0x118] sm:$0xff] %v1243_v51  ;;  %v7616_v53 = vpop.f32.mrb[103].mxu0 }
 0x21d   : > { %5617 = vmatmul.mubr.msk.bf16.gmra.mrb[140].mxu1 %vm449_vm0, %v7127_v7  ;;  %5709 = vmatmul.mubr.msk.bf16.gmra.mrb[252].mxu0 %vm449_vm0, %v7275_v50 }
 0x21e   : > { %1968 = vmatprep.mubr.bf16.mxu1 %v9655_v2  ;;  %2702 = vmatprep.mubr.bf16.mxu0 %v9655_v2  ;;  %v9680_v2 = vpack.c.bf16 %v7427_v57, %v7421_v52  ;;  %v9682_v52 = vpack.c.bf16 %v7494_v8, %v7489_v1 }
 0x220   : > { %v1247_v19 = vpop.f32.mrb[36].mxu1 }
 0x221   : > { %1352 = vst [vmem:[%s7407_s18 + $0x120] sm:$0xff] %v1247_v19  ;;  %v1249_v51 = vpop.f32.mrb[37].mxu1  ;;  %v9677_v19 = vmov 0  }
 0x222   : > { %1353 = vst [vmem:[%s7407_s18 + $0x128] sm:$0xff] %v1249_v51  ;;  %v1251_v22 = vpop.f32.mrb[38].mxu1  ;;  %v7631_v51 = vpop.f32.mrb[104].mxu0 }
 0x223   : > { %1354 = vst [vmem:[%s7407_s18 + $0x130] sm:$0xff] %v1251_v22  ;;  %v1253_v61 = vpop.f32.mrb[39].mxu1  ;;  %9678 = vst [vmem:[#allocation10_spill] sm:$0xff] %v7631_v51  ;;  %v7636_v22 = vpop.f32.mrb[105].mxu0 }
 0x224   : > { %1355 = vst [vmem:[%s7407_s18 + $0x138] sm:$0xff] %v1253_v61 }
 0x225   : > { %5618 = vmatmul.mubr.msk.bf16.gmra.mrb[144].mxu1 %vm449_vm0, %v7136_v14  ;;  %5854 = vmatmul.mubr.msk.bf16.vlgmr.msra.gmra.mrb[0].mxu0 %vm449_vm0, %v7094_v46  ;;  %v7641_v46 = vpop.f32.mrb[106].mxu0 }
 0x226   : > { %1978 = vmatprep.mubr.bf16.mxu1 %v9677_v19  ;;  %2712 = vmatprep.mubr.bf16.mxu0 %v9677_v19  ;;  %v7644_v0 = vpop.f32.mrb[107].mxu0 }
 0x227   : > { %3187 = vmatpush1.bf16.msra.mxu0 %v9679_v59  ;;  %v7665_v57 = vpop.f32.mrb[108].mxu0 }
 0x228   : > { %v1257_v61 = vpop.f32.mrb[40].mxu1  ;;  %3188 = vmatprep.subr.bf16.mxu0 %v9680_v2  ;;  %v9681_v2 = vpack.c.bf16 %v7425_v56, %v7415_v41  ;;  %9683 = vst [vmem:[#allocation11_spill] sm:$0xff] %v7665_v57  ;;  %v7667_v41 = vpop.f32.mrb[109].mxu0 }
 0x229   : > { %1356 = vst [vmem:[%s7407_s18 + $0x140] sm:$0xff] %v1257_v61  ;;  %v1259_v58 = vpop.f32.mrb[41].mxu1  ;;  %9684 = vst [vmem:[#allocation12_spill] sm:$0xff] %v7667_v41 }
 0x22a   : > { %1357 = vst [vmem:[%s7407_s18 + $0x148] sm:$0xff] %v1259_v58  ;;  %v1261_v31 = vpop.f32.mrb[42].mxu1 }
 0x22b   : > { %1358 = vst [vmem:[%s7407_s18 + $0x150] sm:$0xff] %v1261_v31  ;;  %v1263_v59 = vpop.f32.mrb[43].mxu1  ;;  %3189 = vmatpush1.bf16.msra.mxu0 %v9681_v2  ;;  %v7669_v31 = vpop.f32.mrb[110].mxu0 }
 0x22c   : > { %1359 = vst [vmem:[%s7407_s18 + $0x158] sm:$0xff] %v1263_v59  ;;  %3702 = vmatprep.subr.bf16.mxu0 %v9682_v52  ;;  %9685 = vst [vmem:[#allocation13_spill] sm:$0xff] %v7669_v31  ;;  %v7672_v1 = vpop.f32.mrb[111].mxu0 }
 0x22d   : > { %5619 = vmatmul.mubr.msk.bf16.gmra.mrb[148].mxu1 %vm449_vm0, %v7153_v21  ;;  %5855 = vmatmul.mubr.msk.bf16.gmra.mrb[4].mxu0 %vm449_vm0, %v7105_v54  ;;  %9686 = vst [vmem:[#allocation14_spill] sm:$0xff] %v7672_v1  ;;  %v7687_v2 = vpop.f32.mrb[112].mxu0 }
 0x22e   : > { %1988 = vmatprep.mubr.bf16.mxu1 %v9677_v19  ;;  %2722 = vmatprep.mubr.bf16.mxu0 %v9677_v19  ;;  %v7689_v52 = vpop.f32.mrb[113].mxu0 }
 0x230   : > { %v1267_v56 = vpop.f32.mrb[44].mxu1 }
 0x231   : > { %1360 = vst [vmem:[%s7407_s18 + $0x160] sm:$0xff] %v1267_v56  ;;  %v1269_v8 = vpop.f32.mrb[45].mxu1 }
 0x232   : > { %1361 = vst [vmem:[%s7407_s18 + $0x168] sm:$0xff] %v1269_v8  ;;  %v1271_v58 = vpop.f32.mrb[46].mxu1  ;;  %v7691_v8 = vpop.f32.mrb[114].mxu0 }
 0x233   : > { %1362 = vst [vmem:[%s7407_s18 + $0x170] sm:$0xff] %v1271_v58  ;;  %v1273_v59 = vpop.f32.mrb[47].mxu1 }
 0x234   : > { %1363 = vst [vmem:[%s7407_s18 + $0x178] sm:$0xff] %v1273_v59  ;;  %v7694_v59 = vpop.f32.mrb[115].mxu0 }
 0x235   : > { %5620 = vmatmul.mubr.msk.bf16.gmra.mrb[152].mxu1 %vm449_vm0, %v7176_v28  ;;  %5856 = vmatmul.mubr.msk.bf16.gmra.mrb[8].mxu0 %vm449_vm0, %v7116_v62 }
 0x236   : > { %1998 = vmatprep.mubr.bf16.mxu1 %v9677_v19  ;;  %2732 = vmatprep.mubr.bf16.mxu0 %v9677_v19 }
 0x238   : > { %v1277_v56 = vpop.f32.mrb[48].mxu1 }
 0x239   : > { %1364 = vst [vmem:[%s7407_s18 + $0x180] sm:$0xff] %v1277_v56  ;;  %v1279_v58 = vpop.f32.mrb[49].mxu1  ;;  %v7709_v56 = vpop.f32.mrb[116].mxu0 }
 0x23a   : > { %1365 = vst [vmem:[%s7407_s18 + $0x188] sm:$0xff] %v1279_v58  ;;  %v1281_v54 = vpop.f32.mrb[50].mxu1  ;;  %v7711_v58 = vpop.f32.mrb[117].mxu0 }
 0x23b   : > { %1366 = vst [vmem:[%s7407_s18 + $0x190] sm:$0xff] %v1281_v54  ;;  %v1283_v30 = vpop.f32.mrb[51].mxu1  ;;  %v7713_v54 = vpop.f32.mrb[118].mxu0 }
 0x23c   : > { %1367 = vst [vmem:[%s7407_s18 + $0x198] sm:$0xff] %v1283_v30  ;;  %v7716_v32 = vpop.f32.mrb[119].mxu0 }
 0x23d   : > { %5621 = vmatmul.mubr.msk.bf16.gmra.mrb[156].mxu1 %vm449_vm0, %v7187_v35  ;;  %5857 = vmatmul.mubr.msk.bf16.gmra.mrb[12].mxu0 %vm449_vm0, %v7127_v7 }
 0x23e   : > { %2008 = vmatprep.mubr.bf16.mxu1 %v9677_v19  ;;  %2742 = vmatprep.mubr.bf16.mxu0 %v9677_v19 }
 0x240   : > { %v1287_v62 = vpop.f32.mrb[52].mxu1 }
 0x241   : > { %1368 = vst [vmem:[%s7407_s18 + $0x1a0] sm:$0xff] %v1287_v62  ;;  %v1289_v30 = vpop.f32.mrb[53].mxu1  ;;  %v7731_v62 = vpop.f32.mrb[120].mxu0 }
 0x242   : > { %1369 = vst [vmem:[%s7407_s18 + $0x1a8] sm:$0xff] %v1289_v30  ;;  %v1291_v61 = vpop.f32.mrb[54].mxu1  ;;  %9687 = vst [vmem:[#allocation15_spill] sm:$0xff] %v7731_v62  ;;  %v7733_v30 = vpop.f32.mrb[121].mxu0 }
 0x243   : > { %1370 = vst [vmem:[%s7407_s18 + $0x1b0] sm:$0xff] %v1291_v61  ;;  %v1293_v31 = vpop.f32.mrb[55].mxu1  ;;  %9688 = vst [vmem:[#allocation16_spill] sm:$0xff] %v7733_v30  ;;  %v7735_v61 = vpop.f32.mrb[122].mxu0 }
 0x244   : > { %1371 = vst [vmem:[%s7407_s18 + $0x1b8] sm:$0xff] %v1293_v31  ;;  %9689 = vst [vmem:[#allocation17_spill] sm:$0xff] %v7735_v61  ;;  %v7738_v57 = vpop.f32.mrb[123].mxu0 }
 0x245   : > { %5622 = vmatmul.mubr.msk.bf16.gmra.mrb[160].mxu1 %vm449_vm0, %v7198_v42  ;;  %5858 = vmatmul.mubr.msk.bf16.gmra.mrb[16].mxu0 %vm449_vm0, %v7136_v14 }
 0x246   : > { %2018 = vmatprep.mubr.bf16.mxu1 %v9677_v19  ;;  %2752 = vmatprep.mubr.bf16.mxu0 %v9677_v19 }
 0x248   : > { %v1297_v7 = vpop.f32.mrb[56].mxu1 }
 0x249   : > { %1372 = vst [vmem:[%s7407_s18 + $0x1c0] sm:$0xff] %v1297_v7  ;;  %v1299_v31 = vpop.f32.mrb[57].mxu1  ;;  %v7753_v7 = vpop.f32.mrb[124].mxu0 }
 0x24a   : > { %1373 = vst [vmem:[%s7407_s18 + $0x1c8] sm:$0xff] %v1299_v31  ;;  %v1301_v41 = vpop.f32.mrb[58].mxu1  ;;  %9690 = vst [vmem:[#allocation18_spill] sm:$0xff] %v7753_v7  ;;  %v7755_v31 = vpop.f32.mrb[125].mxu0 }
 0x24b   : > { %1374 = vst [vmem:[%s7407_s18 + $0x1d0] sm:$0xff] %v1301_v41  ;;  %v1303_v51 = vpop.f32.mrb[59].mxu1  ;;  %v7757_v41 = vpop.f32.mrb[126].mxu0 }
 0x24c   : > { %1375 = vst [vmem:[%s7407_s18 + $0x1d8] sm:$0xff] %v1303_v51  ;;  %v7760_v1 = vpop.f32.mrb[127].mxu0 }
 0x24d   : > { %5623 = vmatmul.mubr.msk.bf16.gmra.mrb[164].mxu1 %vm449_vm0, %v7209_v43  ;;  %5859 = vmatmul.mubr.msk.bf16.gmra.mrb[20].mxu0 %vm449_vm0, %v7153_v21 }
 0x24e   : > { %2028 = vmatprep.mubr.bf16.mxu1 %v9677_v19  ;;  %2762 = vmatprep.mubr.bf16.mxu0 %v9677_v19 }
 0x250   : > { %v1307_v14 = vpop.f32.mrb[60].mxu1 }
 0x251   : > { %1376 = vst [vmem:[%s7407_s18 + $0x1e0] sm:$0xff] %v1307_v14  ;;  %v1309_v51 = vpop.f32.mrb[61].mxu1  ;;  %v1672_v14 = vpop.f32.mrb[128].mxu0 }
 0x252   : > { %1377 = vst [vmem:[%s7407_s18 + $0x1e8] sm:$0xff] %v1309_v51  ;;  %v1311_v21 = vpop.f32.mrb[62].mxu1  ;;  %5550 = vst [vmem:[%s7407_s18 + $0x400] sm:$0xff] %v1672_v14  ;;  %v1674_v51 = vpop.f32.mrb[129].mxu0 }
 0x253   : > { %1378 = vst [vmem:[%s7407_s18 + $0x1f0] sm:$0xff] %v1311_v21  ;;  %v1313_v30 = vpop.f32.mrb[63].mxu1  ;;  %5551 = vst [vmem:[%s7407_s18 + $0x408] sm:$0xff] %v1674_v51  ;;  %v1676_v62 = vpop.f32.mrb[130].mxu0 }
 0x254   : > { %1379 = vst [vmem:[%s7407_s18 + $0x1f8] sm:$0xff] %v1313_v30  ;;  %5552 = vst [vmem:[%s7407_s18 + $0x410] sm:$0xff] %v1676_v62  ;;  %v1678_v61 = vpop.f32.mrb[131].mxu0 }
 0x255   : > { %5624 = vmatmul.mubr.msk.bf16.gmra.mrb[168].mxu1 %vm449_vm0, %v7220_v44  ;;  %5860 = vmatmul.mubr.msk.bf16.gmra.mrb[24].mxu0 %vm449_vm0, %v7176_v28  ;;  %5553 = vst [vmem:[%s7407_s18 + $0x418] sm:$0xff] %v1678_v61  ;;  %v1682_v62 = vpop.f32.mrb[132].mxu0 }
 0x256   : > { %2038 = vmatprep.mubr.bf16.mxu1 %v9677_v19  ;;  %2772 = vmatprep.mubr.bf16.mxu0 %v9677_v19  ;;  %5554 = vst [vmem:[%s7407_s18 + $0x420] sm:$0xff] %v1682_v62  ;;  %v1684_v61 = vpop.f32.mrb[133].mxu0 }
 0x257   : > { %5555 = vst [vmem:[%s7407_s18 + $0x428] sm:$0xff] %v1684_v61  ;;  %v1686_v51 = vpop.f32.mrb[134].mxu0 }
 0x258   : > { %v1414_v21 = vpop.f32.mrb[64].mxu1  ;;  %5556 = vst [vmem:[%s7407_s18 + $0x430] sm:$0xff] %v1686_v51 }
 0x259   : > { %5470 = vst [vmem:[%s7407_s18 + $0x200] sm:$0xff] %v1414_v21  ;;  %v1416_v30 = vpop.f32.mrb[65].mxu1  ;;  %v1688_v21 = vpop.f32.mrb[135].mxu0 }
 0x25a   : > { %5471 = vst [vmem:[%s7407_s18 + $0x208] sm:$0xff] %v1416_v30  ;;  %v1418_v28 = vpop.f32.mrb[66].mxu1  ;;  %5557 = vst [vmem:[%s7407_s18 + $0x438] sm:$0xff] %v1688_v21 }
 0x25b   : > { %5472 = vst [vmem:[%s7407_s18 + $0x210] sm:$0xff] %v1418_v28  ;;  %v1420_v7 = vpop.f32.mrb[67].mxu1  ;;  %v1692_v28 = vpop.f32.mrb[136].mxu0 }
 0x25c   : > { %5473 = vst [vmem:[%s7407_s18 + $0x218] sm:$0xff] %v1420_v7  ;;  %5558 = vst [vmem:[%s7407_s18 + $0x440] sm:$0xff] %v1692_v28  ;;  %v1694_v62 = vpop.f32.mrb[137].mxu0 }
 0x25d   : > { %5625 = vmatmul.mubr.msk.bf16.gmra.mrb[172].mxu1 %vm449_vm0, %v7231_v45  ;;  %5861 = vmatmul.mubr.msk.bf16.gmra.mrb[28].mxu0 %vm449_vm0, %v7187_v35  ;;  %5559 = vst [vmem:[%s7407_s18 + $0x448] sm:$0xff] %v1694_v62 }
 0x25e   : > { %2048 = vmatprep.mubr.bf16.mxu1 %v9677_v19  ;;  %2782 = vmatprep.mubr.bf16.mxu0 %v9677_v19 }
 0x260   : > { %v1424_v14 = vpop.f32.mrb[68].mxu1 }
 0x261   : > { %5474 = vst [vmem:[%s7407_s18 + $0x220] sm:$0xff] %v1424_v14  ;;  %v1426_v7 = vpop.f32.mrb[69].mxu1  ;;  %v1696_v14 = vpop.f32.mrb[138].mxu0 }
 0x262   : > { %5475 = vst [vmem:[%s7407_s18 + $0x228] sm:$0xff] %v1426_v7  ;;  %v1428_v35 = vpop.f32.mrb[70].mxu1  ;;  %5560 = vst [vmem:[%s7407_s18 + $0x450] sm:$0xff] %v1696_v14 }
 0x263   : > { %5476 = vst [vmem:[%s7407_s18 + $0x230] sm:$0xff] %v1428_v35  ;;  %v1430_v30 = vpop.f32.mrb[71].mxu1 }
 0x264   : > { %5477 = vst [vmem:[%s7407_s18 + $0x238] sm:$0xff] %v1430_v30 }
 0x265   : > { %5626 = vmatmul.mubr.msk.bf16.gmra.mrb[176].mxu1 %vm449_vm0, %v7242_v47  ;;  %5862 = vmatmul.mubr.msk.bf16.gmra.mrb[32].mxu0 %vm449_vm0, %v7198_v42  ;;  %v1698_v47 = vpop.f32.mrb[139].mxu0 }
 0x266   : > { %2058 = vmatprep.mubr.bf16.mxu1 %v9677_v19  ;;  %2792 = vmatprep.mubr.bf16.mxu0 %v9677_v19  ;;  %5561 = vst [vmem:[%s7407_s18 + $0x458] sm:$0xff] %v1698_v47  ;;  %v1702_v21 = vpop.f32.mrb[140].mxu0 }
 0x267   : > { %5562 = vst [vmem:[%s7407_s18 + $0x460] sm:$0xff] %v1702_v21  ;;  %v1704_v35 = vpop.f32.mrb[141].mxu0 }
 0x268   : > { %v1434_v61 = vpop.f32.mrb[72].mxu1  ;;  %5563 = vst [vmem:[%s7407_s18 + $0x468] sm:$0xff] %v1704_v35  ;;  %v1706_v28 = vpop.f32.mrb[142].mxu0 }
 0x269   : > { %5478 = vst [vmem:[%s7407_s18 + $0x240] sm:$0xff] %v1434_v61  ;;  %v1436_v51 = vpop.f32.mrb[73].mxu1  ;;  %5564 = vst [vmem:[%s7407_s18 + $0x470] sm:$0xff] %v1706_v28 }
 0x26a   : > { %5479 = vst [vmem:[%s7407_s18 + $0x248] sm:$0xff] %v1436_v51  ;;  %v1438_v42 = vpop.f32.mrb[74].mxu1 }
 0x26b   : > { %5480 = vst [vmem:[%s7407_s18 + $0x250] sm:$0xff] %v1438_v42  ;;  %v1440_v7 = vpop.f32.mrb[75].mxu1 }
 0x26c   : > { %5481 = vst [vmem:[%s7407_s18 + $0x258] sm:$0xff] %v1440_v7 }
 0x26d   : > { %5627 = vmatmul.mubr.msk.bf16.gmra.mrb[180].mxu1 %vm449_vm0, %v7253_v48  ;;  %5863 = vmatmul.mubr.msk.bf16.gmra.mrb[36].mxu0 %vm449_vm0, %v7209_v43  ;;  %v1708_v48 = vpop.f32.mrb[143].mxu0 }
 0x26e   : > { %2068 = vmatprep.mubr.bf16.mxu1 %v9677_v19  ;;  %2802 = vmatprep.mubr.bf16.mxu0 %v9677_v19  ;;  %5565 = vst [vmem:[%s7407_s18 + $0x478] sm:$0xff] %v1708_v48  ;;  %v1712_v14 = vpop.f32.mrb[144].mxu0 }
 0x26f   : > { %5566 = vst [vmem:[%s7407_s18 + $0x480] sm:$0xff] %v1712_v14  ;;  %v1714_v51 = vpop.f32.mrb[145].mxu0  ;;  %v7863_v14 = vld [vmem:[%s9651_s1 + $0x60] sm:$0xff]  }
 0x270   : > { %v1444_v30 = vpop.f32.mrb[76].mxu1  ;;  %5567 = vst [vmem:[%s7407_s18 + $0x488] sm:$0xff] %v1714_v51  ;;  %v1716_v42 = vpop.f32.mrb[146].mxu0  ;;  %v9691_v51 = vpack.c.bf16 %v7368_v18, %v7362_v16 }
 0x271   : > { %5482 = vst [vmem:[%s7407_s18 + $0x260] sm:$0xff] %v1444_v30  ;;  %v1446_v62 = vpop.f32.mrb[77].mxu1  ;;  %5568 = vst [vmem:[%s7407_s18 + $0x490] sm:$0xff] %v1716_v42  ;;  %v9692_v42 = vpack.c.bf16 %v7389_v26, %v7384_v24  ;;  %v9694_v26 = vpack.c.bf16 %v7449_v13, %v7445_v10 }
 0x272   : > { %5483 = vst [vmem:[%s7407_s18 + $0x268] sm:$0xff] %v1446_v62  ;;  %v1448_v43 = vpop.f32.mrb[78].mxu1 }
 0x273   : > { %5484 = vst [vmem:[%s7407_s18 + $0x270] sm:$0xff] %v1448_v43  ;;  %v1450_v61 = vpop.f32.mrb[79].mxu1 }
 0x274   : > { %5485 = vst [vmem:[%s7407_s18 + $0x278] sm:$0xff] %v1450_v61  ;;  %v7856_v61 = vld [vmem:[%s9651_s1] sm:$0xff]  }
 0x275   : > { %5628 = vmatmul.mubr.msk.bf16.gmra.mrb[184].mxu1 %vm449_vm0, %v7264_v49  ;;  %5864 = vmatmul.mubr.msk.bf16.gmra.mrb[40].mxu0 %vm449_vm0, %v7220_v44  ;;  %v1718_v49 = vpop.f32.mrb[147].mxu0 }
 0x276   : > { %2078 = vmatprep.mubr.bf16.mxu1 %v9677_v19  ;;  %2812 = vmatprep.mubr.bf16.mxu0 %v9677_v19  ;;  %5569 = vst [vmem:[%s7407_s18 + $0x498] sm:$0xff] %v1718_v49  ;;  %v1722_v35 = vpop.f32.mrb[148].mxu0 }
 0x277   : > { %5570 = vst [vmem:[%s7407_s18 + $0x4a0] sm:$0xff] %v1722_v35  ;;  %v1724_v30 = vpop.f32.mrb[149].mxu0 }
 0x278   : > { %v1454_v47 = vpop.f32.mrb[80].mxu1  ;;  %5571 = vst [vmem:[%s7407_s18 + $0x4a8] sm:$0xff] %v1724_v30  ;;  %v1726_v62 = vpop.f32.mrb[150].mxu0  ;;  %v7892_v30 = vld [vmem:[%s9651_s1 + $0x8] sm:$0xff]  }
 0x279   : > { %5486 = vst [vmem:[%s7407_s18 + $0x280] sm:$0xff] %v1454_v47  ;;  %v1456_v7 = vpop.f32.mrb[81].mxu1  ;;  %5572 = vst [vmem:[%s7407_s18 + $0x4b0] sm:$0xff] %v1726_v62 }
 0x27a   : > { %5487 = vst [vmem:[%s7407_s18 + $0x288] sm:$0xff] %v1456_v7  ;;  %v1458_v44 = vpop.f32.mrb[82].mxu1 }
 0x27b   : > { %5488 = vst [vmem:[%s7407_s18 + $0x290] sm:$0xff] %v1458_v44  ;;  %v1460_v21 = vpop.f32.mrb[83].mxu1 }
 0x27c   : > { %5489 = vst [vmem:[%s7407_s18 + $0x298] sm:$0xff] %v1460_v21  ;;  %v9693_v21 = vpack.c.bf16 %v7386_v25, %v7380_v23  ;;  %v7899_v23 = vld [vmem:[%s9651_s1 + $0x68] sm:$0xff]  }
 0x27d   : > { %5629 = vmatmul.mubr.msk.bf16.gmra.mrb[188].mxu1 %vm449_vm0, %v7275_v50  ;;  %5865 = vmatmul.mubr.msk.bf16.gmra.mrb[44].mxu0 %vm449_vm0, %v7231_v45  ;;  %v1728_v50 = vpop.f32.mrb[151].mxu0 }
 0x27e   : > { %2444 = vmatprep.mubr.bf16.mxu1 %v9677_v19  ;;  %2822 = vmatprep.mubr.bf16.mxu0 %v9677_v19  ;;  %5573 = vst [vmem:[%s7407_s18 + $0x4b8] sm:$0xff] %v1728_v50  ;;  %v1732_v47 = vpop.f32.mrb[152].mxu0 }
 0x27f   : > { %5574 = vst [vmem:[%s7407_s18 + $0x4c0] sm:$0xff] %v1732_v47  ;;  %v1734_v7 = vpop.f32.mrb[153].mxu0 }
 0x280   : > { %v1464_v28 = vpop.f32.mrb[84].mxu1  ;;  %5575 = vst [vmem:[%s7407_s18 + $0x4c8] sm:$0xff] %v1734_v7  ;;  %v1736_v44 = vpop.f32.mrb[154].mxu0 }
 0x281   : > { %5490 = vst [vmem:[%s7407_s18 + $0x2a0] sm:$0xff] %v1464_v28  ;;  %v1466_v48 = vpop.f32.mrb[85].mxu1  ;;  %5576 = vst [vmem:[%s7407_s18 + $0x4d0] sm:$0xff] %v1736_v44  ;;  %v1738_v18 = vpop.f32.mrb[155].mxu0 }
 0x282   : > { %5491 = vst [vmem:[%s7407_s18 + $0x2a8] sm:$0xff] %v1466_v48  ;;  %v1468_v43 = vpop.f32.mrb[86].mxu1  ;;  %5577 = vst [vmem:[%s7407_s18 + $0x4d8] sm:$0xff] %v1738_v18  ;;  %v1742_v25 = vpop.f32.mrb[156].mxu0 }
 0x283   : > { %5492 = vst [vmem:[%s7407_s18 + $0x2b0] sm:$0xff] %v1468_v43  ;;  %v1470_v45 = vpop.f32.mrb[87].mxu1  ;;  %5578 = vst [vmem:[%s7407_s18 + $0x4e0] sm:$0xff] %v1742_v25  ;;  %v1744_v10 = vpop.f32.mrb[157].mxu0 }
 0x284   : > { %5493 = vst [vmem:[%s7407_s18 + $0x2b8] sm:$0xff] %v1470_v45  ;;  %5579 = vst [vmem:[%s7407_s18 + $0x4e8] sm:$0xff] %v1744_v10  ;;  %v1746_v28 = vpop.f32.mrb[158].mxu0  ;;  %v7916_v45 = vld [vmem:[%s9651_s1 + $0x10] sm:$0xff]  }
 0x285   : > { %5774 = vmatmul.mubr.msk.bf16.vlgmr.msra.gmra.mrb[192].mxu1 %vm449_vm0, %v7856_v61  ;;  %5866 = vmatmul.mubr.msk.bf16.gmra.mrb[48].mxu0 %vm449_vm0, %v7863_v14  ;;  %5580 = vst [vmem:[%s7407_s18 + $0x4f0] sm:$0xff] %v1746_v28  ;;  %v1748_v48 = vpop.f32.mrb[159].mxu0 }
 0x286   : > { %2929 = vmatpush1.bf16.msra.mxu1 %v9691_v51  ;;  %2454 = vmatprep.mubr.bf16.mxu1 %v9677_v19  ;;  %5581 = vst [vmem:[%s7407_s18 + $0x4f8] sm:$0xff] %v1748_v48  ;;  %v7923_v51 = vld [vmem:[%s9651_s1 + $0x70] sm:$0xff]   ;;  %v1752_v47 = vpop.f32.mrb[160].mxu0 }
 0x287   : > { %2930 = vmatprep.subr.bf16.mxu1 %v9692_v42  ;;  %2832 = vmatprep.mubr.bf16.mxu0 %v9677_v19  ;;  %5582 = vst [vmem:[%s7407_s18 + $0x500] sm:$0xff] %v1752_v47  ;;  %v1754_v42 = vpop.f32.mrb[161].mxu0  ;;  %v9695_v47 = vpack.c.bf16 %v7491_v15, %v7487_v36 }
 0x288   : > { %v1474_v49 = vpop.f32.mrb[88].mxu1  ;;  %5583 = vst [vmem:[%s7407_s18 + $0x508] sm:$0xff] %v1754_v42 }
 0x289   : > { %5494 = vst [vmem:[%s7407_s18 + $0x2c0] sm:$0xff] %v1474_v49  ;;  %v1476_v16 = vpop.f32.mrb[89].mxu1  ;;  %v1756_v49 = vpop.f32.mrb[162].mxu0 }
 0x28a   : > { %2931 = vmatpush1.bf16.msra.mxu1 %v9693_v21  ;;  %5495 = vst [vmem:[%s7407_s18 + $0x2c8] sm:$0xff] %v1476_v16  ;;  %v1478_v24 = vpop.f32.mrb[90].mxu1  ;;  %5584 = vst [vmem:[%s7407_s18 + $0x510] sm:$0xff] %v1756_v49  ;;  %v1758_v16 = vpop.f32.mrb[163].mxu0 }
 0x28b   : > { %3444 = vmatprep.subr.bf16.mxu1 %v9694_v26  ;;  %5496 = vst [vmem:[%s7407_s18 + $0x2d0] sm:$0xff] %v1478_v24  ;;  %v1480_v35 = vpop.f32.mrb[91].mxu1  ;;  %5585 = vst [vmem:[%s7407_s18 + $0x518] sm:$0xff] %v1758_v16  ;;  %v7940_v24 = vld [vmem:[%s9651_s1 + $0x18] sm:$0xff]  }
 0x28c   : > { %5497 = vst [vmem:[%s7407_s18 + $0x2d8] sm:$0xff] %v1480_v35  ;;  %v7947_v26 = vld [vmem:[%s9651_s1 + $0x78] sm:$0xff]   ;;  %v1762_v35 = vpop.f32.mrb[164].mxu0 }
 0x28d   : > { %5775 = vmatmul.mubr.msk.bf16.gmra.mrb[196].mxu1 %vm449_vm0, %v7892_v30  ;;  %5867 = vmatmul.mubr.msk.bf16.gmra.mrb[52].mxu0 %vm449_vm0, %v7899_v23  ;;  %5586 = vst [vmem:[%s7407_s18 + $0x520] sm:$0xff] %v1762_v35  ;;  %v1764_v25 = vpop.f32.mrb[165].mxu0  ;;  %v7995_v35 = vld [vmem:[%s9651_s1 + $0x28] sm:$0xff]  }
 0x28e   : > { %2464 = vmatprep.mubr.bf16.mxu1 %v9677_v19  ;;  %2842 = vmatprep.mubr.bf16.mxu0 %v9677_v19  ;;  %5587 = vst [vmem:[%s7407_s18 + $0x528] sm:$0xff] %v1764_v25 }
 0x290   : > { %v1484_v13 = vpop.f32.mrb[92].mxu1 }
 0x291   : > { %5498 = vst [vmem:[%s7407_s18 + $0x2e0] sm:$0xff] %v1484_v13  ;;  %v1486_v62 = vpop.f32.mrb[93].mxu1  ;;  %v1766_v13 = vpop.f32.mrb[166].mxu0 }
 0x292   : > { %5499 = vst [vmem:[%s7407_s18 + $0x2e8] sm:$0xff] %v1486_v62  ;;  %v1488_v50 = vpop.f32.mrb[94].mxu1  ;;  %5588 = vst [vmem:[%s7407_s18 + $0x530] sm:$0xff] %v1766_v13  ;;  %v1768_v62 = vpop.f32.mrb[167].mxu0 }
 0x293   : > { %5500 = vst [vmem:[%s7407_s18 + $0x2f0] sm:$0xff] %v1488_v50  ;;  %v1490_v43 = vpop.f32.mrb[95].mxu1  ;;  %5589 = vst [vmem:[%s7407_s18 + $0x538] sm:$0xff] %v1768_v62  ;;  %v1772_v42 = vpop.f32.mrb[168].mxu0  ;;  %v8014_v62 = vld [vmem:[%s9651_s1 + $0x30] sm:$0xff]  }
 0x294   : > { %5501 = vst [vmem:[%s7407_s18 + $0x2f8] sm:$0xff] %v1490_v43  ;;  %v7964_v43 = vld [vmem:[%s9651_s1 + $0x20] sm:$0xff]   ;;  %5590 = vst [vmem:[%s7407_s18 + $0x540] sm:$0xff] %v1772_v42  ;;  %v1774_v49 = vpop.f32.mrb[169].mxu0 }
 0x295   : > { %5776 = vmatmul.mubr.msk.bf16.gmra.mrb[200].mxu1 %vm449_vm0, %v7916_v45  ;;  %5868 = vmatmul.mubr.msk.bf16.gmra.mrb[56].mxu0 %vm449_vm0, %v7923_v51  ;;  %5591 = vst [vmem:[%s7407_s18 + $0x548] sm:$0xff] %v1774_v49  ;;  %v1776_v16 = vpop.f32.mrb[170].mxu0 }
 0x296   : > { %2474 = vmatprep.mubr.bf16.mxu1 %v9677_v19  ;;  %2852 = vmatprep.mubr.bf16.mxu0 %v9677_v19  ;;  %5592 = vst [vmem:[%s7407_s18 + $0x550] sm:$0xff] %v1776_v16  ;;  %v1778_v15 = vpop.f32.mrb[171].mxu0 }
 0x297   : > { %5593 = vst [vmem:[%s7407_s18 + $0x558] sm:$0xff] %v1778_v15 }
 0x298   : > { %v1494_v7 = vpop.f32.mrb[96].mxu1 }
 0x299   : > { %5502 = vst [vmem:[%s7407_s18 + $0x300] sm:$0xff] %v1494_v7  ;;  %v1496_v44 = vpop.f32.mrb[97].mxu1  ;;  %v9696_v7 = vpack.c.bf16 %v7516_v29, %v7511_v34  ;;  %v9698_v34 = vpack.c.bf16 %v7594_v17, %v7589_v3 }
 0x29a   : > { %5503 = vst [vmem:[%s7407_s18 + $0x308] sm:$0xff] %v1496_v44  ;;  %v1498_v18 = vpop.f32.mrb[98].mxu1 }
 0x29b   : > { %5504 = vst [vmem:[%s7407_s18 + $0x310] sm:$0xff] %v1498_v18  ;;  %v1500_v21 = vpop.f32.mrb[99].mxu1  ;;  %v9697_v18 = vpack.c.bf16 %v7513_v12, %v7509_v6  ;;  %v1782_v6 = vpop.f32.mrb[172].mxu0 }
 0x29c   : > { %5505 = vst [vmem:[%s7407_s18 + $0x318] sm:$0xff] %v1500_v21  ;;  %5594 = vst [vmem:[%s7407_s18 + $0x560] sm:$0xff] %v1782_v6  ;;  %v1784_v12 = vpop.f32.mrb[173].mxu0 }
 0x29d   : > { %5777 = vmatmul.mubr.msk.bf16.gmra.mrb[204].mxu1 %vm449_vm0, %v7940_v24  ;;  %5869 = vmatmul.mubr.msk.bf16.gmra.mrb[60].mxu0 %vm449_vm0, %v7947_v26  ;;  %5595 = vst [vmem:[%s7407_s18 + $0x568] sm:$0xff] %v1784_v12  ;;  %v1786_v17 = vpop.f32.mrb[174].mxu0 }
 0x29e   : > { %2484 = vmatprep.mubr.bf16.mxu1 %v9677_v19  ;;  %3218 = vmatprep.mubr.bf16.mxu0 %v9677_v19  ;;  %5596 = vst [vmem:[%s7407_s18 + $0x570] sm:$0xff] %v1786_v17  ;;  %v8052_v17 = vld [vmem:[%s9651_s1 + $0x40] sm:$0xff]  }
 0x2a0   : > { %v1504_v10 = vpop.f32.mrb[100].mxu1 }
 0x2a1   : > { %5506 = vst [vmem:[%s7407_s18 + $0x320] sm:$0xff] %v1504_v10  ;;  %v1506_v28 = vpop.f32.mrb[101].mxu1  ;;  %v1788_v10 = vpop.f32.mrb[175].mxu0 }
 0x2a2   : > { %5507 = vst [vmem:[%s7407_s18 + $0x328] sm:$0xff] %v1506_v28  ;;  %v1508_v48 = vpop.f32.mrb[102].mxu1  ;;  %5597 = vst [vmem:[%s7407_s18 + $0x578] sm:$0xff] %v1788_v10 }
 0x2a3   : > { %5508 = vst [vmem:[%s7407_s18 + $0x330] sm:$0xff] %v1508_v48  ;;  %v1510_v50 = vpop.f32.mrb[103].mxu1  ;;  %v1792_v48 = vpop.f32.mrb[176].mxu0 }
 0x2a4   : > { %5509 = vst [vmem:[%s7407_s18 + $0x338] sm:$0xff] %v1510_v50  ;;  %5598 = vst [vmem:[%s7407_s18 + $0x580] sm:$0xff] %v1792_v48  ;;  %v1794_v50 = vpop.f32.mrb[177].mxu0 }
 0x2a5   : > { %5778 = vmatmul.mubr.msk.bf16.gmra.mrb[208].mxu1 %vm449_vm0, %v7964_v43  ;;  %6014 = vmatmul.mubr.msk.bf16.vlgmr.msra.gmra.mrb[64].mxu0 %vm449_vm0, %v7856_v61  ;;  %5599 = vst [vmem:[%s7407_s18 + $0x588] sm:$0xff] %v1794_v50  ;;  %v1796_v42 = vpop.f32.mrb[178].mxu0 }
 0x2a6   : > { %3703 = vmatpush1.bf16.msra.mxu0 %v9695_v47  ;;  %2494 = vmatprep.mubr.bf16.mxu1 %v9677_v19  ;;  %5600 = vst [vmem:[%s7407_s18 + $0x590] sm:$0xff] %v1796_v42  ;;  %v1798_v49 = vpop.f32.mrb[179].mxu0 }
 0x2a7   : > { %3704 = vmatprep.subr.bf16.mxu0 %v9696_v7  ;;  %3228 = vmatprep.mubr.bf16.mxu0 %v9677_v19  ;;  %5601 = vst [vmem:[%s7407_s18 + $0x598] sm:$0xff] %v1798_v49  ;;  %v1802_v15 = vpop.f32.mrb[180].mxu0 }
 0x2a8   : > { %v1514_v44 = vpop.f32.mrb[104].mxu1  ;;  %5602 = vst [vmem:[%s7407_s18 + $0x5a0] sm:$0xff] %v1802_v15 }
 0x2a9   : > { %5510 = vst [vmem:[%s7407_s18 + $0x340] sm:$0xff] %v1514_v44  ;;  %v1516_v36 = vpop.f32.mrb[105].mxu1 }
 0x2aa   : > { %3705 = vmatpush1.bf16.msra.mxu0 %v9697_v18  ;;  %5511 = vst [vmem:[%s7407_s18 + $0x348] sm:$0xff] %v1516_v36  ;;  %v1518_v29 = vpop.f32.mrb[106].mxu1  ;;  %v8033_v36 = vld [vmem:[%s9651_s1 + $0x38] sm:$0xff]   ;;  %v1804_v18 = vpop.f32.mrb[181].mxu0 }
 0x2ab   : > { %4218 = vmatprep.subr.bf16.mxu0 %v9698_v34  ;;  %5512 = vst [vmem:[%s7407_s18 + $0x350] sm:$0xff] %v1518_v29  ;;  %v1520_v21 = vpop.f32.mrb[107].mxu1  ;;  %5603 = vst [vmem:[%s7407_s18 + $0x5a8] sm:$0xff] %v1804_v18  ;;  %v1806_v34 = vpop.f32.mrb[182].mxu0 }
 0x2ac   : > { %5513 = vst [vmem:[%s7407_s18 + $0x358] sm:$0xff] %v1520_v21  ;;  %5604 = vst [vmem:[%s7407_s18 + $0x5b0] sm:$0xff] %v1806_v34  ;;  %v1808_v6 = vpop.f32.mrb[183].mxu0 }
 0x2ad   : > { %5779 = vmatmul.mubr.msk.bf16.gmra.mrb[212].mxu1 %vm449_vm0, %v7995_v35  ;;  %6015 = vmatmul.mubr.msk.bf16.gmra.mrb[68].mxu0 %vm449_vm0, %v7892_v30  ;;  %5605 = vst [vmem:[%s7407_s18 + $0x5b8] sm:$0xff] %v1808_v6  ;;  %v8090_v6 = vld [vmem:[%s9651_s1 + $0x50] sm:$0xff]  }
 0x2ae   : > { %2504 = vmatprep.mubr.bf16.mxu1 %v9677_v19  ;;  %3238 = vmatprep.mubr.bf16.mxu0 %v9677_v19 }
 0x2b0   : > { %v1524_v3 = vpop.f32.mrb[108].mxu1 }
 0x2b1   : > { %5514 = vst [vmem:[%s7407_s18 + $0x360] sm:$0xff] %v1524_v3  ;;  %v1526_v25 = vpop.f32.mrb[109].mxu1 }
 0x2b2   : > { %5515 = vst [vmem:[%s7407_s18 + $0x368] sm:$0xff] %v1526_v25  ;;  %v1528_v13 = vpop.f32.mrb[110].mxu1  ;;  %v1812_v25 = vpop.f32.mrb[184].mxu0 }
 0x2b3   : > { %5516 = vst [vmem:[%s7407_s18 + $0x370] sm:$0xff] %v1528_v13  ;;  %v1530_v28 = vpop.f32.mrb[111].mxu1  ;;  %5606 = vst [vmem:[%s7407_s18 + $0x5c0] sm:$0xff] %v1812_v25  ;;  %v1814_v10 = vpop.f32.mrb[185].mxu0 }
 0x2b4   : > { %5517 = vst [vmem:[%s7407_s18 + $0x378] sm:$0xff] %v1530_v28  ;;  %5607 = vst [vmem:[%s7407_s18 + $0x5c8] sm:$0xff] %v1814_v10  ;;  %v1816_v28 = vpop.f32.mrb[186].mxu0 }
 0x2b5   : > { %5780 = vmatmul.mubr.msk.bf16.gmra.mrb[216].mxu1 %vm449_vm0, %v8014_v62  ;;  %6016 = vmatmul.mubr.msk.bf16.gmra.mrb[72].mxu0 %vm449_vm0, %v7916_v45  ;;  %5608 = vst [vmem:[%s7407_s18 + $0x5d0] sm:$0xff] %v1816_v28  ;;  %v1818_v50 = vpop.f32.mrb[187].mxu0 }
 0x2b6   : > { %2514 = vmatprep.mubr.bf16.mxu1 %v9677_v19  ;;  %3248 = vmatprep.mubr.bf16.mxu0 %v9677_v19  ;;  %5609 = vst [vmem:[%s7407_s18 + $0x5d8] sm:$0xff] %v1818_v50  ;;  %v1822_v49 = vpop.f32.mrb[188].mxu0 }
 0x2b7   : > { %5610 = vst [vmem:[%s7407_s18 + $0x5e0] sm:$0xff] %v1822_v49 }
 0x2b8   : > { %v1534_v47 = vpop.f32.mrb[112].mxu1 }
 0x2b9   : > { %5518 = vst [vmem:[%s7407_s18 + $0x380] sm:$0xff] %v1534_v47  ;;  %v1536_v7 = vpop.f32.mrb[113].mxu1 }
 0x2ba   : > { %5519 = vst [vmem:[%s7407_s18 + $0x388] sm:$0xff] %v1536_v7  ;;  %v1538_v44 = vpop.f32.mrb[114].mxu1  ;;  %v8071_v7 = vld [vmem:[%s9651_s1 + $0x48] sm:$0xff]  }
 0x2bb   : > { %5520 = vst [vmem:[%s7407_s18 + $0x390] sm:$0xff] %v1538_v44  ;;  %v1540_v16 = vpop.f32.mrb[115].mxu1  ;;  %v1824_v44 = vpop.f32.mrb[189].mxu0 }
 0x2bc   : > { %5521 = vst [vmem:[%s7407_s18 + $0x398] sm:$0xff] %v1540_v16  ;;  %5611 = vst [vmem:[%s7407_s18 + $0x5e8] sm:$0xff] %v1824_v44  ;;  %v1826_v15 = vpop.f32.mrb[190].mxu0 }
 0x2bd   : > { %5781 = vmatmul.mubr.msk.bf16.gmra.mrb[220].mxu1 %vm449_vm0, %v8033_v36  ;;  %6017 = vmatmul.mubr.msk.bf16.gmra.mrb[76].mxu0 %vm449_vm0, %v7940_v24  ;;  %5612 = vst [vmem:[%s7407_s18 + $0x5f0] sm:$0xff] %v1826_v15 }
 0x2be   : > { %2524 = vmatprep.mubr.bf16.mxu1 %v9677_v19  ;;  %3258 = vmatprep.mubr.bf16.mxu0 %v9677_v19 }
 0x2c0   : > { %v1544_v29 = vpop.f32.mrb[116].mxu1 }
 0x2c1   : > { %5522 = vst [vmem:[%s7407_s18 + $0x3a0] sm:$0xff] %v1544_v29  ;;  %v1546_v21 = vpop.f32.mrb[117].mxu1  ;;  %v1828_v29 = vpop.f32.mrb[191].mxu0 }
 0x2c2   : > { %5523 = vst [vmem:[%s7407_s18 + $0x3a8] sm:$0xff] %v1546_v21  ;;  %v1548_v12 = vpop.f32.mrb[118].mxu1  ;;  %5613 = vst [vmem:[%s7407_s18 + $0x5f8] sm:$0xff] %v1828_v29 }
 0x2c3   : > { %5524 = vst [vmem:[%s7407_s18 + $0x3b0] sm:$0xff] %v1548_v12  ;;  %v1550_v3 = vpop.f32.mrb[119].mxu1  ;;  %v2188_v12 = vpop.f32.mrb[192].mxu0 }
 0x2c4   : > { %5525 = vst [vmem:[%s7407_s18 + $0x3b8] sm:$0xff] %v1550_v3  ;;  %5710 = vst [vmem:[%s7407_s18 + $0x800] sm:$0xff] %v2188_v12  ;;  %v2190_v3 = vpop.f32.mrb[193].mxu0 }
 0x2c5   : > { %5782 = vmatmul.mubr.msk.bf16.gmra.mrb[224].mxu1 %vm449_vm0, %v8052_v17  ;;  %6018 = vmatmul.mubr.msk.bf16.gmra.mrb[80].mxu0 %vm449_vm0, %v7964_v43  ;;  %5711 = vst [vmem:[%s7407_s18 + $0x808] sm:$0xff] %v2190_v3  ;;  %v2192_v10 = vpop.f32.mrb[194].mxu0 }
 0x2c6   : > { %2534 = vmatprep.mubr.bf16.mxu1 %v9677_v19  ;;  %3268 = vmatprep.mubr.bf16.mxu0 %v9677_v19  ;;  %5712 = vst [vmem:[%s7407_s18 + $0x810] sm:$0xff] %v2192_v10  ;;  %v2194_v28 = vpop.f32.mrb[195].mxu0 }
 0x2c7   : > { %5713 = vst [vmem:[%s7407_s18 + $0x818] sm:$0xff] %v2194_v28 }
 0x2c8   : > { %v1554_v13 = vpop.f32.mrb[120].mxu1 }
 0x2c9   : > { %5526 = vst [vmem:[%s7407_s18 + $0x3c0] sm:$0xff] %v1554_v13  ;;  %v1556_v48 = vpop.f32.mrb[121].mxu1 }
 0x2ca   : > { %5527 = vst [vmem:[%s7407_s18 + $0x3c8] sm:$0xff] %v1556_v48  ;;  %v1558_v47 = vpop.f32.mrb[122].mxu1 }
 0x2cb   : > { %5528 = vst [vmem:[%s7407_s18 + $0x3d0] sm:$0xff] %v1558_v47  ;;  %v1560_v42 = vpop.f32.mrb[123].mxu1  ;;  %v8109_v47 = vld [vmem:[%s9651_s1 + $0x58] sm:$0xff]  }
 0x2cc   : > { %5529 = vst [vmem:[%s7407_s18 + $0x3d8] sm:$0xff] %v1560_v42  ;;  %v2198_v42 = vpop.f32.mrb[196].mxu0 }
 0x2cd   : > { %5783 = vmatmul.mubr.msk.bf16.gmra.mrb[228].mxu1 %vm449_vm0, %v8071_v7  ;;  %6019 = vmatmul.mubr.msk.bf16.gmra.mrb[84].mxu0 %vm449_vm0, %v7995_v35  ;;  %5714 = vst [vmem:[%s7407_s18 + $0x820] sm:$0xff] %v2198_v42  ;;  %v2200_v49 = vpop.f32.mrb[197].mxu0 }
 0x2ce   : > { %2544 = vmatprep.mubr.bf16.mxu1 %v9677_v19  ;;  %3278 = vmatprep.mubr.bf16.mxu0 %v9677_v19  ;;  %5715 = vst [vmem:[%s7407_s18 + $0x828] sm:$0xff] %v2200_v49 }
 0x2d0   : > { %v1564_v16 = vpop.f32.mrb[124].mxu1 }
 0x2d1   : > { %5530 = vst [vmem:[%s7407_s18 + $0x3e0] sm:$0xff] %v1564_v16  ;;  %v1566_v18 = vpop.f32.mrb[125].mxu1  ;;  %v2202_v16 = vpop.f32.mrb[198].mxu0 }
 0x2d2   : > { %5531 = vst [vmem:[%s7407_s18 + $0x3e8] sm:$0xff] %v1566_v18  ;;  %v1568_v34 = vpop.f32.mrb[126].mxu1  ;;  %5716 = vst [vmem:[%s7407_s18 + $0x830] sm:$0xff] %v2202_v16  ;;  %v2204_v18 = vpop.f32.mrb[199].mxu0 }
 0x2d3   : > { %5532 = vst [vmem:[%s7407_s18 + $0x3f0] sm:$0xff] %v1568_v34  ;;  %v1570_v21 = vpop.f32.mrb[127].mxu1  ;;  %5717 = vst [vmem:[%s7407_s18 + $0x838] sm:$0xff] %v2204_v18 }
 0x2d4   : > { %5533 = vst [vmem:[%s7407_s18 + $0x3f8] sm:$0xff] %v1570_v21  ;;  %v2208_v21 = vpop.f32.mrb[200].mxu0 }
 0x2d5   : > { %5784 = vmatmul.mubr.msk.bf16.gmra.mrb[232].mxu1 %vm449_vm0, %v8090_v6  ;;  %6020 = vmatmul.mubr.msk.bf16.gmra.mrb[88].mxu0 %vm449_vm0, %v8014_v62  ;;  %5718 = vst [vmem:[%s7407_s18 + $0x840] sm:$0xff] %v2208_v21  ;;  %v2210_v12 = vpop.f32.mrb[201].mxu0 }
 0x2d6   : > { %2554 = vmatprep.mubr.bf16.mxu1 %v9677_v19  ;;  %3288 = vmatprep.mubr.bf16.mxu0 %v9677_v19  ;;  %5719 = vst [vmem:[%s7407_s18 + $0x848] sm:$0xff] %v2210_v12 }
 0x2d8   : > { %v1930_v25 = vpop.f32.mrb[128].mxu1 }
 0x2d9   : > { %5630 = vst [vmem:[%s7407_s18 + $0x600] sm:$0xff] %v1930_v25  ;;  %v1932_v13 = vpop.f32.mrb[129].mxu1  ;;  %v2212_v25 = vpop.f32.mrb[202].mxu0 }
 0x2da   : > { %5631 = vst [vmem:[%s7407_s18 + $0x608] sm:$0xff] %v1932_v13  ;;  %v1934_v48 = vpop.f32.mrb[130].mxu1  ;;  %5720 = vst [vmem:[%s7407_s18 + $0x850] sm:$0xff] %v2212_v25  ;;  %v2214_v13 = vpop.f32.mrb[203].mxu0 }
 0x2db   : > { %5632 = vst [vmem:[%s7407_s18 + $0x610] sm:$0xff] %v1934_v48  ;;  %v1936_v50 = vpop.f32.mrb[131].mxu1  ;;  %5721 = vst [vmem:[%s7407_s18 + $0x858] sm:$0xff] %v2214_v13 }
 0x2dc   : > { %5633 = vst [vmem:[%s7407_s18 + $0x618] sm:$0xff] %v1936_v50  ;;  %v2218_v50 = vpop.f32.mrb[204].mxu0 }
 0x2dd   : > { %5785 = vmatmul.mubr.msk.bf16.gmra.mrb[236].mxu1 %vm449_vm0, %v8109_v47  ;;  %6021 = vmatmul.mubr.msk.bf16.gmra.mrb[92].mxu0 %vm449_vm0, %v8033_v36  ;;  %5722 = vst [vmem:[%s7407_s18 + $0x860] sm:$0xff] %v2218_v50  ;;  %v2220_v42 = vpop.f32.mrb[205].mxu0 }
 0x2de   : > { %2564 = vmatprep.mubr.bf16.mxu1 %v9677_v19  ;;  %3298 = vmatprep.mubr.bf16.mxu0 %v9677_v19  ;;  %5723 = vst [vmem:[%s7407_s18 + $0x868] sm:$0xff] %v2220_v42 }
 0x2e0   : > { %v1940_v44 = vpop.f32.mrb[132].mxu1 }
 0x2e1   : > { %5634 = vst [vmem:[%s7407_s18 + $0x620] sm:$0xff] %v1940_v44  ;;  %v1942_v15 = vpop.f32.mrb[133].mxu1  ;;  %v2222_v44 = vpop.f32.mrb[206].mxu0 }
 0x2e2   : > { %5635 = vst [vmem:[%s7407_s18 + $0x628] sm:$0xff] %v1942_v15  ;;  %v1944_v29 = vpop.f32.mrb[134].mxu1  ;;  %5724 = vst [vmem:[%s7407_s18 + $0x870] sm:$0xff] %v2222_v44  ;;  %v2224_v15 = vpop.f32.mrb[207].mxu0 }
 0x2e3   : > { %5636 = vst [vmem:[%s7407_s18 + $0x630] sm:$0xff] %v1944_v29  ;;  %v1946_v34 = vpop.f32.mrb[135].mxu1  ;;  %5725 = vst [vmem:[%s7407_s18 + $0x878] sm:$0xff] %v2224_v15 }
 0x2e4   : > { %5637 = vst [vmem:[%s7407_s18 + $0x638] sm:$0xff] %v1946_v34  ;;  %v2228_v34 = vpop.f32.mrb[208].mxu0 }
 0x2e5   : > { %5786 = vmatmul.mubr.msk.bf16.gmra.mrb[240].mxu1 %vm449_vm0, %v7863_v14  ;;  %6022 = vmatmul.mubr.msk.bf16.gmra.mrb[96].mxu0 %vm449_vm0, %v8052_v17  ;;  %5726 = vst [vmem:[%s7407_s18 + $0x880] sm:$0xff] %v2228_v34  ;;  %v2230_v21 = vpop.f32.mrb[209].mxu0 }
 0x2e6   : > { %2574 = vmatprep.mubr.bf16.mxu1 %v9677_v19  ;;  %3308 = vmatprep.mubr.bf16.mxu0 %v9677_v19  ;;  %5727 = vst [vmem:[%s7407_s18 + $0x888] sm:$0xff] %v2230_v21  ;;  %v9700_v21 = vpack.c.bf16 %v7471_v4, %v7467_v39  ;;  %v9702_v4 = vpack.c.bf16 %v7544_v5, %v7536_v20 }
 0x2e8   : > { %v1950_v3 = vpop.f32.mrb[136].mxu1 }
 0x2e9   : > { %5638 = vst [vmem:[%s7407_s18 + $0x640] sm:$0xff] %v1950_v3  ;;  %v1952_v10 = vpop.f32.mrb[137].mxu1  ;;  %v2232_v3 = vpop.f32.mrb[210].mxu0 }
 0x2ea   : > { %5639 = vst [vmem:[%s7407_s18 + $0x648] sm:$0xff] %v1952_v10  ;;  %v1954_v28 = vpop.f32.mrb[138].mxu1  ;;  %5728 = vst [vmem:[%s7407_s18 + $0x890] sm:$0xff] %v2232_v3  ;;  %v2234_v10 = vpop.f32.mrb[211].mxu0 }
 0x2eb   : > { %5640 = vst [vmem:[%s7407_s18 + $0x650] sm:$0xff] %v1954_v28  ;;  %v1956_v48 = vpop.f32.mrb[139].mxu1  ;;  %5729 = vst [vmem:[%s7407_s18 + $0x898] sm:$0xff] %v2234_v10 }
 0x2ec   : > { %5641 = vst [vmem:[%s7407_s18 + $0x658] sm:$0xff] %v1956_v48  ;;  %v2238_v48 = vpop.f32.mrb[212].mxu0 }
 0x2ed   : > { %5787 = vmatmul.mubr.msk.bf16.gmra.mrb[244].mxu1 %vm449_vm0, %v7899_v23  ;;  %6023 = vmatmul.mubr.msk.bf16.gmra.mrb[100].mxu0 %vm449_vm0, %v8071_v7  ;;  %5730 = vst [vmem:[%s7407_s18 + $0x8a0] sm:$0xff] %v2238_v48  ;;  %v2240_v50 = vpop.f32.mrb[213].mxu0 }
 0x2ee   : > { %2584 = vmatprep.mubr.bf16.mxu1 %v9677_v19  ;;  %3318 = vmatprep.mubr.bf16.mxu0 %v9677_v19  ;;  %5731 = vst [vmem:[%s7407_s18 + $0x8a8] sm:$0xff] %v2240_v50 }
 0x2f0   : > { %v1960_v49 = vpop.f32.mrb[140].mxu1 }
 0x2f1   : > { %5642 = vst [vmem:[%s7407_s18 + $0x660] sm:$0xff] %v1960_v49  ;;  %v1962_v16 = vpop.f32.mrb[141].mxu1  ;;  %v2242_v49 = vpop.f32.mrb[214].mxu0 }
 0x2f2   : > { %5643 = vst [vmem:[%s7407_s18 + $0x668] sm:$0xff] %v1962_v16  ;;  %v1964_v18 = vpop.f32.mrb[142].mxu1  ;;  %5732 = vst [vmem:[%s7407_s18 + $0x8b0] sm:$0xff] %v2242_v49  ;;  %v2244_v16 = vpop.f32.mrb[215].mxu0 }
 0x2f3   : > { %5644 = vst [vmem:[%s7407_s18 + $0x670] sm:$0xff] %v1964_v18  ;;  %v1966_v29 = vpop.f32.mrb[143].mxu1  ;;  %5733 = vst [vmem:[%s7407_s18 + $0x8b8] sm:$0xff] %v2244_v16  ;;  %v2248_v34 = vpop.f32.mrb[216].mxu0 }
 0x2f4   : > { %5645 = vst [vmem:[%s7407_s18 + $0x678] sm:$0xff] %v1966_v29  ;;  %v9699_v29 = vpack.c.bf16 %v7447_v11, %v7441_v9  ;;  %5734 = vst [vmem:[%s7407_s18 + $0x8c0] sm:$0xff] %v2248_v34 }
 0x2f5   : > { %5788 = vmatmul.mubr.msk.bf16.gmra.mrb[248].mxu1 %vm449_vm0, %v7923_v51  ;;  %6024 = vmatmul.mubr.msk.bf16.gmra.mrb[104].mxu0 %vm449_vm0, %v8090_v6 }
 0x2f6   : > { %2594 = vmatprep.mubr.bf16.mxu1 %v9677_v19  ;;  %3328 = vmatprep.mubr.bf16.mxu0 %v9677_v19 }
 0x2f8   : > { %v1970_v12 = vpop.f32.mrb[144].mxu1 }
 0x2f9   : > { %5646 = vst [vmem:[%s7407_s18 + $0x680] sm:$0xff] %v1970_v12  ;;  %v1972_v25 = vpop.f32.mrb[145].mxu1  ;;  %v2250_v12 = vpop.f32.mrb[217].mxu0 }
 0x2fa   : > { %5647 = vst [vmem:[%s7407_s18 + $0x688] sm:$0xff] %v1972_v25  ;;  %v1974_v13 = vpop.f32.mrb[146].mxu1  ;;  %5735 = vst [vmem:[%s7407_s18 + $0x8c8] sm:$0xff] %v2250_v12  ;;  %v2252_v3 = vpop.f32.mrb[218].mxu0  ;;  %v9701_v25 = vpack.c.bf16 %v7469_v40, %v7463_v37 }
 0x2fb   : > { %5648 = vst [vmem:[%s7407_s18 + $0x690] sm:$0xff] %v1974_v13  ;;  %v1976_v28 = vpop.f32.mrb[147].mxu1  ;;  %5736 = vst [vmem:[%s7407_s18 + $0x8d0] sm:$0xff] %v2252_v3  ;;  %v2254_v11 = vpop.f32.mrb[219].mxu0 }
 0x2fc   : > { %5649 = vst [vmem:[%s7407_s18 + $0x698] sm:$0xff] %v1976_v28  ;;  %5737 = vst [vmem:[%s7407_s18 + $0x8d8] sm:$0xff] %v2254_v11  ;;  %v2258_v5 = vpop.f32.mrb[220].mxu0  ;;  %v9703_v11 = vpack.c.bf16 %v7591_v60, %v7587_v33 }
 0x2fd   : > { %5789 = vmatmul.mubr.msk.bf16.gmra.mrb[252].mxu1 %vm449_vm0, %v7947_v26  ;;  %6025 = vmatmul.mubr.msk.bf16.gmra.mrb[108].mxu0 %vm449_vm0, %v8109_v47  ;;  %5738 = vst [vmem:[%s7407_s18 + $0x8e0] sm:$0xff] %v2258_v5  ;;  %v2260_v37 = vpop.f32.mrb[221].mxu0  ;;  %v9705_v5 = vpack.c.bf16 %v7613_v38, %v7609_v55 }
 0x2fe   : > { %2960 = vmatprep.mubr.bf16.mxu1 %v9677_v19  ;;  %3338 = vmatprep.mubr.bf16.mxu0 %v9677_v19  ;;  %5739 = vst [vmem:[%s7407_s18 + $0x8e8] sm:$0xff] %v2260_v37  ;;  %v2262_v20 = vpop.f32.mrb[222].mxu0 }
 0x2ff   : > { %5740 = vst [vmem:[%s7407_s18 + $0x8f0] sm:$0xff] %v2262_v20  ;;  %v2264_v28 = vpop.f32.mrb[223].mxu0 }
 0x300   : > { %v1980_v42 = vpop.f32.mrb[148].mxu1  ;;  %5741 = vst [vmem:[%s7407_s18 + $0x8f8] sm:$0xff] %v2264_v28  ;;  %v2268_v50 = vpop.f32.mrb[224].mxu0 }
 0x301   : > { %5650 = vst [vmem:[%s7407_s18 + $0x6a0] sm:$0xff] %v1980_v42  ;;  %v1982_v44 = vpop.f32.mrb[149].mxu1  ;;  %5742 = vst [vmem:[%s7407_s18 + $0x900] sm:$0xff] %v2268_v50  ;;  %v2270_v42 = vpop.f32.mrb[225].mxu0 }
 0x302   : > { %5651 = vst [vmem:[%s7407_s18 + $0x6a8] sm:$0xff] %v1982_v44  ;;  %v1984_v15 = vpop.f32.mrb[150].mxu1  ;;  %5743 = vst [vmem:[%s7407_s18 + $0x908] sm:$0xff] %v2270_v42  ;;  %v2272_v44 = vpop.f32.mrb[226].mxu0 }
 0x303   : > { %5652 = vst [vmem:[%s7407_s18 + $0x6b0] sm:$0xff] %v1984_v15  ;;  %v1986_v18 = vpop.f32.mrb[151].mxu1  ;;  %5744 = vst [vmem:[%s7407_s18 + $0x910] sm:$0xff] %v2272_v44  ;;  %v2274_v15 = vpop.f32.mrb[227].mxu0 }
 0x304   : > { %5653 = vst [vmem:[%s7407_s18 + $0x6b8] sm:$0xff] %v1986_v18  ;;  %5745 = vst [vmem:[%s7407_s18 + $0x918] sm:$0xff] %v2274_v15 }
 0x305   : > { %5934 = vmatmul.mubr.msk.bf16.vlgmr.msra.gmra.mrb[0].mxu1 %vm449_vm0, %v7856_v61  ;;  %6026 = vmatmul.mubr.msk.bf16.gmra.mrb[112].mxu0 %vm449_vm0, %v7863_v14 }
 0x306   : > { %3445 = vmatpush1.bf16.msra.mxu1 %v9699_v29  ;;  %2970 = vmatprep.mubr.bf16.mxu1 %v9677_v19  ;;  %v2278_v29 = vpop.f32.mrb[228].mxu0 }
 0x307   : > { %3446 = vmatprep.subr.bf16.mxu1 %v9700_v21  ;;  %3348 = vmatprep.mubr.bf16.mxu0 %v9677_v19  ;;  %5746 = vst [vmem:[%s7407_s18 + $0x920] sm:$0xff] %v2278_v29  ;;  %v2280_v34 = vpop.f32.mrb[229].mxu0 }
 0x308   : > { %v1990_v14 = vpop.f32.mrb[152].mxu1  ;;  %5747 = vst [vmem:[%s7407_s18 + $0x928] sm:$0xff] %v2280_v34  ;;  %v2282_v12 = vpop.f32.mrb[230].mxu0 }
 0x309   : > { %5654 = vst [vmem:[%s7407_s18 + $0x6c0] sm:$0xff] %v1990_v14  ;;  %v1992_v9 = vpop.f32.mrb[153].mxu1  ;;  %5748 = vst [vmem:[%s7407_s18 + $0x930] sm:$0xff] %v2282_v12  ;;  %v2284_v3 = vpop.f32.mrb[231].mxu0 }
 0x30a   : > { %3447 = vmatpush1.bf16.msra.mxu1 %v9701_v25  ;;  %5655 = vst [vmem:[%s7407_s18 + $0x6c8] sm:$0xff] %v1992_v9  ;;  %v1994_v39 = vpop.f32.mrb[154].mxu1  ;;  %5749 = vst [vmem:[%s7407_s18 + $0x938] sm:$0xff] %v2284_v3  ;;  %v2288_v25 = vpop.f32.mrb[232].mxu0 }
 0x30b   : > { %3960 = vmatprep.subr.bf16.mxu1 %v9702_v4  ;;  %5656 = vst [vmem:[%s7407_s18 + $0x6d0] sm:$0xff] %v1994_v39  ;;  %v1996_v10 = vpop.f32.mrb[155].mxu1  ;;  %v9704_v39 = vpack.c.bf16 %v7616_v53, %v7611_v63  ;;  %5750 = vst [vmem:[%s7407_s18 + $0x940] sm:$0xff] %v2288_v25  ;;  %v2290_v4 = vpop.f32.mrb[233].mxu0  ;;  %v9706_v63 = vpack.c.bf16 %v7694_v59, %v7689_v52 }
 0x30c   : > { %5657 = vst [vmem:[%s7407_s18 + $0x6d8] sm:$0xff] %v1996_v10  ;;  %5751 = vst [vmem:[%s7407_s18 + $0x948] sm:$0xff] %v2290_v4  ;;  %v2292_v10 = vpop.f32.mrb[234].mxu0 }
 0x30d   : > { %5935 = vmatmul.mubr.msk.bf16.gmra.mrb[4].mxu1 %vm449_vm0, %v7892_v30  ;;  %6027 = vmatmul.mubr.msk.bf16.gmra.mrb[116].mxu0 %vm449_vm0, %v7899_v23  ;;  %5752 = vst [vmem:[%s7407_s18 + $0x950] sm:$0xff] %v2292_v10  ;;  %v2294_v60 = vpop.f32.mrb[235].mxu0 }
 0x30e   : > { %2980 = vmatprep.mubr.bf16.mxu1 %v9677_v19  ;;  %3358 = vmatprep.mubr.bf16.mxu0 %v9677_v19  ;;  %5753 = vst [vmem:[%s7407_s18 + $0x958] sm:$0xff] %v2294_v60  ;;  %v2298_v55 = vpop.f32.mrb[236].mxu0 }
 0x30f   : > { %5754 = vst [vmem:[%s7407_s18 + $0x960] sm:$0xff] %v2298_v55  ;;  %v2300_v38 = vpop.f32.mrb[237].mxu0 }
 0x310   : > { %v2000_v40 = vpop.f32.mrb[156].mxu1  ;;  %5755 = vst [vmem:[%s7407_s18 + $0x968] sm:$0xff] %v2300_v38  ;;  %v2302_v59 = vpop.f32.mrb[238].mxu0 }
 0x311   : > { %5658 = vst [vmem:[%s7407_s18 + $0x6e0] sm:$0xff] %v2000_v40  ;;  %v2002_v13 = vpop.f32.mrb[157].mxu1  ;;  %5756 = vst [vmem:[%s7407_s18 + $0x970] sm:$0xff] %v2302_v59  ;;  %v2304_v20 = vpop.f32.mrb[239].mxu0 }
 0x312   : > { %5659 = vst [vmem:[%s7407_s18 + $0x6e8] sm:$0xff] %v2002_v13  ;;  %v2004_v23 = vpop.f32.mrb[158].mxu1  ;;  %5757 = vst [vmem:[%s7407_s18 + $0x978] sm:$0xff] %v2304_v20  ;;  %v2308_v28 = vpop.f32.mrb[240].mxu0 }
 0x313   : > { %5660 = vst [vmem:[%s7407_s18 + $0x6f0] sm:$0xff] %v2004_v23  ;;  %v2006_v48 = vpop.f32.mrb[159].mxu1  ;;  %5758 = vst [vmem:[%s7407_s18 + $0x980] sm:$0xff] %v2308_v28  ;;  %v2310_v23 = vpop.f32.mrb[241].mxu0 }
 0x314   : > { %5661 = vst [vmem:[%s7407_s18 + $0x6f8] sm:$0xff] %v2006_v48  ;;  %5759 = vst [vmem:[%s7407_s18 + $0x988] sm:$0xff] %v2310_v23  ;;  %v2312_v50 = vpop.f32.mrb[242].mxu0 }
 0x315   : > { %5936 = vmatmul.mubr.msk.bf16.gmra.mrb[8].mxu1 %vm449_vm0, %v7916_v45  ;;  %6028 = vmatmul.mubr.msk.bf16.gmra.mrb[120].mxu0 %vm449_vm0, %v7923_v51  ;;  %5760 = vst [vmem:[%s7407_s18 + $0x990] sm:$0xff] %v2312_v50  ;;  %v8376_v50 = vld [vmem:[%s9651_s1 + $0x60] sm:$0xff]  }
 0x316   : > { %2990 = vmatprep.mubr.bf16.mxu1 %v9677_v19  ;;  %3368 = vmatprep.mubr.bf16.mxu0 %v9677_v19 }
 0x318   : > { %v2010_v49 = vpop.f32.mrb[160].mxu1 }
 0x319   : > { %5662 = vst [vmem:[%s7407_s18 + $0x700] sm:$0xff] %v2010_v49  ;;  %v2012_v16 = vpop.f32.mrb[161].mxu1  ;;  %v2314_v49 = vpop.f32.mrb[243].mxu0 }
 0x31a   : > { %5663 = vst [vmem:[%s7407_s18 + $0x708] sm:$0xff] %v2012_v16  ;;  %v2014_v51 = vpop.f32.mrb[162].mxu1  ;;  %5761 = vst [vmem:[%s7407_s18 + $0x998] sm:$0xff] %v2314_v49  ;;  %v2318_v16 = vpop.f32.mrb[244].mxu0 }
 0x31b   : > { %5664 = vst [vmem:[%s7407_s18 + $0x710] sm:$0xff] %v2014_v51  ;;  %v2016_v18 = vpop.f32.mrb[163].mxu1  ;;  %5762 = vst [vmem:[%s7407_s18 + $0x9a0] sm:$0xff] %v2318_v16  ;;  %v2320_v15 = vpop.f32.mrb[245].mxu0 }
 0x31c   : > { %5665 = vst [vmem:[%s7407_s18 + $0x718] sm:$0xff] %v2016_v18  ;;  %5763 = vst [vmem:[%s7407_s18 + $0x9a8] sm:$0xff] %v2320_v15  ;;  %v2322_v18 = vpop.f32.mrb[246].mxu0 }
 0x31d   : > { %5937 = vmatmul.mubr.msk.bf16.gmra.mrb[12].mxu1 %vm449_vm0, %v7940_v24  ;;  %6029 = vmatmul.mubr.msk.bf16.gmra.mrb[124].mxu0 %vm449_vm0, %v7947_v26  ;;  %5764 = vst [vmem:[%s7407_s18 + $0x9b0] sm:$0xff] %v2322_v18  ;;  %v2324_v34 = vpop.f32.mrb[247].mxu0  ;;  %v8395_v18 = vld [vmem:[%s9651_s1 + $0x68] sm:$0xff]  }
 0x31e   : > { %3000 = vmatprep.mubr.bf16.mxu1 %v9677_v19  ;;  %3734 = vmatprep.mubr.bf16.mxu0 %v9677_v19  ;;  %5765 = vst [vmem:[%s7407_s18 + $0x9b8] sm:$0xff] %v2324_v34  ;;  %v2328_v12 = vpop.f32.mrb[248].mxu0 }
 0x31f   : > { %5766 = vst [vmem:[%s7407_s18 + $0x9c0] sm:$0xff] %v2328_v12 }
 0x320   : > { %v2020_v21 = vpop.f32.mrb[164].mxu1 }
 0x321   : > { %5666 = vst [vmem:[%s7407_s18 + $0x720] sm:$0xff] %v2020_v21  ;;  %v2022_v14 = vpop.f32.mrb[165].mxu1 }
 0x322   : > { %5667 = vst [vmem:[%s7407_s18 + $0x728] sm:$0xff] %v2022_v14  ;;  %v2024_v26 = vpop.f32.mrb[166].mxu1  ;;  %v2330_v14 = vpop.f32.mrb[249].mxu0 }
 0x323   : > { %5668 = vst [vmem:[%s7407_s18 + $0x730] sm:$0xff] %v2024_v26  ;;  %v2026_v9 = vpop.f32.mrb[167].mxu1  ;;  %5767 = vst [vmem:[%s7407_s18 + $0x9c8] sm:$0xff] %v2330_v14  ;;  %v2332_v26 = vpop.f32.mrb[250].mxu0 }
 0x324   : > { %5669 = vst [vmem:[%s7407_s18 + $0x738] sm:$0xff] %v2026_v9  ;;  %5768 = vst [vmem:[%s7407_s18 + $0x9d0] sm:$0xff] %v2332_v26  ;;  %v8414_v26 = vld [vmem:[%s9651_s1 + $0x70] sm:$0xff]  }
 0x325   : > { %5938 = vmatmul.mubr.msk.bf16.gmra.mrb[16].mxu1 %vm449_vm0, %v7964_v43  ;;  %6174 = vmatmul.mubr.msk.bf16.vlgmr.msra.gmra.mrb[128].mxu0 %vm449_vm0, %v7856_v61 }
 0x326   : > { %4219 = vmatpush1.bf16.msra.mxu0 %v9703_v11  ;;  %3010 = vmatprep.mubr.bf16.mxu1 %v9677_v19  ;;  %v2334_v11 = vpop.f32.mrb[251].mxu0 }
 0x327   : > { %4220 = vmatprep.subr.bf16.mxu0 %v9704_v39  ;;  %3744 = vmatprep.mubr.bf16.mxu0 %v9677_v19  ;;  %5769 = vst [vmem:[%s7407_s18 + $0x9d8] sm:$0xff] %v2334_v11  ;;  %v2338_v39 = vpop.f32.mrb[252].mxu0 }
 0x328   : > { %v2030_v61 = vpop.f32.mrb[168].mxu1  ;;  %5770 = vst [vmem:[%s7407_s18 + $0x9e0] sm:$0xff] %v2338_v39  ;;  %v2340_v4 = vpop.f32.mrb[253].mxu0 }
 0x329   : > { %5670 = vst [vmem:[%s7407_s18 + $0x740] sm:$0xff] %v2030_v61  ;;  %v2032_v33 = vpop.f32.mrb[169].mxu1  ;;  %5771 = vst [vmem:[%s7407_s18 + $0x9e8] sm:$0xff] %v2340_v4  ;;  %v2342_v10 = vpop.f32.mrb[254].mxu0 }
 0x32a   : > { %4221 = vmatpush1.bf16.msra.mxu0 %v9705_v5  ;;  %5671 = vst [vmem:[%s7407_s18 + $0x748] sm:$0xff] %v2032_v33  ;;  %v2034_v53 = vpop.f32.mrb[170].mxu1  ;;  %5772 = vst [vmem:[%s7407_s18 + $0x9f0] sm:$0xff] %v2342_v10  ;;  %v2344_v60 = vpop.f32.mrb[255].mxu0  ;;  %v8433_v10 = vld [vmem:[%s9651_s1 + $0x78] sm:$0xff]  }
 0x32b   : > { %4734 = vmatprep.subr.bf16.mxu0 %v9706_v63  ;;  %5672 = vst [vmem:[%s7407_s18 + $0x750] sm:$0xff] %v2034_v53  ;;  %v2036_v37 = vpop.f32.mrb[171].mxu1  ;;  %5773 = vst [vmem:[%s7407_s18 + $0x9f8] sm:$0xff] %v2344_v60  ;;  %v2704_v53 = vpop.f32.mrb[0].mxu0 }
 0x32c   : > { %5673 = vst [vmem:[%s7407_s18 + $0x758] sm:$0xff] %v2036_v37  ;;  %5870 = vst [vmem:[%s7407_s18 + $0xc00] sm:$0xff] %v2704_v53  ;;  %v2706_v63 = vpop.f32.mrb[1].mxu0 }
 0x32d   : > { %5939 = vmatmul.mubr.msk.bf16.gmra.mrb[20].mxu1 %vm449_vm0, %v7995_v35  ;;  %6175 = vmatmul.mubr.msk.bf16.gmra.mrb[132].mxu0 %vm449_vm0, %v7892_v30  ;;  %5871 = vst [vmem:[%s7407_s18 + $0xc08] sm:$0xff] %v2706_v63  ;;  %v2708_v55 = vpop.f32.mrb[2].mxu0 }
 0x32e   : > { %3020 = vmatprep.mubr.bf16.mxu1 %v9677_v19  ;;  %3754 = vmatprep.mubr.bf16.mxu0 %v9677_v19  ;;  %5872 = vst [vmem:[%s7407_s18 + $0xc10] sm:$0xff] %v2708_v55  ;;  %v8452_v55 = vld [vmem:[%s9651_s1] sm:$0xff]  }
 0x330   : > { %v2040_v52 = vpop.f32.mrb[172].mxu1 }
 0x331   : > { %5674 = vst [vmem:[%s7407_s18 + $0x760] sm:$0xff] %v2040_v52  ;;  %v2042_v40 = vpop.f32.mrb[173].mxu1  ;;  %v2710_v52 = vpop.f32.mrb[3].mxu0 }
 0x332   : > { %5675 = vst [vmem:[%s7407_s18 + $0x768] sm:$0xff] %v2042_v40  ;;  %v2044_v30 = vpop.f32.mrb[174].mxu1  ;;  %5873 = vst [vmem:[%s7407_s18 + $0xc18] sm:$0xff] %v2710_v52  ;;  %v2714_v40 = vpop.f32.mrb[4].mxu0 }
 0x333   : > { %5676 = vst [vmem:[%s7407_s18 + $0x770] sm:$0xff] %v2044_v30  ;;  %v2046_v13 = vpop.f32.mrb[175].mxu1  ;;  %5874 = vst [vmem:[%s7407_s18 + $0xc20] sm:$0xff] %v2714_v40  ;;  %v2716_v20 = vpop.f32.mrb[5].mxu0  ;;  %v9710_v40 = vld [vmem:[#allocation7_spill] sm:$0xff] }
 0x334   : > { %5677 = vst [vmem:[%s7407_s18 + $0x778] sm:$0xff] %v2046_v13  ;;  %5875 = vst [vmem:[%s7407_s18 + $0xc28] sm:$0xff] %v2716_v20  ;;  %v2718_v13 = vpop.f32.mrb[6].mxu0 }
 0x335   : > { %5940 = vmatmul.mubr.msk.bf16.gmra.mrb[24].mxu1 %vm449_vm0, %v8014_v62  ;;  %6176 = vmatmul.mubr.msk.bf16.gmra.mrb[136].mxu0 %vm449_vm0, %v7916_v45  ;;  %5876 = vst [vmem:[%s7407_s18 + $0xc30] sm:$0xff] %v2718_v13  ;;  %v2720_v23 = vpop.f32.mrb[7].mxu0 }
 0x336   : > { %3030 = vmatprep.mubr.bf16.mxu1 %v9677_v19  ;;  %3764 = vmatprep.mubr.bf16.mxu0 %v9677_v19  ;;  %5877 = vst [vmem:[%s7407_s18 + $0xc38] sm:$0xff] %v2720_v23 }
 0x338   : > { %v2050_v48 = vpop.f32.mrb[176].mxu1 }
 0x339   : > { %5678 = vst [vmem:[%s7407_s18 + $0x780] sm:$0xff] %v2050_v48  ;;  %v2052_v42 = vpop.f32.mrb[177].mxu1 }
 0x33a   : > { %5679 = vst [vmem:[%s7407_s18 + $0x788] sm:$0xff] %v2052_v42  ;;  %v2054_v45 = vpop.f32.mrb[178].mxu1  ;;  %v2724_v42 = vpop.f32.mrb[8].mxu0 }
 0x33b   : > { %5680 = vst [vmem:[%s7407_s18 + $0x790] sm:$0xff] %v2054_v45  ;;  %v2056_v44 = vpop.f32.mrb[179].mxu1  ;;  %5878 = vst [vmem:[%s7407_s18 + $0xc40] sm:$0xff] %v2724_v42  ;;  %v2726_v49 = vpop.f32.mrb[9].mxu0 }
 0x33c   : > { %5681 = vst [vmem:[%s7407_s18 + $0x798] sm:$0xff] %v2056_v44  ;;  %5879 = vst [vmem:[%s7407_s18 + $0xc48] sm:$0xff] %v2726_v49  ;;  %v2728_v44 = vpop.f32.mrb[10].mxu0 }
 0x33d   : > { %5941 = vmatmul.mubr.msk.bf16.gmra.mrb[28].mxu1 %vm449_vm0, %v8033_v36  ;;  %6177 = vmatmul.mubr.msk.bf16.gmra.mrb[140].mxu0 %vm449_vm0, %v7940_v24  ;;  %5880 = vst [vmem:[%s7407_s18 + $0xc50] sm:$0xff] %v2728_v44  ;;  %v2730_v15 = vpop.f32.mrb[11].mxu0 }
 0x33e   : > { %3040 = vmatprep.mubr.bf16.mxu1 %v9677_v19  ;;  %3774 = vmatprep.mubr.bf16.mxu0 %v9677_v19  ;;  %5881 = vst [vmem:[%s7407_s18 + $0xc58] sm:$0xff] %v2730_v15 }
 0x340   : > { %v2060_v51 = vpop.f32.mrb[180].mxu1 }
 0x341   : > { %5682 = vst [vmem:[%s7407_s18 + $0x7a0] sm:$0xff] %v2060_v51  ;;  %v2062_v29 = vpop.f32.mrb[181].mxu1 }
 0x342   : > { %5683 = vst [vmem:[%s7407_s18 + $0x7a8] sm:$0xff] %v2062_v29  ;;  %v2064_v24 = vpop.f32.mrb[182].mxu1  ;;  %v2734_v29 = vpop.f32.mrb[12].mxu0 }
 0x343   : > { %5684 = vst [vmem:[%s7407_s18 + $0x7b0] sm:$0xff] %v2064_v24  ;;  %v2066_v21 = vpop.f32.mrb[183].mxu1  ;;  %5882 = vst [vmem:[%s7407_s18 + $0xc60] sm:$0xff] %v2734_v29  ;;  %v2736_v34 = vpop.f32.mrb[13].mxu0 }
 0x344   : > { %5685 = vst [vmem:[%s7407_s18 + $0x7b8] sm:$0xff] %v2066_v21  ;;  %5883 = vst [vmem:[%s7407_s18 + $0xc68] sm:$0xff] %v2736_v34  ;;  %v2738_v21 = vpop.f32.mrb[14].mxu0 }
 0x345   : > { %5942 = vmatmul.mubr.msk.bf16.gmra.mrb[32].mxu1 %vm449_vm0, %v8052_v17  ;;  %6178 = vmatmul.mubr.msk.bf16.gmra.mrb[144].mxu0 %vm449_vm0, %v7964_v43  ;;  %5884 = vst [vmem:[%s7407_s18 + $0xc70] sm:$0xff] %v2738_v21  ;;  %v2740_v14 = vpop.f32.mrb[15].mxu0  ;;  %v8502_v21 = vld [vmem:[%s9651_s1 + $0x10] sm:$0xff]  }
 0x346   : > { %3050 = vmatprep.mubr.bf16.mxu1 %v9677_v19  ;;  %3784 = vmatprep.mubr.bf16.mxu0 %v9677_v19  ;;  %5885 = vst [vmem:[%s7407_s18 + $0xc78] sm:$0xff] %v2740_v14 }
 0x348   : > { %v2070_v3 = vpop.f32.mrb[184].mxu1 }
 0x349   : > { %5686 = vst [vmem:[%s7407_s18 + $0x7c0] sm:$0xff] %v2070_v3  ;;  %v2072_v9 = vpop.f32.mrb[185].mxu1 }
 0x34a   : > { %5687 = vst [vmem:[%s7407_s18 + $0x7c8] sm:$0xff] %v2072_v9  ;;  %v2074_v43 = vpop.f32.mrb[186].mxu1  ;;  %v2744_v9 = vpop.f32.mrb[16].mxu0 }
 0x34b   : > { %5688 = vst [vmem:[%s7407_s18 + $0x7d0] sm:$0xff] %v2074_v43  ;;  %v2076_v25 = vpop.f32.mrb[187].mxu1  ;;  %5886 = vst [vmem:[%s7407_s18 + $0xc80] sm:$0xff] %v2744_v9  ;;  %v2746_v11 = vpop.f32.mrb[17].mxu0 }
 0x34c   : > { %5689 = vst [vmem:[%s7407_s18 + $0x7d8] sm:$0xff] %v2076_v25  ;;  %5887 = vst [vmem:[%s7407_s18 + $0xc88] sm:$0xff] %v2746_v11  ;;  %v2748_v25 = vpop.f32.mrb[18].mxu0 }
 0x34d   : > { %5943 = vmatmul.mubr.msk.bf16.gmra.mrb[36].mxu1 %vm449_vm0, %v8071_v7  ;;  %6179 = vmatmul.mubr.msk.bf16.gmra.mrb[148].mxu0 %vm449_vm0, %v7995_v35  ;;  %5888 = vst [vmem:[%s7407_s18 + $0xc90] sm:$0xff] %v2748_v25  ;;  %v2750_v4 = vpop.f32.mrb[19].mxu0 }
 0x34e   : > { %3060 = vmatprep.mubr.bf16.mxu1 %v9677_v19  ;;  %3794 = vmatprep.mubr.bf16.mxu0 %v9677_v19  ;;  %5889 = vst [vmem:[%s7407_s18 + $0xc98] sm:$0xff] %v2750_v4 }
 0x350   : > { %v2080_v61 = vpop.f32.mrb[188].mxu1 }
 0x351   : > { %5690 = vst [vmem:[%s7407_s18 + $0x7e0] sm:$0xff] %v2080_v61  ;;  %v2082_v33 = vpop.f32.mrb[189].mxu1 }
 0x352   : > { %5691 = vst [vmem:[%s7407_s18 + $0x7e8] sm:$0xff] %v2082_v33  ;;  %v2084_v35 = vpop.f32.mrb[190].mxu1  ;;  %v2754_v33 = vpop.f32.mrb[20].mxu0 }
 0x353   : > { %5692 = vst [vmem:[%s7407_s18 + $0x7f0] sm:$0xff] %v2084_v35  ;;  %v2086_v5 = vpop.f32.mrb[191].mxu1  ;;  %5890 = vst [vmem:[%s7407_s18 + $0xca0] sm:$0xff] %v2754_v33  ;;  %v2756_v60 = vpop.f32.mrb[21].mxu0 }
 0x354   : > { %5693 = vst [vmem:[%s7407_s18 + $0x7f8] sm:$0xff] %v2086_v5  ;;  %5891 = vst [vmem:[%s7407_s18 + $0xca8] sm:$0xff] %v2756_v60  ;;  %v2758_v5 = vpop.f32.mrb[22].mxu0 }
 0x355   : > { %5944 = vmatmul.mubr.msk.bf16.gmra.mrb[40].mxu1 %vm449_vm0, %v8090_v6  ;;  %6180 = vmatmul.mubr.msk.bf16.gmra.mrb[152].mxu0 %vm449_vm0, %v8014_v62  ;;  %5892 = vst [vmem:[%s7407_s18 + $0xcb0] sm:$0xff] %v2758_v5  ;;  %v2760_v63 = vpop.f32.mrb[23].mxu0 }
 0x356   : > { %3070 = vmatprep.mubr.bf16.mxu1 %v9677_v19  ;;  %3804 = vmatprep.mubr.bf16.mxu0 %v9677_v19  ;;  %5893 = vst [vmem:[%s7407_s18 + $0xcb8] sm:$0xff] %v2760_v63  ;;  %v8540_v63 = vld [vmem:[%s9651_s1 + $0x20] sm:$0xff]  }
 0x358   : > { %v2446_v37 = vpop.f32.mrb[192].mxu1 }
 0x359   : > { %5790 = vst [vmem:[%s7407_s18 + $0xa00] sm:$0xff] %v2446_v37  ;;  %v2448_v38 = vpop.f32.mrb[193].mxu1 }
 0x35a   : > { %5791 = vst [vmem:[%s7407_s18 + $0xa08] sm:$0xff] %v2448_v38  ;;  %v2450_v62 = vpop.f32.mrb[194].mxu1  ;;  %v9707_v38 = vld [vmem:[#allocation5_spill] sm:$0xff] }
 0x35b   : > { %5792 = vst [vmem:[%s7407_s18 + $0xa10] sm:$0xff] %v2450_v62  ;;  %v2452_v59 = vpop.f32.mrb[195].mxu1  ;;  %v9708_v52 = vpack.c.bf16 %v7541_v27, %v9707_v38  ;;  %v2764_v62 = vpop.f32.mrb[24].mxu0  ;;  %v9717_v38 = vpack.c.bf16 %v7716_v32, %v7711_v58 }
 0x35c   : > { %5793 = vst [vmem:[%s7407_s18 + $0xa18] sm:$0xff] %v2452_v59  ;;  %v9709_v59 = vld [vmem:[#allocation9_spill] sm:$0xff]  ;;  %5894 = vst [vmem:[%s7407_s18 + $0xcc0] sm:$0xff] %v2764_v62 }
 0x35d   : > { %5945 = vmatmul.mubr.msk.bf16.gmra.mrb[44].mxu1 %vm449_vm0, %v8109_v47  ;;  %6181 = vmatmul.mubr.msk.bf16.gmra.mrb[156].mxu0 %vm449_vm0, %v8033_v36  ;;  %v9711_v20 = vpack.c.bf16 %v9709_v59, %v9710_v40  ;;  %v9718_v40 = vpack.c.bf16 %v7713_v54, %v7709_v56 }
 0x35e   : > { %3080 = vmatprep.mubr.bf16.mxu1 %v9677_v19  ;;  %3814 = vmatprep.mubr.bf16.mxu0 %v9677_v19 }
 0x360   : > { %v2456_v30 = vpop.f32.mrb[196].mxu1 }
 0x361   : > { %5794 = vst [vmem:[%s7407_s18 + $0xa20] sm:$0xff] %v2456_v30  ;;  %v2458_v28 = vpop.f32.mrb[197].mxu1  ;;  %v2766_v30 = vpop.f32.mrb[25].mxu0 }
 0x362   : > { %5795 = vst [vmem:[%s7407_s18 + $0xa28] sm:$0xff] %v2458_v28  ;;  %v2460_v36 = vpop.f32.mrb[198].mxu1  ;;  %5895 = vst [vmem:[%s7407_s18 + $0xcc8] sm:$0xff] %v2766_v30  ;;  %v2768_v28 = vpop.f32.mrb[26].mxu0 }
 0x363   : > { %5796 = vst [vmem:[%s7407_s18 + $0xa30] sm:$0xff] %v2460_v36  ;;  %v2462_v48 = vpop.f32.mrb[199].mxu1  ;;  %5896 = vst [vmem:[%s7407_s18 + $0xcd0] sm:$0xff] %v2768_v28  ;;  %v2770_v23 = vpop.f32.mrb[27].mxu0  ;;  %v9712_v36 = vld [vmem:[#allocation8_spill] sm:$0xff] }
 0x364   : > { %5797 = vst [vmem:[%s7407_s18 + $0xa38] sm:$0xff] %v2462_v48  ;;  %v9713_v48 = vld [vmem:[#allocation6_spill] sm:$0xff]  ;;  %5897 = vst [vmem:[%s7407_s18 + $0xcd8] sm:$0xff] %v2770_v23 }
 0x365   : > { %5946 = vmatmul.mubr.msk.bf16.gmra.mrb[48].mxu1 %vm449_vm0, %v8376_v50  ;;  %6182 = vmatmul.mubr.msk.bf16.gmra.mrb[160].mxu0 %vm449_vm0, %v8052_v17  ;;  %v9714_v42 = vpack.c.bf16 %v9712_v36, %v9713_v48  ;;  %v8587_v48 = vld [vmem:[%s9651_s1 + $0x30] sm:$0xff]  }
 0x366   : > { %3090 = vmatprep.mubr.bf16.mxu1 %v9677_v19  ;;  %3824 = vmatprep.mubr.bf16.mxu0 %v9677_v19 }
 0x368   : > { %v2466_v45 = vpop.f32.mrb[200].mxu1 }
 0x369   : > { %5798 = vst [vmem:[%s7407_s18 + $0xa40] sm:$0xff] %v2466_v45  ;;  %v2468_v16 = vpop.f32.mrb[201].mxu1  ;;  %v9715_v45 = vpack.c.bf16 %v7644_v0, %v7636_v22  ;;  %v2774_v0 = vpop.f32.mrb[28].mxu0 }
 0x36a   : > { %5799 = vst [vmem:[%s7407_s18 + $0xa48] sm:$0xff] %v2468_v16  ;;  %v2470_v17 = vpop.f32.mrb[202].mxu1  ;;  %v8483_v16 = vld [vmem:[%s9651_s1 + $0x8] sm:$0xff]   ;;  %5898 = vst [vmem:[%s7407_s18 + $0xce0] sm:$0xff] %v2774_v0  ;;  %v2776_v22 = vpop.f32.mrb[29].mxu0 }
 0x36b   : > { %5800 = vst [vmem:[%s7407_s18 + $0xa50] sm:$0xff] %v2470_v17  ;;  %v2472_v51 = vpop.f32.mrb[203].mxu1  ;;  %5899 = vst [vmem:[%s7407_s18 + $0xce8] sm:$0xff] %v2776_v22  ;;  %v2778_v17 = vpop.f32.mrb[30].mxu0 }
 0x36c   : > { %5801 = vst [vmem:[%s7407_s18 + $0xa58] sm:$0xff] %v2472_v51  ;;  %5900 = vst [vmem:[%s7407_s18 + $0xcf0] sm:$0xff] %v2778_v17  ;;  %v2780_v29 = vpop.f32.mrb[31].mxu0 }
 0x36d   : > { %5947 = vmatmul.mubr.msk.bf16.gmra.mrb[52].mxu1 %vm449_vm0, %v8395_v18  ;;  %6183 = vmatmul.mubr.msk.bf16.gmra.mrb[164].mxu0 %vm449_vm0, %v8071_v7  ;;  %5901 = vst [vmem:[%s7407_s18 + $0xcf8] sm:$0xff] %v2780_v29 }
 0x36e   : > { %3100 = vmatprep.mubr.bf16.mxu1 %v9677_v19  ;;  %3834 = vmatprep.mubr.bf16.mxu0 %v9677_v19 }
 0x370   : > { %v2476_v24 = vpop.f32.mrb[204].mxu1 }
 0x371   : > { %5802 = vst [vmem:[%s7407_s18 + $0xa60] sm:$0xff] %v2476_v24  ;;  %v2478_v12 = vpop.f32.mrb[205].mxu1 }
 0x372   : > { %5803 = vst [vmem:[%s7407_s18 + $0xa68] sm:$0xff] %v2478_v12  ;;  %v2480_v7 = vpop.f32.mrb[206].mxu1  ;;  %v2784_v12 = vpop.f32.mrb[32].mxu0 }
 0x373   : > { %5804 = vst [vmem:[%s7407_s18 + $0xa70] sm:$0xff] %v2480_v7  ;;  %v2482_v3 = vpop.f32.mrb[207].mxu1  ;;  %5902 = vst [vmem:[%s7407_s18 + $0xd00] sm:$0xff] %v2784_v12  ;;  %v2786_v14 = vpop.f32.mrb[33].mxu0 }
 0x374   : > { %5805 = vst [vmem:[%s7407_s18 + $0xa78] sm:$0xff] %v2482_v3  ;;  %5903 = vst [vmem:[%s7407_s18 + $0xd08] sm:$0xff] %v2786_v14  ;;  %v2788_v3 = vpop.f32.mrb[34].mxu0 }
 0x375   : > { %5948 = vmatmul.mubr.msk.bf16.gmra.mrb[56].mxu1 %vm449_vm0, %v8414_v26  ;;  %6184 = vmatmul.mubr.msk.bf16.gmra.mrb[168].mxu0 %vm449_vm0, %v8090_v6  ;;  %5904 = vst [vmem:[%s7407_s18 + $0xd10] sm:$0xff] %v2788_v3  ;;  %v2790_v11 = vpop.f32.mrb[35].mxu0 }
 0x376   : > { %3110 = vmatprep.mubr.bf16.mxu1 %v9677_v19  ;;  %3844 = vmatprep.mubr.bf16.mxu0 %v9677_v19  ;;  %5905 = vst [vmem:[%s7407_s18 + $0xd18] sm:$0xff] %v2790_v11  ;;  %v2794_v4 = vpop.f32.mrb[36].mxu0  ;;  %v8625_v11 = vld [vmem:[%s9651_s1 + $0x40] sm:$0xff]  }
 0x377   : > { %5906 = vst [vmem:[%s7407_s18 + $0xd20] sm:$0xff] %v2794_v4 }
 0x378   : > { %v2486_v43 = vpop.f32.mrb[208].mxu1 }
 0x379   : > { %5806 = vst [vmem:[%s7407_s18 + $0xa80] sm:$0xff] %v2486_v43  ;;  %v2488_v39 = vpop.f32.mrb[209].mxu1 }
 0x37a   : > { %5807 = vst [vmem:[%s7407_s18 + $0xa88] sm:$0xff] %v2488_v39  ;;  %v2490_v6 = vpop.f32.mrb[210].mxu1  ;;  %v8521_v39 = vld [vmem:[%s9651_s1 + $0x18] sm:$0xff]  }
 0x37b   : > { %5808 = vst [vmem:[%s7407_s18 + $0xa90] sm:$0xff] %v2490_v6  ;;  %v2492_v61 = vpop.f32.mrb[211].mxu1  ;;  %v2796_v6 = vpop.f32.mrb[37].mxu0 }
 0x37c   : > { %5809 = vst [vmem:[%s7407_s18 + $0xa98] sm:$0xff] %v2492_v61  ;;  %5907 = vst [vmem:[%s7407_s18 + $0xd28] sm:$0xff] %v2796_v6  ;;  %v2798_v33 = vpop.f32.mrb[38].mxu0 }
 0x37d   : > { %5949 = vmatmul.mubr.msk.bf16.gmra.mrb[60].mxu1 %vm449_vm0, %v8433_v10  ;;  %6185 = vmatmul.mubr.msk.bf16.gmra.mrb[172].mxu0 %vm449_vm0, %v8109_v47  ;;  %5908 = vst [vmem:[%s7407_s18 + $0xd30] sm:$0xff] %v2798_v33 }
 0x37e   : > { %3476 = vmatprep.mubr.bf16.mxu1 %v9677_v19  ;;  %3854 = vmatprep.mubr.bf16.mxu0 %v9677_v19 }
 0x380   : > { %v2496_v35 = vpop.f32.mrb[212].mxu1 }
 0x381   : > { %5810 = vst [vmem:[%s7407_s18 + $0xaa0] sm:$0xff] %v2496_v35  ;;  %v2498_v53 = vpop.f32.mrb[213].mxu1  ;;  %v2800_v35 = vpop.f32.mrb[39].mxu0 }
 0x382   : > { %5811 = vst [vmem:[%s7407_s18 + $0xaa8] sm:$0xff] %v2498_v53  ;;  %v2500_v37 = vpop.f32.mrb[214].mxu1  ;;  %5909 = vst [vmem:[%s7407_s18 + $0xd38] sm:$0xff] %v2800_v35 }
 0x383   : > { %5812 = vst [vmem:[%s7407_s18 + $0xab0] sm:$0xff] %v2500_v37  ;;  %v2502_v47 = vpop.f32.mrb[215].mxu1  ;;  %v9716_v37 = vpack.c.bf16 %v7691_v8, %v7687_v2 }
 0x384   : > { %5813 = vst [vmem:[%s7407_s18 + $0xab8] sm:$0xff] %v2502_v47  ;;  %v2804_v47 = vpop.f32.mrb[40].mxu0 }
 0x385   : > { %6094 = vmatmul.mubr.msk.bf16.vlgmr.msra.gmra.mrb[64].mxu1 %vm449_vm0, %v8452_v55  ;;  %6186 = vmatmul.mubr.msk.bf16.gmra.mrb[176].mxu0 %vm449_vm0, %v8376_v50  ;;  %5910 = vst [vmem:[%s7407_s18 + $0xd40] sm:$0xff] %v2804_v47 }
 0x386   : > { %3961 = vmatpush1.bf16.msra.mxu1 %v9708_v52  ;;  %3486 = vmatprep.mubr.bf16.mxu1 %v9677_v19  ;;  %v2806_v52 = vpop.f32.mrb[41].mxu0 }
 0x387   : > { %3962 = vmatprep.subr.bf16.mxu1 %v9711_v20  ;;  %3864 = vmatprep.mubr.bf16.mxu0 %v9677_v19  ;;  %5911 = vst [vmem:[%s7407_s18 + $0xd48] sm:$0xff] %v2806_v52  ;;  %v2808_v59 = vpop.f32.mrb[42].mxu0  ;;  %v8568_v20 = vld [vmem:[%s9651_s1 + $0x28] sm:$0xff]  }
 0x388   : > { %v2506_v13 = vpop.f32.mrb[216].mxu1  ;;  %5912 = vst [vmem:[%s7407_s18 + $0xd50] sm:$0xff] %v2808_v59  ;;  %v2810_v8 = vpop.f32.mrb[43].mxu0 }
 0x389   : > { %5814 = vst [vmem:[%s7407_s18 + $0xac0] sm:$0xff] %v2506_v13  ;;  %v2508_v27 = vpop.f32.mrb[217].mxu1  ;;  %5913 = vst [vmem:[%s7407_s18 + $0xd58] sm:$0xff] %v2810_v8  ;;  %v2814_v56 = vpop.f32.mrb[44].mxu0  ;;  %v8663_v8 = vld [vmem:[%s9651_s1 + $0x50] sm:$0xff]  }
 0x38a   : > { %3963 = vmatpush1.bf16.msra.mxu1 %v9714_v42  ;;  %5815 = vst [vmem:[%s7407_s18 + $0xac8] sm:$0xff] %v2508_v27  ;;  %v2510_v49 = vpop.f32.mrb[218].mxu1  ;;  %5914 = vst [vmem:[%s7407_s18 + $0xd60] sm:$0xff] %v2814_v56  ;;  %v2816_v54 = vpop.f32.mrb[45].mxu0 }
 0x38b   : > { %4476 = vmatprep.subr.bf16.mxu1 %v9715_v45  ;;  %5816 = vst [vmem:[%s7407_s18 + $0xad0] sm:$0xff] %v2510_v49  ;;  %v2512_v44 = vpop.f32.mrb[219].mxu1  ;;  %5915 = vst [vmem:[%s7407_s18 + $0xd68] sm:$0xff] %v2816_v54  ;;  %v2818_v13 = vpop.f32.mrb[46].mxu0 }
 0x38c   : > { %5817 = vst [vmem:[%s7407_s18 + $0xad8] sm:$0xff] %v2512_v44  ;;  %5916 = vst [vmem:[%s7407_s18 + $0xd70] sm:$0xff] %v2818_v13  ;;  %v2820_v27 = vpop.f32.mrb[47].mxu0 }
 0x38d   : > { %6095 = vmatmul.mubr.msk.bf16.gmra.mrb[68].mxu1 %vm449_vm0, %v8483_v16  ;;  %6187 = vmatmul.mubr.msk.bf16.gmra.mrb[180].mxu0 %vm449_vm0, %v8395_v18  ;;  %5917 = vst [vmem:[%s7407_s18 + $0xd78] sm:$0xff] %v2820_v27  ;;  %v2824_v42 = vpop.f32.mrb[48].mxu0  ;;  %v8682_v27 = vld [vmem:[%s9651_s1 + $0x58] sm:$0xff]  }
 0x38e   : > { %3496 = vmatprep.mubr.bf16.mxu1 %v9677_v19  ;;  %3874 = vmatprep.mubr.bf16.mxu0 %v9677_v19  ;;  %5918 = vst [vmem:[%s7407_s18 + $0xd80] sm:$0xff] %v2824_v42  ;;  %v2826_v49 = vpop.f32.mrb[49].mxu0 }
 0x38f   : > { %5919 = vst [vmem:[%s7407_s18 + $0xd88] sm:$0xff] %v2826_v49  ;;  %v2828_v44 = vpop.f32.mrb[50].mxu0 }
 0x390   : > { %v2516_v15 = vpop.f32.mrb[220].mxu1  ;;  %5920 = vst [vmem:[%s7407_s18 + $0xd90] sm:$0xff] %v2828_v44  ;;  %v2830_v22 = vpop.f32.mrb[51].mxu0 }
 0x391   : > { %5818 = vst [vmem:[%s7407_s18 + $0xae0] sm:$0xff] %v2516_v15  ;;  %v2518_v51 = vpop.f32.mrb[221].mxu1  ;;  %5921 = vst [vmem:[%s7407_s18 + $0xd98] sm:$0xff] %v2830_v22  ;;  %v2834_v29 = vpop.f32.mrb[52].mxu0 }
 0x392   : > { %5819 = vst [vmem:[%s7407_s18 + $0xae8] sm:$0xff] %v2518_v51  ;;  %v2520_v34 = vpop.f32.mrb[222].mxu1  ;;  %v8606_v51 = vld [vmem:[%s9651_s1 + $0x38] sm:$0xff]   ;;  %5922 = vst [vmem:[%s7407_s18 + $0xda0] sm:$0xff] %v2834_v29 }
 0x393   : > { %5820 = vst [vmem:[%s7407_s18 + $0xaf0] sm:$0xff] %v2520_v34  ;;  %v2522_v24 = vpop.f32.mrb[223].mxu1  ;;  %v2836_v34 = vpop.f32.mrb[53].mxu0 }
 0x394   : > { %5821 = vst [vmem:[%s7407_s18 + $0xaf8] sm:$0xff] %v2522_v24  ;;  %5923 = vst [vmem:[%s7407_s18 + $0xda8] sm:$0xff] %v2836_v34  ;;  %v2838_v12 = vpop.f32.mrb[54].mxu0 }
 0x395   : > { %6096 = vmatmul.mubr.msk.bf16.gmra.mrb[72].mxu1 %vm449_vm0, %v8502_v21  ;;  %6188 = vmatmul.mubr.msk.bf16.gmra.mrb[184].mxu0 %vm449_vm0, %v8414_v26  ;;  %5924 = vst [vmem:[%s7407_s18 + $0xdb0] sm:$0xff] %v2838_v12 }
 0x396   : > { %3506 = vmatprep.mubr.bf16.mxu1 %v9677_v19  ;;  %3884 = vmatprep.mubr.bf16.mxu0 %v9677_v19 }
 0x398   : > { %v2526_v7 = vpop.f32.mrb[224].mxu1 }
 0x399   : > { %5822 = vst [vmem:[%s7407_s18 + $0xb00] sm:$0xff] %v2526_v7  ;;  %v2528_v9 = vpop.f32.mrb[225].mxu1  ;;  %v2840_v7 = vpop.f32.mrb[55].mxu0 }
 0x39a   : > { %5823 = vst [vmem:[%s7407_s18 + $0xb08] sm:$0xff] %v2528_v9  ;;  %v2530_v43 = vpop.f32.mrb[226].mxu1  ;;  %5925 = vst [vmem:[%s7407_s18 + $0xdb8] sm:$0xff] %v2840_v7 }
 0x39b   : > { %5824 = vst [vmem:[%s7407_s18 + $0xb10] sm:$0xff] %v2530_v43  ;;  %v2532_v25 = vpop.f32.mrb[227].mxu1  ;;  %v2844_v43 = vpop.f32.mrb[56].mxu0 }
 0x39c   : > { %5825 = vst [vmem:[%s7407_s18 + $0xb18] sm:$0xff] %v2532_v25  ;;  %5926 = vst [vmem:[%s7407_s18 + $0xdc0] sm:$0xff] %v2844_v43  ;;  %v2846_v25 = vpop.f32.mrb[57].mxu0 }
 0x39d   : > { %6097 = vmatmul.mubr.msk.bf16.gmra.mrb[76].mxu1 %vm449_vm0, %v8521_v39  ;;  %6189 = vmatmul.mubr.msk.bf16.gmra.mrb[188].mxu0 %vm449_vm0, %v8433_v10  ;;  %5927 = vst [vmem:[%s7407_s18 + $0xdc8] sm:$0xff] %v2846_v25  ;;  %v2848_v6 = vpop.f32.mrb[58].mxu0 }
 0x39e   : > { %3516 = vmatprep.mubr.bf16.mxu1 %v9677_v19  ;;  %4250 = vmatprep.mubr.bf16.mxu0 %v9677_v19  ;;  %5928 = vst [vmem:[%s7407_s18 + $0xdd0] sm:$0xff] %v2848_v6  ;;  %v2850_v33 = vpop.f32.mrb[59].mxu0 }
 0x39f   : > { %5929 = vst [vmem:[%s7407_s18 + $0xdd8] sm:$0xff] %v2850_v33 }
 0x3a0   : > { %v2536_v61 = vpop.f32.mrb[228].mxu1 }
 0x3a1   : > { %5826 = vst [vmem:[%s7407_s18 + $0xb20] sm:$0xff] %v2536_v61  ;;  %v2538_v60 = vpop.f32.mrb[229].mxu1 }
 0x3a2   : > { %5827 = vst [vmem:[%s7407_s18 + $0xb28] sm:$0xff] %v2538_v60  ;;  %v2540_v5 = vpop.f32.mrb[230].mxu1 }
 0x3a3   : > { %5828 = vst [vmem:[%s7407_s18 + $0xb30] sm:$0xff] %v2540_v5  ;;  %v2542_v53 = vpop.f32.mrb[231].mxu1  ;;  %v8644_v5 = vld [vmem:[%s9651_s1 + $0x48] sm:$0xff]  }
 0x3a4   : > { %5829 = vst [vmem:[%s7407_s18 + $0xb38] sm:$0xff] %v2542_v53  ;;  %v2854_v53 = vpop.f32.mrb[60].mxu0 }
 0x3a5   : > { %6098 = vmatmul.mubr.msk.bf16.gmra.mrb[80].mxu1 %vm449_vm0, %v8540_v63  ;;  %6334 = vmatmul.mubr.msk.bf16.vlgmr.msra.gmra.mrb[192].mxu0 %vm449_vm0, %v8452_v55  ;;  %5930 = vst [vmem:[%s7407_s18 + $0xde0] sm:$0xff] %v2854_v53 }
 0x3a6   : > { %4735 = vmatpush1.bf16.msra.mxu0 %v9716_v37  ;;  %3526 = vmatprep.mubr.bf16.mxu1 %v9677_v19  ;;  %v2856_v37 = vpop.f32.mrb[61].mxu0 }
 0x3a7   : > { %4736 = vmatprep.subr.bf16.mxu0 %v9717_v38  ;;  %4260 = vmatprep.mubr.bf16.mxu0 %v9677_v19  ;;  %5931 = vst [vmem:[%s7407_s18 + $0xde8] sm:$0xff] %v2856_v37  ;;  %v2858_v38 = vpop.f32.mrb[62].mxu0 }
 0x3a8   : > { %v2546_v62 = vpop.f32.mrb[232].mxu1  ;;  %5932 = vst [vmem:[%s7407_s18 + $0xdf0] sm:$0xff] %v2858_v38 }
 0x3a9   : > { %5830 = vst [vmem:[%s7407_s18 + $0xb40] sm:$0xff] %v2546_v62  ;;  %v2548_v2 = vpop.f32.mrb[233].mxu1  ;;  %v2860_v62 = vpop.f32.mrb[63].mxu0 }
 0x3aa   : > { %4737 = vmatpush1.bf16.msra.mxu0 %v9718_v40  ;;  %5831 = vst [vmem:[%s7407_s18 + $0xb48] sm:$0xff] %v2548_v2  ;;  %v2550_v32 = vpop.f32.mrb[234].mxu1  ;;  %5933 = vst [vmem:[%s7407_s18 + $0xdf8] sm:$0xff] %v2860_v62  ;;  %v3220_v40 = vpop.f32.mrb[64].mxu0 }
 0x3ab   : > { %5832 = vst [vmem:[%s7407_s18 + $0xb50] sm:$0xff] %v2550_v32  ;;  %v2552_v58 = vpop.f32.mrb[235].mxu1  ;;  %6030 = vst [vmem:[%s7407_s18 + $0x1000] sm:$0xff] %v3220_v40  ;;  %v3222_v32 = vpop.f32.mrb[65].mxu0 }
 0x3ac   : > { %5833 = vst [vmem:[%s7407_s18 + $0xb58] sm:$0xff] %v2552_v58  ;;  %6031 = vst [vmem:[%s7407_s18 + $0x1008] sm:$0xff] %v3222_v32  ;;  %v3224_v56 = vpop.f32.mrb[66].mxu0 }
 0x3ad   : > { %6099 = vmatmul.mubr.msk.bf16.gmra.mrb[84].mxu1 %vm449_vm0, %v8568_v20  ;;  %6335 = vmatmul.mubr.msk.bf16.gmra.mrb[196].mxu0 %vm449_vm0, %v8483_v16  ;;  %6032 = vst [vmem:[%s7407_s18 + $0x1010] sm:$0xff] %v3224_v56 }
 0x3ae   : > { %3536 = vmatprep.mubr.bf16.mxu1 %v9677_v19  ;;  %4270 = vmatprep.mubr.bf16.mxu0 %v9677_v19 }
 0x3b0   : > { %v2556_v30 = vpop.f32.mrb[236].mxu1 }
 0x3b1   : > { %5834 = vst [vmem:[%s7407_s18 + $0xb60] sm:$0xff] %v2556_v30  ;;  %v2558_v28 = vpop.f32.mrb[237].mxu1  ;;  %v3226_v30 = vpop.f32.mrb[67].mxu0 }
 0x3b2   : > { %5835 = vst [vmem:[%s7407_s18 + $0xb68] sm:$0xff] %v2558_v28  ;;  %v2560_v23 = vpop.f32.mrb[238].mxu1  ;;  %6033 = vst [vmem:[%s7407_s18 + $0x1018] sm:$0xff] %v3226_v30 }
 0x3b3   : > { %5836 = vst [vmem:[%s7407_s18 + $0xb70] sm:$0xff] %v2560_v23  ;;  %v2562_v36 = vpop.f32.mrb[239].mxu1  ;;  %v3230_v23 = vpop.f32.mrb[68].mxu0 }
 0x3b4   : > { %5837 = vst [vmem:[%s7407_s18 + $0xb78] sm:$0xff] %v2562_v36  ;;  %6034 = vst [vmem:[%s7407_s18 + $0x1020] sm:$0xff] %v3230_v23  ;;  %v3232_v36 = vpop.f32.mrb[69].mxu0 }
 0x3b5   : > { %6100 = vmatmul.mubr.msk.bf16.gmra.mrb[88].mxu1 %vm449_vm0, %v8587_v48  ;;  %6336 = vmatmul.mubr.msk.bf16.gmra.mrb[200].mxu0 %vm449_vm0, %v8502_v21  ;;  %6035 = vst [vmem:[%s7407_s18 + $0x1028] sm:$0xff] %v3232_v36  ;;  %v3234_v49 = vpop.f32.mrb[70].mxu0  ;;  %v9721_v36 = vld [vmem:[#allocation14_spill] sm:$0xff] }
 0x3b6   : > { %3546 = vmatprep.mubr.bf16.mxu1 %v9677_v19  ;;  %4280 = vmatprep.mubr.bf16.mxu0 %v9677_v19  ;;  %6036 = vst [vmem:[%s7407_s18 + $0x1030] sm:$0xff] %v3234_v49  ;;  %v3236_v44 = vpop.f32.mrb[71].mxu0 }
 0x3b7   : > { %6037 = vst [vmem:[%s7407_s18 + $0x1038] sm:$0xff] %v3236_v44 }
 0x3b8   : > { %v2566_v45 = vpop.f32.mrb[240].mxu1 }
 0x3b9   : > { %5838 = vst [vmem:[%s7407_s18 + $0xb80] sm:$0xff] %v2566_v45  ;;  %v2568_v0 = vpop.f32.mrb[241].mxu1 }
 0x3ba   : > { %5839 = vst [vmem:[%s7407_s18 + $0xb88] sm:$0xff] %v2568_v0  ;;  %v2570_v15 = vpop.f32.mrb[242].mxu1 }
 0x3bb   : > { %5840 = vst [vmem:[%s7407_s18 + $0xb90] sm:$0xff] %v2570_v15  ;;  %v2572_v17 = vpop.f32.mrb[243].mxu1  ;;  %v3240_v15 = vpop.f32.mrb[72].mxu0 }
 0x3bc   : > { %5841 = vst [vmem:[%s7407_s18 + $0xb98] sm:$0xff] %v2572_v17  ;;  %6038 = vst [vmem:[%s7407_s18 + $0x1040] sm:$0xff] %v3240_v15  ;;  %v3242_v17 = vpop.f32.mrb[73].mxu0  ;;  %v9725_v15 = vld [vmem:[#allocation11_spill] sm:$0xff] }
 0x3bd   : > { %6101 = vmatmul.mubr.msk.bf16.gmra.mrb[92].mxu1 %vm449_vm0, %v8606_v51  ;;  %6337 = vmatmul.mubr.msk.bf16.gmra.mrb[204].mxu0 %vm449_vm0, %v8521_v39  ;;  %6039 = vst [vmem:[%s7407_s18 + $0x1048] sm:$0xff] %v3242_v17  ;;  %v3244_v34 = vpop.f32.mrb[74].mxu0 }
 0x3be   : > { %3556 = vmatprep.mubr.bf16.mxu1 %v9677_v19  ;;  %4290 = vmatprep.mubr.bf16.mxu0 %v9677_v19  ;;  %6040 = vst [vmem:[%s7407_s18 + $0x1050] sm:$0xff] %v3244_v34  ;;  %v3246_v12 = vpop.f32.mrb[75].mxu0  ;;  %v9727_v34 = vld [vmem:[#allocation16_spill] sm:$0xff] }
 0x3bf   : > { %6041 = vst [vmem:[%s7407_s18 + $0x1058] sm:$0xff] %v3246_v12 }
 0x3c0   : > { %v2576_v24 = vpop.f32.mrb[244].mxu1 }
 0x3c1   : > { %5842 = vst [vmem:[%s7407_s18 + $0xba0] sm:$0xff] %v2576_v24  ;;  %v2578_v14 = vpop.f32.mrb[245].mxu1 }
 0x3c2   : > { %5843 = vst [vmem:[%s7407_s18 + $0xba8] sm:$0xff] %v2578_v14  ;;  %v2580_v3 = vpop.f32.mrb[246].mxu1 }
 0x3c3   : > { %5844 = vst [vmem:[%s7407_s18 + $0xbb0] sm:$0xff] %v2580_v3  ;;  %v2582_v9 = vpop.f32.mrb[247].mxu1  ;;  %v3250_v3 = vpop.f32.mrb[76].mxu0 }
 0x3c4   : > { %5845 = vst [vmem:[%s7407_s18 + $0xbb8] sm:$0xff] %v2582_v9  ;;  %6042 = vst [vmem:[%s7407_s18 + $0x1060] sm:$0xff] %v3250_v3  ;;  %v3252_v9 = vpop.f32.mrb[77].mxu0 }
 0x3c5   : > { %6102 = vmatmul.mubr.msk.bf16.gmra.mrb[96].mxu1 %vm449_vm0, %v8625_v11  ;;  %6338 = vmatmul.mubr.msk.bf16.gmra.mrb[208].mxu0 %vm449_vm0, %v8540_v63  ;;  %6043 = vst [vmem:[%s7407_s18 + $0x1068] sm:$0xff] %v3252_v9  ;;  %v3254_v25 = vpop.f32.mrb[78].mxu0 }
 0x3c6   : > { %3566 = vmatprep.mubr.bf16.mxu1 %v9677_v19  ;;  %4300 = vmatprep.mubr.bf16.mxu0 %v9677_v19  ;;  %6044 = vst [vmem:[%s7407_s18 + $0x1070] sm:$0xff] %v3254_v25  ;;  %v3256_v6 = vpop.f32.mrb[79].mxu0 }
 0x3c7   : > { %6045 = vst [vmem:[%s7407_s18 + $0x1078] sm:$0xff] %v3256_v6 }
 0x3c8   : > { %v2586_v4 = vpop.f32.mrb[248].mxu1 }
 0x3c9   : > { %5846 = vst [vmem:[%s7407_s18 + $0xbc0] sm:$0xff] %v2586_v4  ;;  %v2588_v61 = vpop.f32.mrb[249].mxu1 }
 0x3ca   : > { %5847 = vst [vmem:[%s7407_s18 + $0xbc8] sm:$0xff] %v2588_v61  ;;  %v2590_v60 = vpop.f32.mrb[250].mxu1 }
 0x3cb   : > { %5848 = vst [vmem:[%s7407_s18 + $0xbd0] sm:$0xff] %v2590_v60  ;;  %v2592_v35 = vpop.f32.mrb[251].mxu1  ;;  %v3260_v60 = vpop.f32.mrb[80].mxu0 }
 0x3cc   : > { %5849 = vst [vmem:[%s7407_s18 + $0xbd8] sm:$0xff] %v2592_v35  ;;  %6046 = vst [vmem:[%s7407_s18 + $0x1080] sm:$0xff] %v3260_v60  ;;  %v3262_v35 = vpop.f32.mrb[81].mxu0 }
 0x3cd   : > { %6103 = vmatmul.mubr.msk.bf16.gmra.mrb[100].mxu1 %vm449_vm0, %v8644_v5  ;;  %6339 = vmatmul.mubr.msk.bf16.gmra.mrb[212].mxu0 %vm449_vm0, %v8568_v20  ;;  %6047 = vst [vmem:[%s7407_s18 + $0x1088] sm:$0xff] %v3262_v35  ;;  %v3264_v37 = vpop.f32.mrb[82].mxu0 }
 0x3ce   : > { %3576 = vmatprep.mubr.bf16.mxu1 %v9677_v19  ;;  %4310 = vmatprep.mubr.bf16.mxu0 %v9677_v19  ;;  %6048 = vst [vmem:[%s7407_s18 + $0x1090] sm:$0xff] %v3264_v37  ;;  %v3266_v38 = vpop.f32.mrb[83].mxu0 }
 0x3cf   : > { %6049 = vst [vmem:[%s7407_s18 + $0x1098] sm:$0xff] %v3266_v38 }
 0x3d0   : > { %v2596_v47 = vpop.f32.mrb[252].mxu1 }
 0x3d1   : > { %5850 = vst [vmem:[%s7407_s18 + $0xbe0] sm:$0xff] %v2596_v47  ;;  %v2598_v52 = vpop.f32.mrb[253].mxu1 }
 0x3d2   : > { %5851 = vst [vmem:[%s7407_s18 + $0xbe8] sm:$0xff] %v2598_v52  ;;  %v2600_v59 = vpop.f32.mrb[254].mxu1 }
 0x3d3   : > { %5852 = vst [vmem:[%s7407_s18 + $0xbf0] sm:$0xff] %v2600_v59  ;;  %v2602_v2 = vpop.f32.mrb[255].mxu1  ;;  %v3270_v59 = vpop.f32.mrb[84].mxu0 }
 0x3d4   : > { %5853 = vst [vmem:[%s7407_s18 + $0xbf8] sm:$0xff] %v2602_v2  ;;  %6050 = vst [vmem:[%s7407_s18 + $0x10a0] sm:$0xff] %v3270_v59  ;;  %v3272_v2 = vpop.f32.mrb[85].mxu0 }
 0x3d5   : > { %6104 = vmatmul.mubr.msk.bf16.gmra.mrb[104].mxu1 %vm449_vm0, %v8663_v8  ;;  %6340 = vmatmul.mubr.msk.bf16.gmra.mrb[216].mxu0 %vm449_vm0, %v8587_v48  ;;  %6051 = vst [vmem:[%s7407_s18 + $0x10a8] sm:$0xff] %v3272_v2  ;;  %v3274_v32 = vpop.f32.mrb[86].mxu0 }
 0x3d6   : > { %3586 = vmatprep.mubr.bf16.mxu1 %v9677_v19  ;;  %4320 = vmatprep.mubr.bf16.mxu0 %v9677_v19  ;;  %6052 = vst [vmem:[%s7407_s18 + $0x10b0] sm:$0xff] %v3274_v32  ;;  %v3276_v56 = vpop.f32.mrb[87].mxu0 }
 0x3d7   : > { %6053 = vst [vmem:[%s7407_s18 + $0x10b8] sm:$0xff] %v3276_v56  ;;  %v3280_v23 = vpop.f32.mrb[88].mxu0 }
 0x3d8   : > { %v2962_v58 = vpop.f32.mrb[0].mxu1  ;;  %6054 = vst [vmem:[%s7407_s18 + $0x10c0] sm:$0xff] %v3280_v23 }
 0x3d9   : > { %5950 = vst [vmem:[%s7407_s18 + $0xe00] sm:$0xff] %v2962_v58  ;;  %v2964_v54 = vpop.f32.mrb[1].mxu1 }
 0x3da   : > { %5951 = vst [vmem:[%s7407_s18 + $0xe08] sm:$0xff] %v2964_v54  ;;  %v2966_v13 = vpop.f32.mrb[2].mxu1 }
 0x3db   : > { %5952 = vst [vmem:[%s7407_s18 + $0xe10] sm:$0xff] %v2966_v13  ;;  %v2968_v28 = vpop.f32.mrb[3].mxu1  ;;  %v9719_v13 = vld [vmem:[#allocation10_spill] sm:$0xff] }
 0x3dc   : > { %5953 = vst [vmem:[%s7407_s18 + $0xe18] sm:$0xff] %v2968_v28  ;;  %v9720_v28 = vpack.c.bf16 %v7641_v46, %v9719_v13 }
 0x3dd   : > { %6105 = vmatmul.mubr.msk.bf16.gmra.mrb[108].mxu1 %vm449_vm0, %v8682_v27  ;;  %6341 = vmatmul.mubr.msk.bf16.gmra.mrb[220].mxu0 %vm449_vm0, %v8606_v51 }
 0x3de   : > { %3596 = vmatprep.mubr.bf16.mxu1 %v9677_v19  ;;  %4330 = vmatprep.mubr.bf16.mxu0 %v9677_v19 }
 0x3e0   : > { %v2972_v42 = vpop.f32.mrb[4].mxu1 }
 0x3e1   : > { %5954 = vst [vmem:[%s7407_s18 + $0xe20] sm:$0xff] %v2972_v42  ;;  %v2974_v45 = vpop.f32.mrb[5].mxu1  ;;  %v9722_v42 = vld [vmem:[#allocation12_spill] sm:$0xff] }
 0x3e2   : > { %5955 = vst [vmem:[%s7407_s18 + $0xe28] sm:$0xff] %v2974_v45  ;;  %v2976_v0 = vpop.f32.mrb[6].mxu1  ;;  %v9723_v49 = vpack.c.bf16 %v9721_v36, %v9722_v42  ;;  %v3282_v45 = vpop.f32.mrb[89].mxu0 }
 0x3e3   : > { %5956 = vst [vmem:[%s7407_s18 + $0xe30] sm:$0xff] %v2976_v0  ;;  %v2978_v22 = vpop.f32.mrb[7].mxu1  ;;  %6055 = vst [vmem:[%s7407_s18 + $0x10c8] sm:$0xff] %v3282_v45  ;;  %v3284_v44 = vpop.f32.mrb[90].mxu0 }
 0x3e4   : > { %5957 = vst [vmem:[%s7407_s18 + $0xe38] sm:$0xff] %v2978_v22  ;;  %6056 = vst [vmem:[%s7407_s18 + $0x10d0] sm:$0xff] %v3284_v44  ;;  %v3286_v0 = vpop.f32.mrb[91].mxu0  ;;  %v9724_v22 = vld [vmem:[#allocation13_spill] sm:$0xff] }
 0x3e5   : > { %6106 = vmatmul.mubr.msk.bf16.gmra.mrb[112].mxu1 %vm449_vm0, %v8376_v50  ;;  %6342 = vmatmul.mubr.msk.bf16.gmra.mrb[224].mxu0 %vm449_vm0, %v8625_v11  ;;  %v9726_v17 = vpack.c.bf16 %v9724_v22, %v9725_v15  ;;  %6057 = vst [vmem:[%s7407_s18 + $0x10d8] sm:$0xff] %v3286_v0 }
 0x3e6   : > { %3606 = vmatprep.mubr.bf16.mxu1 %v9677_v19  ;;  %4340 = vmatprep.mubr.bf16.mxu0 %v9677_v19 }
 0x3e8   : > { %v2982_v29 = vpop.f32.mrb[8].mxu1 }
 0x3e9   : > { %5958 = vst [vmem:[%s7407_s18 + $0xe40] sm:$0xff] %v2982_v29  ;;  %v2984_v24 = vpop.f32.mrb[9].mxu1 }
 0x3ea   : > { %5959 = vst [vmem:[%s7407_s18 + $0xe48] sm:$0xff] %v2984_v24  ;;  %v2986_v14 = vpop.f32.mrb[10].mxu1  ;;  %v9728_v24 = vpack.c.bf16 %v7738_v57, %v9727_v34 }
 0x3eb   : > { %5960 = vst [vmem:[%s7407_s18 + $0xe50] sm:$0xff] %v2986_v14  ;;  %v2988_v7 = vpop.f32.mrb[11].mxu1  ;;  %v3290_v14 = vpop.f32.mrb[92].mxu0 }
 0x3ec   : > { %5961 = vst [vmem:[%s7407_s18 + $0xe58] sm:$0xff] %v2988_v7  ;;  %6058 = vst [vmem:[%s7407_s18 + $0x10e0] sm:$0xff] %v3290_v14  ;;  %v3292_v57 = vpop.f32.mrb[93].mxu0 }
 0x3ed   : > { %6107 = vmatmul.mubr.msk.bf16.gmra.mrb[116].mxu1 %vm449_vm0, %v8395_v18  ;;  %6343 = vmatmul.mubr.msk.bf16.gmra.mrb[228].mxu0 %vm449_vm0, %v8644_v5  ;;  %6059 = vst [vmem:[%s7407_s18 + $0x10e8] sm:$0xff] %v3292_v57  ;;  %v3294_v3 = vpop.f32.mrb[94].mxu0 }
 0x3ee   : > { %3616 = vmatprep.mubr.bf16.mxu1 %v9677_v19  ;;  %4350 = vmatprep.mubr.bf16.mxu0 %v9677_v19  ;;  %6060 = vst [vmem:[%s7407_s18 + $0x10f0] sm:$0xff] %v3294_v3 }
 0x3f0   : > { %v2992_v43 = vpop.f32.mrb[12].mxu1 }
 0x3f1   : > { %5962 = vst [vmem:[%s7407_s18 + $0xe60] sm:$0xff] %v2992_v43  ;;  %v2994_v4 = vpop.f32.mrb[13].mxu1  ;;  %v3296_v43 = vpop.f32.mrb[95].mxu0 }
 0x3f2   : > { %5963 = vst [vmem:[%s7407_s18 + $0xe68] sm:$0xff] %v2994_v4  ;;  %v2996_v61 = vpop.f32.mrb[14].mxu1  ;;  %6061 = vst [vmem:[%s7407_s18 + $0x10f8] sm:$0xff] %v3296_v43  ;;  %v3300_v4 = vpop.f32.mrb[96].mxu0 }
 0x3f3   : > { %5964 = vst [vmem:[%s7407_s18 + $0xe70] sm:$0xff] %v2996_v61  ;;  %v2998_v33 = vpop.f32.mrb[15].mxu1  ;;  %6062 = vst [vmem:[%s7407_s18 + $0x1100] sm:$0xff] %v3300_v4  ;;  %v3302_v6 = vpop.f32.mrb[97].mxu0 }
 0x3f4   : > { %5965 = vst [vmem:[%s7407_s18 + $0xe78] sm:$0xff] %v2998_v33  ;;  %6063 = vst [vmem:[%s7407_s18 + $0x1108] sm:$0xff] %v3302_v6  ;;  %v3304_v33 = vpop.f32.mrb[98].mxu0 }
 0x3f5   : > { %6108 = vmatmul.mubr.msk.bf16.gmra.mrb[120].mxu1 %vm449_vm0, %v8414_v26  ;;  %6344 = vmatmul.mubr.msk.bf16.gmra.mrb[232].mxu0 %vm449_vm0, %v8663_v8  ;;  %6064 = vst [vmem:[%s7407_s18 + $0x1110] sm:$0xff] %v3304_v33  ;;  %v3306_v35 = vpop.f32.mrb[99].mxu0 }
 0x3f6   : > { %3626 = vmatprep.mubr.bf16.mxu1 %v9677_v19  ;;  %4360 = vmatprep.mubr.bf16.mxu0 %v9677_v19  ;;  %6065 = vst [vmem:[%s7407_s18 + $0x1118] sm:$0xff] %v3306_v35  ;;  %v3310_v37 = vpop.f32.mrb[100].mxu0 }
 0x3f7   : > { %6066 = vst [vmem:[%s7407_s18 + $0x1120] sm:$0xff] %v3310_v37 }
 0x3f8   : > { %v3002_v53 = vpop.f32.mrb[16].mxu1 }
 0x3f9   : > { %5966 = vst [vmem:[%s7407_s18 + $0xe80] sm:$0xff] %v3002_v53  ;;  %v3004_v47 = vpop.f32.mrb[17].mxu1 }
 0x3fa   : > { %5967 = vst [vmem:[%s7407_s18 + $0xe88] sm:$0xff] %v3004_v47  ;;  %v3006_v52 = vpop.f32.mrb[18].mxu1  ;;  %v3312_v47 = vpop.f32.mrb[101].mxu0 }
 0x3fb   : > { %5968 = vst [vmem:[%s7407_s18 + $0xe90] sm:$0xff] %v3006_v52  ;;  %v3008_v62 = vpop.f32.mrb[19].mxu1  ;;  %6067 = vst [vmem:[%s7407_s18 + $0x1128] sm:$0xff] %v3312_v47  ;;  %v3314_v52 = vpop.f32.mrb[102].mxu0 }
 0x3fc   : > { %5969 = vst [vmem:[%s7407_s18 + $0xe98] sm:$0xff] %v3008_v62  ;;  %6068 = vst [vmem:[%s7407_s18 + $0x1130] sm:$0xff] %v3314_v52  ;;  %v3316_v59 = vpop.f32.mrb[103].mxu0 }
 0x3fd   : > { %6109 = vmatmul.mubr.msk.bf16.gmra.mrb[124].mxu1 %vm449_vm0, %v8433_v10  ;;  %6345 = vmatmul.mubr.msk.bf16.gmra.mrb[236].mxu0 %vm449_vm0, %v8682_v27  ;;  %6069 = vst [vmem:[%s7407_s18 + $0x1138] sm:$0xff] %v3316_v59 }
 0x3fe   : > { %3992 = vmatprep.mubr.bf16.mxu1 %v9677_v19  ;;  %4370 = vmatprep.mubr.bf16.mxu0 %v9677_v19 }
 0x400   : > { %v3012_v40 = vpop.f32.mrb[20].mxu1 }
 0x401   : > { %5970 = vst [vmem:[%s7407_s18 + $0xea0] sm:$0xff] %v3012_v40  ;;  %v3014_v58 = vpop.f32.mrb[21].mxu1  ;;  %v3320_v40 = vpop.f32.mrb[104].mxu0 }
 0x402   : > { %5971 = vst [vmem:[%s7407_s18 + $0xea8] sm:$0xff] %v3014_v58  ;;  %v3016_v54 = vpop.f32.mrb[22].mxu1  ;;  %6070 = vst [vmem:[%s7407_s18 + $0x1140] sm:$0xff] %v3320_v40  ;;  %v3322_v32 = vpop.f32.mrb[105].mxu0 }
 0x403   : > { %5972 = vst [vmem:[%s7407_s18 + $0xeb0] sm:$0xff] %v3016_v54  ;;  %v3018_v30 = vpop.f32.mrb[23].mxu1  ;;  %6071 = vst [vmem:[%s7407_s18 + $0x1148] sm:$0xff] %v3322_v32  ;;  %v3324_v56 = vpop.f32.mrb[106].mxu0 }
 0x404   : > { %5973 = vst [vmem:[%s7407_s18 + $0xeb8] sm:$0xff] %v3018_v30  ;;  %6072 = vst [vmem:[%s7407_s18 + $0x1150] sm:$0xff] %v3324_v56  ;;  %v3326_v30 = vpop.f32.mrb[107].mxu0 }
 0x405   : > { %6254 = vmatmul.mubr.msk.bf16.vlgmr.msra.gmra.mrb[128].mxu1 %vm449_vm0, %v8452_v55  ;;  %6346 = vmatmul.mubr.msk.bf16.gmra.mrb[240].mxu0 %vm449_vm0, %v8376_v50  ;;  %6073 = vst [vmem:[%s7407_s18 + $0x1158] sm:$0xff] %v3326_v30 }
 0x406   : > { %4477 = vmatpush1.bf16.msra.mxu1 %v9720_v28  ;;  %4002 = vmatprep.mubr.bf16.mxu1 %v9677_v19  ;;  %v3330_v28 = vpop.f32.mrb[108].mxu0 }
 0x407   : > { %4478 = vmatprep.subr.bf16.mxu1 %v9723_v49  ;;  %4380 = vmatprep.mubr.bf16.mxu0 %v9677_v19  ;;  %6074 = vst [vmem:[%s7407_s18 + $0x1160] sm:$0xff] %v3330_v28  ;;  %v3332_v23 = vpop.f32.mrb[109].mxu0  ;;  %v8937_v28 = vld [vmem:[%s9651_s1 + $0x60] sm:$0xff]  }
 0x408   : > { %v3022_v50 = vpop.f32.mrb[24].mxu1  ;;  %6075 = vst [vmem:[%s7407_s18 + $0x1168] sm:$0xff] %v3332_v23  ;;  %v3334_v42 = vpop.f32.mrb[110].mxu0 }
 0x409   : > { %5974 = vst [vmem:[%s7407_s18 + $0xec0] sm:$0xff] %v3022_v50  ;;  %v3024_v46 = vpop.f32.mrb[25].mxu1  ;;  %6076 = vst [vmem:[%s7407_s18 + $0x1170] sm:$0xff] %v3334_v42  ;;  %v3336_v45 = vpop.f32.mrb[111].mxu0 }
 0x40a   : > { %4479 = vmatpush1.bf16.msra.mxu1 %v9726_v17  ;;  %5975 = vst [vmem:[%s7407_s18 + $0xec8] sm:$0xff] %v3024_v46  ;;  %v3026_v29 = vpop.f32.mrb[26].mxu1  ;;  %6077 = vst [vmem:[%s7407_s18 + $0x1178] sm:$0xff] %v3336_v45  ;;  %v3340_v44 = vpop.f32.mrb[112].mxu0 }
 0x40b   : > { %4992 = vmatprep.subr.bf16.mxu1 %v9728_v24  ;;  %5976 = vst [vmem:[%s7407_s18 + $0xed0] sm:$0xff] %v3026_v29  ;;  %v3028_v12 = vpop.f32.mrb[27].mxu1  ;;  %6078 = vst [vmem:[%s7407_s18 + $0x1180] sm:$0xff] %v3340_v44  ;;  %v3342_v46 = vpop.f32.mrb[113].mxu0  ;;  %v8956_v44 = vld [vmem:[%s9651_s1 + $0x68] sm:$0xff]  }
 0x40c   : > { %5977 = vst [vmem:[%s7407_s18 + $0xed8] sm:$0xff] %v3028_v12  ;;  %6079 = vst [vmem:[%s7407_s18 + $0x1188] sm:$0xff] %v3342_v46  ;;  %v3344_v22 = vpop.f32.mrb[114].mxu0 }
 0x40d   : > { %6255 = vmatmul.mubr.msk.bf16.gmra.mrb[132].mxu1 %vm449_vm0, %v8483_v16  ;;  %6347 = vmatmul.mubr.msk.bf16.gmra.mrb[244].mxu0 %vm449_vm0, %v8395_v18  ;;  %6080 = vst [vmem:[%s7407_s18 + $0x1190] sm:$0xff] %v3344_v22  ;;  %v3346_v17 = vpop.f32.mrb[115].mxu0 }
 0x40e   : > { %4012 = vmatprep.mubr.bf16.mxu1 %v9677_v19  ;;  %4390 = vmatprep.mubr.bf16.mxu0 %v9677_v19  ;;  %6081 = vst [vmem:[%s7407_s18 + $0x1198] sm:$0xff] %v3346_v17  ;;  %v3350_v34 = vpop.f32.mrb[116].mxu0 }
 0x40f   : > { %6082 = vst [vmem:[%s7407_s18 + $0x11a0] sm:$0xff] %v3350_v34  ;;  %v3352_v24 = vpop.f32.mrb[117].mxu0  ;;  %v8975_v34 = vld [vmem:[%s9651_s1 + $0x70] sm:$0xff]  }
 0x410   : > { %v3032_v7 = vpop.f32.mrb[28].mxu1  ;;  %6083 = vst [vmem:[%s7407_s18 + $0x11a8] sm:$0xff] %v3352_v24  ;;  %v3354_v14 = vpop.f32.mrb[118].mxu0 }
 0x411   : > { %5978 = vst [vmem:[%s7407_s18 + $0xee0] sm:$0xff] %v3032_v7  ;;  %v3034_v9 = vpop.f32.mrb[29].mxu1  ;;  %6084 = vst [vmem:[%s7407_s18 + $0x11b0] sm:$0xff] %v3354_v14  ;;  %v3356_v7 = vpop.f32.mrb[119].mxu0 }
 0x412   : > { %5979 = vst [vmem:[%s7407_s18 + $0xee8] sm:$0xff] %v3034_v9  ;;  %v3036_v25 = vpop.f32.mrb[30].mxu1  ;;  %6085 = vst [vmem:[%s7407_s18 + $0x11b8] sm:$0xff] %v3356_v7  ;;  %v3360_v9 = vpop.f32.mrb[120].mxu0 }
 0x413   : > { %5980 = vst [vmem:[%s7407_s18 + $0xef0] sm:$0xff] %v3036_v25  ;;  %v3038_v18 = vpop.f32.mrb[31].mxu1  ;;  %6086 = vst [vmem:[%s7407_s18 + $0x11c0] sm:$0xff] %v3360_v9  ;;  %v3362_v43 = vpop.f32.mrb[121].mxu0  ;;  %v8994_v9 = vld [vmem:[%s9651_s1 + $0x78] sm:$0xff]  }
 0x414   : > { %5981 = vst [vmem:[%s7407_s18 + $0xef8] sm:$0xff] %v3038_v18  ;;  %6087 = vst [vmem:[%s7407_s18 + $0x11c8] sm:$0xff] %v3362_v43  ;;  %v3364_v18 = vpop.f32.mrb[122].mxu0 }
 0x415   : > { %6256 = vmatmul.mubr.msk.bf16.gmra.mrb[136].mxu1 %vm449_vm0, %v8502_v21  ;;  %6348 = vmatmul.mubr.msk.bf16.gmra.mrb[248].mxu0 %vm449_vm0, %v8414_v26  ;;  %6088 = vst [vmem:[%s7407_s18 + $0x11d0] sm:$0xff] %v3364_v18  ;;  %v3366_v6 = vpop.f32.mrb[123].mxu0 }
 0x416   : > { %4022 = vmatprep.mubr.bf16.mxu1 %v9677_v19  ;;  %4400 = vmatprep.mubr.bf16.mxu0 %v9677_v19  ;;  %6089 = vst [vmem:[%s7407_s18 + $0x11d8] sm:$0xff] %v3366_v6  ;;  %v3370_v33 = vpop.f32.mrb[124].mxu0 }
 0x417   : > { %6090 = vst [vmem:[%s7407_s18 + $0x11e0] sm:$0xff] %v3370_v33  ;;  %v9013_v33 = vld [vmem:[%s9651_s1] sm:$0xff]  }
 0x418   : > { %v3042_v61 = vpop.f32.mrb[32].mxu1 }
 0x419   : > { %5982 = vst [vmem:[%s7407_s18 + $0xf00] sm:$0xff] %v3042_v61  ;;  %v3044_v60 = vpop.f32.mrb[33].mxu1 }
 0x41a   : > { %5983 = vst [vmem:[%s7407_s18 + $0xf08] sm:$0xff] %v3044_v60  ;;  %v3046_v53 = vpop.f32.mrb[34].mxu1  ;;  %v3372_v60 = vpop.f32.mrb[125].mxu0 }
 0x41b   : > { %5984 = vst [vmem:[%s7407_s18 + $0xf10] sm:$0xff] %v3046_v53  ;;  %v3048_v26 = vpop.f32.mrb[35].mxu1  ;;  %6091 = vst [vmem:[%s7407_s18 + $0x11e8] sm:$0xff] %v3372_v60  ;;  %v3374_v53 = vpop.f32.mrb[126].mxu0 }
 0x41c   : > { %5985 = vst [vmem:[%s7407_s18 + $0xf18] sm:$0xff] %v3048_v26  ;;  %6092 = vst [vmem:[%s7407_s18 + $0x11f0] sm:$0xff] %v3374_v53  ;;  %v3376_v37 = vpop.f32.mrb[127].mxu0  ;;  %v9730_v53 = vld [vmem:[#allocation15_spill] sm:$0xff] }
 0x41d   : > { %6257 = vmatmul.mubr.msk.bf16.gmra.mrb[140].mxu1 %vm449_vm0, %v8521_v39  ;;  %6349 = vmatmul.mubr.msk.bf16.gmra.mrb[252].mxu0 %vm449_vm0, %v8433_v10  ;;  %6093 = vst [vmem:[%s7407_s18 + $0x11f8] sm:$0xff] %v3376_v37  ;;  %v9732_v37 = vpack.c.bf16 %v7760_v1, %v7755_v31 }
 0x41e   : > { %4032 = vmatprep.mubr.bf16.mxu1 %v9677_v19  ;;  %4766 = vmatprep.mubr.bf16.mxu0 %v9677_v19 }
 0x420   : > { %v3052_v38 = vpop.f32.mrb[36].mxu1 }
 0x421   : > { %5986 = vst [vmem:[%s7407_s18 + $0xf20] sm:$0xff] %v3052_v38  ;;  %v3054_v62 = vpop.f32.mrb[37].mxu1  ;;  %v3736_v38 = vpop.f32.mrb[128].mxu0 }
 0x422   : > { %5987 = vst [vmem:[%s7407_s18 + $0xf28] sm:$0xff] %v3054_v62  ;;  %v3056_v2 = vpop.f32.mrb[38].mxu1  ;;  %6190 = vst [vmem:[%s7407_s18 + $0x1400] sm:$0xff] %v3736_v38  ;;  %v3738_v52 = vpop.f32.mrb[129].mxu0 }
 0x423   : > { %5988 = vst [vmem:[%s7407_s18 + $0xf30] sm:$0xff] %v3056_v2  ;;  %v3058_v10 = vpop.f32.mrb[39].mxu1  ;;  %6191 = vst [vmem:[%s7407_s18 + $0x1408] sm:$0xff] %v3738_v52  ;;  %v3740_v59 = vpop.f32.mrb[130].mxu0 }
 0x424   : > { %5989 = vst [vmem:[%s7407_s18 + $0xf38] sm:$0xff] %v3058_v10  ;;  %6192 = vst [vmem:[%s7407_s18 + $0x1410] sm:$0xff] %v3740_v59  ;;  %v3742_v10 = vpop.f32.mrb[131].mxu0  ;;  %v9733_v59 = vld [vmem:[#allocation18_spill] sm:$0xff] }
 0x425   : > { %6258 = vmatmul.mubr.msk.bf16.gmra.mrb[144].mxu1 %vm449_vm0, %v8540_v63  ;;  %6494 = vmatmul.mubr.msk.bf16.vlgmr.msra.gmra.mrb[0].mxu0 %vm449_vm0, %v8452_v55  ;;  %6193 = vst [vmem:[%s7407_s18 + $0x1418] sm:$0xff] %v3742_v10  ;;  %v3746_v32 = vpop.f32.mrb[132].mxu0  ;;  %v9041_v10 = vld [vmem:[%s9651_s1 + $0x8] sm:$0xff]  }
 0x426   : > { %4042 = vmatprep.mubr.bf16.mxu1 %v9677_v19  ;;  %4776 = vmatprep.mubr.bf16.mxu0 %v9677_v19  ;;  %6194 = vst [vmem:[%s7407_s18 + $0x1420] sm:$0xff] %v3746_v32 }
 0x428   : > { %v3062_v58 = vpop.f32.mrb[40].mxu1 }
 0x429   : > { %5990 = vst [vmem:[%s7407_s18 + $0xf40] sm:$0xff] %v3062_v58  ;;  %v3064_v54 = vpop.f32.mrb[41].mxu1  ;;  %v3748_v58 = vpop.f32.mrb[133].mxu0 }
 0x42a   : > { %5991 = vst [vmem:[%s7407_s18 + $0xf48] sm:$0xff] %v3064_v54  ;;  %v3066_v13 = vpop.f32.mrb[42].mxu1  ;;  %6195 = vst [vmem:[%s7407_s18 + $0x1428] sm:$0xff] %v3748_v58  ;;  %v3750_v54 = vpop.f32.mrb[134].mxu0 }
 0x42b   : > { %5992 = vst [vmem:[%s7407_s18 + $0xf50] sm:$0xff] %v3066_v13  ;;  %v3068_v55 = vpop.f32.mrb[43].mxu1  ;;  %6196 = vst [vmem:[%s7407_s18 + $0x1430] sm:$0xff] %v3750_v54  ;;  %v3752_v13 = vpop.f32.mrb[135].mxu0 }
 0x42c   : > { %5993 = vst [vmem:[%s7407_s18 + $0xf58] sm:$0xff] %v3068_v55  ;;  %6197 = vst [vmem:[%s7407_s18 + $0x1438] sm:$0xff] %v3752_v13  ;;  %v3756_v23 = vpop.f32.mrb[136].mxu0  ;;  %v9060_v13 = vld [vmem:[%s9651_s1 + $0x10] sm:$0xff]  }
 0x42d   : > { %6259 = vmatmul.mubr.msk.bf16.gmra.mrb[148].mxu1 %vm449_vm0, %v8568_v20  ;;  %6495 = vmatmul.mubr.msk.bf16.gmra.mrb[4].mxu0 %vm449_vm0, %v8483_v16  ;;  %6198 = vst [vmem:[%s7407_s18 + $0x1440] sm:$0xff] %v3756_v23 }
 0x42e   : > { %4052 = vmatprep.mubr.bf16.mxu1 %v9677_v19  ;;  %4786 = vmatprep.mubr.bf16.mxu0 %v9677_v19 }
 0x430   : > { %v3072_v36 = vpop.f32.mrb[44].mxu1 }
 0x431   : > { %5994 = vst [vmem:[%s7407_s18 + $0xf60] sm:$0xff] %v3072_v36  ;;  %v3074_v49 = vpop.f32.mrb[45].mxu1  ;;  %v3758_v36 = vpop.f32.mrb[137].mxu0 }
 0x432   : > { %5995 = vst [vmem:[%s7407_s18 + $0xf68] sm:$0xff] %v3074_v49  ;;  %v3076_v50 = vpop.f32.mrb[46].mxu1  ;;  %6199 = vst [vmem:[%s7407_s18 + $0x1448] sm:$0xff] %v3758_v36  ;;  %v3760_v49 = vpop.f32.mrb[138].mxu0 }
 0x433   : > { %5996 = vst [vmem:[%s7407_s18 + $0xf70] sm:$0xff] %v3076_v50  ;;  %v3078_v16 = vpop.f32.mrb[47].mxu1  ;;  %6200 = vst [vmem:[%s7407_s18 + $0x1450] sm:$0xff] %v3760_v49  ;;  %v3762_v50 = vpop.f32.mrb[139].mxu0 }
 0x434   : > { %5997 = vst [vmem:[%s7407_s18 + $0xf78] sm:$0xff] %v3078_v16  ;;  %6201 = vst [vmem:[%s7407_s18 + $0x1458] sm:$0xff] %v3762_v50  ;;  %v3766_v46 = vpop.f32.mrb[140].mxu0 }
 0x435   : > { %6260 = vmatmul.mubr.msk.bf16.gmra.mrb[152].mxu1 %vm449_vm0, %v8587_v48  ;;  %6496 = vmatmul.mubr.msk.bf16.gmra.mrb[8].mxu0 %vm449_vm0, %v8502_v21  ;;  %6202 = vst [vmem:[%s7407_s18 + $0x1460] sm:$0xff] %v3766_v46 }
 0x436   : > { %4062 = vmatprep.mubr.bf16.mxu1 %v9677_v19  ;;  %4796 = vmatprep.mubr.bf16.mxu0 %v9677_v19 }
 0x438   : > { %v3082_v0 = vpop.f32.mrb[48].mxu1 }
 0x439   : > { %5998 = vst [vmem:[%s7407_s18 + $0xf80] sm:$0xff] %v3082_v0  ;;  %v3084_v15 = vpop.f32.mrb[49].mxu1  ;;  %v3768_v0 = vpop.f32.mrb[141].mxu0 }
 0x43a   : > { %5999 = vst [vmem:[%s7407_s18 + $0xf88] sm:$0xff] %v3084_v15  ;;  %v3086_v29 = vpop.f32.mrb[50].mxu1  ;;  %6203 = vst [vmem:[%s7407_s18 + $0x1468] sm:$0xff] %v3768_v0  ;;  %v3770_v15 = vpop.f32.mrb[142].mxu0 }
 0x43b   : > { %6000 = vst [vmem:[%s7407_s18 + $0xf90] sm:$0xff] %v3086_v29  ;;  %v3088_v21 = vpop.f32.mrb[51].mxu1  ;;  %6204 = vst [vmem:[%s7407_s18 + $0x1470] sm:$0xff] %v3770_v15  ;;  %v3772_v29 = vpop.f32.mrb[143].mxu0 }
 0x43c   : > { %6001 = vst [vmem:[%s7407_s18 + $0xf98] sm:$0xff] %v3088_v21  ;;  %6205 = vst [vmem:[%s7407_s18 + $0x1478] sm:$0xff] %v3772_v29  ;;  %v3776_v24 = vpop.f32.mrb[144].mxu0 }
 0x43d   : > { %6261 = vmatmul.mubr.msk.bf16.gmra.mrb[156].mxu1 %vm449_vm0, %v8606_v51  ;;  %6497 = vmatmul.mubr.msk.bf16.gmra.mrb[12].mxu0 %vm449_vm0, %v8521_v39  ;;  %6206 = vst [vmem:[%s7407_s18 + $0x1480] sm:$0xff] %v3776_v24 }
 0x43e   : > { %4072 = vmatprep.mubr.bf16.mxu1 %v9677_v19  ;;  %4806 = vmatprep.mubr.bf16.mxu0 %v9677_v19 }
 0x440   : > { %v3092_v12 = vpop.f32.mrb[52].mxu1 }
 0x441   : > { %6002 = vst [vmem:[%s7407_s18 + $0xfa0] sm:$0xff] %v3092_v12  ;;  %v3094_v57 = vpop.f32.mrb[53].mxu1  ;;  %v3778_v12 = vpop.f32.mrb[145].mxu0 }
 0x442   : > { %6003 = vst [vmem:[%s7407_s18 + $0xfa8] sm:$0xff] %v3094_v57  ;;  %v3096_v3 = vpop.f32.mrb[54].mxu1  ;;  %6207 = vst [vmem:[%s7407_s18 + $0x1488] sm:$0xff] %v3778_v12  ;;  %v3780_v57 = vpop.f32.mrb[146].mxu0 }
 0x443   : > { %6004 = vst [vmem:[%s7407_s18 + $0xfb0] sm:$0xff] %v3096_v3  ;;  %v3098_v39 = vpop.f32.mrb[55].mxu1  ;;  %6208 = vst [vmem:[%s7407_s18 + $0x1490] sm:$0xff] %v3780_v57  ;;  %v3782_v3 = vpop.f32.mrb[147].mxu0 }
 0x444   : > { %6005 = vst [vmem:[%s7407_s18 + $0xfb8] sm:$0xff] %v3098_v39  ;;  %6209 = vst [vmem:[%s7407_s18 + $0x1498] sm:$0xff] %v3782_v3  ;;  %v3786_v43 = vpop.f32.mrb[148].mxu0 }
 0x445   : > { %6262 = vmatmul.mubr.msk.bf16.gmra.mrb[160].mxu1 %vm449_vm0, %v8625_v11  ;;  %6498 = vmatmul.mubr.msk.bf16.gmra.mrb[16].mxu0 %vm449_vm0, %v8540_v63  ;;  %6210 = vst [vmem:[%s7407_s18 + $0x14a0] sm:$0xff] %v3786_v43  ;;  %v9113_v43 = vld [vmem:[%s9651_s1 + $0x28] sm:$0xff]  }
 0x446   : > { %4082 = vmatprep.mubr.bf16.mxu1 %v9677_v19  ;;  %4816 = vmatprep.mubr.bf16.mxu0 %v9677_v19 }
 0x448   : > { %v3102_v25 = vpop.f32.mrb[56].mxu1 }
 0x449   : > { %6006 = vst [vmem:[%s7407_s18 + $0xfc0] sm:$0xff] %v3102_v25  ;;  %v3104_v4 = vpop.f32.mrb[57].mxu1  ;;  %v3788_v25 = vpop.f32.mrb[149].mxu0 }
 0x44a   : > { %6007 = vst [vmem:[%s7407_s18 + $0xfc8] sm:$0xff] %v3104_v4  ;;  %v3106_v61 = vpop.f32.mrb[58].mxu1  ;;  %6211 = vst [vmem:[%s7407_s18 + $0x14a8] sm:$0xff] %v3788_v25  ;;  %v3790_v4 = vpop.f32.mrb[150].mxu0 }
 0x44b   : > { %6008 = vst [vmem:[%s7407_s18 + $0xfd0] sm:$0xff] %v3106_v61  ;;  %v3108_v63 = vpop.f32.mrb[59].mxu1  ;;  %6212 = vst [vmem:[%s7407_s18 + $0x14b0] sm:$0xff] %v3790_v4  ;;  %v3792_v61 = vpop.f32.mrb[151].mxu0 }
 0x44c   : > { %6009 = vst [vmem:[%s7407_s18 + $0xfd8] sm:$0xff] %v3108_v63  ;;  %6213 = vst [vmem:[%s7407_s18 + $0x14b8] sm:$0xff] %v3792_v61  ;;  %v3796_v60 = vpop.f32.mrb[152].mxu0 }
 0x44d   : > { %6263 = vmatmul.mubr.msk.bf16.gmra.mrb[164].mxu1 %vm449_vm0, %v8644_v5  ;;  %6499 = vmatmul.mubr.msk.bf16.gmra.mrb[20].mxu0 %vm449_vm0, %v8568_v20  ;;  %6214 = vst [vmem:[%s7407_s18 + $0x14c0] sm:$0xff] %v3796_v60 }
 0x44e   : > { %4092 = vmatprep.mubr.bf16.mxu1 %v9677_v19  ;;  %4826 = vmatprep.mubr.bf16.mxu0 %v9677_v19 }
 0x450   : > { %v3112_v35 = vpop.f32.mrb[60].mxu1 }
 0x451   : > { %6010 = vst [vmem:[%s7407_s18 + $0xfe0] sm:$0xff] %v3112_v35  ;;  %v3114_v26 = vpop.f32.mrb[61].mxu1  ;;  %v9729_v35 = vld [vmem:[#allocation17_spill] sm:$0xff] }
 0x452   : > { %6011 = vst [vmem:[%s7407_s18 + $0xfe8] sm:$0xff] %v3114_v26  ;;  %v3116_v47 = vpop.f32.mrb[62].mxu1  ;;  %v9731_v26 = vpack.c.bf16 %v9729_v35, %v9730_v53  ;;  %v9129_v35 = vld [vmem:[%s9651_s1 + $0x30] sm:$0xff]  }
 0x453   : > { %6012 = vst [vmem:[%s7407_s18 + $0xff0] sm:$0xff] %v3116_v47  ;;  %v3118_v20 = vpop.f32.mrb[63].mxu1  ;;  %v3798_v47 = vpop.f32.mrb[153].mxu0 }
 0x454   : > { %6013 = vst [vmem:[%s7407_s18 + $0xff8] sm:$0xff] %v3118_v20  ;;  %6215 = vst [vmem:[%s7407_s18 + $0x14c8] sm:$0xff] %v3798_v47  ;;  %v3800_v38 = vpop.f32.mrb[154].mxu0 }
 0x455   : > { %6264 = vmatmul.mubr.msk.bf16.gmra.mrb[168].mxu1 %vm449_vm0, %v8663_v8  ;;  %6500 = vmatmul.mubr.msk.bf16.gmra.mrb[24].mxu0 %vm449_vm0, %v8587_v48  ;;  %6216 = vst [vmem:[%s7407_s18 + $0x14d0] sm:$0xff] %v3800_v38 }
 0x456   : > { %4102 = vmatprep.mubr.bf16.mxu1 %v9677_v19  ;;  %4836 = vmatprep.mubr.bf16.mxu0 %v9677_v19 }
 0x458   : > { %v3478_v62 = vpop.f32.mrb[64].mxu1 }
 0x459   : > { %6110 = vst [vmem:[%s7407_s18 + $0x1200] sm:$0xff] %v3478_v62  ;;  %v3480_v2 = vpop.f32.mrb[65].mxu1  ;;  %v3802_v62 = vpop.f32.mrb[155].mxu0 }
 0x45a   : > { %6111 = vst [vmem:[%s7407_s18 + $0x1208] sm:$0xff] %v3480_v2  ;;  %v3482_v40 = vpop.f32.mrb[66].mxu1  ;;  %v9734_v2 = vpack.c.bf16 %v7757_v41, %v9733_v59  ;;  %6217 = vst [vmem:[%s7407_s18 + $0x14d8] sm:$0xff] %v3802_v62  ;;  %v3806_v41 = vpop.f32.mrb[156].mxu0  ;;  %v9145_v59 = vld [vmem:[%s9651_s1 + $0x38] sm:$0xff]  }
 0x45b   : > { %6112 = vst [vmem:[%s7407_s18 + $0x1210] sm:$0xff] %v3482_v40  ;;  %v3484_v48 = vpop.f32.mrb[67].mxu1  ;;  %6218 = vst [vmem:[%s7407_s18 + $0x14e0] sm:$0xff] %v3806_v41  ;;  %v3808_v40 = vpop.f32.mrb[157].mxu0 }
 0x45c   : > { %6113 = vst [vmem:[%s7407_s18 + $0x1218] sm:$0xff] %v3484_v48  ;;  %6219 = vst [vmem:[%s7407_s18 + $0x14e8] sm:$0xff] %v3808_v40  ;;  %v3810_v32 = vpop.f32.mrb[158].mxu0 }
 0x45d   : > { %6265 = vmatmul.mubr.msk.bf16.gmra.mrb[172].mxu1 %vm449_vm0, %v8682_v27  ;;  %6501 = vmatmul.mubr.msk.bf16.gmra.mrb[28].mxu0 %vm449_vm0, %v8606_v51  ;;  %6220 = vst [vmem:[%s7407_s18 + $0x14f0] sm:$0xff] %v3810_v32 }
 0x45e   : > { %4112 = vmatprep.mubr.bf16.mxu1 %v9677_v19  ;;  %4846 = vmatprep.mubr.bf16.mxu0 %v9677_v19 }
 0x460   : > { %v3488_v56 = vpop.f32.mrb[68].mxu1 }
 0x461   : > { %6114 = vst [vmem:[%s7407_s18 + $0x1220] sm:$0xff] %v3488_v56  ;;  %v3490_v30 = vpop.f32.mrb[69].mxu1  ;;  %v3812_v56 = vpop.f32.mrb[159].mxu0 }
 0x462   : > { %6115 = vst [vmem:[%s7407_s18 + $0x1228] sm:$0xff] %v3490_v30  ;;  %v3492_v55 = vpop.f32.mrb[70].mxu1  ;;  %6221 = vst [vmem:[%s7407_s18 + $0x14f8] sm:$0xff] %v3812_v56  ;;  %v9161_v56 = vld [vmem:[%s9651_s1 + $0x40] sm:$0xff]  }
 0x463   : > { %6116 = vst [vmem:[%s7407_s18 + $0x1230] sm:$0xff] %v3492_v55  ;;  %v3494_v51 = vpop.f32.mrb[71].mxu1  ;;  %v3816_v55 = vpop.f32.mrb[160].mxu0 }
 0x464   : > { %6117 = vst [vmem:[%s7407_s18 + $0x1238] sm:$0xff] %v3494_v51  ;;  %6222 = vst [vmem:[%s7407_s18 + $0x1500] sm:$0xff] %v3816_v55  ;;  %v3818_v51 = vpop.f32.mrb[161].mxu0 }
 0x465   : > { %6266 = vmatmul.mubr.msk.bf16.gmra.mrb[176].mxu1 %vm449_vm0, %v8937_v28  ;;  %6502 = vmatmul.mubr.msk.bf16.gmra.mrb[32].mxu0 %vm449_vm0, %v8625_v11  ;;  %6223 = vst [vmem:[%s7407_s18 + $0x1508] sm:$0xff] %v3818_v51  ;;  %v3820_v36 = vpop.f32.mrb[162].mxu0 }
 0x466   : > { %4122 = vmatprep.mubr.bf16.mxu1 %v9677_v19  ;;  %4856 = vmatprep.mubr.bf16.mxu0 %v9677_v19  ;;  %6224 = vst [vmem:[%s7407_s18 + $0x1510] sm:$0xff] %v3820_v36  ;;  %v3822_v49 = vpop.f32.mrb[163].mxu0 }
 0x467   : > { %6225 = vst [vmem:[%s7407_s18 + $0x1518] sm:$0xff] %v3822_v49 }
 0x468   : > { %v3498_v42 = vpop.f32.mrb[72].mxu1 }
 0x469   : > { %6118 = vst [vmem:[%s7407_s18 + $0x1240] sm:$0xff] %v3498_v42  ;;  %v3500_v45 = vpop.f32.mrb[73].mxu1 }
 0x46a   : > { %6119 = vst [vmem:[%s7407_s18 + $0x1248] sm:$0xff] %v3500_v45  ;;  %v3502_v16 = vpop.f32.mrb[74].mxu1 }
 0x46b   : > { %6120 = vst [vmem:[%s7407_s18 + $0x1250] sm:$0xff] %v3502_v16  ;;  %v3504_v11 = vpop.f32.mrb[75].mxu1  ;;  %v9079_v16 = vld [vmem:[%s9651_s1 + $0x18] sm:$0xff]  }
 0x46c   : > { %6121 = vst [vmem:[%s7407_s18 + $0x1258] sm:$0xff] %v3504_v11  ;;  %v3826_v11 = vpop.f32.mrb[164].mxu0 }
 0x46d   : > { %6267 = vmatmul.mubr.msk.bf16.gmra.mrb[180].mxu1 %vm449_vm0, %v8956_v44  ;;  %6503 = vmatmul.mubr.msk.bf16.gmra.mrb[36].mxu0 %vm449_vm0, %v8644_v5  ;;  %6226 = vst [vmem:[%s7407_s18 + $0x1520] sm:$0xff] %v3826_v11  ;;  %v3828_v46 = vpop.f32.mrb[165].mxu0 }
 0x46e   : > { %4132 = vmatprep.mubr.bf16.mxu1 %v9677_v19  ;;  %4866 = vmatprep.mubr.bf16.mxu0 %v9677_v19  ;;  %6227 = vst [vmem:[%s7407_s18 + $0x1528] sm:$0xff] %v3828_v46 }
 0x470   : > { %v3508_v22 = vpop.f32.mrb[76].mxu1 }
 0x471   : > { %6122 = vst [vmem:[%s7407_s18 + $0x1260] sm:$0xff] %v3508_v22  ;;  %v3510_v17 = vpop.f32.mrb[77].mxu1  ;;  %v3830_v22 = vpop.f32.mrb[166].mxu0 }
 0x472   : > { %6123 = vst [vmem:[%s7407_s18 + $0x1268] sm:$0xff] %v3510_v17  ;;  %v3512_v21 = vpop.f32.mrb[78].mxu1  ;;  %6228 = vst [vmem:[%s7407_s18 + $0x1530] sm:$0xff] %v3830_v22  ;;  %v3832_v17 = vpop.f32.mrb[167].mxu0 }
 0x473   : > { %6124 = vst [vmem:[%s7407_s18 + $0x1270] sm:$0xff] %v3512_v21  ;;  %v3514_v5 = vpop.f32.mrb[79].mxu1  ;;  %6229 = vst [vmem:[%s7407_s18 + $0x1538] sm:$0xff] %v3832_v17  ;;  %v3836_v24 = vpop.f32.mrb[168].mxu0 }
 0x474   : > { %6125 = vst [vmem:[%s7407_s18 + $0x1278] sm:$0xff] %v3514_v5  ;;  %v9097_v5 = vld [vmem:[%s9651_s1 + $0x20] sm:$0xff]   ;;  %6230 = vst [vmem:[%s7407_s18 + $0x1540] sm:$0xff] %v3836_v24  ;;  %v3838_v12 = vpop.f32.mrb[169].mxu0 }
 0x475   : > { %6268 = vmatmul.mubr.msk.bf16.gmra.mrb[184].mxu1 %vm449_vm0, %v8975_v34  ;;  %6504 = vmatmul.mubr.msk.bf16.gmra.mrb[40].mxu0 %vm449_vm0, %v8663_v8  ;;  %6231 = vst [vmem:[%s7407_s18 + $0x1548] sm:$0xff] %v3838_v12  ;;  %v3840_v57 = vpop.f32.mrb[170].mxu0 }
 0x476   : > { %4142 = vmatprep.mubr.bf16.mxu1 %v9677_v19  ;;  %4876 = vmatprep.mubr.bf16.mxu0 %v9677_v19  ;;  %6232 = vst [vmem:[%s7407_s18 + $0x1550] sm:$0xff] %v3840_v57  ;;  %v3842_v3 = vpop.f32.mrb[171].mxu0 }
 0x477   : > { %6233 = vst [vmem:[%s7407_s18 + $0x1558] sm:$0xff] %v3842_v3  ;;  %v3846_v25 = vpop.f32.mrb[172].mxu0 }
 0x478   : > { %v3518_v14 = vpop.f32.mrb[80].mxu1  ;;  %6234 = vst [vmem:[%s7407_s18 + $0x1560] sm:$0xff] %v3846_v25  ;;  %v9209_v25 = vld [vmem:[%s9651_s1 + $0x58] sm:$0xff]  }
 0x479   : > { %6126 = vst [vmem:[%s7407_s18 + $0x1280] sm:$0xff] %v3518_v14  ;;  %v3520_v7 = vpop.f32.mrb[81].mxu1 }
 0x47a   : > { %6127 = vst [vmem:[%s7407_s18 + $0x1288] sm:$0xff] %v3520_v7  ;;  %v3522_v39 = vpop.f32.mrb[82].mxu1 }
 0x47b   : > { %6128 = vst [vmem:[%s7407_s18 + $0x1290] sm:$0xff] %v3522_v39  ;;  %v3524_v8 = vpop.f32.mrb[83].mxu1 }
 0x47c   : > { %6129 = vst [vmem:[%s7407_s18 + $0x1298] sm:$0xff] %v3524_v8 }
 0x47d   : > { %6269 = vmatmul.mubr.msk.bf16.gmra.mrb[188].mxu1 %vm449_vm0, %v8994_v9  ;;  %6505 = vmatmul.mubr.msk.bf16.gmra.mrb[44].mxu0 %vm449_vm0, %v8682_v27 }
 0x47e   : > { %4508 = vmatprep.mubr.bf16.mxu1 %v9677_v19  ;;  %4886 = vmatprep.mubr.bf16.mxu0 %v9677_v19 }
 0x480   : > { %v3528_v18 = vpop.f32.mrb[84].mxu1 }
 0x481   : > { %6130 = vst [vmem:[%s7407_s18 + $0x12a0] sm:$0xff] %v3528_v18  ;;  %v3530_v6 = vpop.f32.mrb[85].mxu1  ;;  %v3848_v18 = vpop.f32.mrb[173].mxu0 }
 0x482   : > { %6131 = vst [vmem:[%s7407_s18 + $0x12a8] sm:$0xff] %v3530_v6  ;;  %v3532_v63 = vpop.f32.mrb[86].mxu1  ;;  %6235 = vst [vmem:[%s7407_s18 + $0x1568] sm:$0xff] %v3848_v18  ;;  %v3850_v6 = vpop.f32.mrb[174].mxu0 }
 0x483   : > { %6132 = vst [vmem:[%s7407_s18 + $0x12b0] sm:$0xff] %v3532_v63  ;;  %v3534_v27 = vpop.f32.mrb[87].mxu1  ;;  %6236 = vst [vmem:[%s7407_s18 + $0x1570] sm:$0xff] %v3850_v6  ;;  %v3852_v63 = vpop.f32.mrb[175].mxu0 }
 0x484   : > { %6133 = vst [vmem:[%s7407_s18 + $0x12b8] sm:$0xff] %v3534_v27  ;;  %6237 = vst [vmem:[%s7407_s18 + $0x1578] sm:$0xff] %v3852_v63  ;;  %v3856_v53 = vpop.f32.mrb[176].mxu0 }
 0x485   : > { %6414 = vmatmul.mubr.msk.bf16.vlgmr.msra.gmra.mrb[192].mxu1 %vm449_vm0, %v9013_v33  ;;  %6506 = vmatmul.mubr.msk.bf16.gmra.mrb[48].mxu0 %vm449_vm0, %v8937_v28  ;;  %6238 = vst [vmem:[%s7407_s18 + $0x1580] sm:$0xff] %v3856_v53 }
 0x486   : > { %4993 = vmatpush1.bf16.msra.mxu1 %v9731_v26  ;;  %4518 = vmatprep.mubr.bf16.mxu1 %v9677_v19  ;;  %v3858_v26 = vpop.f32.mrb[177].mxu0 }
 0x487   : > { %4994 = vmatprep.subr.bf16.mxu1 %v9732_v37  ;;  %4896 = vmatprep.mubr.bf16.mxu0 %v9677_v19  ;;  %6239 = vst [vmem:[%s7407_s18 + $0x1588] sm:$0xff] %v3858_v26  ;;  %v3860_v47 = vpop.f32.mrb[178].mxu0 }
 0x488   : > { %v3538_v20 = vpop.f32.mrb[88].mxu1  ;;  %6240 = vst [vmem:[%s7407_s18 + $0x1590] sm:$0xff] %v3860_v47  ;;  %v3862_v38 = vpop.f32.mrb[179].mxu0 }
 0x489   : > { %6134 = vst [vmem:[%s7407_s18 + $0x12c0] sm:$0xff] %v3538_v20  ;;  %v3540_v52 = vpop.f32.mrb[89].mxu1  ;;  %6241 = vst [vmem:[%s7407_s18 + $0x1598] sm:$0xff] %v3862_v38 }
 0x48a   : > { %4995 = vmatpush1.bf16.msra.mxu1 %v9734_v2  ;;  %6135 = vst [vmem:[%s7407_s18 + $0x12c8] sm:$0xff] %v3540_v52  ;;  %v3542_v1 = vpop.f32.mrb[90].mxu1  ;;  %v3866_v2 = vpop.f32.mrb[180].mxu0 }
 0x48b   : > { %6136 = vst [vmem:[%s7407_s18 + $0x12d0] sm:$0xff] %v3542_v1  ;;  %v3544_v31 = vpop.f32.mrb[91].mxu1  ;;  %6242 = vst [vmem:[%s7407_s18 + $0x15a0] sm:$0xff] %v3866_v2  ;;  %v3868_v1 = vpop.f32.mrb[181].mxu0 }
 0x48c   : > { %6137 = vst [vmem:[%s7407_s18 + $0x12d8] sm:$0xff] %v3544_v31  ;;  %6243 = vst [vmem:[%s7407_s18 + $0x15a8] sm:$0xff] %v3868_v1  ;;  %v3870_v41 = vpop.f32.mrb[182].mxu0 }
 0x48d   : > { %6415 = vmatmul.mubr.msk.bf16.gmra.mrb[196].mxu1 %vm449_vm0, %v9041_v10  ;;  %6507 = vmatmul.mubr.msk.bf16.gmra.mrb[52].mxu0 %vm449_vm0, %v8956_v44  ;;  %6244 = vst [vmem:[%s7407_s18 + $0x15b0] sm:$0xff] %v3870_v41 }
 0x48e   : > { %4528 = vmatprep.mubr.bf16.mxu1 %v9677_v19  ;;  %4906 = vmatprep.mubr.bf16.mxu0 %v9677_v19 }
 0x490   : > { %v3548_v48 = vpop.f32.mrb[92].mxu1 }
 0x491   : > { %6138 = vst [vmem:[%s7407_s18 + $0x12e0] sm:$0xff] %v3548_v48  ;;  %v3550_v58 = vpop.f32.mrb[93].mxu1  ;;  %v3872_v48 = vpop.f32.mrb[183].mxu0 }
 0x492   : > { %6139 = vst [vmem:[%s7407_s18 + $0x12e8] sm:$0xff] %v3550_v58  ;;  %v3552_v54 = vpop.f32.mrb[94].mxu1  ;;  %6245 = vst [vmem:[%s7407_s18 + $0x15b8] sm:$0xff] %v3872_v48 }
 0x493   : > { %6140 = vst [vmem:[%s7407_s18 + $0x12f0] sm:$0xff] %v3552_v54  ;;  %v3554_v30 = vpop.f32.mrb[95].mxu1  ;;  %v3876_v54 = vpop.f32.mrb[184].mxu0 }
 0x494   : > { %6141 = vst [vmem:[%s7407_s18 + $0x12f8] sm:$0xff] %v3554_v30  ;;  %6246 = vst [vmem:[%s7407_s18 + $0x15c0] sm:$0xff] %v3876_v54  ;;  %v3878_v30 = vpop.f32.mrb[185].mxu0 }
 0x495   : > { %6416 = vmatmul.mubr.msk.bf16.gmra.mrb[200].mxu1 %vm449_vm0, %v9060_v13  ;;  %6508 = vmatmul.mubr.msk.bf16.gmra.mrb[56].mxu0 %vm449_vm0, %v8975_v34  ;;  %6247 = vst [vmem:[%s7407_s18 + $0x15c8] sm:$0xff] %v3878_v30  ;;  %v3880_v51 = vpop.f32.mrb[186].mxu0 }
 0x496   : > { %4538 = vmatprep.mubr.bf16.mxu1 %v9677_v19  ;;  %4916 = vmatprep.mubr.bf16.mxu0 %v9677_v19  ;;  %6248 = vst [vmem:[%s7407_s18 + $0x15d0] sm:$0xff] %v3880_v51  ;;  %v3882_v36 = vpop.f32.mrb[187].mxu0 }
 0x497   : > { %6249 = vst [vmem:[%s7407_s18 + $0x15d8] sm:$0xff] %v3882_v36 }
 0x498   : > { %v3558_v23 = vpop.f32.mrb[96].mxu1 }
 0x499   : > { %6142 = vst [vmem:[%s7407_s18 + $0x1300] sm:$0xff] %v3558_v23  ;;  %v3560_v42 = vpop.f32.mrb[97].mxu1 }
 0x49a   : > { %6143 = vst [vmem:[%s7407_s18 + $0x1308] sm:$0xff] %v3560_v42  ;;  %v3562_v45 = vpop.f32.mrb[98].mxu1 }
 0x49b   : > { %6144 = vst [vmem:[%s7407_s18 + $0x1310] sm:$0xff] %v3562_v45  ;;  %v3564_v50 = vpop.f32.mrb[99].mxu1  ;;  %v9177_v45 = vld [vmem:[%s9651_s1 + $0x48] sm:$0xff]  }
 0x49c   : > { %6145 = vst [vmem:[%s7407_s18 + $0x1318] sm:$0xff] %v3564_v50  ;;  %v3886_v50 = vpop.f32.mrb[188].mxu0 }
 0x49d   : > { %6417 = vmatmul.mubr.msk.bf16.gmra.mrb[204].mxu1 %vm449_vm0, %v9079_v16  ;;  %6509 = vmatmul.mubr.msk.bf16.gmra.mrb[60].mxu0 %vm449_vm0, %v8994_v9  ;;  %6250 = vst [vmem:[%s7407_s18 + $0x15e0] sm:$0xff] %v3886_v50  ;;  %v3888_v11 = vpop.f32.mrb[189].mxu0 }
 0x49e   : > { %4548 = vmatprep.mubr.bf16.mxu1 %v9677_v19  ;;  %6251 = vst [vmem:[%s7407_s18 + $0x15e8] sm:$0xff] %v3888_v11 }
 0x4a0   : > { %v3568_v0 = vpop.f32.mrb[100].mxu1 }
 0x4a1   : > { %6146 = vst [vmem:[%s7407_s18 + $0x1320] sm:$0xff] %v3568_v0  ;;  %v3570_v15 = vpop.f32.mrb[101].mxu1  ;;  %v3890_v0 = vpop.f32.mrb[190].mxu0 }
 0x4a2   : > { %6147 = vst [vmem:[%s7407_s18 + $0x1328] sm:$0xff] %v3570_v15  ;;  %v3572_v29 = vpop.f32.mrb[102].mxu1  ;;  %6252 = vst [vmem:[%s7407_s18 + $0x15f0] sm:$0xff] %v3890_v0  ;;  %v3892_v15 = vpop.f32.mrb[191].mxu0 }
 0x4a3   : > { %6148 = vst [vmem:[%s7407_s18 + $0x1330] sm:$0xff] %v3572_v29  ;;  %v3574_v21 = vpop.f32.mrb[103].mxu1  ;;  %6253 = vst [vmem:[%s7407_s18 + $0x15f8] sm:$0xff] %v3892_v15  ;;  %v4252_v24 = vpop.f32.mrb[192].mxu0 }
 0x4a4   : > { %6149 = vst [vmem:[%s7407_s18 + $0x1338] sm:$0xff] %v3574_v21  ;;  %v9193_v21 = vld [vmem:[%s9651_s1 + $0x50] sm:$0xff]   ;;  %6350 = vst [vmem:[%s7407_s18 + $0x1800] sm:$0xff] %v4252_v24  ;;  %v4254_v12 = vpop.f32.mrb[193].mxu0 }
 0x4a5   : > { %6418 = vmatmul.mubr.msk.bf16.gmra.mrb[208].mxu1 %vm449_vm0, %v9097_v5  ;;  %6351 = vst [vmem:[%s7407_s18 + $0x1808] sm:$0xff] %v4254_v12  ;;  %v4256_v57 = vpop.f32.mrb[194].mxu0 }
 0x4a6   : > { %4558 = vmatprep.mubr.bf16.mxu1 %v9677_v19  ;;  %6352 = vst [vmem:[%s7407_s18 + $0x1810] sm:$0xff] %v4256_v57  ;;  %v4258_v3 = vpop.f32.mrb[195].mxu0 }
 0x4a7   : > { %6353 = vst [vmem:[%s7407_s18 + $0x1818] sm:$0xff] %v4258_v3  ;;  %v4262_v18 = vpop.f32.mrb[196].mxu0 }
 0x4a8   : > { %v3578_v14 = vpop.f32.mrb[104].mxu1  ;;  %6354 = vst [vmem:[%s7407_s18 + $0x1820] sm:$0xff] %v4262_v18 }
 0x4a9   : > { %6150 = vst [vmem:[%s7407_s18 + $0x1340] sm:$0xff] %v3578_v14  ;;  %v3580_v7 = vpop.f32.mrb[105].mxu1 }
 0x4aa   : > { %6151 = vst [vmem:[%s7407_s18 + $0x1348] sm:$0xff] %v3580_v7  ;;  %v3582_v39 = vpop.f32.mrb[106].mxu1 }
 0x4ab   : > { %6152 = vst [vmem:[%s7407_s18 + $0x1350] sm:$0xff] %v3582_v39  ;;  %v3584_v8 = vpop.f32.mrb[107].mxu1 }
 0x4ac   : > { %6153 = vst [vmem:[%s7407_s18 + $0x1358] sm:$0xff] %v3584_v8 }
 0x4ad   : > { %6419 = vmatmul.mubr.msk.bf16.gmra.mrb[212].mxu1 %vm449_vm0, %v9113_v43 }
 0x4ae   : > { %4568 = vmatprep.mubr.bf16.mxu1 %v9677_v19 }
 0x4b0   : > { %v3588_v4 = vpop.f32.mrb[108].mxu1 }
 0x4b1   : > { %6154 = vst [vmem:[%s7407_s18 + $0x1360] sm:$0xff] %v3588_v4  ;;  %v3590_v61 = vpop.f32.mrb[109].mxu1  ;;  %v4264_v4 = vpop.f32.mrb[197].mxu0 }
 0x4b2   : > { %6155 = vst [vmem:[%s7407_s18 + $0x1368] sm:$0xff] %v3590_v61  ;;  %v3592_v27 = vpop.f32.mrb[110].mxu1  ;;  %6355 = vst [vmem:[%s7407_s18 + $0x1828] sm:$0xff] %v4264_v4  ;;  %v4266_v61 = vpop.f32.mrb[198].mxu0 }
 0x4b3   : > { %6156 = vst [vmem:[%s7407_s18 + $0x1370] sm:$0xff] %v3592_v27  ;;  %v3594_v60 = vpop.f32.mrb[111].mxu1  ;;  %6356 = vst [vmem:[%s7407_s18 + $0x1830] sm:$0xff] %v4266_v61  ;;  %v4268_v27 = vpop.f32.mrb[199].mxu0 }
 0x4b4   : > { %6157 = vst [vmem:[%s7407_s18 + $0x1378] sm:$0xff] %v3594_v60  ;;  %6357 = vst [vmem:[%s7407_s18 + $0x1838] sm:$0xff] %v4268_v27  ;;  %v4272_v26 = vpop.f32.mrb[200].mxu0 }
 0x4b5   : > { %6420 = vmatmul.mubr.msk.bf16.gmra.mrb[216].mxu1 %vm449_vm0, %v9129_v35  ;;  %6358 = vst [vmem:[%s7407_s18 + $0x1840] sm:$0xff] %v4272_v26 }
 0x4b6   : > { %4578 = vmatprep.mubr.bf16.mxu1 %v9677_v19 }
 0x4b8   : > { %v3598_v37 = vpop.f32.mrb[112].mxu1 }
 0x4b9   : > { %6158 = vst [vmem:[%s7407_s18 + $0x1380] sm:$0xff] %v3598_v37  ;;  %v3600_v20 = vpop.f32.mrb[113].mxu1  ;;  %v4274_v37 = vpop.f32.mrb[201].mxu0 }
 0x4ba   : > { %6159 = vst [vmem:[%s7407_s18 + $0x1388] sm:$0xff] %v3600_v20  ;;  %v3602_v52 = vpop.f32.mrb[114].mxu1  ;;  %6359 = vst [vmem:[%s7407_s18 + $0x1848] sm:$0xff] %v4274_v37  ;;  %v4276_v20 = vpop.f32.mrb[202].mxu0 }
 0x4bb   : > { %6160 = vst [vmem:[%s7407_s18 + $0x1390] sm:$0xff] %v3602_v52  ;;  %v3604_v62 = vpop.f32.mrb[115].mxu1  ;;  %6360 = vst [vmem:[%s7407_s18 + $0x1850] sm:$0xff] %v4276_v20  ;;  %v4278_v52 = vpop.f32.mrb[203].mxu0 }
 0x4bc   : > { %6161 = vst [vmem:[%s7407_s18 + $0x1398] sm:$0xff] %v3604_v62  ;;  %6361 = vst [vmem:[%s7407_s18 + $0x1858] sm:$0xff] %v4278_v52  ;;  %v4282_v2 = vpop.f32.mrb[204].mxu0 }
 0x4bd   : > { %6421 = vmatmul.mubr.msk.bf16.gmra.mrb[220].mxu1 %vm449_vm0, %v9145_v59  ;;  %6362 = vst [vmem:[%s7407_s18 + $0x1860] sm:$0xff] %v4282_v2  ;;  %v4284_v1 = vpop.f32.mrb[205].mxu0 }
 0x4be   : > { %4588 = vmatprep.mubr.bf16.mxu1 %v9677_v19  ;;  %6363 = vst [vmem:[%s7407_s18 + $0x1868] sm:$0xff] %v4284_v1  ;;  %v4286_v41 = vpop.f32.mrb[206].mxu0 }
 0x4bf   : > { %6364 = vst [vmem:[%s7407_s18 + $0x1870] sm:$0xff] %v4286_v41  ;;  %v4288_v48 = vpop.f32.mrb[207].mxu0 }
 0x4c0   : > { %v3608_v31 = vpop.f32.mrb[116].mxu1  ;;  %6365 = vst [vmem:[%s7407_s18 + $0x1878] sm:$0xff] %v4288_v48 }
 0x4c1   : > { %6162 = vst [vmem:[%s7407_s18 + $0x13a0] sm:$0xff] %v3608_v31  ;;  %v3610_v40 = vpop.f32.mrb[117].mxu1 }
 0x4c2   : > { %6163 = vst [vmem:[%s7407_s18 + $0x13a8] sm:$0xff] %v3610_v40  ;;  %v3612_v32 = vpop.f32.mrb[118].mxu1 }
 0x4c3   : > { %6164 = vst [vmem:[%s7407_s18 + $0x13b0] sm:$0xff] %v3612_v32  ;;  %v3614_v58 = vpop.f32.mrb[119].mxu1 }
 0x4c4   : > { %6165 = vst [vmem:[%s7407_s18 + $0x13b8] sm:$0xff] %v3614_v58  ;;  %v4292_v58 = vpop.f32.mrb[208].mxu0 }
 0x4c5   : > { %6422 = vmatmul.mubr.msk.bf16.gmra.mrb[224].mxu1 %vm449_vm0, %v9161_v56  ;;  %6366 = vst [vmem:[%s7407_s18 + $0x1880] sm:$0xff] %v4292_v58  ;;  %v4294_v54 = vpop.f32.mrb[209].mxu0 }
 0x4c6   : > { %4598 = vmatprep.mubr.bf16.mxu1 %v9677_v19  ;;  %6367 = vst [vmem:[%s7407_s18 + $0x1888] sm:$0xff] %v4294_v54 }
 0x4c8   : > { %v3618_v55 = vpop.f32.mrb[120].mxu1 }
 0x4c9   : > { %6166 = vst [vmem:[%s7407_s18 + $0x13c0] sm:$0xff] %v3618_v55  ;;  %v3620_v23 = vpop.f32.mrb[121].mxu1  ;;  %v4296_v55 = vpop.f32.mrb[210].mxu0 }
 0x4ca   : > { %6167 = vst [vmem:[%s7407_s18 + $0x13c8] sm:$0xff] %v3620_v23  ;;  %v3622_v42 = vpop.f32.mrb[122].mxu1  ;;  %6368 = vst [vmem:[%s7407_s18 + $0x1890] sm:$0xff] %v4296_v55  ;;  %v4298_v23 = vpop.f32.mrb[211].mxu0 }
 0x4cb   : > { %6168 = vst [vmem:[%s7407_s18 + $0x13d0] sm:$0xff] %v3622_v42  ;;  %v3624_v49 = vpop.f32.mrb[123].mxu1  ;;  %6369 = vst [vmem:[%s7407_s18 + $0x1898] sm:$0xff] %v4298_v23  ;;  %v4302_v42 = vpop.f32.mrb[212].mxu0 }
 0x4cc   : > { %6169 = vst [vmem:[%s7407_s18 + $0x13d8] sm:$0xff] %v3624_v49  ;;  %6370 = vst [vmem:[%s7407_s18 + $0x18a0] sm:$0xff] %v4302_v42  ;;  %v4304_v49 = vpop.f32.mrb[213].mxu0 }
 0x4cd   : > { %6423 = vmatmul.mubr.msk.bf16.gmra.mrb[228].mxu1 %vm449_vm0, %v9177_v45  ;;  %6371 = vst [vmem:[%s7407_s18 + $0x18a8] sm:$0xff] %v4304_v49  ;;  %v4306_v11 = vpop.f32.mrb[214].mxu0 }
 0x4ce   : > { %4608 = vmatprep.mubr.bf16.mxu1 %v9677_v19  ;;  %6372 = vst [vmem:[%s7407_s18 + $0x18b0] sm:$0xff] %v4306_v11  ;;  %v4308_v0 = vpop.f32.mrb[215].mxu0 }
 0x4cf   : > { %6373 = vst [vmem:[%s7407_s18 + $0x18b8] sm:$0xff] %v4308_v0  ;;  %v4312_v15 = vpop.f32.mrb[216].mxu0 }
 0x4d0   : > { %v3628_v46 = vpop.f32.mrb[124].mxu1  ;;  %6374 = vst [vmem:[%s7407_s18 + $0x18c0] sm:$0xff] %v4312_v15 }
 0x4d1   : > { %6170 = vst [vmem:[%s7407_s18 + $0x13e0] sm:$0xff] %v3628_v46  ;;  %v3630_v22 = vpop.f32.mrb[125].mxu1 }
 0x4d2   : > { %6171 = vst [vmem:[%s7407_s18 + $0x13e8] sm:$0xff] %v3630_v22  ;;  %v3632_v17 = vpop.f32.mrb[126].mxu1 }
 0x4d3   : > { %6172 = vst [vmem:[%s7407_s18 + $0x13f0] sm:$0xff] %v3632_v17  ;;  %v3634_v29 = vpop.f32.mrb[127].mxu1  ;;  %v4314_v17 = vpop.f32.mrb[217].mxu0 }
 0x4d4   : > { %6173 = vst [vmem:[%s7407_s18 + $0x13f8] sm:$0xff] %v3634_v29  ;;  %6375 = vst [vmem:[%s7407_s18 + $0x18c8] sm:$0xff] %v4314_v17  ;;  %v4316_v24 = vpop.f32.mrb[218].mxu0 }
 0x4d5   : > { %6424 = vmatmul.mubr.msk.bf16.gmra.mrb[232].mxu1 %vm449_vm0, %v9193_v21  ;;  %6376 = vst [vmem:[%s7407_s18 + $0x18d0] sm:$0xff] %v4316_v24 }
 0x4d6   : > { %4618 = vmatprep.mubr.bf16.mxu1 %v9677_v19 }
 0x4d8   : > { %v3994_v14 = vpop.f32.mrb[128].mxu1 }
 0x4d9   : > { %6270 = vst [vmem:[%s7407_s18 + $0x1600] sm:$0xff] %v3994_v14  ;;  %v3996_v7 = vpop.f32.mrb[129].mxu1  ;;  %v4318_v14 = vpop.f32.mrb[219].mxu0 }
 0x4da   : > { %6271 = vst [vmem:[%s7407_s18 + $0x1608] sm:$0xff] %v3996_v7  ;;  %v3998_v39 = vpop.f32.mrb[130].mxu1  ;;  %6377 = vst [vmem:[%s7407_s18 + $0x18d8] sm:$0xff] %v4318_v14  ;;  %v4322_v7 = vpop.f32.mrb[220].mxu0 }
 0x4db   : > { %6272 = vst [vmem:[%s7407_s18 + $0x1610] sm:$0xff] %v3998_v39  ;;  %v4000_v8 = vpop.f32.mrb[131].mxu1  ;;  %6378 = vst [vmem:[%s7407_s18 + $0x18e0] sm:$0xff] %v4322_v7  ;;  %v4324_v3 = vpop.f32.mrb[221].mxu0 }
 0x4dc   : > { %6273 = vst [vmem:[%s7407_s18 + $0x1618] sm:$0xff] %v4000_v8  ;;  %6379 = vst [vmem:[%s7407_s18 + $0x18e8] sm:$0xff] %v4324_v3  ;;  %v4326_v8 = vpop.f32.mrb[222].mxu0 }
 0x4dd   : > { %6425 = vmatmul.mubr.msk.bf16.gmra.mrb[236].mxu1 %vm449_vm0, %v9209_v25  ;;  %6380 = vst [vmem:[%s7407_s18 + $0x18f0] sm:$0xff] %v4326_v8  ;;  %v4328_v4 = vpop.f32.mrb[223].mxu0 }
 0x4de   : > { %4628 = vmatprep.mubr.bf16.mxu1 %v9677_v19  ;;  %6381 = vst [vmem:[%s7407_s18 + $0x18f8] sm:$0xff] %v4328_v4  ;;  %v4332_v61 = vpop.f32.mrb[224].mxu0 }
 0x4df   : > { %6382 = vst [vmem:[%s7407_s18 + $0x1900] sm:$0xff] %v4332_v61 }
 0x4e0   : > { %v4004_v6 = vpop.f32.mrb[132].mxu1 }
 0x4e1   : > { %6274 = vst [vmem:[%s7407_s18 + $0x1620] sm:$0xff] %v4004_v6  ;;  %v4006_v63 = vpop.f32.mrb[133].mxu1 }
 0x4e2   : > { %6275 = vst [vmem:[%s7407_s18 + $0x1628] sm:$0xff] %v4006_v63  ;;  %v4008_v60 = vpop.f32.mrb[134].mxu1  ;;  %v4334_v63 = vpop.f32.mrb[225].mxu0 }
 0x4e3   : > { %6276 = vst [vmem:[%s7407_s18 + $0x1630] sm:$0xff] %v4008_v60  ;;  %v4010_v53 = vpop.f32.mrb[135].mxu1  ;;  %6383 = vst [vmem:[%s7407_s18 + $0x1908] sm:$0xff] %v4334_v63  ;;  %v4336_v60 = vpop.f32.mrb[226].mxu0 }
 0x4e4   : > { %6277 = vst [vmem:[%s7407_s18 + $0x1638] sm:$0xff] %v4010_v53  ;;  %6384 = vst [vmem:[%s7407_s18 + $0x1910] sm:$0xff] %v4336_v60  ;;  %v4338_v26 = vpop.f32.mrb[227].mxu0 }
 0x4e5   : > { %6426 = vmatmul.mubr.msk.bf16.gmra.mrb[240].mxu1 %vm449_vm0, %v8937_v28  ;;  %6385 = vst [vmem:[%s7407_s18 + $0x1918] sm:$0xff] %v4338_v26 }
 0x4e6   : > { %4638 = vmatprep.mubr.bf16.mxu1 %v9677_v19 }
 0x4e8   : > { %v4014_v47 = vpop.f32.mrb[136].mxu1 }
 0x4e9   : > { %6278 = vst [vmem:[%s7407_s18 + $0x1640] sm:$0xff] %v4014_v47  ;;  %v4016_v38 = vpop.f32.mrb[137].mxu1  ;;  %v4342_v47 = vpop.f32.mrb[228].mxu0 }
 0x4ea   : > { %6279 = vst [vmem:[%s7407_s18 + $0x1648] sm:$0xff] %v4016_v38  ;;  %v4018_v62 = vpop.f32.mrb[138].mxu1  ;;  %6386 = vst [vmem:[%s7407_s18 + $0x1920] sm:$0xff] %v4342_v47  ;;  %v4344_v20 = vpop.f32.mrb[229].mxu0 }
 0x4eb   : > { %6280 = vst [vmem:[%s7407_s18 + $0x1650] sm:$0xff] %v4018_v62  ;;  %v4020_v28 = vpop.f32.mrb[139].mxu1  ;;  %6387 = vst [vmem:[%s7407_s18 + $0x1928] sm:$0xff] %v4344_v20  ;;  %v4346_v52 = vpop.f32.mrb[230].mxu0 }
 0x4ec   : > { %6281 = vst [vmem:[%s7407_s18 + $0x1658] sm:$0xff] %v4020_v28  ;;  %6388 = vst [vmem:[%s7407_s18 + $0x1930] sm:$0xff] %v4346_v52  ;;  %v4348_v28 = vpop.f32.mrb[231].mxu0 }
 0x4ed   : > { %6427 = vmatmul.mubr.msk.bf16.gmra.mrb[244].mxu1 %vm449_vm0, %v8956_v44  ;;  %6389 = vst [vmem:[%s7407_s18 + $0x1938] sm:$0xff] %v4348_v28  ;;  %v4352_v1 = vpop.f32.mrb[232].mxu0 }
 0x4ee   : > { %4648 = vmatprep.mubr.bf16.mxu1 %v9677_v19  ;;  %6390 = vst [vmem:[%s7407_s18 + $0x1940] sm:$0xff] %v4352_v1 }
 0x4f0   : > { %v4024_v31 = vpop.f32.mrb[140].mxu1 }
 0x4f1   : > { %6282 = vst [vmem:[%s7407_s18 + $0x1660] sm:$0xff] %v4024_v31  ;;  %v4026_v40 = vpop.f32.mrb[141].mxu1  ;;  %v4354_v31 = vpop.f32.mrb[233].mxu0 }
 0x4f2   : > { %6283 = vst [vmem:[%s7407_s18 + $0x1668] sm:$0xff] %v4026_v40  ;;  %v4028_v32 = vpop.f32.mrb[142].mxu1  ;;  %6391 = vst [vmem:[%s7407_s18 + $0x1948] sm:$0xff] %v4354_v31  ;;  %v4356_v40 = vpop.f32.mrb[234].mxu0 }
 0x4f3   : > { %6284 = vst [vmem:[%s7407_s18 + $0x1670] sm:$0xff] %v4028_v32  ;;  %v4030_v44 = vpop.f32.mrb[143].mxu1  ;;  %6392 = vst [vmem:[%s7407_s18 + $0x1950] sm:$0xff] %v4356_v40  ;;  %v4358_v32 = vpop.f32.mrb[235].mxu0 }
 0x4f4   : > { %6285 = vst [vmem:[%s7407_s18 + $0x1678] sm:$0xff] %v4030_v44  ;;  %6393 = vst [vmem:[%s7407_s18 + $0x1958] sm:$0xff] %v4358_v32  ;;  %v4362_v58 = vpop.f32.mrb[236].mxu0 }
 0x4f5   : > { %6428 = vmatmul.mubr.msk.bf16.gmra.mrb[248].mxu1 %vm449_vm0, %v8975_v34  ;;  %6394 = vst [vmem:[%s7407_s18 + $0x1960] sm:$0xff] %v4362_v58  ;;  %v4364_v54 = vpop.f32.mrb[237].mxu0 }
 0x4f6   : > { %4658 = vmatprep.mubr.bf16.mxu1 %v9677_v19  ;;  %6395 = vst [vmem:[%s7407_s18 + $0x1968] sm:$0xff] %v4364_v54  ;;  %v4366_v55 = vpop.f32.mrb[238].mxu0 }
 0x4f7   : > { %6396 = vst [vmem:[%s7407_s18 + $0x1970] sm:$0xff] %v4366_v55  ;;  %v4368_v23 = vpop.f32.mrb[239].mxu0  ;;  %v6822_v55 = vld [vmem:[%s9651_s1 + $0x68] sm:$0xff]  }
 0x4f8   : > { %v4034_v30 = vpop.f32.mrb[144].mxu1  ;;  %6397 = vst [vmem:[%s7407_s18 + $0x1978] sm:$0xff] %v4368_v23 }
 0x4f9   : > { %6286 = vst [vmem:[%s7407_s18 + $0x1680] sm:$0xff] %v4034_v30  ;;  %v4036_v51 = vpop.f32.mrb[145].mxu1 }
 0x4fa   : > { %6287 = vst [vmem:[%s7407_s18 + $0x1688] sm:$0xff] %v4036_v51  ;;  %v4038_v36 = vpop.f32.mrb[146].mxu1 }
 0x4fb   : > { %6288 = vst [vmem:[%s7407_s18 + $0x1690] sm:$0xff] %v4038_v36  ;;  %v4040_v34 = vpop.f32.mrb[147].mxu1 }
 0x4fc   : > { %6289 = vst [vmem:[%s7407_s18 + $0x1698] sm:$0xff] %v4040_v34  ;;  %v4372_v34 = vpop.f32.mrb[240].mxu0 }
 0x4fd   : > { %6429 = vmatmul.mubr.msk.bf16.gmra.mrb[252].mxu1 %vm449_vm0, %v8994_v9  ;;  %6398 = vst [vmem:[%s7407_s18 + $0x1980] sm:$0xff] %v4372_v34  ;;  %v4374_v42 = vpop.f32.mrb[241].mxu0 }
 0x4fe   : > { %5024 = vmatprep.mubr.bf16.mxu1 %v9677_v19  ;;  %6399 = vst [vmem:[%s7407_s18 + $0x1988] sm:$0xff] %v4374_v42 }
 0x500   : > { %v4044_v50 = vpop.f32.mrb[148].mxu1 }
 0x501   : > { %6290 = vst [vmem:[%s7407_s18 + $0x16a0] sm:$0xff] %v4044_v50  ;;  %v4046_v46 = vpop.f32.mrb[149].mxu1  ;;  %v4376_v50 = vpop.f32.mrb[242].mxu0 }
 0x502   : > { %6291 = vst [vmem:[%s7407_s18 + $0x16a8] sm:$0xff] %v4046_v46  ;;  %v4048_v22 = vpop.f32.mrb[150].mxu1  ;;  %6400 = vst [vmem:[%s7407_s18 + $0x1990] sm:$0xff] %v4376_v50  ;;  %v4378_v46 = vpop.f32.mrb[243].mxu0 }
 0x503   : > { %6292 = vst [vmem:[%s7407_s18 + $0x16b0] sm:$0xff] %v4048_v22  ;;  %v4050_v9 = vpop.f32.mrb[151].mxu1  ;;  %6401 = vst [vmem:[%s7407_s18 + $0x1998] sm:$0xff] %v4378_v46  ;;  %v4382_v22 = vpop.f32.mrb[244].mxu0 }
 0x504   : > { %6293 = vst [vmem:[%s7407_s18 + $0x16b8] sm:$0xff] %v4050_v9  ;;  %6402 = vst [vmem:[%s7407_s18 + $0x19a0] sm:$0xff] %v4382_v22  ;;  %v4384_v9 = vpop.f32.mrb[245].mxu0 }
 0x505   : > { %6574 = vmatmul.mubr.msk.bf16.vlgmr.msra.gmra.mrb[0].mxu1 %vm449_vm0, %v9013_v33  ;;  %6403 = vst [vmem:[%s7407_s18 + $0x19a8] sm:$0xff] %v4384_v9  ;;  %v4386_v17 = vpop.f32.mrb[246].mxu0 }
 0x506   : > { %5034 = vmatprep.mubr.bf16.mxu1 %v9677_v19  ;;  %6404 = vst [vmem:[%s7407_s18 + $0x19b0] sm:$0xff] %v4386_v17  ;;  %v4388_v24 = vpop.f32.mrb[247].mxu0 }
 0x507   : > { %6405 = vst [vmem:[%s7407_s18 + $0x19b8] sm:$0xff] %v4388_v24  ;;  %v4392_v14 = vpop.f32.mrb[248].mxu0 }
 0x508   : > { %v4054_v29 = vpop.f32.mrb[152].mxu1  ;;  %6406 = vst [vmem:[%s7407_s18 + $0x19c0] sm:$0xff] %v4392_v14 }
 0x509   : > { %6294 = vst [vmem:[%s7407_s18 + $0x16c0] sm:$0xff] %v4054_v29  ;;  %v4056_v12 = vpop.f32.mrb[153].mxu1 }
 0x50a   : > { %6295 = vst [vmem:[%s7407_s18 + $0x16c8] sm:$0xff] %v4056_v12  ;;  %v4058_v57 = vpop.f32.mrb[154].mxu1 }
 0x50b   : > { %6296 = vst [vmem:[%s7407_s18 + $0x16d0] sm:$0xff] %v4058_v57  ;;  %v4060_v33 = vpop.f32.mrb[155].mxu1  ;;  %v4394_v57 = vpop.f32.mrb[249].mxu0 }
 0x50c   : > { %6297 = vst [vmem:[%s7407_s18 + $0x16d8] sm:$0xff] %v4060_v33  ;;  %6407 = vst [vmem:[%s7407_s18 + $0x19c8] sm:$0xff] %v4394_v57  ;;  %v4396_v7 = vpop.f32.mrb[250].mxu0 }
 0x50d   : > { %6575 = vmatmul.mubr.msk.bf16.gmra.mrb[4].mxu1 %vm449_vm0, %v9041_v10  ;;  %6408 = vst [vmem:[%s7407_s18 + $0x19d0] sm:$0xff] %v4396_v7 }
 0x50e   : > { %5044 = vmatprep.mubr.bf16.mxu1 %v9677_v19 }
 0x510   : > { %v4064_v39 = vpop.f32.mrb[156].mxu1 }
 0x511   : > { %6298 = vst [vmem:[%s7407_s18 + $0x16e0] sm:$0xff] %v4064_v39  ;;  %v4066_v18 = vpop.f32.mrb[157].mxu1  ;;  %v4398_v39 = vpop.f32.mrb[251].mxu0 }
 0x512   : > { %6299 = vst [vmem:[%s7407_s18 + $0x16e8] sm:$0xff] %v4066_v18  ;;  %v4068_v6 = vpop.f32.mrb[158].mxu1  ;;  %6409 = vst [vmem:[%s7407_s18 + $0x19d8] sm:$0xff] %v4398_v39  ;;  %v4402_v18 = vpop.f32.mrb[252].mxu0 }
 0x513   : > { %6300 = vst [vmem:[%s7407_s18 + $0x16f0] sm:$0xff] %v4068_v6  ;;  %v4070_v10 = vpop.f32.mrb[159].mxu1  ;;  %6410 = vst [vmem:[%s7407_s18 + $0x19e0] sm:$0xff] %v4402_v18  ;;  %v4404_v4 = vpop.f32.mrb[253].mxu0 }
 0x514   : > { %6301 = vst [vmem:[%s7407_s18 + $0x16f8] sm:$0xff] %v4070_v10  ;;  %6411 = vst [vmem:[%s7407_s18 + $0x19e8] sm:$0xff] %v4404_v4  ;;  %v4406_v10 = vpop.f32.mrb[254].mxu0 }
 0x515   : > { %6576 = vmatmul.mubr.msk.bf16.gmra.mrb[8].mxu1 %vm449_vm0, %v9060_v13  ;;  %6412 = vst [vmem:[%s7407_s18 + $0x19f0] sm:$0xff] %v4406_v10  ;;  %v4408_v63 = vpop.f32.mrb[255].mxu0 }
 0x516   : > { %5054 = vmatprep.mubr.bf16.mxu1 %v9677_v19  ;;  %6413 = vst [vmem:[%s7407_s18 + $0x19f8] sm:$0xff] %v4408_v63  ;;  %v4768_v60 = vpop.f32.mrb[0].mxu0 }
 0x517   : > { %6510 = vst [vmem:[%s7407_s18 + $0x1c00] sm:$0xff] %v4768_v60 }
 0x518   : > { %v4074_v27 = vpop.f32.mrb[160].mxu1 }
 0x519   : > { %6302 = vst [vmem:[%s7407_s18 + $0x1700] sm:$0xff] %v4074_v27  ;;  %v4076_v53 = vpop.f32.mrb[161].mxu1 }
 0x51a   : > { %6303 = vst [vmem:[%s7407_s18 + $0x1708] sm:$0xff] %v4076_v53  ;;  %v4078_v37 = vpop.f32.mrb[162].mxu1  ;;  %v4770_v53 = vpop.f32.mrb[1].mxu0 }
 0x51b   : > { %6304 = vst [vmem:[%s7407_s18 + $0x1710] sm:$0xff] %v4078_v37  ;;  %v4080_v13 = vpop.f32.mrb[163].mxu1  ;;  %6511 = vst [vmem:[%s7407_s18 + $0x1c08] sm:$0xff] %v4770_v53  ;;  %v4772_v37 = vpop.f32.mrb[2].mxu0 }
 0x51c   : > { %6305 = vst [vmem:[%s7407_s18 + $0x1718] sm:$0xff] %v4080_v13  ;;  %6512 = vst [vmem:[%s7407_s18 + $0x1c10] sm:$0xff] %v4772_v37  ;;  %v4774_v47 = vpop.f32.mrb[3].mxu0 }
 0x51d   : > { %6577 = vmatmul.mubr.msk.bf16.gmra.mrb[12].mxu1 %vm449_vm0, %v9079_v16  ;;  %6513 = vst [vmem:[%s7407_s18 + $0x1c18] sm:$0xff] %v4774_v47 }
 0x51e   : > { %5064 = vmatprep.mubr.bf16.mxu1 %v9677_v19 }
 0x520   : > { %v4084_v38 = vpop.f32.mrb[164].mxu1 }
 0x521   : > { %6306 = vst [vmem:[%s7407_s18 + $0x1720] sm:$0xff] %v4084_v38  ;;  %v4086_v62 = vpop.f32.mrb[165].mxu1  ;;  %v4778_v38 = vpop.f32.mrb[4].mxu0 }
 0x522   : > { %6307 = vst [vmem:[%s7407_s18 + $0x1728] sm:$0xff] %v4086_v62  ;;  %v4088_v2 = vpop.f32.mrb[166].mxu1  ;;  %6514 = vst [vmem:[%s7407_s18 + $0x1c20] sm:$0xff] %v4778_v38  ;;  %v4780_v52 = vpop.f32.mrb[5].mxu0 }
 0x523   : > { %6308 = vst [vmem:[%s7407_s18 + $0x1730] sm:$0xff] %v4088_v2  ;;  %v4090_v16 = vpop.f32.mrb[167].mxu1  ;;  %6515 = vst [vmem:[%s7407_s18 + $0x1c28] sm:$0xff] %v4780_v52  ;;  %v4782_v28 = vpop.f32.mrb[6].mxu0 }
 0x524   : > { %6309 = vst [vmem:[%s7407_s18 + $0x1738] sm:$0xff] %v4090_v16  ;;  %6516 = vst [vmem:[%s7407_s18 + $0x1c30] sm:$0xff] %v4782_v28  ;;  %v4784_v16 = vpop.f32.mrb[7].mxu0 }
 0x525   : > { %6578 = vmatmul.mubr.msk.bf16.gmra.mrb[16].mxu1 %vm449_vm0, %v9097_v5  ;;  %6517 = vst [vmem:[%s7407_s18 + $0x1c38] sm:$0xff] %v4784_v16  ;;  %v4788_v31 = vpop.f32.mrb[8].mxu0 }
 0x526   : > { %5074 = vmatprep.mubr.bf16.mxu1 %v9677_v19  ;;  %6518 = vst [vmem:[%s7407_s18 + $0x1c40] sm:$0xff] %v4788_v31  ;;  %v4790_v40 = vpop.f32.mrb[9].mxu0 }
 0x527   : > { %6519 = vst [vmem:[%s7407_s18 + $0x1c48] sm:$0xff] %v4790_v40  ;;  %v4792_v32 = vpop.f32.mrb[10].mxu0 }
 0x528   : > { %v4094_v41 = vpop.f32.mrb[168].mxu1  ;;  %6520 = vst [vmem:[%s7407_s18 + $0x1c50] sm:$0xff] %v4792_v32 }
 0x529   : > { %6310 = vst [vmem:[%s7407_s18 + $0x1740] sm:$0xff] %v4094_v41  ;;  %v4096_v48 = vpop.f32.mrb[169].mxu1  ;;  %v6821_v41 = vld [vmem:[%s9651_s1 + $0x60] sm:$0xff]  }
 0x52a   : > { %6311 = vst [vmem:[%s7407_s18 + $0x1748] sm:$0xff] %v4096_v48  ;;  %v4098_v44 = vpop.f32.mrb[170].mxu1 }
 0x52b   : > { %6312 = vst [vmem:[%s7407_s18 + $0x1750] sm:$0xff] %v4098_v44  ;;  %v4100_v5 = vpop.f32.mrb[171].mxu1 }
 0x52c   : > { %6313 = vst [vmem:[%s7407_s18 + $0x1758] sm:$0xff] %v4100_v5  ;;  %v4794_v5 = vpop.f32.mrb[11].mxu0 }
 0x52d   : > { %6579 = vmatmul.mubr.msk.bf16.gmra.mrb[20].mxu1 %vm449_vm0, %v9113_v43  ;;  %6521 = vst [vmem:[%s7407_s18 + $0x1c58] sm:$0xff] %v4794_v5 }
 0x52e   : > { %5084 = vmatprep.mubr.bf16.mxu1 %v9677_v19 }
 0x530   : > { %v4104_v30 = vpop.f32.mrb[172].mxu1 }
 0x531   : > { %6314 = vst [vmem:[%s7407_s18 + $0x1760] sm:$0xff] %v4104_v30  ;;  %v4106_v51 = vpop.f32.mrb[173].mxu1  ;;  %v4798_v30 = vpop.f32.mrb[12].mxu0 }
 0x532   : > { %6315 = vst [vmem:[%s7407_s18 + $0x1768] sm:$0xff] %v4106_v51  ;;  %v4108_v36 = vpop.f32.mrb[174].mxu1  ;;  %6522 = vst [vmem:[%s7407_s18 + $0x1c60] sm:$0xff] %v4798_v30  ;;  %v4800_v51 = vpop.f32.mrb[13].mxu0 }
 0x533   : > { %6316 = vst [vmem:[%s7407_s18 + $0x1770] sm:$0xff] %v4108_v36  ;;  %v4110_v43 = vpop.f32.mrb[175].mxu1  ;;  %6523 = vst [vmem:[%s7407_s18 + $0x1c68] sm:$0xff] %v4800_v51  ;;  %v4802_v36 = vpop.f32.mrb[14].mxu0 }
 0x534   : > { %6317 = vst [vmem:[%s7407_s18 + $0x1778] sm:$0xff] %v4110_v43  ;;  %6524 = vst [vmem:[%s7407_s18 + $0x1c70] sm:$0xff] %v4802_v36  ;;  %v4804_v34 = vpop.f32.mrb[15].mxu0 }
 0x535   : > { %6580 = vmatmul.mubr.msk.bf16.gmra.mrb[24].mxu1 %vm449_vm0, %v9129_v35  ;;  %6525 = vst [vmem:[%s7407_s18 + $0x1c78] sm:$0xff] %v4804_v34  ;;  %v4808_v50 = vpop.f32.mrb[16].mxu0 }
 0x536   : > { %5094 = vmatprep.mubr.bf16.mxu1 %v9677_v19  ;;  %6526 = vst [vmem:[%s7407_s18 + $0x1c80] sm:$0xff] %v4808_v50  ;;  %v4810_v46 = vpop.f32.mrb[17].mxu0 }
 0x537   : > { %6527 = vst [vmem:[%s7407_s18 + $0x1c88] sm:$0xff] %v4810_v46 }
 0x538   : > { %v4114_v49 = vpop.f32.mrb[176].mxu1 }
 0x539   : > { %6318 = vst [vmem:[%s7407_s18 + $0x1780] sm:$0xff] %v4114_v49  ;;  %v4116_v11 = vpop.f32.mrb[177].mxu1 }
 0x53a   : > { %6319 = vst [vmem:[%s7407_s18 + $0x1788] sm:$0xff] %v4116_v11  ;;  %v4118_v0 = vpop.f32.mrb[178].mxu1  ;;  %v6823_v11 = vld [vmem:[%s9651_s1 + $0x70] sm:$0xff]  }
 0x53b   : > { %6320 = vst [vmem:[%s7407_s18 + $0x1790] sm:$0xff] %v4118_v0  ;;  %v4120_v35 = vpop.f32.mrb[179].mxu1 }
 0x53c   : > { %6321 = vst [vmem:[%s7407_s18 + $0x1798] sm:$0xff] %v4120_v35  ;;  %v4812_v35 = vpop.f32.mrb[18].mxu0 }
 0x53d   : > { %6581 = vmatmul.mubr.msk.bf16.gmra.mrb[28].mxu1 %vm449_vm0, %v9145_v59  ;;  %6528 = vst [vmem:[%s7407_s18 + $0x1c90] sm:$0xff] %v4812_v35  ;;  %v4814_v9 = vpop.f32.mrb[19].mxu0 }
 0x53e   : > { %5104 = vmatprep.mubr.bf16.mxu1 %v9677_v19  ;;  %6529 = vst [vmem:[%s7407_s18 + $0x1c98] sm:$0xff] %v4814_v9 }
 0x540   : > { %v4124_v15 = vpop.f32.mrb[180].mxu1 }
 0x541   : > { %6322 = vst [vmem:[%s7407_s18 + $0x17a0] sm:$0xff] %v4124_v15  ;;  %v4126_v29 = vpop.f32.mrb[181].mxu1 }
 0x542   : > { %6323 = vst [vmem:[%s7407_s18 + $0x17a8] sm:$0xff] %v4126_v29  ;;  %v4128_v12 = vpop.f32.mrb[182].mxu1  ;;  %v6824_v29 = vld [vmem:[%s9651_s1 + $0x78] sm:$0xff]  }
 0x543   : > { %6324 = vst [vmem:[%s7407_s18 + $0x17b0] sm:$0xff] %v4128_v12  ;;  %v4130_v59 = vpop.f32.mrb[183].mxu1 }
 0x544   : > { %6325 = vst [vmem:[%s7407_s18 + $0x17b8] sm:$0xff] %v4130_v59 }
 0x545   : > { %6582 = vmatmul.mubr.msk.bf16.gmra.mrb[32].mxu1 %vm449_vm0, %v9161_v56 }
 0x546   : > { %5114 = vmatprep.mubr.bf16.mxu1 %v9677_v19 }
 0x548   : > { %v4134_v33 = vpop.f32.mrb[184].mxu1 }
 0x549   : > { %6326 = vst [vmem:[%s7407_s18 + $0x17c0] sm:$0xff] %v4134_v33  ;;  %v4136_v3 = vpop.f32.mrb[185].mxu1 }
 0x54a   : > { %6327 = vst [vmem:[%s7407_s18 + $0x17c8] sm:$0xff] %v4136_v3  ;;  %v4138_v8 = vpop.f32.mrb[186].mxu1 }
 0x54b   : > { %6328 = vst [vmem:[%s7407_s18 + $0x17d0] sm:$0xff] %v4138_v8  ;;  %v4140_v56 = vpop.f32.mrb[187].mxu1 }
 0x54c   : > { %6329 = vst [vmem:[%s7407_s18 + $0x17d8] sm:$0xff] %v4140_v56 }
 0x54d   : > { %6583 = vmatmul.mubr.msk.bf16.gmra.mrb[36].mxu1 %vm449_vm0, %v9177_v45 }
 0x54e   : > { %5124 = vmatprep.mubr.bf16.mxu1 %v9677_v19 }
 0x550   : > { %v4144_v6 = vpop.f32.mrb[188].mxu1 }
 0x551   : > { %6330 = vst [vmem:[%s7407_s18 + $0x17e0] sm:$0xff] %v4144_v6  ;;  %v4146_v61 = vpop.f32.mrb[189].mxu1 }
 0x552   : > { %6331 = vst [vmem:[%s7407_s18 + $0x17e8] sm:$0xff] %v4146_v61  ;;  %v4148_v27 = vpop.f32.mrb[190].mxu1 }
 0x553   : > { %6332 = vst [vmem:[%s7407_s18 + $0x17f0] sm:$0xff] %v4148_v27  ;;  %v4150_v45 = vpop.f32.mrb[191].mxu1 }
 0x554   : > { %6333 = vst [vmem:[%s7407_s18 + $0x17f8] sm:$0xff] %v4150_v45 }
 0x555   : > { %6584 = vmatmul.mubr.msk.bf16.gmra.mrb[40].mxu1 %vm449_vm0, %v9193_v21 }
 0x556   : > { %5134 = vmatprep.mubr.bf16.mxu1 %v9677_v19 }
 0x558   : > { %v4510_v26 = vpop.f32.mrb[192].mxu1 }
 0x559   : > { %6430 = vst [vmem:[%s7407_s18 + $0x1a00] sm:$0xff] %v4510_v26  ;;  %v4512_v13 = vpop.f32.mrb[193].mxu1 }
 0x55a   : > { %6431 = vst [vmem:[%s7407_s18 + $0x1a08] sm:$0xff] %v4512_v13  ;;  %v4514_v20 = vpop.f32.mrb[194].mxu1 }
 0x55b   : > { %6432 = vst [vmem:[%s7407_s18 + $0x1a10] sm:$0xff] %v4514_v20  ;;  %v4516_v21 = vpop.f32.mrb[195].mxu1 }
 0x55c   : > { %6433 = vst [vmem:[%s7407_s18 + $0x1a18] sm:$0xff] %v4516_v21 }
 0x55d   : > { %6585 = vmatmul.mubr.msk.bf16.gmra.mrb[44].mxu1 %vm449_vm0, %v9209_v25 }
 0x55e   : > { %5144 = vmatprep.mubr.bf16.mxu1 %v9677_v19 }
 0x560   : > { %v4520_v62 = vpop.f32.mrb[196].mxu1 }
 0x561   : > { %6434 = vst [vmem:[%s7407_s18 + $0x1a20] sm:$0xff] %v4520_v62  ;;  %v4522_v2 = vpop.f32.mrb[197].mxu1 }
 0x562   : > { %6435 = vst [vmem:[%s7407_s18 + $0x1a28] sm:$0xff] %v4522_v2  ;;  %v4524_v1 = vpop.f32.mrb[198].mxu1 }
 0x563   : > { %6436 = vst [vmem:[%s7407_s18 + $0x1a30] sm:$0xff] %v4524_v1  ;;  %v4526_v25 = vpop.f32.mrb[199].mxu1 }
 0x564   : > { %6437 = vst [vmem:[%s7407_s18 + $0x1a38] sm:$0xff] %v4526_v25 }
 0x565   : > { %6586 = vmatmul.mubr.msk.bf16.gmra.mrb[48].mxu1 %vm449_vm0, %v6821_v41 }
 0x566   : > { %5154 = vmatprep.mubr.bf16.mxu1 %v9677_v19 }
 0x568   : > { %v4530_v48 = vpop.f32.mrb[200].mxu1 }
 0x569   : > { %6438 = vst [vmem:[%s7407_s18 + $0x1a40] sm:$0xff] %v4530_v48  ;;  %v4532_v44 = vpop.f32.mrb[201].mxu1 }
 0x56a   : > { %6439 = vst [vmem:[%s7407_s18 + $0x1a48] sm:$0xff] %v4532_v44  ;;  %v4534_v58 = vpop.f32.mrb[202].mxu1 }
 0x56b   : > { %6440 = vst [vmem:[%s7407_s18 + $0x1a50] sm:$0xff] %v4534_v58  ;;  %v4536_v54 = vpop.f32.mrb[203].mxu1 }
 0x56c   : > { %6441 = vst [vmem:[%s7407_s18 + $0x1a58] sm:$0xff] %v4536_v54 }
 0x56d   : > { %6587 = vmatmul.mubr.msk.bf16.gmra.mrb[52].mxu1 %vm449_vm0, %v6822_v55 }
 0x56e   : > { %5164 = vmatprep.mubr.bf16.mxu1 %v9677_v19 }
 0x570   : > { %v4540_v23 = vpop.f32.mrb[204].mxu1 }
 0x571   : > { %6442 = vst [vmem:[%s7407_s18 + $0x1a60] sm:$0xff] %v4540_v23  ;;  %v4542_v43 = vpop.f32.mrb[205].mxu1 }
 0x572   : > { %6443 = vst [vmem:[%s7407_s18 + $0x1a68] sm:$0xff] %v4542_v43  ;;  %v4544_v42 = vpop.f32.mrb[206].mxu1 }
 0x573   : > { %6444 = vst [vmem:[%s7407_s18 + $0x1a70] sm:$0xff] %v4544_v42  ;;  %v4546_v49 = vpop.f32.mrb[207].mxu1 }
 0x574   : > { %6445 = vst [vmem:[%s7407_s18 + $0x1a78] sm:$0xff] %v4546_v49 }
 0x575   : > { %6588 = vmatmul.mubr.msk.bf16.gmra.mrb[56].mxu1 %vm449_vm0, %v6823_v11 }
 0x576   : > { %5174 = vmatprep.mubr.bf16.mxu1 %v9677_v19  ;;  %v4818_v19 = vpop.f32.mrb[20].mxu0 }
 0x577   : > { %6530 = vst [vmem:[%s7407_s18 + $0x1ca0] sm:$0xff] %v4818_v19  ;;  %v4820_v24 = vpop.f32.mrb[21].mxu0 }
 0x578   : > { %v4550_v0 = vpop.f32.mrb[208].mxu1  ;;  %6531 = vst [vmem:[%s7407_s18 + $0x1ca8] sm:$0xff] %v4820_v24  ;;  %v4822_v59 = vpop.f32.mrb[22].mxu0 }
 0x579   : > { %6446 = vst [vmem:[%s7407_s18 + $0x1a80] sm:$0xff] %v4550_v0  ;;  %v4552_v22 = vpop.f32.mrb[209].mxu1  ;;  %6532 = vst [vmem:[%s7407_s18 + $0x1cb0] sm:$0xff] %v4822_v59  ;;  %v4824_v57 = vpop.f32.mrb[23].mxu0 }
 0x57a   : > { %6447 = vst [vmem:[%s7407_s18 + $0x1a88] sm:$0xff] %v4552_v22  ;;  %v4554_v15 = vpop.f32.mrb[210].mxu1  ;;  %6533 = vst [vmem:[%s7407_s18 + $0x1cb8] sm:$0xff] %v4824_v57  ;;  %v4828_v3 = vpop.f32.mrb[24].mxu0 }
 0x57b   : > { %6448 = vst [vmem:[%s7407_s18 + $0x1a90] sm:$0xff] %v4554_v15  ;;  %v4556_v17 = vpop.f32.mrb[211].mxu1  ;;  %6534 = vst [vmem:[%s7407_s18 + $0x1cc0] sm:$0xff] %v4828_v3  ;;  %v4830_v39 = vpop.f32.mrb[25].mxu0 }
 0x57c   : > { %6449 = vst [vmem:[%s7407_s18 + $0x1a98] sm:$0xff] %v4556_v17  ;;  %6535 = vst [vmem:[%s7407_s18 + $0x1cc8] sm:$0xff] %v4830_v39  ;;  %v4832_v56 = vpop.f32.mrb[26].mxu0 }
 0x57d   : > { %6589 = vmatmul.mubr.msk.bf16.gmra.mrb[60].mxu1 %vm449_vm0, %v6824_v29  ;;  %6536 = vst [vmem:[%s7407_s18 + $0x1cd0] sm:$0xff] %v4832_v56  ;;  %v4834_v4 = vpop.f32.mrb[27].mxu0 }
 0x57e   : > { %6537 = vst [vmem:[%s7407_s18 + $0x1cd8] sm:$0xff] %v4834_v4  ;;  %v4838_v61 = vpop.f32.mrb[28].mxu0 }
 0x57f   : > { %6538 = vst [vmem:[%s7407_s18 + $0x1ce0] sm:$0xff] %v4838_v61  ;;  %v4840_v63 = vpop.f32.mrb[29].mxu0 }
 0x580   : > { %v4560_v12 = vpop.f32.mrb[212].mxu1  ;;  %6539 = vst [vmem:[%s7407_s18 + $0x1ce8] sm:$0xff] %v4840_v63  ;;  %v4842_v45 = vpop.f32.mrb[30].mxu0 }
 0x581   : > { %6450 = vst [vmem:[%s7407_s18 + $0x1aa0] sm:$0xff] %v4560_v12  ;;  %v4562_v14 = vpop.f32.mrb[213].mxu1  ;;  %6540 = vst [vmem:[%s7407_s18 + $0x1cf0] sm:$0xff] %v4842_v45  ;;  %v4844_v53 = vpop.f32.mrb[31].mxu0 }
 0x582   : > { %6451 = vst [vmem:[%s7407_s18 + $0x1aa8] sm:$0xff] %v4562_v14  ;;  %v4564_v33 = vpop.f32.mrb[214].mxu1  ;;  %6541 = vst [vmem:[%s7407_s18 + $0x1cf8] sm:$0xff] %v4844_v53  ;;  %v4848_v13 = vpop.f32.mrb[32].mxu0 }
 0x583   : > { %6452 = vst [vmem:[%s7407_s18 + $0x1ab0] sm:$0xff] %v4564_v33  ;;  %v4566_v7 = vpop.f32.mrb[215].mxu1  ;;  %6542 = vst [vmem:[%s7407_s18 + $0x1d00] sm:$0xff] %v4848_v13  ;;  %v4850_v47 = vpop.f32.mrb[33].mxu0 }
 0x584   : > { %6453 = vst [vmem:[%s7407_s18 + $0x1ab8] sm:$0xff] %v4566_v7  ;;  %6543 = vst [vmem:[%s7407_s18 + $0x1d08] sm:$0xff] %v4850_v47  ;;  %v4852_v21 = vpop.f32.mrb[34].mxu0 }
 0x585   : > { %6544 = vst [vmem:[%s7407_s18 + $0x1d10] sm:$0xff] %v4852_v21  ;;  %v4854_v52 = vpop.f32.mrb[35].mxu0 }
 0x586   : > { %6545 = vst [vmem:[%s7407_s18 + $0x1d18] sm:$0xff] %v4854_v52  ;;  %v4858_v2 = vpop.f32.mrb[36].mxu0 }
 0x587   : > { %6546 = vst [vmem:[%s7407_s18 + $0x1d20] sm:$0xff] %v4858_v2  ;;  %v4860_v16 = vpop.f32.mrb[37].mxu0 }
 0x588   : > { %v4570_v8 = vpop.f32.mrb[216].mxu1  ;;  %6547 = vst [vmem:[%s7407_s18 + $0x1d28] sm:$0xff] %v4860_v16  ;;  %v4862_v25 = vpop.f32.mrb[38].mxu0 }
 0x589   : > { %6454 = vst [vmem:[%s7407_s18 + $0x1ac0] sm:$0xff] %v4570_v8  ;;  %v4572_v18 = vpop.f32.mrb[217].mxu1  ;;  %6548 = vst [vmem:[%s7407_s18 + $0x1d30] sm:$0xff] %v4862_v25  ;;  %v4864_v41 = vpop.f32.mrb[39].mxu0 }
 0x58a   : > { %6455 = vst [vmem:[%s7407_s18 + $0x1ac8] sm:$0xff] %v4572_v18  ;;  %v4574_v6 = vpop.f32.mrb[218].mxu1  ;;  %6549 = vst [vmem:[%s7407_s18 + $0x1d38] sm:$0xff] %v4864_v41  ;;  %v4868_v32 = vpop.f32.mrb[40].mxu0 }
 0x58b   : > { %6456 = vst [vmem:[%s7407_s18 + $0x1ad0] sm:$0xff] %v4574_v6  ;;  %v4576_v10 = vpop.f32.mrb[219].mxu1  ;;  %6550 = vst [vmem:[%s7407_s18 + $0x1d40] sm:$0xff] %v4868_v32  ;;  %v4870_v44 = vpop.f32.mrb[41].mxu0 }
 0x58c   : > { %6457 = vst [vmem:[%s7407_s18 + $0x1ad8] sm:$0xff] %v4576_v10  ;;  %6551 = vst [vmem:[%s7407_s18 + $0x1d48] sm:$0xff] %v4870_v44  ;;  %v4872_v58 = vpop.f32.mrb[42].mxu0 }
 0x58d   : > { %6552 = vst [vmem:[%s7407_s18 + $0x1d50] sm:$0xff] %v4872_v58  ;;  %v4874_v30 = vpop.f32.mrb[43].mxu0 }
 0x58e   : > { %6553 = vst [vmem:[%s7407_s18 + $0x1d58] sm:$0xff] %v4874_v30  ;;  %v4878_v23 = vpop.f32.mrb[44].mxu0 }
 0x58f   : > { %6554 = vst [vmem:[%s7407_s18 + $0x1d60] sm:$0xff] %v4878_v23  ;;  %v4880_v36 = vpop.f32.mrb[45].mxu0 }
 0x590   : > { %v4580_v27 = vpop.f32.mrb[220].mxu1  ;;  %6555 = vst [vmem:[%s7407_s18 + $0x1d68] sm:$0xff] %v4880_v36  ;;  %v4882_v34 = vpop.f32.mrb[46].mxu0 }
 0x591   : > { %6458 = vst [vmem:[%s7407_s18 + $0x1ae0] sm:$0xff] %v4580_v27  ;;  %v4582_v60 = vpop.f32.mrb[221].mxu1  ;;  %6556 = vst [vmem:[%s7407_s18 + $0x1d70] sm:$0xff] %v4882_v34  ;;  %v4884_v49 = vpop.f32.mrb[47].mxu0 }
 0x592   : > { %6459 = vst [vmem:[%s7407_s18 + $0x1ae8] sm:$0xff] %v4582_v60  ;;  %v4584_v26 = vpop.f32.mrb[222].mxu1  ;;  %6557 = vst [vmem:[%s7407_s18 + $0x1d78] sm:$0xff] %v4884_v49  ;;  %v4888_v46 = vpop.f32.mrb[48].mxu0 }
 0x593   : > { %6460 = vst [vmem:[%s7407_s18 + $0x1af0] sm:$0xff] %v4584_v26  ;;  %v4586_v37 = vpop.f32.mrb[223].mxu1  ;;  %6558 = vst [vmem:[%s7407_s18 + $0x1d80] sm:$0xff] %v4888_v46  ;;  %v4890_v0 = vpop.f32.mrb[49].mxu0 }
 0x594   : > { %6461 = vst [vmem:[%s7407_s18 + $0x1af8] sm:$0xff] %v4586_v37  ;;  %6559 = vst [vmem:[%s7407_s18 + $0x1d88] sm:$0xff] %v4890_v0  ;;  %v4892_v22 = vpop.f32.mrb[50].mxu0 }
 0x595   : > { %6560 = vst [vmem:[%s7407_s18 + $0x1d90] sm:$0xff] %v4892_v22  ;;  %v4894_v15 = vpop.f32.mrb[51].mxu0 }
 0x596   : > { %6561 = vst [vmem:[%s7407_s18 + $0x1d98] sm:$0xff] %v4894_v15  ;;  %v4898_v29 = vpop.f32.mrb[52].mxu0 }
 0x597   : > { %6562 = vst [vmem:[%s7407_s18 + $0x1da0] sm:$0xff] %v4898_v29  ;;  %v4900_v24 = vpop.f32.mrb[53].mxu0 }
 0x598   : > { %v4590_v20 = vpop.f32.mrb[224].mxu1  ;;  %6563 = vst [vmem:[%s7407_s18 + $0x1da8] sm:$0xff] %v4900_v24  ;;  %v4902_v59 = vpop.f32.mrb[54].mxu0 }
 0x599   : > { %6462 = vst [vmem:[%s7407_s18 + $0x1b00] sm:$0xff] %v4590_v20  ;;  %v4592_v38 = vpop.f32.mrb[225].mxu1  ;;  %6564 = vst [vmem:[%s7407_s18 + $0x1db0] sm:$0xff] %v4902_v59  ;;  %v4904_v57 = vpop.f32.mrb[55].mxu0 }
 0x59a   : > { %6463 = vst [vmem:[%s7407_s18 + $0x1b08] sm:$0xff] %v4592_v38  ;;  %v4594_v62 = vpop.f32.mrb[226].mxu1  ;;  %6565 = vst [vmem:[%s7407_s18 + $0x1db8] sm:$0xff] %v4904_v57  ;;  %v4908_v3 = vpop.f32.mrb[56].mxu0 }
 0x59b   : > { %6464 = vst [vmem:[%s7407_s18 + $0x1b10] sm:$0xff] %v4594_v62  ;;  %v4596_v28 = vpop.f32.mrb[227].mxu1  ;;  %6566 = vst [vmem:[%s7407_s18 + $0x1dc0] sm:$0xff] %v4908_v3  ;;  %v4910_v39 = vpop.f32.mrb[57].mxu0 }
 0x59c   : > { %6465 = vst [vmem:[%s7407_s18 + $0x1b18] sm:$0xff] %v4596_v28  ;;  %6567 = vst [vmem:[%s7407_s18 + $0x1dc8] sm:$0xff] %v4910_v39  ;;  %v4912_v56 = vpop.f32.mrb[58].mxu0 }
 0x59d   : > { %6568 = vst [vmem:[%s7407_s18 + $0x1dd0] sm:$0xff] %v4912_v56  ;;  %v4914_v4 = vpop.f32.mrb[59].mxu0 }
 0x59e   : > { %6569 = vst [vmem:[%s7407_s18 + $0x1dd8] sm:$0xff] %v4914_v4  ;;  %v4918_v61 = vpop.f32.mrb[60].mxu0 }
 0x59f   : > { %6570 = vst [vmem:[%s7407_s18 + $0x1de0] sm:$0xff] %v4918_v61  ;;  %v4920_v63 = vpop.f32.mrb[61].mxu0 }
 0x5a0   : > { %v4600_v1 = vpop.f32.mrb[228].mxu1  ;;  %6571 = vst [vmem:[%s7407_s18 + $0x1de8] sm:$0xff] %v4920_v63  ;;  %v4922_v45 = vpop.f32.mrb[62].mxu0 }
 0x5a1   : > { %6466 = vst [vmem:[%s7407_s18 + $0x1b20] sm:$0xff] %v4600_v1  ;;  %v4602_v31 = vpop.f32.mrb[229].mxu1  ;;  %6572 = vst [vmem:[%s7407_s18 + $0x1df0] sm:$0xff] %v4922_v45  ;;  %v4924_v53 = vpop.f32.mrb[63].mxu0 }
 0x5a2   : > { %6467 = vst [vmem:[%s7407_s18 + $0x1b28] sm:$0xff] %v4602_v31  ;;  %v4604_v40 = vpop.f32.mrb[230].mxu1  ;;  %6573 = vst [vmem:[%s7407_s18 + $0x1df8] sm:$0xff] %v4924_v53 }
 0x5a3   : > { %6468 = vst [vmem:[%s7407_s18 + $0x1b30] sm:$0xff] %v4604_v40  ;;  %v4606_v48 = vpop.f32.mrb[231].mxu1 }
 0x5a4   : > { %6469 = vst [vmem:[%s7407_s18 + $0x1b38] sm:$0xff] %v4606_v48 }
 0x5a8   : > { %v4610_v5 = vpop.f32.mrb[232].mxu1 }
 0x5a9   : > { %6470 = vst [vmem:[%s7407_s18 + $0x1b40] sm:$0xff] %v4610_v5  ;;  %v4612_v54 = vpop.f32.mrb[233].mxu1 }
 0x5aa   : > { %6471 = vst [vmem:[%s7407_s18 + $0x1b48] sm:$0xff] %v4612_v54  ;;  %v4614_v55 = vpop.f32.mrb[234].mxu1 }
 0x5ab   : > { %6472 = vst [vmem:[%s7407_s18 + $0x1b50] sm:$0xff] %v4614_v55  ;;  %v4616_v51 = vpop.f32.mrb[235].mxu1 }
 0x5ac   : > { %6473 = vst [vmem:[%s7407_s18 + $0x1b58] sm:$0xff] %v4616_v51 }
 0x5b0   : > { %v4620_v43 = vpop.f32.mrb[236].mxu1 }
 0x5b1   : > { %6474 = vst [vmem:[%s7407_s18 + $0x1b60] sm:$0xff] %v4620_v43  ;;  %v4622_v42 = vpop.f32.mrb[237].mxu1 }
 0x5b2   : > { %6475 = vst [vmem:[%s7407_s18 + $0x1b68] sm:$0xff] %v4622_v42  ;;  %v4624_v50 = vpop.f32.mrb[238].mxu1 }
 0x5b3   : > { %6476 = vst [vmem:[%s7407_s18 + $0x1b70] sm:$0xff] %v4624_v50  ;;  %v4626_v11 = vpop.f32.mrb[239].mxu1 }
 0x5b4   : > { %6477 = vst [vmem:[%s7407_s18 + $0x1b78] sm:$0xff] %v4626_v11 }
 0x5b8   : > { %v4630_v35 = vpop.f32.mrb[240].mxu1 }
 0x5b9   : > { %6478 = vst [vmem:[%s7407_s18 + $0x1b80] sm:$0xff] %v4630_v35  ;;  %v4632_v9 = vpop.f32.mrb[241].mxu1 }
 0x5ba   : > { %6479 = vst [vmem:[%s7407_s18 + $0x1b88] sm:$0xff] %v4632_v9  ;;  %v4634_v17 = vpop.f32.mrb[242].mxu1 }
 0x5bb   : > { %6480 = vst [vmem:[%s7407_s18 + $0x1b90] sm:$0xff] %v4634_v17  ;;  %v4636_v19 = vpop.f32.mrb[243].mxu1 }
 0x5bc   : > { %6481 = vst [vmem:[%s7407_s18 + $0x1b98] sm:$0xff] %v4636_v19 }
 0x5c0   : > { %v4640_v12 = vpop.f32.mrb[244].mxu1 }
 0x5c1   : > { %6482 = vst [vmem:[%s7407_s18 + $0x1ba0] sm:$0xff] %v4640_v12  ;;  %v4642_v14 = vpop.f32.mrb[245].mxu1 }
 0x5c2   : > { %6483 = vst [vmem:[%s7407_s18 + $0x1ba8] sm:$0xff] %v4642_v14  ;;  %v4644_v33 = vpop.f32.mrb[246].mxu1 }
 0x5c3   : > { %6484 = vst [vmem:[%s7407_s18 + $0x1bb0] sm:$0xff] %v4644_v33  ;;  %v4646_v7 = vpop.f32.mrb[247].mxu1 }
 0x5c4   : > { %6485 = vst [vmem:[%s7407_s18 + $0x1bb8] sm:$0xff] %v4646_v7 }
 0x5c8   : > { %v4650_v8 = vpop.f32.mrb[248].mxu1 }
 0x5c9   : > { %6486 = vst [vmem:[%s7407_s18 + $0x1bc0] sm:$0xff] %v4650_v8  ;;  %v4652_v18 = vpop.f32.mrb[249].mxu1 }
 0x5ca   : > { %6487 = vst [vmem:[%s7407_s18 + $0x1bc8] sm:$0xff] %v4652_v18  ;;  %v4654_v6 = vpop.f32.mrb[250].mxu1 }
 0x5cb   : > { %6488 = vst [vmem:[%s7407_s18 + $0x1bd0] sm:$0xff] %v4654_v6  ;;  %v4656_v10 = vpop.f32.mrb[251].mxu1 }
 0x5cc   : > { %6489 = vst [vmem:[%s7407_s18 + $0x1bd8] sm:$0xff] %v4656_v10 }
 0x5d0   : > { %v4660_v27 = vpop.f32.mrb[252].mxu1 }
 0x5d1   : > { %6490 = vst [vmem:[%s7407_s18 + $0x1be0] sm:$0xff] %v4660_v27  ;;  %v4662_v60 = vpop.f32.mrb[253].mxu1 }
 0x5d2   : > { %6491 = vst [vmem:[%s7407_s18 + $0x1be8] sm:$0xff] %v4662_v60  ;;  %v4664_v26 = vpop.f32.mrb[254].mxu1 }
 0x5d3   : > { %6492 = vst [vmem:[%s7407_s18 + $0x1bf0] sm:$0xff] %v4664_v26  ;;  %v4666_v37 = vpop.f32.mrb[255].mxu1 }
 0x5d4   : > { %6493 = vst [vmem:[%s7407_s18 + $0x1bf8] sm:$0xff] %v4666_v37 }
 0x5d8   : > { %v5026_v13 = vpop.f32.mrb[0].mxu1 }
 0x5d9   : > { %6590 = vst [vmem:[%s7407_s18 + $0x1e00] sm:$0xff] %v5026_v13  ;;  %v5028_v47 = vpop.f32.mrb[1].mxu1 }
 0x5da   : > { %6591 = vst [vmem:[%s7407_s18 + $0x1e08] sm:$0xff] %v5028_v47  ;;  %v5030_v20 = vpop.f32.mrb[2].mxu1 }
 0x5db   : > { %6592 = vst [vmem:[%s7407_s18 + $0x1e10] sm:$0xff] %v5030_v20  ;;  %v5032_v21 = vpop.f32.mrb[3].mxu1 }
 0x5dc   : > { %6593 = vst [vmem:[%s7407_s18 + $0x1e18] sm:$0xff] %v5032_v21 }
 0x5e0   : > { %v5036_v38 = vpop.f32.mrb[4].mxu1 }
 0x5e1   : > { %6594 = vst [vmem:[%s7407_s18 + $0x1e20] sm:$0xff] %v5036_v38  ;;  %v5038_v52 = vpop.f32.mrb[5].mxu1 }
 0x5e2   : > { %6595 = vst [vmem:[%s7407_s18 + $0x1e28] sm:$0xff] %v5038_v52  ;;  %v5040_v62 = vpop.f32.mrb[6].mxu1 }
 0x5e3   : > { %6596 = vst [vmem:[%s7407_s18 + $0x1e30] sm:$0xff] %v5040_v62  ;;  %v5042_v28 = vpop.f32.mrb[7].mxu1 }
 0x5e4   : > { %6597 = vst [vmem:[%s7407_s18 + $0x1e38] sm:$0xff] %v5042_v28 }
 0x5e8   : > { %v5046_v2 = vpop.f32.mrb[8].mxu1 }
 0x5e9   : > { %6598 = vst [vmem:[%s7407_s18 + $0x1e40] sm:$0xff] %v5046_v2  ;;  %v5048_v16 = vpop.f32.mrb[9].mxu1 }
 0x5ea   : > { %6599 = vst [vmem:[%s7407_s18 + $0x1e48] sm:$0xff] %v5048_v16  ;;  %v5050_v1 = vpop.f32.mrb[10].mxu1 }
 0x5eb   : > { %6600 = vst [vmem:[%s7407_s18 + $0x1e50] sm:$0xff] %v5050_v1  ;;  %v5052_v25 = vpop.f32.mrb[11].mxu1 }
 0x5ec   : > { %6601 = vst [vmem:[%s7407_s18 + $0x1e58] sm:$0xff] %v5052_v25 }
 0x5f0   : > { %v5056_v31 = vpop.f32.mrb[12].mxu1 }
 0x5f1   : > { %6602 = vst [vmem:[%s7407_s18 + $0x1e60] sm:$0xff] %v5056_v31  ;;  %v5058_v41 = vpop.f32.mrb[13].mxu1 }
 0x5f2   : > { %6603 = vst [vmem:[%s7407_s18 + $0x1e68] sm:$0xff] %v5058_v41  ;;  %v5060_v40 = vpop.f32.mrb[14].mxu1 }
 0x5f3   : > { %6604 = vst [vmem:[%s7407_s18 + $0x1e70] sm:$0xff] %v5060_v40  ;;  %v5062_v48 = vpop.f32.mrb[15].mxu1 }
 0x5f4   : > { %6605 = vst [vmem:[%s7407_s18 + $0x1e78] sm:$0xff] %v5062_v48 }
 0x5f8   : > { %v5066_v32 = vpop.f32.mrb[16].mxu1 }
 0x5f9   : > { %6606 = vst [vmem:[%s7407_s18 + $0x1e80] sm:$0xff] %v5066_v32  ;;  %v5068_v44 = vpop.f32.mrb[17].mxu1 }
 0x5fa   : > { %6607 = vst [vmem:[%s7407_s18 + $0x1e88] sm:$0xff] %v5068_v44  ;;  %v5070_v5 = vpop.f32.mrb[18].mxu1 }
 0x5fb   : > { %6608 = vst [vmem:[%s7407_s18 + $0x1e90] sm:$0xff] %v5070_v5  ;;  %v5072_v58 = vpop.f32.mrb[19].mxu1 }
 0x5fc   : > { %6609 = vst [vmem:[%s7407_s18 + $0x1e98] sm:$0xff] %v5072_v58 }
 0x600   : > { %v5076_v54 = vpop.f32.mrb[20].mxu1 }
 0x601   : > { %6610 = vst [vmem:[%s7407_s18 + $0x1ea0] sm:$0xff] %v5076_v54  ;;  %v5078_v30 = vpop.f32.mrb[21].mxu1 }
 0x602   : > { %6611 = vst [vmem:[%s7407_s18 + $0x1ea8] sm:$0xff] %v5078_v30  ;;  %v5080_v55 = vpop.f32.mrb[22].mxu1 }
 0x603   : > { %6612 = vst [vmem:[%s7407_s18 + $0x1eb0] sm:$0xff] %v5080_v55  ;;  %v5082_v51 = vpop.f32.mrb[23].mxu1 }
 0x604   : > { %6613 = vst [vmem:[%s7407_s18 + $0x1eb8] sm:$0xff] %v5082_v51 }
 0x608   : > { %v5086_v23 = vpop.f32.mrb[24].mxu1 }
 0x609   : > { %6614 = vst [vmem:[%s7407_s18 + $0x1ec0] sm:$0xff] %v5086_v23  ;;  %v5088_v36 = vpop.f32.mrb[25].mxu1 }
 0x60a   : > { %6615 = vst [vmem:[%s7407_s18 + $0x1ec8] sm:$0xff] %v5088_v36  ;;  %v5090_v43 = vpop.f32.mrb[26].mxu1 }
 0x60b   : > { %6616 = vst [vmem:[%s7407_s18 + $0x1ed0] sm:$0xff] %v5090_v43  ;;  %v5092_v34 = vpop.f32.mrb[27].mxu1 }
 0x60c   : > { %6617 = vst [vmem:[%s7407_s18 + $0x1ed8] sm:$0xff] %v5092_v34 }
 0x610   : > { %v5096_v42 = vpop.f32.mrb[28].mxu1 }
 0x611   : > { %6618 = vst [vmem:[%s7407_s18 + $0x1ee0] sm:$0xff] %v5096_v42  ;;  %v5098_v49 = vpop.f32.mrb[29].mxu1 }
 0x612   : > { %6619 = vst [vmem:[%s7407_s18 + $0x1ee8] sm:$0xff] %v5098_v49  ;;  %v5100_v50 = vpop.f32.mrb[30].mxu1 }
 0x613   : > { %6620 = vst [vmem:[%s7407_s18 + $0x1ef0] sm:$0xff] %v5100_v50  ;;  %v5102_v11 = vpop.f32.mrb[31].mxu1 }
 0x614   : > { %6621 = vst [vmem:[%s7407_s18 + $0x1ef8] sm:$0xff] %v5102_v11 }
 0x618   : > { %v5106_v46 = vpop.f32.mrb[32].mxu1 }
 0x619   : > { %6622 = vst [vmem:[%s7407_s18 + $0x1f00] sm:$0xff] %v5106_v46  ;;  %v5108_v0 = vpop.f32.mrb[33].mxu1 }
 0x61a   : > { %6623 = vst [vmem:[%s7407_s18 + $0x1f08] sm:$0xff] %v5108_v0  ;;  %v5110_v35 = vpop.f32.mrb[34].mxu1 }
 0x61b   : > { %6624 = vst [vmem:[%s7407_s18 + $0x1f10] sm:$0xff] %v5110_v35  ;;  %v5112_v22 = vpop.f32.mrb[35].mxu1 }
 0x61c   : > { %6625 = vst [vmem:[%s7407_s18 + $0x1f18] sm:$0xff] %v5112_v22 }
 0x620   : > { %v5116_v9 = vpop.f32.mrb[36].mxu1 }
 0x621   : > { %6626 = vst [vmem:[%s7407_s18 + $0x1f20] sm:$0xff] %v5116_v9  ;;  %v5118_v15 = vpop.f32.mrb[37].mxu1 }
 0x622   : > { %6627 = vst [vmem:[%s7407_s18 + $0x1f28] sm:$0xff] %v5118_v15  ;;  %v5120_v17 = vpop.f32.mrb[38].mxu1 }
 0x623   : > { %6628 = vst [vmem:[%s7407_s18 + $0x1f30] sm:$0xff] %v5120_v17  ;;  %v5122_v19 = vpop.f32.mrb[39].mxu1 }
 0x624   : > { %6629 = vst [vmem:[%s7407_s18 + $0x1f38] sm:$0xff] %v5122_v19 }
 0x628   : > { %v5126_v29 = vpop.f32.mrb[40].mxu1 }
 0x629   : > { %6630 = vst [vmem:[%s7407_s18 + $0x1f40] sm:$0xff] %v5126_v29  ;;  %v5128_v24 = vpop.f32.mrb[41].mxu1 }
 0x62a   : > { %6631 = vst [vmem:[%s7407_s18 + $0x1f48] sm:$0xff] %v5128_v24  ;;  %v5130_v12 = vpop.f32.mrb[42].mxu1 }
 0x62b   : > { %6632 = vst [vmem:[%s7407_s18 + $0x1f50] sm:$0xff] %v5130_v12  ;;  %v5132_v59 = vpop.f32.mrb[43].mxu1 }
 0x62c   : > { %6633 = vst [vmem:[%s7407_s18 + $0x1f58] sm:$0xff] %v5132_v59 }
 0x630   : > { %v5136_v14 = vpop.f32.mrb[44].mxu1 }
 0x631   : > { %6634 = vst [vmem:[%s7407_s18 + $0x1f60] sm:$0xff] %v5136_v14  ;;  %v5138_v57 = vpop.f32.mrb[45].mxu1 }
 0x632   : > { %6635 = vst [vmem:[%s7407_s18 + $0x1f68] sm:$0xff] %v5138_v57  ;;  %v5140_v33 = vpop.f32.mrb[46].mxu1 }
 0x633   : > { %6636 = vst [vmem:[%s7407_s18 + $0x1f70] sm:$0xff] %v5140_v33  ;;  %v5142_v7 = vpop.f32.mrb[47].mxu1 }
 0x634   : > { %6637 = vst [vmem:[%s7407_s18 + $0x1f78] sm:$0xff] %v5142_v7 }
 0x638   : > { %v5146_v3 = vpop.f32.mrb[48].mxu1 }
 0x639   : > { %6638 = vst [vmem:[%s7407_s18 + $0x1f80] sm:$0xff] %v5146_v3  ;;  %v5148_v39 = vpop.f32.mrb[49].mxu1 }
 0x63a   : > { %6639 = vst [vmem:[%s7407_s18 + $0x1f88] sm:$0xff] %v5148_v39  ;;  %v5150_v8 = vpop.f32.mrb[50].mxu1 }
 0x63b   : > { %6640 = vst [vmem:[%s7407_s18 + $0x1f90] sm:$0xff] %v5150_v8  ;;  %v5152_v56 = vpop.f32.mrb[51].mxu1 }
 0x63c   : > { %6641 = vst [vmem:[%s7407_s18 + $0x1f98] sm:$0xff] %v5152_v56 }
 0x640   : > { %v5156_v18 = vpop.f32.mrb[52].mxu1 }
 0x641   : > { %6642 = vst [vmem:[%s7407_s18 + $0x1fa0] sm:$0xff] %v5156_v18  ;;  %v5158_v4 = vpop.f32.mrb[53].mxu1 }
 0x642   : > { %6643 = vst [vmem:[%s7407_s18 + $0x1fa8] sm:$0xff] %v5158_v4  ;;  %v5160_v6 = vpop.f32.mrb[54].mxu1 }
 0x643   : > { %6644 = vst [vmem:[%s7407_s18 + $0x1fb0] sm:$0xff] %v5160_v6  ;;  %v5162_v10 = vpop.f32.mrb[55].mxu1 }
 0x644   : > { %6645 = vst [vmem:[%s7407_s18 + $0x1fb8] sm:$0xff] %v5162_v10 }
 0x648   : > { %v5166_v61 = vpop.f32.mrb[56].mxu1 }
 0x649   : > { %6646 = vst [vmem:[%s7407_s18 + $0x1fc0] sm:$0xff] %v5166_v61  ;;  %v5168_v63 = vpop.f32.mrb[57].mxu1 }
 0x64a   : > { %6647 = vst [vmem:[%s7407_s18 + $0x1fc8] sm:$0xff] %v5168_v63  ;;  %v5170_v27 = vpop.f32.mrb[58].mxu1 }
 0x64b   : > { %6648 = vst [vmem:[%s7407_s18 + $0x1fd0] sm:$0xff] %v5170_v27  ;;  %v5172_v45 = vpop.f32.mrb[59].mxu1 }
 0x64c   : > { %6649 = vst [vmem:[%s7407_s18 + $0x1fd8] sm:$0xff] %v5172_v45 }
 0x650   : > { %v5176_v60 = vpop.f32.mrb[60].mxu1 }
 0x651   : > { %6650 = vst [vmem:[%s7407_s18 + $0x1fe0] sm:$0xff] %v5176_v60  ;;  %v5178_v53 = vpop.f32.mrb[61].mxu1 }
 0x652   : > { %6651 = vst [vmem:[%s7407_s18 + $0x1fe8] sm:$0xff] %v5178_v53  ;;  %v5180_v26 = vpop.f32.mrb[62].mxu1 }
 0x653   : > { %6652 = vst [vmem:[%s7407_s18 + $0x1ff0] sm:$0xff] %v5180_v26  ;;  %v5182_v37 = vpop.f32.mrb[63].mxu1 }
 0x654   : > { %6653 = vst [vmem:[%s7407_s18 + $0x1ff8] sm:$0xff] %v5182_v37 }
 0x655   : > { %6838 = shalt.err (!%p6835_p5)
}
 0x656   : > { %s6839_s10 = scalar_lea.hbm %s9595_s26, 131072  ;;  %s6843_s5 = scalar_lea.hbm %s9653_s3, 262144 }
 0x657   : > { %p6840_p6 = scmp.ne.s32.totalorder %s9595_s26, %s6839_s10  ;;  %p6844_p10 = scmp.lt.u32.totalorder %s9595_s26, %s9653_s3 }
 0x658   : > { %p6845_p11 = scmp.lt.u32.totalorder %s6843_s5, %s6839_s10  ;;  %p6847_p13 = scmp.lt.u32.totalorder %s6839_s10, %s9595_s26 }
 0x659   : > { %p6841_p7 = pnand %p6840_p6, %p6969_p4 }
 0x65a   : > { %p6846_p12 = por %p6845_p11, %p6844_p10 }
 0x65b   : > { %p6842_p9 = pneg %p6841_p7 }
 0x65c   : > { %p6848_p0 = por %p6847_p13, %p6846_p12 }
 0x65e   : > { %p6849_p1 = pnand %p6848_p0, %p6842_p9 }
 0x660   : > { %6852 = shalt.err (!%p6849_p1)
}
 0x661   : > { %s6907_s8 = smov 256   ;;  %s6908_s9 = smov 16  }
 0x662   : > { %6661 = dma.vmem_to_hbm [thread:$0]  (%p6969_p4), %s9597_s19, 131072, %s9595_s26, %s9604_s15, %s6907_s8, %s6907_s8, %s6908_s9  }
 0x663 PF: > { %p6667_p2 = scmp.ge.s32.totalorder %s6903_s17, 2  ;;  %s5282_s11 = sand.u32 1, %s6883_s12  }
 0x664   : > { %s5283_s21 = scalar_lea.sflag [#allocation3], %s5282_s11 }
 0x665   : > { %p6664_p3 = pnand %p6667_p2, %p6976_p8 }
 0x667   : > { %6878 = dma.done.wait (!%p6664_p3), %s5283_s21, 131072  }
 0x668   : > { %6880 = vsyncadd (!%p6664_p3), %s5283_s21, 4294836224  ;;  %s16_s17 = sadd.s32 1, %s6903_s17   ;;  %s9735_s12 = smov %s6887_s13 }
 0x669   : > { %p13_p5 = scmp.ge.s32.totalorder %s16_s17, 4   ;;  %s9736_s13 = smov %s6891_s14 }
 0x66a   : > { %s9737_s14 = smov %s6982_s25  ;;  %s9738_s15 = smov %s6899_s16 }
 0x66b   : > { %s9739_s16 = smov %s9741_s20  ;;  %15 = sbr.rel (!%p13_p5) target bundleno = 4 (0x4), region = 82 }
 0x672   :  { %5288 = vsyncpa [#allocation3], 1 }
 0x673   :  { %5290 = vsyncpa [#allocation3 + $0x1], 1 }

</bundles_post_ra>
